<compile_context>
chip_gen: v5e
topology: v5e:2x2
jax: 0.10.0
libtpu: 0.0.40
codegen_flags: <defaults>
</compile_context>

<pallas_src>
import functools
import math

import jax
import jax.numpy as jnp
from jax import lax
from jax.experimental import pallas as pl
from jax.experimental.pallas import tpu as pltpu

jax.config.update("jax_default_matmul_precision", "highest")

# ---- model hyper-parameters (small, consistent with the module's __init__) ----
VOCAB = 50        # vocabulary_size
EMBED = 32        # embed_dim
HIDDEN = 32       # hidden_size
NUM_HEADS = 8     # nn.MultiheadAttention(num_heads=8)
NUM_LSTM_LAYERS = 3
BATCH = 2
TOKENS = 8        # tokens_length / sequence length
OUT_LANES = 128   # lane-dense combined output width


# =====================================================================================
# Fused kernel: embed -> MHA -> 3-layer LSTM (wavefront) -> L2-normalize, one invocation
# =====================================================================================
def fused_question_kernel(ids_ref, mask_ref, emb_ref, hmask_ref,
                          wqkv_ref, bqkv_ref, wo_ref, bo_ref,
                          wx0_ref, wh0_ref, wxh_ref, lstm_b_ref,
                          out_ref, *, num_heads, batch, tokens):
    f32 = jnp.float32
    B, T, NH = batch, tokens, num_heads
    BT = B * T
    E = emb_ref.shape[1]
    H = wh0_ref.shape[0]
    hd = E // NH
    scale = 1.0 / math.sqrt(float(hd))

    # ------------- embedding gather as a one-hot MXU matmul (time-major rows) --------
    ids = ids_ref[...]                                                    # [BT, 1] i32
    vpad = emb_ref.shape[0]
    onehot = (lax.broadcasted_iota(jnp.int32, (BT, vpad), 1) == ids).astype(f32)
    x = jnp.dot(onehot, emb_ref[...], preferred_element_type=f32)         # [BT, E]

    # ------------------------- fused Q/K/V projection ---------------------------------
    qkv = jnp.dot(x, wqkv_ref[...], preferred_element_type=f32) + bqkv_ref[...]
    q = qkv[:, 0:E] * scale                                               # [BT, E]
    k = qkv[:, E:2 * E]
    v = qkv[:, 2 * E:3 * E]

    # -------- stacked per-head scores: ONE MXU push  [NH*BT, E] x [BT, E]^T -----------
    hmask = hmask_ref[...]                                                # [NH*BT, E]
    q_st = jnp.concatenate([q] * NH, axis=0) * hmask                      # [NH*BT, E]
    s = lax.dot_general(q_st, k, (((1,), (1,)), ((), ())),
                        preferred_element_type=f32)                       # [NH*BT, BT]

    # ---- additive bias built in-kernel: cross-batch block mask + key padding ---------
    row_b = lax.broadcasted_iota(jnp.int32, (NH * BT, BT), 0) % B
    col_b = lax.broadcasted_iota(jnp.int32, (NH * BT, BT), 1) % B
    bias_batch = jnp.where(row_b != col_b, -1e30, 0.0)                    # [NH*BT, BT]
    bias_pad = jnp.where(mask_ref[...] > 0, -1e30, 0.0)                   # [1, BT]
    s = s + bias_batch + bias_pad

    # --------------------- ONE stacked softmax over the key axis ----------------------
    m = jnp.max(s, axis=-1, keepdims=True)
    e = jnp.exp(s - m)
    p = e / jnp.sum(e, axis=-1, keepdims=True)                            # [NH*BT, BT]

    # ---- stacked context: ONE MXU push, heads recombined with lane-masked adds -------
    ctx_st = jnp.dot(p, v, preferred_element_type=f32) * hmask            # [NH*BT, E]
    ctx = ctx_st[0:BT, :]
    for h in range(1, NH):
        ctx = ctx + ctx_st[h * BT:(h + 1) * BT, :]                        # [BT, E]

    word = jnp.dot(ctx, wo_ref[...], preferred_element_type=f32) + bo_ref[...]  # [BT, E]

    # ---------------- 3-layer LSTM, wavefront over (layer, time) ----------------------
    L = wxh_ref.shape[0] + 1
    # layer-0 input projection (+ bias) hoisted for all timesteps: one [BT,4H] matmul
    xg0 = jnp.dot(word, wx0_ref[...], preferred_element_type=f32) + lstm_b_ref[0]
    wh0 = wh0_ref[...]                                                    # [H, 4H]
    wxh = [wxh_ref[l] for l in range(L - 1)]                              # [2H, 4H] each
    bs = [lstm_b_ref[l + 1] for l in range(L - 1)]                        # [1, 4H] each

    h_st = [jnp.zeros((B, H), f32) for _ in range(L)]
    c_st = [jnp.zeros((B, H), f32) for _ in range(L)]
    lay_out = [None] * L        # most recent h of each layer (input to the layer above)
    ys = [None] * T             # final-layer outputs, kept in vregs

    for w in range(T + L - 1):
        updates = []
        for l in range(L):
            t = w - l
            if 0 <= t < T:
                if l == 0:
                    g = xg0[t * B:(t + 1) * B, :] + jnp.dot(
                        h_st[0], wh0, preferred_element_type=f32)          # [B, 4H]
                else:
                    xin = jnp.concatenate([lay_out[l - 1], h_st[l]], axis=-1)   # [B, 2H]
                    g = jnp.dot(xin, wxh[l - 1],
                                preferred_element_type=f32) + bs[l - 1]    # [B, 4H]
                sg = jax.nn.sigmoid(g)              # one EUP pass over all 4H lanes
                i_g = sg[:, 0:H]                    # PyTorch gate order: i, f, g, o
                f_g = sg[:, H:2 * H]
                o_g = sg[:, 3 * H:4 * H]
                g_g = jnp.tanh(g[:, 2 * H:3 * H])
                c_new = f_g * c_st[l] + i_g * g_g
                h_new = o_g * jnp.tanh(c_new)
                updates.append((l, t, h_new, c_new))
        # commit after the whole wave so every cell read previous-wave state
        for (l, t, h_new, c_new) in updates:
            h_st[l] = h_new
            c_st[l] = c_new
            lay_out[l] = h_new
            if l == L - 1:
                ys[t] = h_new

    seq = jnp.concatenate(ys, axis=0)                                     # [BT, H]

    # ---------------- F.normalize(p=2, dim=-1) via rsqrt ------------------------------
    ss = jnp.sum(seq * seq, axis=-1, keepdims=True)
    question = seq * lax.rsqrt(jnp.maximum(ss, 1e-24))

    # ------------- single lane-dense (128-lane) store: [word | question | 0] ----------
    pad_lanes = out_ref.shape[1] - (E + H)
    out_ref[...] = jnp.concatenate(
        [word, question, jnp.zeros((BT, pad_lanes), f32)], axis=-1)


def fused_forward(kparams, ids_tm, mask_tm, *, num_heads, batch, tokens):
    bt = batch * tokens
    kernel = functools.partial(fused_question_kernel, num_heads=num_heads,
                               batch=batch, tokens=tokens)
    vmem = pl.BlockSpec(memory_space=pltpu.MemorySpace.VMEM)
    return pl.pallas_call(
        kernel,
        out_shape=jax.ShapeDtypeStruct((bt, OUT_LANES), jnp.float32),
        in_specs=[vmem] * 12,
        out_specs=vmem,
    )(ids_tm, mask_tm, kparams["emb"], kparams["hmask"],
      kparams["wqkv"], kparams["bqkv"], kparams["wo"], kparams["bo"],
      kparams["wx0"], kparams["wh0"], kparams["wxh"], kparams["lstm_b"])


# =====================================================================================
# Parameter construction (deterministic, shapes from the module's __init__)
# =====================================================================================
def init_params(key, V, E, H, num_layers=NUM_LSTM_LAYERS):
    keys = jax.random.split(key, 3 + num_layers)

    def xavier(k, shape):
        fan_out, fan_in = shape
        lim = math.sqrt(6.0 / (fan_in + fan_out))
        return jax.random.uniform(k, shape, jnp.float32, -lim, lim)

    raw = {
        "embedding": xavier(keys[0], (V, E)),          # nn.Embedding weight (xavier init)
        "in_w": xavier(keys[1], (3 * E, E)),           # MHA in_proj_weight
        "in_b": jnp.zeros((3 * E,), jnp.float32),      # MHA in_proj_bias
        "out_w": xavier(keys[2], (E, E)),              # MHA out_proj.weight
        "out_b": jnp.zeros((E,), jnp.float32),         # MHA out_proj.bias
        "lstm": [],
    }
    bound = 1.0 / math.sqrt(H)
    for layer in range(num_layers):
        in_dim = E if layer == 0 else H
        k1, k2, k3, k4 = jax.random.split(keys[3 + layer], 4)
        w_ih = jax.random.uniform(k1, (4 * H, in_dim), jnp.float32, -bound, bound)
        w_hh = jax.random.uniform(k2, (4 * H, H), jnp.float32, -bound, bound)
        b_ih = jax.random.uniform(k3, (4 * H,), jnp.float32, -bound, bound)
        b_hh = jax.random.uniform(k4, (4 * H,), jnp.float32, -bound, bound)
        raw["lstm"].append((w_ih, w_hh, b_ih, b_hh))
    return raw


def prepare_kernel_params(raw, E, H, num_heads, batch, tokens):
    assert E == H
    V = raw["embedding"].shape[0]
    vpad = ((V + 7) // 8) * 8
    emb = jnp.zeros((vpad, E), jnp.float32).at[:V].set(raw["embedding"])

    hd = E // num_heads
    head_of_lane = jnp.arange(E) // hd
    masks = (head_of_lane[None, :] == jnp.arange(num_heads)[:, None]).astype(jnp.float32)
    hmask = jnp.repeat(masks, batch * tokens, axis=0)            # [NH*BT, E]

    wqkv = raw["in_w"].T                                          # [E, 3E]
    bqkv = raw["in_b"].reshape(1, 3 * E)
    wo = raw["out_w"].T                                           # [E, E]
    bo = raw["out_b"].reshape(1, E)

    (w_ih0, w_hh0, _, _) = raw["lstm"][0]
    wx0 = w_ih0.T                                                 # [E, 4H]
    wh0 = w_hh0.T                                                 # [H, 4H]
    wxh = jnp.stack([jnp.concatenate([w_ih.T, w_hh.T], axis=0)
                     for (w_ih, w_hh, _, _) in raw["lstm"][1:]], axis=0)   # [L-1, 2H, 4H]
    lstm_b = jnp.stack([(b_ih + b_hh).reshape(1, 4 * H)
                        for (_, _, b_ih, b_hh) in raw["lstm"]], axis=0)    # [L, 1, 4H]
    return {"emb": emb, "hmask": hmask, "wqkv": wqkv, "bqkv": bqkv,
            "wo": wo, "bo": bo, "wx0": wx0, "wh0": wh0, "wxh": wxh, "lstm_b": lstm_b}


# =====================================================================================
# Full forward (wrapper only re-layouts tiny int inputs / outputs; all math in-kernel)
# =====================================================================================
def question_model_forward(kparams, x_tokens, key_padding_mask):
    B, T = x_tokens.shape
    ids_tm = x_tokens.T.reshape(B * T, 1).astype(jnp.int32)       # time-major p = t*B + b
    mask_tm = key_padding_mask.T.reshape(1, B * T).astype(jnp.int32)
    out = fused_forward(kparams, ids_tm, mask_tm,
                        num_heads=NUM_HEADS, batch=B, tokens=T)   # [B*T, 128]
    word = out[:, :EMBED].reshape(T, B, EMBED).transpose(1, 0, 2)
    question = out[:, EMBED:EMBED + HIDDEN].reshape(T, B, HIDDEN).transpose(1, 0, 2)
    return word, question


# =====================================================================================
# Pure-JAX reference (for correctness check)
# =====================================================================================
def reference_forward(raw, x_tokens, mask):
    E = raw["embedding"].shape[1]
    B, T = x_tokens.shape
    word_in = raw["embedding"][x_tokens]
    q = word_in @ raw["in_w"][:E].T + raw["in_b"][:E]
    k = word_in @ raw["in_w"][E:2 * E].T + raw["in_b"][E:2 * E]
    v = word_in @ raw["in_w"][2 * E:].T + raw["in_b"][2 * E:]
    hd = E // NUM_HEADS

    def heads(a):
        return a.reshape(B, T, NUM_HEADS, hd).transpose(0, 2, 1, 3)

    qh, kh, vh = heads(q) * (hd ** -0.5), heads(k), heads(v)
    s = jnp.einsum("bhqd,bhkd->bhqk", qh, kh)
    s = jnp.where(mask[:, None, None, :], -jnp.inf, s)
    p = jax.nn.softmax(s, axis=-1)
    ctx = jnp.einsum("bhqk,bhkd->bhqd", p, vh).transpose(0, 2, 1, 3).reshape(B, T, E)
    word = ctx @ raw["out_w"].T + raw["out_b"]

    x = word
    H = raw["lstm"][0][1].shape[1]
    for (w_ih, w_hh, b_ih, b_hh) in raw["lstm"]:
        def step(carry, x_t):
            h, c = carry
            g = x_t @ w_ih.T + b_ih + h @ w_hh.T + b_hh
            i_g, f_g, g_g, o_g = jnp.split(g, 4, axis=-1)
            c = jax.nn.sigmoid(f_g) * c + jax.nn.sigmoid(i_g) * jnp.tanh(g_g)
            h = jax.nn.sigmoid(o_g) * jnp.tanh(c)
            return (h, c), h

        init = (jnp.zeros((B, H)), jnp.zeros((B, H)))
        _, ys = jax.lax.scan(step, init, jnp.transpose(x, (1, 0, 2)))
        x = jnp.transpose(ys, (1, 0, 2))
    question = x / jnp.maximum(jnp.linalg.norm(x, axis=-1, keepdims=True), 1e-12)
    return word, question


# =====================================================================================
if __name__ == "__main__":
    key = jax.random.PRNGKey(0)
    k_params, k_tokens = jax.random.split(key)

    raw = init_params(k_params, VOCAB, EMBED, HIDDEN)
    kparams = prepare_kernel_params(raw, EMBED, HIDDEN, NUM_HEADS, BATCH, TOKENS)

    # deterministic example inputs
    x_tokens = jax.random.randint(k_tokens, (BATCH, TOKENS), 1, VOCAB)
    lengths = jnp.array([6, 5])
    mask = jnp.arange(TOKENS)[None, :] >= lengths[:, None]     # True == padding
    x_tokens = jnp.where(mask, 0, x_tokens)                    # padding_idx = 0

    fwd = jax.jit(functools.partial(question_model_forward, kparams))
    word, question = fwd(x_tokens, mask)
    jax.block_until_ready((word, question))

    word_r, question_r = reference_forward(raw, x_tokens, mask)

    assert word.shape == (BATCH, TOKENS, EMBED)
    assert question.shape == (BATCH, TOKENS, HIDDEN)
    assert bool(jnp.all(jnp.isfinite(word))) and bool(jnp.all(jnp.isfinite(question)))
    assert bool(jnp.allclose(word, word_r, atol=1e-3, rtol=1e-3)), \
        float(jnp.max(jnp.abs(word - word_r)))
    assert bool(jnp.allclose(question, question_r, atol=1e-3, rtol=1e-3)), \
        float(jnp.max(jnp.abs(question - question_r)))

    print("KERNEL_OK")
</pallas_src>

<mosaic_0001>
module attributes {stable_mosaic.version = 11 : i64} {
  func.func @fused_question_kernel(%arg0: memref<16x1xi32, #tpu.memory_space<vmem>>, %arg1: memref<1x16xi32, #tpu.memory_space<vmem>>, %arg2: memref<56x32xf32, #tpu.memory_space<vmem>>, %arg3: memref<128x32xf32, #tpu.memory_space<vmem>>, %arg4: memref<32x96xf32, #tpu.memory_space<vmem>>, %arg5: memref<1x96xf32, #tpu.memory_space<vmem>>, %arg6: memref<32x32xf32, #tpu.memory_space<vmem>>, %arg7: memref<1x32xf32, #tpu.memory_space<vmem>>, %arg8: memref<32x128xf32, #tpu.memory_space<vmem>>, %arg9: memref<32x128xf32, #tpu.memory_space<vmem>>, %arg10: memref<2x64x128xf32, #tpu.memory_space<vmem>>, %arg11: memref<3x1x128xf32, #tpu.memory_space<vmem>>, %arg12: memref<16x128xf32, #tpu.memory_space<vmem>>) attributes {dimension_semantics = [], scalar_prefetch = 0 : i64, scratch_operands = 0 : i64, tpu.core_type = #tpu.core_type<tc>} {
    %c0 = arith.constant 0 : index
    %c0_0 = arith.constant 0 : index
    %0 = vector.load %arg0[%c0, %c0_0] : memref<16x1xi32, #tpu.memory_space<vmem>>, vector<16x1xi32>
    %1 = tpu.iota {dimensions = array<i32: 1>} : vector<16x56xi32>
    %2 = vector.broadcast %0 : vector<16x1xi32> to vector<16x56xi32>
    %3 = arith.cmpi eq, %1, %2 : vector<16x56xi32>
    %4 = arith.extui %3 : vector<16x56xi1> to vector<16x56xi32>
    %5 = arith.sitofp %4 : vector<16x56xi32> to vector<16x56xf32>
    %c0_1 = arith.constant 0 : index
    %c0_2 = arith.constant 0 : index
    %6 = vector.load %arg2[%c0_1, %c0_2] : memref<56x32xf32, #tpu.memory_space<vmem>>, vector<56x32xf32>
    %cst = arith.constant dense<0.000000e+00> : vector<16x32xf32>
    %7 = tpu.matmul %5, %6, %cst {dimension_numbers = #tpu.dot_dimension_numbers<[1], [0], [0], [1], [0, 0, 1, 1], [], []>, precision = #tpu.contract_precision<fp32>} : vector<16x56xf32>, vector<56x32xf32>, vector<16x32xf32> -> vector<16x32xf32>
    %c0_3 = arith.constant 0 : index
    %c0_4 = arith.constant 0 : index
    %8 = vector.load %arg4[%c0_3, %c0_4] : memref<32x96xf32, #tpu.memory_space<vmem>>, vector<32x96xf32>
    %cst_5 = arith.constant dense<0.000000e+00> : vector<16x96xf32>
    %9 = tpu.matmul %7, %8, %cst_5 {dimension_numbers = #tpu.dot_dimension_numbers<[1], [0], [0], [1], [0, 0, 1, 1], [], []>, precision = #tpu.contract_precision<fp32>} : vector<16x32xf32>, vector<32x96xf32>, vector<16x96xf32> -> vector<16x96xf32>
    %c0_6 = arith.constant 0 : index
    %c0_7 = arith.constant 0 : index
    %10 = vector.load %arg5[%c0_6, %c0_7] : memref<1x96xf32, #tpu.memory_space<vmem>>, vector<1x96xf32>
    %11 = vector.broadcast %10 : vector<1x96xf32> to vector<16x96xf32>
    %12 = arith.addf %9, %11 : vector<16x96xf32>
    %13 = vector.extract_strided_slice %12 {offsets = [0, 0], sizes = [16, 32], strides = [1, 1]} : vector<16x96xf32> to vector<16x32xf32>
    %cst_8 = arith.constant 5.000000e-01 : f32
    %14 = vector.broadcast %cst_8 : f32 to vector<16x32xf32>
    %15 = arith.mulf %13, %14 : vector<16x32xf32>
    %16 = vector.extract_strided_slice %12 {offsets = [0, 32], sizes = [16, 32], strides = [1, 1]} : vector<16x96xf32> to vector<16x32xf32>
    %17 = vector.extract_strided_slice %12 {offsets = [0, 64], sizes = [16, 32], strides = [1, 1]} : vector<16x96xf32> to vector<16x32xf32>
    %c0_9 = arith.constant 0 : index
    %c0_10 = arith.constant 0 : index
    %18 = vector.load %arg3[%c0_9, %c0_10] : memref<128x32xf32, #tpu.memory_space<vmem>>, vector<128x32xf32>
    %19 = tpu.concatenate %15, %15, %15, %15, %15, %15, %15, %15 in 0 : vector<16x32xf32>, vector<16x32xf32>, vector<16x32xf32>, vector<16x32xf32>, vector<16x32xf32>, vector<16x32xf32>, vector<16x32xf32>, vector<16x32xf32> -> vector<128x32xf32>
    %20 = arith.mulf %19, %18 : vector<128x32xf32>
    %cst_11 = arith.constant dense<0.000000e+00> : vector<128x16xf32>
    %21 = tpu.matmul %20, %16, %cst_11 {dimension_numbers = #tpu.dot_dimension_numbers<[1], [1], [0], [0], [0, 0, 1, 0], [], []>, precision = #tpu.contract_precision<fp32>} : vector<128x32xf32>, vector<16x32xf32>, vector<128x16xf32> -> vector<128x16xf32>
    %22 = tpu.iota {dimensions = array<i32: 0>} : vector<128x16xi32>
    %c2_i32 = arith.constant 2 : i32
    %c0_i32 = arith.constant 0 : i32
    %23 = arith.cmpi eq, %c2_i32, %c0_i32 : i32
    %c1_i32 = arith.constant 1 : i32
    %24 = arith.select %23, %c1_i32, %c2_i32 : i32
    %25 = vector.broadcast %24 : i32 to vector<128x16xi32>
    %26 = arith.remsi %22, %25 : vector<128x16xi32>
    %c0_i32_12 = arith.constant 0 : i32
    %27 = vector.broadcast %c0_i32_12 : i32 to vector<128x16xi32>
    %28 = arith.cmpi ne, %26, %27 : vector<128x16xi32>
    %c0_i32_13 = arith.constant 0 : i32
    %29 = vector.broadcast %c0_i32_13 : i32 to vector<128x16xi32>
    %30 = arith.cmpi slt, %26, %29 : vector<128x16xi32>
    %c0_i32_14 = arith.constant 0 : i32
    %31 = arith.cmpi slt, %24, %c0_i32_14 : i32
    %32 = vector.broadcast %31 : i1 to vector<128x16xi1>
    %33 = vector.broadcast %32 : vector<128x16xi1> to vector<128x16xi1>
    %34 = arith.xori %30, %33 : vector<128x16xi1>
    %35 = arith.andi %34, %28 : vector<128x16xi1>
    %36 = vector.broadcast %24 : i32 to vector<128x16xi32>
    %37 = arith.addi %26, %36 : vector<128x16xi32>
    %38 = arith.select %35, %37, %26 : vector<128x16xi1>, vector<128x16xi32>
    %39 = tpu.iota {dimensions = array<i32: 1>} : vector<128x16xi32>
    %c2_i32_15 = arith.constant 2 : i32
    %c0_i32_16 = arith.constant 0 : i32
    %40 = arith.cmpi eq, %c2_i32_15, %c0_i32_16 : i32
    %c1_i32_17 = arith.constant 1 : i32
    %41 = arith.select %40, %c1_i32_17, %c2_i32_15 : i32
    %42 = vector.broadcast %41 : i32 to vector<128x16xi32>
    %43 = arith.remsi %39, %42 : vector<128x16xi32>
    %c0_i32_18 = arith.constant 0 : i32
    %44 = vector.broadcast %c0_i32_18 : i32 to vector<128x16xi32>
    %45 = arith.cmpi ne, %43, %44 : vector<128x16xi32>
    %c0_i32_19 = arith.constant 0 : i32
    %46 = vector.broadcast %c0_i32_19 : i32 to vector<128x16xi32>
    %47 = arith.cmpi slt, %43, %46 : vector<128x16xi32>
    %c0_i32_20 = arith.constant 0 : i32
    %48 = arith.cmpi slt, %41, %c0_i32_20 : i32
    %49 = vector.broadcast %48 : i1 to vector<128x16xi1>
    %50 = vector.broadcast %49 : vector<128x16xi1> to vector<128x16xi1>
    %51 = arith.xori %47, %50 : vector<128x16xi1>
    %52 = arith.andi %51, %45 : vector<128x16xi1>
    %53 = vector.broadcast %41 : i32 to vector<128x16xi32>
    %54 = arith.addi %43, %53 : vector<128x16xi32>
    %55 = arith.select %52, %54, %43 : vector<128x16xi1>, vector<128x16xi32>
    %56 = arith.cmpi ne, %38, %55 : vector<128x16xi32>
    %cst_21 = arith.constant -1.000000e+30 : f32
    %cst_22 = arith.constant 0.000000e+00 : f32
    %57 = vector.broadcast %cst_21 : f32 to vector<128x16xf32>
    %58 = vector.broadcast %cst_22 : f32 to vector<128x16xf32>
    %59 = arith.select %56, %57, %58 : vector<128x16xi1>, vector<128x16xf32>
    %c0_23 = arith.constant 0 : index
    %c0_24 = arith.constant 0 : index
    %60 = vector.load %arg1[%c0_23, %c0_24] : memref<1x16xi32, #tpu.memory_space<vmem>>, vector<1x16xi32>
    %c0_i32_25 = arith.constant 0 : i32
    %61 = vector.broadcast %c0_i32_25 : i32 to vector<1x16xi32>
    %62 = arith.cmpi sgt, %60, %61 : vector<1x16xi32>
    %cst_26 = arith.constant -1.000000e+30 : f32
    %cst_27 = arith.constant 0.000000e+00 : f32
    %63 = vector.broadcast %cst_26 : f32 to vector<1x16xf32>
    %64 = vector.broadcast %cst_27 : f32 to vector<1x16xf32>
    %65 = arith.select %62, %63, %64 : vector<1x16xi1>, vector<1x16xf32>
    %66 = arith.addf %21, %59 : vector<128x16xf32>
    %67 = vector.broadcast %65 : vector<1x16xf32> to vector<128x16xf32>
    %68 = arith.addf %66, %67 : vector<128x16xf32>
    %cst_28 = arith.constant dense<0xFF800000> : vector<128xf32>
    %69 = vector.multi_reduction <maximumf>, %68, %cst_28 [1] : vector<128x16xf32> to vector<128xf32>
    %70 = vector.shape_cast %69 : vector<128xf32> to vector<128x1xf32>
    %71 = vector.broadcast %70 : vector<128x1xf32> to vector<128x16xf32>
    %72 = arith.subf %68, %71 : vector<128x16xf32>
    %73 = math.exp %72 : vector<128x16xf32>
    %cst_29 = arith.constant dense<0.000000e+00> : vector<128xf32>
    %74 = vector.multi_reduction <add>, %73, %cst_29 [1] : vector<128x16xf32> to vector<128xf32>
    %75 = vector.shape_cast %74 : vector<128xf32> to vector<128x1xf32>
    %76 = vector.broadcast %75 : vector<128x1xf32> to vector<128x16xf32>
    %77 = arith.divf %73, %76 : vector<128x16xf32>
    %cst_30 = arith.constant dense<0.000000e+00> : vector<128x32xf32>
    %78 = tpu.matmul %77, %17, %cst_30 {dimension_numbers = #tpu.dot_dimension_numbers<[1], [0], [0], [1], [0, 0, 1, 1], [], []>, precision = #tpu.contract_precision<fp32>} : vector<128x16xf32>, vector<16x32xf32>, vector<128x32xf32> -> vector<128x32xf32>
    %79 = arith.mulf %78, %18 : vector<128x32xf32>
    %80 = vector.extract_strided_slice %79 {offsets = [0, 0], sizes = [16, 32], strides = [1, 1]} : vector<128x32xf32> to vector<16x32xf32>
    %81 = vector.extract_strided_slice %79 {offsets = [16, 0], sizes = [16, 32], strides = [1, 1]} : vector<128x32xf32> to vector<16x32xf32>
    %82 = arith.addf %80, %81 : vector<16x32xf32>
    %83 = vector.extract_strided_slice %79 {offsets = [32, 0], sizes = [16, 32], strides = [1, 1]} : vector<128x32xf32> to vector<16x32xf32>
    %84 = arith.addf %82, %83 : vector<16x32xf32>
    %85 = vector.extract_strided_slice %79 {offsets = [48, 0], sizes = [16, 32], strides = [1, 1]} : vector<128x32xf32> to vector<16x32xf32>
    %86 = arith.addf %84, %85 : vector<16x32xf32>
    %87 = vector.extract_strided_slice %79 {offsets = [64, 0], sizes = [16, 32], strides = [1, 1]} : vector<128x32xf32> to vector<16x32xf32>
    %88 = arith.addf %86, %87 : vector<16x32xf32>
    %89 = vector.extract_strided_slice %79 {offsets = [80, 0], sizes = [16, 32], strides = [1, 1]} : vector<128x32xf32> to vector<16x32xf32>
    %90 = arith.addf %88, %89 : vector<16x32xf32>
    %91 = vector.extract_strided_slice %79 {offsets = [96, 0], sizes = [16, 32], strides = [1, 1]} : vector<128x32xf32> to vector<16x32xf32>
    %92 = arith.addf %90, %91 : vector<16x32xf32>
    %93 = vector.extract_strided_slice %79 {offsets = [112, 0], sizes = [16, 32], strides = [1, 1]} : vector<128x32xf32> to vector<16x32xf32>
    %94 = arith.addf %92, %93 : vector<16x32xf32>
    %c0_31 = arith.constant 0 : index
    %c0_32 = arith.constant 0 : index
    %95 = vector.load %arg6[%c0_31, %c0_32] : memref<32x32xf32, #tpu.memory_space<vmem>>, vector<32x32xf32>
    %cst_33 = arith.constant dense<0.000000e+00> : vector<16x32xf32>
    %96 = tpu.matmul %94, %95, %cst_33 {dimension_numbers = #tpu.dot_dimension_numbers<[1], [0], [0], [1], [0, 0, 1, 1], [], []>, precision = #tpu.contract_precision<fp32>} : vector<16x32xf32>, vector<32x32xf32>, vector<16x32xf32> -> vector<16x32xf32>
    %c0_34 = arith.constant 0 : index
    %c0_35 = arith.constant 0 : index
    %97 = vector.load %arg7[%c0_34, %c0_35] : memref<1x32xf32, #tpu.memory_space<vmem>>, vector<1x32xf32>
    %98 = vector.broadcast %97 : vector<1x32xf32> to vector<16x32xf32>
    %99 = arith.addf %96, %98 : vector<16x32xf32>
    %c0_36 = arith.constant 0 : index
    %c0_37 = arith.constant 0 : index
    %100 = vector.load %arg8[%c0_36, %c0_37] : memref<32x128xf32, #tpu.memory_space<vmem>>, vector<32x128xf32>
    %cst_38 = arith.constant dense<0.000000e+00> : vector<16x128xf32>
    %101 = tpu.matmul %99, %100, %cst_38 {dimension_numbers = #tpu.dot_dimension_numbers<[1], [0], [0], [1], [0, 0, 1, 1], [], []>, precision = #tpu.contract_precision<fp32>} : vector<16x32xf32>, vector<32x128xf32>, vector<16x128xf32> -> vector<16x128xf32>
    %c0_39 = arith.constant 0 : index
    %c0_40 = arith.constant 0 : index
    %c0_41 = arith.constant 0 : index
    %102 = vector.load %arg11[%c0_39, %c0_40, %c0_41] : memref<3x1x128xf32, #tpu.memory_space<vmem>>, vector<1x1x128xf32>
    %103 = vector.shape_cast %102 : vector<1x1x128xf32> to vector<1x128xf32>
    %104 = vector.broadcast %103 : vector<1x128xf32> to vector<16x128xf32>
    %105 = arith.addf %101, %104 : vector<16x128xf32>
    %c0_42 = arith.constant 0 : index
    %c0_43 = arith.constant 0 : index
    %106 = vector.load %arg9[%c0_42, %c0_43] : memref<32x128xf32, #tpu.memory_space<vmem>>, vector<32x128xf32>
    %c0_44 = arith.constant 0 : index
    %c0_45 = arith.constant 0 : index
    %c0_46 = arith.constant 0 : index
    %107 = vector.load %arg10[%c0_44, %c0_45, %c0_46] : memref<2x64x128xf32, #tpu.memory_space<vmem>>, vector<1x64x128xf32>
    %108 = vector.shape_cast %107 : vector<1x64x128xf32> to vector<64x128xf32>
    %c1 = arith.constant 1 : index
    %c0_47 = arith.constant 0 : index
    %c0_48 = arith.constant 0 : index
    %109 = vector.load %arg10[%c1, %c0_47, %c0_48] : memref<2x64x128xf32, #tpu.memory_space<vmem>>, vector<1x64x128xf32>
    %110 = vector.shape_cast %109 : vector<1x64x128xf32> to vector<64x128xf32>
    %c1_49 = arith.constant 1 : index
    %c0_50 = arith.constant 0 : index
    %c0_51 = arith.constant 0 : index
    %111 = vector.load %arg11[%c1_49, %c0_50, %c0_51] : memref<3x1x128xf32, #tpu.memory_space<vmem>>, vector<1x1x128xf32>
    %112 = vector.shape_cast %111 : vector<1x1x128xf32> to vector<1x128xf32>
    %c2 = arith.constant 2 : index
    %c0_52 = arith.constant 0 : index
    %c0_53 = arith.constant 0 : index
    %113 = vector.load %arg11[%c2, %c0_52, %c0_53] : memref<3x1x128xf32, #tpu.memory_space<vmem>>, vector<1x1x128xf32>
    %114 = vector.shape_cast %113 : vector<1x1x128xf32> to vector<1x128xf32>
    %cst_54 = arith.constant 0.000000e+00 : f32
    %115 = vector.broadcast %cst_54 : f32 to vector<2x32xf32>
    %cst_55 = arith.constant 0.000000e+00 : f32
    %116 = vector.broadcast %cst_55 : f32 to vector<2x32xf32>
    %cst_56 = arith.constant 0.000000e+00 : f32
    %117 = vector.broadcast %cst_56 : f32 to vector<2x32xf32>
    %cst_57 = arith.constant 0.000000e+00 : f32
    %118 = vector.broadcast %cst_57 : f32 to vector<2x32xf32>
    %cst_58 = arith.constant 0.000000e+00 : f32
    %119 = vector.broadcast %cst_58 : f32 to vector<2x32xf32>
    %cst_59 = arith.constant 0.000000e+00 : f32
    %120 = vector.broadcast %cst_59 : f32 to vector<2x32xf32>
    %121 = vector.extract_strided_slice %105 {offsets = [0, 0], sizes = [2, 128], strides = [1, 1]} : vector<16x128xf32> to vector<2x128xf32>
    %cst_60 = arith.constant dense<0.000000e+00> : vector<2x128xf32>
    %122 = tpu.matmul %115, %106, %cst_60 {dimension_numbers = #tpu.dot_dimension_numbers<[1], [0], [0], [1], [0, 0, 1, 1], [], []>, precision = #tpu.contract_precision<fp32>} : vector<2x32xf32>, vector<32x128xf32>, vector<2x128xf32> -> vector<2x128xf32>
    %123 = arith.addf %121, %122 : vector<2x128xf32>
    %124 = arith.negf %123 : vector<2x128xf32>
    %125 = math.exp %124 : vector<2x128xf32>
    %cst_61 = arith.constant 1.000000e+00 : f32
    %126 = vector.broadcast %cst_61 : f32 to vector<2x128xf32>
    %127 = arith.addf %126, %125 : vector<2x128xf32>
    %128 = arith.divf %126, %127 : vector<2x128xf32>
    %129 = vector.extract_strided_slice %128 {offsets = [0, 0], sizes = [2, 32], strides = [1, 1]} : vector<2x128xf32> to vector<2x32xf32>
    %130 = vector.extract_strided_slice %128 {offsets = [0, 32], sizes = [2, 32], strides = [1, 1]} : vector<2x128xf32> to vector<2x32xf32>
    %131 = vector.extract_strided_slice %128 {offsets = [0, 96], sizes = [2, 32], strides = [1, 1]} : vector<2x128xf32> to vector<2x32xf32>
    %132 = vector.extract_strided_slice %123 {offsets = [0, 64], sizes = [2, 32], strides = [1, 1]} : vector<2x128xf32> to vector<2x32xf32>
    %133 = math.tanh %132 : vector<2x32xf32>
    %134 = arith.mulf %130, %118 : vector<2x32xf32>
    %135 = arith.mulf %129, %133 : vector<2x32xf32>
    %136 = arith.addf %134, %135 : vector<2x32xf32>
    %137 = math.tanh %136 : vector<2x32xf32>
    %138 = arith.mulf %131, %137 : vector<2x32xf32>
    %139 = vector.extract_strided_slice %105 {offsets = [2, 0], sizes = [2, 128], strides = [1, 1]} : vector<16x128xf32> to vector<2x128xf32>
    %cst_62 = arith.constant dense<0.000000e+00> : vector<2x128xf32>
    %140 = tpu.matmul %138, %106, %cst_62 {dimension_numbers = #tpu.dot_dimension_numbers<[1], [0], [0], [1], [0, 0, 1, 1], [], []>, precision = #tpu.contract_precision<fp32>} : vector<2x32xf32>, vector<32x128xf32>, vector<2x128xf32> -> vector<2x128xf32>
    %141 = arith.addf %139, %140 : vector<2x128xf32>
    %142 = arith.negf %141 : vector<2x128xf32>
    %143 = math.exp %142 : vector<2x128xf32>
    %cst_63 = arith.constant 1.000000e+00 : f32
    %144 = vector.broadcast %cst_63 : f32 to vector<2x128xf32>
    %145 = arith.addf %144, %143 : vector<2x128xf32>
    %146 = arith.divf %144, %145 : vector<2x128xf32>
    %147 = vector.extract_strided_slice %146 {offsets = [0, 0], sizes = [2, 32], strides = [1, 1]} : vector<2x128xf32> to vector<2x32xf32>
    %148 = vector.extract_strided_slice %146 {offsets = [0, 32], sizes = [2, 32], strides = [1, 1]} : vector<2x128xf32> to vector<2x32xf32>
    %149 = vector.extract_strided_slice %146 {offsets = [0, 96], sizes = [2, 32], strides = [1, 1]} : vector<2x128xf32> to vector<2x32xf32>
    %150 = vector.extract_strided_slice %141 {offsets = [0, 64], sizes = [2, 32], strides = [1, 1]} : vector<2x128xf32> to vector<2x32xf32>
    %151 = math.tanh %150 : vector<2x32xf32>
    %152 = arith.mulf %148, %136 : vector<2x32xf32>
    %153 = arith.mulf %147, %151 : vector<2x32xf32>
    %154 = arith.addf %152, %153 : vector<2x32xf32>
    %155 = math.tanh %154 : vector<2x32xf32>
    %156 = arith.mulf %149, %155 : vector<2x32xf32>
    %157 = tpu.concatenate %138, %116 in 1 : vector<2x32xf32>, vector<2x32xf32> -> vector<2x64xf32>
    %cst_64 = arith.constant dense<0.000000e+00> : vector<2x128xf32>
    %158 = tpu.matmul %157, %108, %cst_64 {dimension_numbers = #tpu.dot_dimension_numbers<[1], [0], [0], [1], [0, 0, 1, 1], [], []>, precision = #tpu.contract_precision<fp32>} : vector<2x64xf32>, vector<64x128xf32>, vector<2x128xf32> -> vector<2x128xf32>
    %159 = vector.broadcast %112 : vector<1x128xf32> to vector<2x128xf32>
    %160 = arith.addf %158, %159 : vector<2x128xf32>
    %161 = arith.negf %160 : vector<2x128xf32>
    %162 = math.exp %161 : vector<2x128xf32>
    %cst_65 = arith.constant 1.000000e+00 : f32
    %163 = vector.broadcast %cst_65 : f32 to vector<2x128xf32>
    %164 = arith.addf %163, %162 : vector<2x128xf32>
    %165 = arith.divf %163, %164 : vector<2x128xf32>
    %166 = vector.extract_strided_slice %165 {offsets = [0, 0], sizes = [2, 32], strides = [1, 1]} : vector<2x128xf32> to vector<2x32xf32>
    %167 = vector.extract_strided_slice %165 {offsets = [0, 32], sizes = [2, 32], strides = [1, 1]} : vector<2x128xf32> to vector<2x32xf32>
    %168 = vector.extract_strided_slice %165 {offsets = [0, 96], sizes = [2, 32], strides = [1, 1]} : vector<2x128xf32> to vector<2x32xf32>
    %169 = vector.extract_strided_slice %160 {offsets = [0, 64], sizes = [2, 32], strides = [1, 1]} : vector<2x128xf32> to vector<2x32xf32>
    %170 = math.tanh %169 : vector<2x32xf32>
    %171 = arith.mulf %167, %119 : vector<2x32xf32>
    %172 = arith.mulf %166, %170 : vector<2x32xf32>
    %173 = arith.addf %171, %172 : vector<2x32xf32>
    %174 = math.tanh %173 : vector<2x32xf32>
    %175 = arith.mulf %168, %174 : vector<2x32xf32>
    %176 = vector.extract_strided_slice %105 {offsets = [4, 0], sizes = [2, 128], strides = [1, 1]} : vector<16x128xf32> to vector<2x128xf32>
    %cst_66 = arith.constant dense<0.000000e+00> : vector<2x128xf32>
    %177 = tpu.matmul %156, %106, %cst_66 {dimension_numbers = #tpu.dot_dimension_numbers<[1], [0], [0], [1], [0, 0, 1, 1], [], []>, precision = #tpu.contract_precision<fp32>} : vector<2x32xf32>, vector<32x128xf32>, vector<2x128xf32> -> vector<2x128xf32>
    %178 = arith.addf %176, %177 : vector<2x128xf32>
    %179 = arith.negf %178 : vector<2x128xf32>
    %180 = math.exp %179 : vector<2x128xf32>
    %cst_67 = arith.constant 1.000000e+00 : f32
    %181 = vector.broadcast %cst_67 : f32 to vector<2x128xf32>
    %182 = arith.addf %181, %180 : vector<2x128xf32>
    %183 = arith.divf %181, %182 : vector<2x128xf32>
    %184 = vector.extract_strided_slice %183 {offsets = [0, 0], sizes = [2, 32], strides = [1, 1]} : vector<2x128xf32> to vector<2x32xf32>
    %185 = vector.extract_strided_slice %183 {offsets = [0, 32], sizes = [2, 32], strides = [1, 1]} : vector<2x128xf32> to vector<2x32xf32>
    %186 = vector.extract_strided_slice %183 {offsets = [0, 96], sizes = [2, 32], strides = [1, 1]} : vector<2x128xf32> to vector<2x32xf32>
    %187 = vector.extract_strided_slice %178 {offsets = [0, 64], sizes = [2, 32], strides = [1, 1]} : vector<2x128xf32> to vector<2x32xf32>
    %188 = math.tanh %187 : vector<2x32xf32>
    %189 = arith.mulf %185, %154 : vector<2x32xf32>
    %190 = arith.mulf %184, %188 : vector<2x32xf32>
    %191 = arith.addf %189, %190 : vector<2x32xf32>
    %192 = math.tanh %191 : vector<2x32xf32>
    %193 = arith.mulf %186, %192 : vector<2x32xf32>
    %194 = tpu.concatenate %156, %175 in 1 : vector<2x32xf32>, vector<2x32xf32> -> vector<2x64xf32>
    %cst_68 = arith.constant dense<0.000000e+00> : vector<2x128xf32>
    %195 = tpu.matmul %194, %108, %cst_68 {dimension_numbers = #tpu.dot_dimension_numbers<[1], [0], [0], [1], [0, 0, 1, 1], [], []>, precision = #tpu.contract_precision<fp32>} : vector<2x64xf32>, vector<64x128xf32>, vector<2x128xf32> -> vector<2x128xf32>
    %196 = vector.broadcast %112 : vector<1x128xf32> to vector<2x128xf32>
    %197 = arith.addf %195, %196 : vector<2x128xf32>
    %198 = arith.negf %197 : vector<2x128xf32>
    %199 = math.exp %198 : vector<2x128xf32>
    %cst_69 = arith.constant 1.000000e+00 : f32
    %200 = vector.broadcast %cst_69 : f32 to vector<2x128xf32>
    %201 = arith.addf %200, %199 : vector<2x128xf32>
    %202 = arith.divf %200, %201 : vector<2x128xf32>
    %203 = vector.extract_strided_slice %202 {offsets = [0, 0], sizes = [2, 32], strides = [1, 1]} : vector<2x128xf32> to vector<2x32xf32>
    %204 = vector.extract_strided_slice %202 {offsets = [0, 32], sizes = [2, 32], strides = [1, 1]} : vector<2x128xf32> to vector<2x32xf32>
    %205 = vector.extract_strided_slice %202 {offsets = [0, 96], sizes = [2, 32], strides = [1, 1]} : vector<2x128xf32> to vector<2x32xf32>
    %206 = vector.extract_strided_slice %197 {offsets = [0, 64], sizes = [2, 32], strides = [1, 1]} : vector<2x128xf32> to vector<2x32xf32>
    %207 = math.tanh %206 : vector<2x32xf32>
    %208 = arith.mulf %204, %173 : vector<2x32xf32>
    %209 = arith.mulf %203, %207 : vector<2x32xf32>
    %210 = arith.addf %208, %209 : vector<2x32xf32>
    %211 = math.tanh %210 : vector<2x32xf32>
    %212 = arith.mulf %205, %211 : vector<2x32xf32>
    %213 = tpu.concatenate %175, %117 in 1 : vector<2x32xf32>, vector<2x32xf32> -> vector<2x64xf32>
    %cst_70 = arith.constant dense<0.000000e+00> : vector<2x128xf32>
    %214 = tpu.matmul %213, %110, %cst_70 {dimension_numbers = #tpu.dot_dimension_numbers<[1], [0], [0], [1], [0, 0, 1, 1], [], []>, precision = #tpu.contract_precision<fp32>} : vector<2x64xf32>, vector<64x128xf32>, vector<2x128xf32> -> vector<2x128xf32>
    %215 = vector.broadcast %114 : vector<1x128xf32> to vector<2x128xf32>
    %216 = arith.addf %214, %215 : vector<2x128xf32>
    %217 = arith.negf %216 : vector<2x128xf32>
    %218 = math.exp %217 : vector<2x128xf32>
    %cst_71 = arith.constant 1.000000e+00 : f32
    %219 = vector.broadcast %cst_71 : f32 to vector<2x128xf32>
    %220 = arith.addf %219, %218 : vector<2x128xf32>
    %221 = arith.divf %219, %220 : vector<2x128xf32>
    %222 = vector.extract_strided_slice %221 {offsets = [0, 0], sizes = [2, 32], strides = [1, 1]} : vector<2x128xf32> to vector<2x32xf32>
    %223 = vector.extract_strided_slice %221 {offsets = [0, 32], sizes = [2, 32], strides = [1, 1]} : vector<2x128xf32> to vector<2x32xf32>
    %224 = vector.extract_strided_slice %221 {offsets = [0, 96], sizes = [2, 32], strides = [1, 1]} : vector<2x128xf32> to vector<2x32xf32>
    %225 = vector.extract_strided_slice %216 {offsets = [0, 64], sizes = [2, 32], strides = [1, 1]} : vector<2x128xf32> to vector<2x32xf32>
    %226 = math.tanh %225 : vector<2x32xf32>
    %227 = arith.mulf %223, %120 : vector<2x32xf32>
    %228 = arith.mulf %222, %226 : vector<2x32xf32>
    %229 = arith.addf %227, %228 : vector<2x32xf32>
    %230 = math.tanh %229 : vector<2x32xf32>
    %231 = arith.mulf %224, %230 : vector<2x32xf32>
    %232 = vector.extract_strided_slice %105 {offsets = [6, 0], sizes = [2, 128], strides = [1, 1]} : vector<16x128xf32> to vector<2x128xf32>
    %cst_72 = arith.constant dense<0.000000e+00> : vector<2x128xf32>
    %233 = tpu.matmul %193, %106, %cst_72 {dimension_numbers = #tpu.dot_dimension_numbers<[1], [0], [0], [1], [0, 0, 1, 1], [], []>, precision = #tpu.contract_precision<fp32>} : vector<2x32xf32>, vector<32x128xf32>, vector<2x128xf32> -> vector<2x128xf32>
    %234 = arith.addf %232, %233 : vector<2x128xf32>
    %235 = arith.negf %234 : vector<2x128xf32>
    %236 = math.exp %235 : vector<2x128xf32>
    %cst_73 = arith.constant 1.000000e+00 : f32
    %237 = vector.broadcast %cst_73 : f32 to vector<2x128xf32>
    %238 = arith.addf %237, %236 : vector<2x128xf32>
    %239 = arith.divf %237, %238 : vector<2x128xf32>
    %240 = vector.extract_strided_slice %239 {offsets = [0, 0], sizes = [2, 32], strides = [1, 1]} : vector<2x128xf32> to vector<2x32xf32>
    %241 = vector.extract_strided_slice %239 {offsets = [0, 32], sizes = [2, 32], strides = [1, 1]} : vector<2x128xf32> to vector<2x32xf32>
    %242 = vector.extract_strided_slice %239 {offsets = [0, 96], sizes = [2, 32], strides = [1, 1]} : vector<2x128xf32> to vector<2x32xf32>
    %243 = vector.extract_strided_slice %234 {offsets = [0, 64], sizes = [2, 32], strides = [1, 1]} : vector<2x128xf32> to vector<2x32xf32>
    %244 = math.tanh %243 : vector<2x32xf32>
    %245 = arith.mulf %241, %191 : vector<2x32xf32>
    %246 = arith.mulf %240, %244 : vector<2x32xf32>
    %247 = arith.addf %245, %246 : vector<2x32xf32>
    %248 = math.tanh %247 : vector<2x32xf32>
    %249 = arith.mulf %242, %248 : vector<2x32xf32>
    %250 = tpu.concatenate %193, %212 in 1 : vector<2x32xf32>, vector<2x32xf32> -> vector<2x64xf32>
    %cst_74 = arith.constant dense<0.000000e+00> : vector<2x128xf32>
    %251 = tpu.matmul %250, %108, %cst_74 {dimension_numbers = #tpu.dot_dimension_numbers<[1], [0], [0], [1], [0, 0, 1, 1], [], []>, precision = #tpu.contract_precision<fp32>} : vector<2x64xf32>, vector<64x128xf32>, vector<2x128xf32> -> vector<2x128xf32>
    %252 = vector.broadcast %112 : vector<1x128xf32> to vector<2x128xf32>
    %253 = arith.addf %251, %252 : vector<2x128xf32>
    %254 = arith.negf %253 : vector<2x128xf32>
    %255 = math.exp %254 : vector<2x128xf32>
    %cst_75 = arith.constant 1.000000e+00 : f32
    %256 = vector.broadcast %cst_75 : f32 to vector<2x128xf32>
    %257 = arith.addf %256, %255 : vector<2x128xf32>
    %258 = arith.divf %256, %257 : vector<2x128xf32>
    %259 = vector.extract_strided_slice %258 {offsets = [0, 0], sizes = [2, 32], strides = [1, 1]} : vector<2x128xf32> to vector<2x32xf32>
    %260 = vector.extract_strided_slice %258 {offsets = [0, 32], sizes = [2, 32], strides = [1, 1]} : vector<2x128xf32> to vector<2x32xf32>
    %261 = vector.extract_strided_slice %258 {offsets = [0, 96], sizes = [2, 32], strides = [1, 1]} : vector<2x128xf32> to vector<2x32xf32>
    %262 = vector.extract_strided_slice %253 {offsets = [0, 64], sizes = [2, 32], strides = [1, 1]} : vector<2x128xf32> to vector<2x32xf32>
    %263 = math.tanh %262 : vector<2x32xf32>
    %264 = arith.mulf %260, %210 : vector<2x32xf32>
    %265 = arith.mulf %259, %263 : vector<2x32xf32>
    %266 = arith.addf %264, %265 : vector<2x32xf32>
    %267 = math.tanh %266 : vector<2x32xf32>
    %268 = arith.mulf %261, %267 : vector<2x32xf32>
    %269 = tpu.concatenate %212, %231 in 1 : vector<2x32xf32>, vector<2x32xf32> -> vector<2x64xf32>
    %cst_76 = arith.constant dense<0.000000e+00> : vector<2x128xf32>
    %270 = tpu.matmul %269, %110, %cst_76 {dimension_numbers = #tpu.dot_dimension_numbers<[1], [0], [0], [1], [0, 0, 1, 1], [], []>, precision = #tpu.contract_precision<fp32>} : vector<2x64xf32>, vector<64x128xf32>, vector<2x128xf32> -> vector<2x128xf32>
    %271 = vector.broadcast %114 : vector<1x128xf32> to vector<2x128xf32>
    %272 = arith.addf %270, %271 : vector<2x128xf32>
    %273 = arith.negf %272 : vector<2x128xf32>
    %274 = math.exp %273 : vector<2x128xf32>
    %cst_77 = arith.constant 1.000000e+00 : f32
    %275 = vector.broadcast %cst_77 : f32 to vector<2x128xf32>
    %276 = arith.addf %275, %274 : vector<2x128xf32>
    %277 = arith.divf %275, %276 : vector<2x128xf32>
    %278 = vector.extract_strided_slice %277 {offsets = [0, 0], sizes = [2, 32], strides = [1, 1]} : vector<2x128xf32> to vector<2x32xf32>
    %279 = vector.extract_strided_slice %277 {offsets = [0, 32], sizes = [2, 32], strides = [1, 1]} : vector<2x128xf32> to vector<2x32xf32>
    %280 = vector.extract_strided_slice %277 {offsets = [0, 96], sizes = [2, 32], strides = [1, 1]} : vector<2x128xf32> to vector<2x32xf32>
    %281 = vector.extract_strided_slice %272 {offsets = [0, 64], sizes = [2, 32], strides = [1, 1]} : vector<2x128xf32> to vector<2x32xf32>
    %282 = math.tanh %281 : vector<2x32xf32>
    %283 = arith.mulf %279, %229 : vector<2x32xf32>
    %284 = arith.mulf %278, %282 : vector<2x32xf32>
    %285 = arith.addf %283, %284 : vector<2x32xf32>
    %286 = math.tanh %285 : vector<2x32xf32>
    %287 = arith.mulf %280, %286 : vector<2x32xf32>
    %288 = vector.extract_strided_slice %105 {offsets = [8, 0], sizes = [2, 128], strides = [1, 1]} : vector<16x128xf32> to vector<2x128xf32>
    %cst_78 = arith.constant dense<0.000000e+00> : vector<2x128xf32>
    %289 = tpu.matmul %249, %106, %cst_78 {dimension_numbers = #tpu.dot_dimension_numbers<[1], [0], [0], [1], [0, 0, 1, 1], [], []>, precision = #tpu.contract_precision<fp32>} : vector<2x32xf32>, vector<32x128xf32>, vector<2x128xf32> -> vector<2x128xf32>
    %290 = arith.addf %288, %289 : vector<2x128xf32>
    %291 = arith.negf %290 : vector<2x128xf32>
    %292 = math.exp %291 : vector<2x128xf32>
    %cst_79 = arith.constant 1.000000e+00 : f32
    %293 = vector.broadcast %cst_79 : f32 to vector<2x128xf32>
    %294 = arith.addf %293, %292 : vector<2x128xf32>
    %295 = arith.divf %293, %294 : vector<2x128xf32>
    %296 = vector.extract_strided_slice %295 {offsets = [0, 0], sizes = [2, 32], strides = [1, 1]} : vector<2x128xf32> to vector<2x32xf32>
    %297 = vector.extract_strided_slice %295 {offsets = [0, 32], sizes = [2, 32], strides = [1, 1]} : vector<2x128xf32> to vector<2x32xf32>
    %298 = vector.extract_strided_slice %295 {offsets = [0, 96], sizes = [2, 32], strides = [1, 1]} : vector<2x128xf32> to vector<2x32xf32>
    %299 = vector.extract_strided_slice %290 {offsets = [0, 64], sizes = [2, 32], strides = [1, 1]} : vector<2x128xf32> to vector<2x32xf32>
    %300 = math.tanh %299 : vector<2x32xf32>
    %301 = arith.mulf %297, %247 : vector<2x32xf32>
    %302 = arith.mulf %296, %300 : vector<2x32xf32>
    %303 = arith.addf %301, %302 : vector<2x32xf32>
    %304 = math.tanh %303 : vector<2x32xf32>
    %305 = arith.mulf %298, %304 : vector<2x32xf32>
    %306 = tpu.concatenate %249, %268 in 1 : vector<2x32xf32>, vector<2x32xf32> -> vector<2x64xf32>
    %cst_80 = arith.constant dense<0.000000e+00> : vector<2x128xf32>
    %307 = tpu.matmul %306, %108, %cst_80 {dimension_numbers = #tpu.dot_dimension_numbers<[1], [0], [0], [1], [0, 0, 1, 1], [], []>, precision = #tpu.contract_precision<fp32>} : vector<2x64xf32>, vector<64x128xf32>, vector<2x128xf32> -> vector<2x128xf32>
    %308 = vector.broadcast %112 : vector<1x128xf32> to vector<2x128xf32>
    %309 = arith.addf %307, %308 : vector<2x128xf32>
    %310 = arith.negf %309 : vector<2x128xf32>
    %311 = math.exp %310 : vector<2x128xf32>
    %cst_81 = arith.constant 1.000000e+00 : f32
    %312 = vector.broadcast %cst_81 : f32 to vector<2x128xf32>
    %313 = arith.addf %312, %311 : vector<2x128xf32>
    %314 = arith.divf %312, %313 : vector<2x128xf32>
    %315 = vector.extract_strided_slice %314 {offsets = [0, 0], sizes = [2, 32], strides = [1, 1]} : vector<2x128xf32> to vector<2x32xf32>
    %316 = vector.extract_strided_slice %314 {offsets = [0, 32], sizes = [2, 32], strides = [1, 1]} : vector<2x128xf32> to vector<2x32xf32>
    %317 = vector.extract_strided_slice %314 {offsets = [0, 96], sizes = [2, 32], strides = [1, 1]} : vector<2x128xf32> to vector<2x32xf32>
    %318 = vector.extract_strided_slice %309 {offsets = [0, 64], sizes = [2, 32], strides = [1, 1]} : vector<2x128xf32> to vector<2x32xf32>
    %319 = math.tanh %318 : vector<2x32xf32>
    %320 = arith.mulf %316, %266 : vector<2x32xf32>
    %321 = arith.mulf %315, %319 : vector<2x32xf32>
    %322 = arith.addf %320, %321 : vector<2x32xf32>
    %323 = math.tanh %322 : vector<2x32xf32>
    %324 = arith.mulf %317, %323 : vector<2x32xf32>
    %325 = tpu.concatenate %268, %287 in 1 : vector<2x32xf32>, vector<2x32xf32> -> vector<2x64xf32>
    %cst_82 = arith.constant dense<0.000000e+00> : vector<2x128xf32>
    %326 = tpu.matmul %325, %110, %cst_82 {dimension_numbers = #tpu.dot_dimension_numbers<[1], [0], [0], [1], [0, 0, 1, 1], [], []>, precision = #tpu.contract_precision<fp32>} : vector<2x64xf32>, vector<64x128xf32>, vector<2x128xf32> -> vector<2x128xf32>
    %327 = vector.broadcast %114 : vector<1x128xf32> to vector<2x128xf32>
    %328 = arith.addf %326, %327 : vector<2x128xf32>
    %329 = arith.negf %328 : vector<2x128xf32>
    %330 = math.exp %329 : vector<2x128xf32>
    %cst_83 = arith.constant 1.000000e+00 : f32
    %331 = vector.broadcast %cst_83 : f32 to vector<2x128xf32>
    %332 = arith.addf %331, %330 : vector<2x128xf32>
    %333 = arith.divf %331, %332 : vector<2x128xf32>
    %334 = vector.extract_strided_slice %333 {offsets = [0, 0], sizes = [2, 32], strides = [1, 1]} : vector<2x128xf32> to vector<2x32xf32>
    %335 = vector.extract_strided_slice %333 {offsets = [0, 32], sizes = [2, 32], strides = [1, 1]} : vector<2x128xf32> to vector<2x32xf32>
    %336 = vector.extract_strided_slice %333 {offsets = [0, 96], sizes = [2, 32], strides = [1, 1]} : vector<2x128xf32> to vector<2x32xf32>
    %337 = vector.extract_strided_slice %328 {offsets = [0, 64], sizes = [2, 32], strides = [1, 1]} : vector<2x128xf32> to vector<2x32xf32>
    %338 = math.tanh %337 : vector<2x32xf32>
    %339 = arith.mulf %335, %285 : vector<2x32xf32>
    %340 = arith.mulf %334, %338 : vector<2x32xf32>
    %341 = arith.addf %339, %340 : vector<2x32xf32>
    %342 = math.tanh %341 : vector<2x32xf32>
    %343 = arith.mulf %336, %342 : vector<2x32xf32>
    %344 = vector.extract_strided_slice %105 {offsets = [10, 0], sizes = [2, 128], strides = [1, 1]} : vector<16x128xf32> to vector<2x128xf32>
    %cst_84 = arith.constant dense<0.000000e+00> : vector<2x128xf32>
    %345 = tpu.matmul %305, %106, %cst_84 {dimension_numbers = #tpu.dot_dimension_numbers<[1], [0], [0], [1], [0, 0, 1, 1], [], []>, precision = #tpu.contract_precision<fp32>} : vector<2x32xf32>, vector<32x128xf32>, vector<2x128xf32> -> vector<2x128xf32>
    %346 = arith.addf %344, %345 : vector<2x128xf32>
    %347 = arith.negf %346 : vector<2x128xf32>
    %348 = math.exp %347 : vector<2x128xf32>
    %cst_85 = arith.constant 1.000000e+00 : f32
    %349 = vector.broadcast %cst_85 : f32 to vector<2x128xf32>
    %350 = arith.addf %349, %348 : vector<2x128xf32>
    %351 = arith.divf %349, %350 : vector<2x128xf32>
    %352 = vector.extract_strided_slice %351 {offsets = [0, 0], sizes = [2, 32], strides = [1, 1]} : vector<2x128xf32> to vector<2x32xf32>
    %353 = vector.extract_strided_slice %351 {offsets = [0, 32], sizes = [2, 32], strides = [1, 1]} : vector<2x128xf32> to vector<2x32xf32>
    %354 = vector.extract_strided_slice %351 {offsets = [0, 96], sizes = [2, 32], strides = [1, 1]} : vector<2x128xf32> to vector<2x32xf32>
    %355 = vector.extract_strided_slice %346 {offsets = [0, 64], sizes = [2, 32], strides = [1, 1]} : vector<2x128xf32> to vector<2x32xf32>
    %356 = math.tanh %355 : vector<2x32xf32>
    %357 = arith.mulf %353, %303 : vector<2x32xf32>
    %358 = arith.mulf %352, %356 : vector<2x32xf32>
    %359 = arith.addf %357, %358 : vector<2x32xf32>
    %360 = math.tanh %359 : vector<2x32xf32>
    %361 = arith.mulf %354, %360 : vector<2x32xf32>
    %362 = tpu.concatenate %305, %324 in 1 : vector<2x32xf32>, vector<2x32xf32> -> vector<2x64xf32>
    %cst_86 = arith.constant dense<0.000000e+00> : vector<2x128xf32>
    %363 = tpu.matmul %362, %108, %cst_86 {dimension_numbers = #tpu.dot_dimension_numbers<[1], [0], [0], [1], [0, 0, 1, 1], [], []>, precision = #tpu.contract_precision<fp32>} : vector<2x64xf32>, vector<64x128xf32>, vector<2x128xf32> -> vector<2x128xf32>
    %364 = vector.broadcast %112 : vector<1x128xf32> to vector<2x128xf32>
    %365 = arith.addf %363, %364 : vector<2x128xf32>
    %366 = arith.negf %365 : vector<2x128xf32>
    %367 = math.exp %366 : vector<2x128xf32>
    %cst_87 = arith.constant 1.000000e+00 : f32
    %368 = vector.broadcast %cst_87 : f32 to vector<2x128xf32>
    %369 = arith.addf %368, %367 : vector<2x128xf32>
    %370 = arith.divf %368, %369 : vector<2x128xf32>
    %371 = vector.extract_strided_slice %370 {offsets = [0, 0], sizes = [2, 32], strides = [1, 1]} : vector<2x128xf32> to vector<2x32xf32>
    %372 = vector.extract_strided_slice %370 {offsets = [0, 32], sizes = [2, 32], strides = [1, 1]} : vector<2x128xf32> to vector<2x32xf32>
    %373 = vector.extract_strided_slice %370 {offsets = [0, 96], sizes = [2, 32], strides = [1, 1]} : vector<2x128xf32> to vector<2x32xf32>
    %374 = vector.extract_strided_slice %365 {offsets = [0, 64], sizes = [2, 32], strides = [1, 1]} : vector<2x128xf32> to vector<2x32xf32>
    %375 = math.tanh %374 : vector<2x32xf32>
    %376 = arith.mulf %372, %322 : vector<2x32xf32>
    %377 = arith.mulf %371, %375 : vector<2x32xf32>
    %378 = arith.addf %376, %377 : vector<2x32xf32>
    %379 = math.tanh %378 : vector<2x32xf32>
    %380 = arith.mulf %373, %379 : vector<2x32xf32>
    %381 = tpu.concatenate %324, %343 in 1 : vector<2x32xf32>, vector<2x32xf32> -> vector<2x64xf32>
    %cst_88 = arith.constant dense<0.000000e+00> : vector<2x128xf32>
    %382 = tpu.matmul %381, %110, %cst_88 {dimension_numbers = #tpu.dot_dimension_numbers<[1], [0], [0], [1], [0, 0, 1, 1], [], []>, precision = #tpu.contract_precision<fp32>} : vector<2x64xf32>, vector<64x128xf32>, vector<2x128xf32> -> vector<2x128xf32>
    %383 = vector.broadcast %114 : vector<1x128xf32> to vector<2x128xf32>
    %384 = arith.addf %382, %383 : vector<2x128xf32>
    %385 = arith.negf %384 : vector<2x128xf32>
    %386 = math.exp %385 : vector<2x128xf32>
    %cst_89 = arith.constant 1.000000e+00 : f32
    %387 = vector.broadcast %cst_89 : f32 to vector<2x128xf32>
    %388 = arith.addf %387, %386 : vector<2x128xf32>
    %389 = arith.divf %387, %388 : vector<2x128xf32>
    %390 = vector.extract_strided_slice %389 {offsets = [0, 0], sizes = [2, 32], strides = [1, 1]} : vector<2x128xf32> to vector<2x32xf32>
    %391 = vector.extract_strided_slice %389 {offsets = [0, 32], sizes = [2, 32], strides = [1, 1]} : vector<2x128xf32> to vector<2x32xf32>
    %392 = vector.extract_strided_slice %389 {offsets = [0, 96], sizes = [2, 32], strides = [1, 1]} : vector<2x128xf32> to vector<2x32xf32>
    %393 = vector.extract_strided_slice %384 {offsets = [0, 64], sizes = [2, 32], strides = [1, 1]} : vector<2x128xf32> to vector<2x32xf32>
    %394 = math.tanh %393 : vector<2x32xf32>
    %395 = arith.mulf %391, %341 : vector<2x32xf32>
    %396 = arith.mulf %390, %394 : vector<2x32xf32>
    %397 = arith.addf %395, %396 : vector<2x32xf32>
    %398 = math.tanh %397 : vector<2x32xf32>
    %399 = arith.mulf %392, %398 : vector<2x32xf32>
    %400 = vector.extract_strided_slice %105 {offsets = [12, 0], sizes = [2, 128], strides = [1, 1]} : vector<16x128xf32> to vector<2x128xf32>
    %cst_90 = arith.constant dense<0.000000e+00> : vector<2x128xf32>
    %401 = tpu.matmul %361, %106, %cst_90 {dimension_numbers = #tpu.dot_dimension_numbers<[1], [0], [0], [1], [0, 0, 1, 1], [], []>, precision = #tpu.contract_precision<fp32>} : vector<2x32xf32>, vector<32x128xf32>, vector<2x128xf32> -> vector<2x128xf32>
    %402 = arith.addf %400, %401 : vector<2x128xf32>
    %403 = arith.negf %402 : vector<2x128xf32>
    %404 = math.exp %403 : vector<2x128xf32>
    %cst_91 = arith.constant 1.000000e+00 : f32
    %405 = vector.broadcast %cst_91 : f32 to vector<2x128xf32>
    %406 = arith.addf %405, %404 : vector<2x128xf32>
    %407 = arith.divf %405, %406 : vector<2x128xf32>
    %408 = vector.extract_strided_slice %407 {offsets = [0, 0], sizes = [2, 32], strides = [1, 1]} : vector<2x128xf32> to vector<2x32xf32>
    %409 = vector.extract_strided_slice %407 {offsets = [0, 32], sizes = [2, 32], strides = [1, 1]} : vector<2x128xf32> to vector<2x32xf32>
    %410 = vector.extract_strided_slice %407 {offsets = [0, 96], sizes = [2, 32], strides = [1, 1]} : vector<2x128xf32> to vector<2x32xf32>
    %411 = vector.extract_strided_slice %402 {offsets = [0, 64], sizes = [2, 32], strides = [1, 1]} : vector<2x128xf32> to vector<2x32xf32>
    %412 = math.tanh %411 : vector<2x32xf32>
    %413 = arith.mulf %409, %359 : vector<2x32xf32>
    %414 = arith.mulf %408, %412 : vector<2x32xf32>
    %415 = arith.addf %413, %414 : vector<2x32xf32>
    %416 = math.tanh %415 : vector<2x32xf32>
    %417 = arith.mulf %410, %416 : vector<2x32xf32>
    %418 = tpu.concatenate %361, %380 in 1 : vector<2x32xf32>, vector<2x32xf32> -> vector<2x64xf32>
    %cst_92 = arith.constant dense<0.000000e+00> : vector<2x128xf32>
    %419 = tpu.matmul %418, %108, %cst_92 {dimension_numbers = #tpu.dot_dimension_numbers<[1], [0], [0], [1], [0, 0, 1, 1], [], []>, precision = #tpu.contract_precision<fp32>} : vector<2x64xf32>, vector<64x128xf32>, vector<2x128xf32> -> vector<2x128xf32>
    %420 = vector.broadcast %112 : vector<1x128xf32> to vector<2x128xf32>
    %421 = arith.addf %419, %420 : vector<2x128xf32>
    %422 = arith.negf %421 : vector<2x128xf32>
    %423 = math.exp %422 : vector<2x128xf32>
    %cst_93 = arith.constant 1.000000e+00 : f32
    %424 = vector.broadcast %cst_93 : f32 to vector<2x128xf32>
    %425 = arith.addf %424, %423 : vector<2x128xf32>
    %426 = arith.divf %424, %425 : vector<2x128xf32>
    %427 = vector.extract_strided_slice %426 {offsets = [0, 0], sizes = [2, 32], strides = [1, 1]} : vector<2x128xf32> to vector<2x32xf32>
    %428 = vector.extract_strided_slice %426 {offsets = [0, 32], sizes = [2, 32], strides = [1, 1]} : vector<2x128xf32> to vector<2x32xf32>
    %429 = vector.extract_strided_slice %426 {offsets = [0, 96], sizes = [2, 32], strides = [1, 1]} : vector<2x128xf32> to vector<2x32xf32>
    %430 = vector.extract_strided_slice %421 {offsets = [0, 64], sizes = [2, 32], strides = [1, 1]} : vector<2x128xf32> to vector<2x32xf32>
    %431 = math.tanh %430 : vector<2x32xf32>
    %432 = arith.mulf %428, %378 : vector<2x32xf32>
    %433 = arith.mulf %427, %431 : vector<2x32xf32>
    %434 = arith.addf %432, %433 : vector<2x32xf32>
    %435 = math.tanh %434 : vector<2x32xf32>
    %436 = arith.mulf %429, %435 : vector<2x32xf32>
    %437 = tpu.concatenate %380, %399 in 1 : vector<2x32xf32>, vector<2x32xf32> -> vector<2x64xf32>
    %cst_94 = arith.constant dense<0.000000e+00> : vector<2x128xf32>
    %438 = tpu.matmul %437, %110, %cst_94 {dimension_numbers = #tpu.dot_dimension_numbers<[1], [0], [0], [1], [0, 0, 1, 1], [], []>, precision = #tpu.contract_precision<fp32>} : vector<2x64xf32>, vector<64x128xf32>, vector<2x128xf32> -> vector<2x128xf32>
    %439 = vector.broadcast %114 : vector<1x128xf32> to vector<2x128xf32>
    %440 = arith.addf %438, %439 : vector<2x128xf32>
    %441 = arith.negf %440 : vector<2x128xf32>
    %442 = math.exp %441 : vector<2x128xf32>
    %cst_95 = arith.constant 1.000000e+00 : f32
    %443 = vector.broadcast %cst_95 : f32 to vector<2x128xf32>
    %444 = arith.addf %443, %442 : vector<2x128xf32>
    %445 = arith.divf %443, %444 : vector<2x128xf32>
    %446 = vector.extract_strided_slice %445 {offsets = [0, 0], sizes = [2, 32], strides = [1, 1]} : vector<2x128xf32> to vector<2x32xf32>
    %447 = vector.extract_strided_slice %445 {offsets = [0, 32], sizes = [2, 32], strides = [1, 1]} : vector<2x128xf32> to vector<2x32xf32>
    %448 = vector.extract_strided_slice %445 {offsets = [0, 96], sizes = [2, 32], strides = [1, 1]} : vector<2x128xf32> to vector<2x32xf32>
    %449 = vector.extract_strided_slice %440 {offsets = [0, 64], sizes = [2, 32], strides = [1, 1]} : vector<2x128xf32> to vector<2x32xf32>
    %450 = math.tanh %449 : vector<2x32xf32>
    %451 = arith.mulf %447, %397 : vector<2x32xf32>
    %452 = arith.mulf %446, %450 : vector<2x32xf32>
    %453 = arith.addf %451, %452 : vector<2x32xf32>
    %454 = math.tanh %453 : vector<2x32xf32>
    %455 = arith.mulf %448, %454 : vector<2x32xf32>
    %456 = vector.extract_strided_slice %105 {offsets = [14, 0], sizes = [2, 128], strides = [1, 1]} : vector<16x128xf32> to vector<2x128xf32>
    %cst_96 = arith.constant dense<0.000000e+00> : vector<2x128xf32>
    %457 = tpu.matmul %417, %106, %cst_96 {dimension_numbers = #tpu.dot_dimension_numbers<[1], [0], [0], [1], [0, 0, 1, 1], [], []>, precision = #tpu.contract_precision<fp32>} : vector<2x32xf32>, vector<32x128xf32>, vector<2x128xf32> -> vector<2x128xf32>
    %458 = arith.addf %456, %457 : vector<2x128xf32>
    %459 = arith.negf %458 : vector<2x128xf32>
    %460 = math.exp %459 : vector<2x128xf32>
    %cst_97 = arith.constant 1.000000e+00 : f32
    %461 = vector.broadcast %cst_97 : f32 to vector<2x128xf32>
    %462 = arith.addf %461, %460 : vector<2x128xf32>
    %463 = arith.divf %461, %462 : vector<2x128xf32>
    %464 = vector.extract_strided_slice %463 {offsets = [0, 0], sizes = [2, 32], strides = [1, 1]} : vector<2x128xf32> to vector<2x32xf32>
    %465 = vector.extract_strided_slice %463 {offsets = [0, 32], sizes = [2, 32], strides = [1, 1]} : vector<2x128xf32> to vector<2x32xf32>
    %466 = vector.extract_strided_slice %463 {offsets = [0, 96], sizes = [2, 32], strides = [1, 1]} : vector<2x128xf32> to vector<2x32xf32>
    %467 = vector.extract_strided_slice %458 {offsets = [0, 64], sizes = [2, 32], strides = [1, 1]} : vector<2x128xf32> to vector<2x32xf32>
    %468 = math.tanh %467 : vector<2x32xf32>
    %469 = arith.mulf %465, %415 : vector<2x32xf32>
    %470 = arith.mulf %464, %468 : vector<2x32xf32>
    %471 = arith.addf %469, %470 : vector<2x32xf32>
    %472 = math.tanh %471 : vector<2x32xf32>
    %473 = arith.mulf %466, %472 : vector<2x32xf32>
    %474 = tpu.concatenate %417, %436 in 1 : vector<2x32xf32>, vector<2x32xf32> -> vector<2x64xf32>
    %cst_98 = arith.constant dense<0.000000e+00> : vector<2x128xf32>
    %475 = tpu.matmul %474, %108, %cst_98 {dimension_numbers = #tpu.dot_dimension_numbers<[1], [0], [0], [1], [0, 0, 1, 1], [], []>, precision = #tpu.contract_precision<fp32>} : vector<2x64xf32>, vector<64x128xf32>, vector<2x128xf32> -> vector<2x128xf32>
    %476 = vector.broadcast %112 : vector<1x128xf32> to vector<2x128xf32>
    %477 = arith.addf %475, %476 : vector<2x128xf32>
    %478 = arith.negf %477 : vector<2x128xf32>
    %479 = math.exp %478 : vector<2x128xf32>
    %cst_99 = arith.constant 1.000000e+00 : f32
    %480 = vector.broadcast %cst_99 : f32 to vector<2x128xf32>
    %481 = arith.addf %480, %479 : vector<2x128xf32>
    %482 = arith.divf %480, %481 : vector<2x128xf32>
    %483 = vector.extract_strided_slice %482 {offsets = [0, 0], sizes = [2, 32], strides = [1, 1]} : vector<2x128xf32> to vector<2x32xf32>
    %484 = vector.extract_strided_slice %482 {offsets = [0, 32], sizes = [2, 32], strides = [1, 1]} : vector<2x128xf32> to vector<2x32xf32>
    %485 = vector.extract_strided_slice %482 {offsets = [0, 96], sizes = [2, 32], strides = [1, 1]} : vector<2x128xf32> to vector<2x32xf32>
    %486 = vector.extract_strided_slice %477 {offsets = [0, 64], sizes = [2, 32], strides = [1, 1]} : vector<2x128xf32> to vector<2x32xf32>
    %487 = math.tanh %486 : vector<2x32xf32>
    %488 = arith.mulf %484, %434 : vector<2x32xf32>
    %489 = arith.mulf %483, %487 : vector<2x32xf32>
    %490 = arith.addf %488, %489 : vector<2x32xf32>
    %491 = math.tanh %490 : vector<2x32xf32>
    %492 = arith.mulf %485, %491 : vector<2x32xf32>
    %493 = tpu.concatenate %436, %455 in 1 : vector<2x32xf32>, vector<2x32xf32> -> vector<2x64xf32>
    %cst_100 = arith.constant dense<0.000000e+00> : vector<2x128xf32>
    %494 = tpu.matmul %493, %110, %cst_100 {dimension_numbers = #tpu.dot_dimension_numbers<[1], [0], [0], [1], [0, 0, 1, 1], [], []>, precision = #tpu.contract_precision<fp32>} : vector<2x64xf32>, vector<64x128xf32>, vector<2x128xf32> -> vector<2x128xf32>
    %495 = vector.broadcast %114 : vector<1x128xf32> to vector<2x128xf32>
    %496 = arith.addf %494, %495 : vector<2x128xf32>
    %497 = arith.negf %496 : vector<2x128xf32>
    %498 = math.exp %497 : vector<2x128xf32>
    %cst_101 = arith.constant 1.000000e+00 : f32
    %499 = vector.broadcast %cst_101 : f32 to vector<2x128xf32>
    %500 = arith.addf %499, %498 : vector<2x128xf32>
    %501 = arith.divf %499, %500 : vector<2x128xf32>
    %502 = vector.extract_strided_slice %501 {offsets = [0, 0], sizes = [2, 32], strides = [1, 1]} : vector<2x128xf32> to vector<2x32xf32>
    %503 = vector.extract_strided_slice %501 {offsets = [0, 32], sizes = [2, 32], strides = [1, 1]} : vector<2x128xf32> to vector<2x32xf32>
    %504 = vector.extract_strided_slice %501 {offsets = [0, 96], sizes = [2, 32], strides = [1, 1]} : vector<2x128xf32> to vector<2x32xf32>
    %505 = vector.extract_strided_slice %496 {offsets = [0, 64], sizes = [2, 32], strides = [1, 1]} : vector<2x128xf32> to vector<2x32xf32>
    %506 = math.tanh %505 : vector<2x32xf32>
    %507 = arith.mulf %503, %453 : vector<2x32xf32>
    %508 = arith.mulf %502, %506 : vector<2x32xf32>
    %509 = arith.addf %507, %508 : vector<2x32xf32>
    %510 = math.tanh %509 : vector<2x32xf32>
    %511 = arith.mulf %504, %510 : vector<2x32xf32>
    %512 = tpu.concatenate %473, %492 in 1 : vector<2x32xf32>, vector<2x32xf32> -> vector<2x64xf32>
    %cst_102 = arith.constant dense<0.000000e+00> : vector<2x128xf32>
    %513 = tpu.matmul %512, %108, %cst_102 {dimension_numbers = #tpu.dot_dimension_numbers<[1], [0], [0], [1], [0, 0, 1, 1], [], []>, precision = #tpu.contract_precision<fp32>} : vector<2x64xf32>, vector<64x128xf32>, vector<2x128xf32> -> vector<2x128xf32>
    %514 = vector.broadcast %112 : vector<1x128xf32> to vector<2x128xf32>
    %515 = arith.addf %513, %514 : vector<2x128xf32>
    %516 = arith.negf %515 : vector<2x128xf32>
    %517 = math.exp %516 : vector<2x128xf32>
    %cst_103 = arith.constant 1.000000e+00 : f32
    %518 = vector.broadcast %cst_103 : f32 to vector<2x128xf32>
    %519 = arith.addf %518, %517 : vector<2x128xf32>
    %520 = arith.divf %518, %519 : vector<2x128xf32>
    %521 = vector.extract_strided_slice %520 {offsets = [0, 0], sizes = [2, 32], strides = [1, 1]} : vector<2x128xf32> to vector<2x32xf32>
    %522 = vector.extract_strided_slice %520 {offsets = [0, 32], sizes = [2, 32], strides = [1, 1]} : vector<2x128xf32> to vector<2x32xf32>
    %523 = vector.extract_strided_slice %520 {offsets = [0, 96], sizes = [2, 32], strides = [1, 1]} : vector<2x128xf32> to vector<2x32xf32>
    %524 = vector.extract_strided_slice %515 {offsets = [0, 64], sizes = [2, 32], strides = [1, 1]} : vector<2x128xf32> to vector<2x32xf32>
    %525 = math.tanh %524 : vector<2x32xf32>
    %526 = arith.mulf %522, %490 : vector<2x32xf32>
    %527 = arith.mulf %521, %525 : vector<2x32xf32>
    %528 = arith.addf %526, %527 : vector<2x32xf32>
    %529 = math.tanh %528 : vector<2x32xf32>
    %530 = arith.mulf %523, %529 : vector<2x32xf32>
    %531 = tpu.concatenate %492, %511 in 1 : vector<2x32xf32>, vector<2x32xf32> -> vector<2x64xf32>
    %cst_104 = arith.constant dense<0.000000e+00> : vector<2x128xf32>
    %532 = tpu.matmul %531, %110, %cst_104 {dimension_numbers = #tpu.dot_dimension_numbers<[1], [0], [0], [1], [0, 0, 1, 1], [], []>, precision = #tpu.contract_precision<fp32>} : vector<2x64xf32>, vector<64x128xf32>, vector<2x128xf32> -> vector<2x128xf32>
    %533 = vector.broadcast %114 : vector<1x128xf32> to vector<2x128xf32>
    %534 = arith.addf %532, %533 : vector<2x128xf32>
    %535 = arith.negf %534 : vector<2x128xf32>
    %536 = math.exp %535 : vector<2x128xf32>
    %cst_105 = arith.constant 1.000000e+00 : f32
    %537 = vector.broadcast %cst_105 : f32 to vector<2x128xf32>
    %538 = arith.addf %537, %536 : vector<2x128xf32>
    %539 = arith.divf %537, %538 : vector<2x128xf32>
    %540 = vector.extract_strided_slice %539 {offsets = [0, 0], sizes = [2, 32], strides = [1, 1]} : vector<2x128xf32> to vector<2x32xf32>
    %541 = vector.extract_strided_slice %539 {offsets = [0, 32], sizes = [2, 32], strides = [1, 1]} : vector<2x128xf32> to vector<2x32xf32>
    %542 = vector.extract_strided_slice %539 {offsets = [0, 96], sizes = [2, 32], strides = [1, 1]} : vector<2x128xf32> to vector<2x32xf32>
    %543 = vector.extract_strided_slice %534 {offsets = [0, 64], sizes = [2, 32], strides = [1, 1]} : vector<2x128xf32> to vector<2x32xf32>
    %544 = math.tanh %543 : vector<2x32xf32>
    %545 = arith.mulf %541, %509 : vector<2x32xf32>
    %546 = arith.mulf %540, %544 : vector<2x32xf32>
    %547 = arith.addf %545, %546 : vector<2x32xf32>
    %548 = math.tanh %547 : vector<2x32xf32>
    %549 = arith.mulf %542, %548 : vector<2x32xf32>
    %550 = tpu.concatenate %530, %549 in 1 : vector<2x32xf32>, vector<2x32xf32> -> vector<2x64xf32>
    %cst_106 = arith.constant dense<0.000000e+00> : vector<2x128xf32>
    %551 = tpu.matmul %550, %110, %cst_106 {dimension_numbers = #tpu.dot_dimension_numbers<[1], [0], [0], [1], [0, 0, 1, 1], [], []>, precision = #tpu.contract_precision<fp32>} : vector<2x64xf32>, vector<64x128xf32>, vector<2x128xf32> -> vector<2x128xf32>
    %552 = vector.broadcast %114 : vector<1x128xf32> to vector<2x128xf32>
    %553 = arith.addf %551, %552 : vector<2x128xf32>
    %554 = arith.negf %553 : vector<2x128xf32>
    %555 = math.exp %554 : vector<2x128xf32>
    %cst_107 = arith.constant 1.000000e+00 : f32
    %556 = vector.broadcast %cst_107 : f32 to vector<2x128xf32>
    %557 = arith.addf %556, %555 : vector<2x128xf32>
    %558 = arith.divf %556, %557 : vector<2x128xf32>
    %559 = vector.extract_strided_slice %558 {offsets = [0, 0], sizes = [2, 32], strides = [1, 1]} : vector<2x128xf32> to vector<2x32xf32>
    %560 = vector.extract_strided_slice %558 {offsets = [0, 32], sizes = [2, 32], strides = [1, 1]} : vector<2x128xf32> to vector<2x32xf32>
    %561 = vector.extract_strided_slice %558 {offsets = [0, 96], sizes = [2, 32], strides = [1, 1]} : vector<2x128xf32> to vector<2x32xf32>
    %562 = vector.extract_strided_slice %553 {offsets = [0, 64], sizes = [2, 32], strides = [1, 1]} : vector<2x128xf32> to vector<2x32xf32>
    %563 = math.tanh %562 : vector<2x32xf32>
    %564 = arith.mulf %560, %547 : vector<2x32xf32>
    %565 = arith.mulf %559, %563 : vector<2x32xf32>
    %566 = arith.addf %564, %565 : vector<2x32xf32>
    %567 = math.tanh %566 : vector<2x32xf32>
    %568 = arith.mulf %561, %567 : vector<2x32xf32>
    %569 = tpu.concatenate %231, %287, %343, %399, %455, %511, %549, %568 in 0 : vector<2x32xf32>, vector<2x32xf32>, vector<2x32xf32>, vector<2x32xf32>, vector<2x32xf32>, vector<2x32xf32>, vector<2x32xf32>, vector<2x32xf32> -> vector<16x32xf32>
    %570 = arith.mulf %569, %569 : vector<16x32xf32>
    %cst_108 = arith.constant dense<0.000000e+00> : vector<16xf32>
    %571 = vector.multi_reduction <add>, %570, %cst_108 [1] : vector<16x32xf32> to vector<16xf32>
    %572 = vector.shape_cast %571 : vector<16xf32> to vector<16x1xf32>
    %cst_109 = arith.constant 1.000000e-24 : f32
    %573 = vector.broadcast %cst_109 : f32 to vector<16x1xf32>
    %574 = arith.maximumf %572, %573 : vector<16x1xf32>
    %575 = math.rsqrt %574 : vector<16x1xf32>
    %576 = vector.broadcast %575 : vector<16x1xf32> to vector<16x32xf32>
    %577 = arith.mulf %569, %576 : vector<16x32xf32>
    %cst_110 = arith.constant 0.000000e+00 : f32
    %578 = vector.broadcast %cst_110 : f32 to vector<16x64xf32>
    %579 = tpu.concatenate %99, %577, %578 in 1 : vector<16x32xf32>, vector<16x32xf32>, vector<16x64xf32> -> vector<16x128xf32>
    %c0_111 = arith.constant 0 : index
    %c0_112 = arith.constant 0 : index
    %580 = vector.load %arg12[%c0_111, %c0_112] : memref<16x128xf32, #tpu.memory_space<vmem>>, vector<16x128xf32>
    tpu.vector_store %arg12[%c0_111, %c0_112], %579 {strides = array<i32>} : memref<16x128xf32, #tpu.memory_space<vmem>>, vector<16x128xf32>,
    return
  }
}

</mosaic_0001>

<bundles_post_ra>
// kernel: question_model_forward.1
= control target key start
LH: loop header
LB: loop body
LE: loop exit
PB: predicated region body
PF: predicated region fallthrough
CT: control target
= control target key end

     0   :  { %17 = vsyncpa [#allocation3], 0  ;;  %s13072_s0 = inlined_call_operand.vmem [shape: s32[16,1], index: 0, kind: input, shape index: {}]   ;;  %s13073_s1 = inlined_call_operand.vmem [shape: s32[1,16], index: 1, kind: input, shape index: {}]   ;;  %s13074_s2 = inlined_call_operand.hbm [shape: f32[56,32], index: 2, kind: input, shape index: {}]   ;;  %s13075_s3 = inlined_call_operand.hbm [shape: f32[128,32], index: 3, kind: input, shape index: {}]   ;;  %s13076_s4 = inlined_call_operand.hbm [shape: f32[32,96], index: 4, kind: input, shape index: {}]   ;;  %s13077_s5 = inlined_call_operand.vmem [shape: f32[1,96], index: 5, kind: input, shape index: {}]   ;;  %s13078_s6 = inlined_call_operand.hbm [shape: f32[32,32], index: 6, kind: input, shape index: {}]   ;;  %s13079_s7 = inlined_call_operand.vmem [shape: f32[1,32], index: 7, kind: input, shape index: {}]   ;;  %s13080_s8 = inlined_call_operand.hbm [shape: f32[32,128], index: 8, kind: input, shape index: {}]   ;;  %s13081_s9 = inlined_call_operand.vmem [shape: f32[32,128], index: 9, kind: input, shape index: {}]   ;;  %s13082_s10 = inlined_call_operand.hbm [shape: f32[2,64,128], index: 10, kind: input, shape index: {}]   ;;  %s13083_s11 = inlined_call_operand.vmem [shape: f32[3,1,128], index: 11, kind: input, shape index: {}]   ;;  %s13084_s12 = inlined_call_operand.vmem [shape: f32[16,128], index: 12, kind: output, shape index: {}]  }
   0x1   :  { %18 = vsyncpa [#allocation5], 0 }
   0x2   :  { %19 = vsyncpa [#allocation8], 0 }
   0x3   :  { %20 = vsyncpa [#allocation11], 0  ;;  %s42_s23 = sshll.u32 %s13075_s3, 4  ;;  %s10241_s24 = smov [#allocation4]   ;;  %s43_s23 = int_to_ptr.hbm [resolvable:$true] %s42_s23 }
   0x4   :  { %s44_s25 = sshll.u32 %s10241_s24, 4  ;;  %s70_s28 = sshll.u32 %s13078_s6, 4  ;;  %s45_s25 = int_to_ptr.vmem [resolvable:$true] %s44_s25  ;;  %s71_s28 = int_to_ptr.hbm [resolvable:$true] %s70_s28 }
   0x5   :  { %s10242_s29 = smov 128   ;;  %s10243_s30 = smov 8  }
   0x6   :  { %50 = dma.hbm_to_vmem [thread:$0]  %s43_s23, 2048, %s45_s25, [#allocation5], %s10242_s29, %s10242_s29, %s10243_s30  }
   0x7   :  { %s10244_s13 = smov [#allocation7]   ;;  %s29_s3 = sshll.u32 %s13074_s2, 4  ;;  %s30_s3 = int_to_ptr.hbm [resolvable:$true] %s29_s3 }
   0x8   :  { %s72_s14 = sshll.u32 %s10244_s13, 4  ;;  %s55_s18 = sshll.u32 %s13076_s4, 4  ;;  %s73_s14 = int_to_ptr.vmem [resolvable:$true] %s72_s14  ;;  %s56_s18 = int_to_ptr.hbm [resolvable:$true] %s55_s18 }
   0x9   :  { %78 = dma.hbm_to_vmem [thread:$0]  %s71_s28, 512, %s73_s14, [#allocation8], %s10242_s29, %s10242_s29, %s10243_s30  }
   0xa   :  { %s10245_s19 = smov [#allocation2]   ;;  %s10246_s21 = smov [#allocation6]  }
   0xb   :  { %s31_s20 = sshll.u32 %s10245_s19, 4  ;;  %s57_s2 = sshll.u32 %s10246_s21, 4  ;;  %s32_s20 = int_to_ptr.vmem [resolvable:$true] %s31_s20  ;;  %s58_s2 = int_to_ptr.vmem [resolvable:$true] %s57_s2 }
   0xc   :  { %37 = dma.hbm_to_vmem [thread:$0]  %s30_s3, 896, %s32_s20, [#allocation3], %s10242_s29, %s10242_s29, %s10243_s30  }
   0xd   :  { %s85_s24 = sshll.u32 %s13080_s8, 4  ;;  %s100_s26 = sshll.u32 %s13082_s10, 4  ;;  %s86_s24 = int_to_ptr.hbm [resolvable:$true] %s85_s24  ;;  %s101_s26 = int_to_ptr.hbm [resolvable:$true] %s100_s26 }
   0xe   :  { %63 = dma.hbm_to_vmem [thread:$0]  %s56_s18, 512, %s58_s2, [#allocation5], %s10242_s29, %s10242_s29, %s10243_s30  }
   0xf   :  { %s10247_s27 = smov [#allocation9]   ;;  %s10248_s13 = smov [#allocation10]  }
  0x10   :  { %s87_s28 = sshll.u32 %s10247_s27, 4  ;;  %s102_s8 = sshll.u32 %s10248_s13, 4  ;;  %s88_s28 = int_to_ptr.vmem [resolvable:$true] %s87_s28  ;;  %s103_s8 = int_to_ptr.vmem [resolvable:$true] %s102_s8 }
  0x11   :  { %93 = dma.hbm_to_vmem [thread:$0]  %s86_s24, 512, %s88_s28, [#allocation8], %s10242_s29, %s10242_s29, %s10243_s30  }
  0x12   :  { %108 = dma.hbm_to_vmem [thread:$0]  %s101_s26, 2048, %s103_s8, [#allocation11], %s10242_s29, %s10242_s29, %s10243_s30  }
  0x13   :  { %10233 = dma.done.wait [#allocation3], 896  }
  0x14   :  { %10234 = vsyncadd [#allocation3], 4294966400 }
  0x15   :  { %10235 = dma.done.wait [#allocation5], 2560  }
  0x16   :  { %10236 = vsyncadd [#allocation5], 4294964736 }
  0x17   :  { %10237 = dma.done.wait [#allocation8], 1024  }
  0x18   :  { %10238 = vsyncadd [#allocation8], 4294966272 }
  0x19   :  { %10239 = dma.done.wait [#allocation11], 2048  }
  0x1a   :  { %10240 = vsyncadd [#allocation11], 4294965248  ;;  %v10249_v0 = vmov 0   ;;  %v135_v1 = vld [vmem:[%s13072_s0] sm:$0xff]  ;;  %v157_v2 = vld [vmem:[#allocation2 + $0x30] sm:$0xff]  ;;  %v137_v45 = vlaneseq  ;;  %vm158_vm0 = vcmask 457728  }
  0x1b   :  { %9800 = vset.pattern.permute.xlu0 %v10249_v0  ;;  %v10358_v3 = vand.u32 4294901760, %v157_v2  ;;  %v156_v4 = vld [vmem:[#allocation2 + $0x28] sm:$0xff]  ;;  %v155_v5 = vld [vmem:[#allocation2 + $0x20] sm:$0xff]  ;;  %v154_v6 = vld [vmem:[#allocation2 + $0x18] sm:$0xff]  ;;  %v13085_v48 = vmov 0.0   ;;  %vm428_vm3 = vcmask 261120  }
  0x1c   :  { %140 = vperm.xlu0 %9800, %v135_v1   ;;  %v10360_v7 = vand.u32 4294901760, %v156_v4  ;;  %v10362_v8 = vand.u32 4294901760, %v155_v5  ;;  %v10364_v9 = vand.u32 4294901760, %v154_v6  ;;  %v153_v10 = vld [vmem:[#allocation2 + $0x10] sm:$0xff]  ;;  %v152_v11 = vld [vmem:[#allocation2 + $0x8] sm:$0xff]  ;;  %v151_v39 = vld [vmem:[#allocation2] sm:$0xff] }
  0x1d   :  { %v215_v12 = vsub.f32 %v157_v2, %v10358_v3  ;;  %316 = vmatpush.msra.mxu3 %v10358_v3  ;;  %v10368_v13 = vand.u32 4294901760, %v153_v10  ;;  %175 = vmatpush.msra.mxu0 %v10358_v3  ;;  %v10371_v14 = vand.u32 4294901760, %v152_v11  ;;  %v136_v21 = vld [vmem:[%s13072_s0 + $0x8] sm:$0xff]  ;;  %v186_v40 = vand.u32 4294901760, %v151_v39  ;;  %v423_v62 = vld [vmem:[#allocation6 + $0x18] sm:$0xff]  ;;  %s10251_s16 = smov 96  }
  0x1e   :  { %v221_v15 = vsub.f32 %v156_v4, %v10360_v7  ;;  %v227_v16 = vsub.f32 %v155_v5, %v10362_v8  ;;  %v233_v17 = vsub.f32 %v154_v6, %v10364_v9  ;;  %v10404_v46 = vand.u32 127, %v137_v45  ;;  %v422_v0 = vld [vmem:[#allocation6 + $0x10] sm:$0xff]  ;;  %s10253_s4 = smov 32  }
  0x1f   :  { %v216_v18 = vand.u32 4294901760, %v215_v12  ;;  %276 = vmatpush.msra.mxu2 %v215_v12  ;;  %318 = vmatpush.msra.mxu3 %v10360_v7  ;;  %v239_v19 = vsub.f32 %v153_v10, %v10368_v13  ;;  %v245_v20 = vsub.f32 %v152_v11, %v10371_v14  ;;  %v251_v41 = vsub.f32 %v151_v39, %v186_v40 }
  0x20   :  { %v222_v22 = vand.u32 4294901760, %v221_v15  ;;  %v228_v23 = vand.u32 4294901760, %v227_v16  ;;  %v234_v24 = vand.u32 4294901760, %v233_v17  ;;  %177 = vmatpush.msra.mxu0 %v10360_v7  ;;  %v447_v63 = vand.u32 4294901760, %v423_v62 }
  0x21   :  { %v217_v25 = vsub.f32 %v215_v12, %v216_v18  ;;  %279 = vmatpush.msra.mxu2 %v221_v15  ;;  %v240_v26 = vand.u32 4294901760, %v239_v19  ;;  %320 = vmatpush.msra.mxu3 %v10362_v8  ;;  %v246_v31 = vand.u32 4294901760, %v245_v20  ;;  %v252_v42 = vand.u32 4294901760, %v251_v41 }
  0x22   :  { %v223_v27 = vsub.f32 %v221_v15, %v222_v22  ;;  %v229_v28 = vsub.f32 %v227_v16, %v228_v23  ;;  %179 = vmatpush.msra.mxu0 %v10362_v8  ;;  %v235_v30 = vsub.f32 %v233_v17, %v234_v24  ;;  %v485_v1 = vsub.f32 %v423_v62, %v447_v63 }
  0x23   :  { %v218_v29 = vand.u32 4294901760, %v217_v25  ;;  %282 = vmatpush.msra.mxu2 %v227_v16  ;;  %322 = vmatpush.msra.mxu3 %v10364_v9  ;;  %v241_v34 = vsub.f32 %v239_v19, %v240_v26  ;;  %v247_v36 = vsub.f32 %v245_v20, %v246_v31  ;;  %v253_v43 = vsub.f32 %v251_v41, %v252_v42 }
  0x24   :  { %143 = vperm.xlu0 %9800, %v136_v21   ;;  %v224_v32 = vand.u32 4294901760, %v223_v27  ;;  %181 = vmatpush.msra.mxu0 %v10364_v9  ;;  %v230_v33 = vand.u32 4294901760, %v229_v28  ;;  %v236_v35 = vand.u32 4294901760, %v235_v30  ;;  %v449_v2 = vand.u32 4294901760, %v422_v0 }
  0x25   :  { %219 = vmatpush.msra.mxu1 %v218_v29  ;;  %285 = vmatpush.msra.mxu2 %v233_v17  ;;  %v242_v37 = vand.u32 4294901760, %v241_v34  ;;  %v248_v38 = vand.u32 4294901760, %v247_v36  ;;  %v254_v44 = vand.u32 4294901760, %v253_v43  ;;  %v486_v4 = vand.u32 4294901760, %v485_v1 }
  0x26   :  { %324 = vmatpush.msra.mxu3 %v10368_v13  ;;  %183 = vmatpush.msra.mxu0 %v10368_v13  ;;  %v491_v5 = vsub.f32 %v422_v0, %v449_v2  ;;  %v9801_v0 = vld [vmem:[%s13077_s5] ss:$0 sm:$0xff]  ;;  %vm1642_vm8 = vcmask 130048  }
  0x27   :  { %225 = vmatpush.msra.mxu1 %v224_v32  ;;  %288 = vmatpush.msra.mxu2 %v239_v19 }
  0x28   :  { %326 = vmatpush.msra.mxu3 %v10371_v14  ;;  %185 = vmatpush.msra.mxu0 %v10371_v14 }
  0x29   :  { %231 = vmatpush.msra.mxu1 %v230_v33  ;;  %291 = vmatpush.msra.mxu2 %v245_v20 }
  0x2a   :  { %328 = vmatpush.msra.mxu3 %v186_v40  ;;  %187 = vmatpush.msra.mxu0 %v186_v40 }
  0x2b   :  { %237 = vmatpush.msra.mxu1 %v236_v35  ;;  %294 = vmatpush.msra.mxu2 %v251_v41 }
  0x2c   :  { %9780 = vmatpush.msrb.mxu3 %v10358_v3  ;;  %354 = vmatpush.msrb.mxu0 %v216_v18 }
  0x2d   :  { %243 = vmatpush.msra.mxu1 %v242_v37  ;;  %9773 = vmatpush.msrb.mxu2 %v216_v18 }
  0x2e   :  { %9781 = vmatpush.msrb.mxu3 %v10360_v7  ;;  %358 = vmatpush.msrb.mxu0 %v222_v22 }
  0x2f   :  { %249 = vmatpush.msra.mxu1 %v248_v38  ;;  %9774 = vmatpush.msrb.mxu2 %v222_v22 }
  0x30   :  { %9782 = vmatpush.msrb.mxu3 %v10362_v8  ;;  %362 = vmatpush.msrb.mxu0 %v228_v23 }
  0x31   :  { %9775 = vmatpush.msrb.mxu2 %v228_v23  ;;  %255 = vmatpush.msra.mxu1 %v254_v44 }
  0x32   :  { %9783 = vmatpush.msrb.mxu3 %v10364_v9  ;;  %366 = vmatpush.msrb.mxu0 %v234_v24 }
  0x33   :  { %398 = vmatpush.msrb.mxu1 %v10358_v3  ;;  %9776 = vmatpush.msrb.mxu2 %v234_v24  ;;  %v421_v3 = vld [vmem:[#allocation6 + $0x8] sm:$0xff] }
  0x34   :  { %9784 = vmatpush.msrb.mxu3 %v10368_v13  ;;  %370 = vmatpush.msrb.mxu0 %v240_v26  ;;  %v451_v6 = vand.u32 4294901760, %v421_v3 }
  0x35   :  { %400 = vmatpush.msrb.mxu1 %v10360_v7  ;;  %9777 = vmatpush.msrb.mxu2 %v240_v26  ;;  %v420_v7 = vld [vmem:[#allocation6] sm:$0xff] }
  0x36   :  { %9785 = vmatpush.msrb.mxu3 %v10371_v14  ;;  %374 = vmatpush.msrb.mxu0 %v246_v31  ;;  %v497_v10 = vsub.f32 %v421_v3, %v451_v6  ;;  %v453_v11 = vand.u32 4294901760, %v420_v7 }
  0x37   :  { %402 = vmatpush.msrb.mxu1 %v10362_v8  ;;  %9778 = vmatpush.msrb.mxu2 %v246_v31  ;;  %v487_v8 = vsub.f32 %v485_v1, %v486_v4 }
  0x38   :  { %9786 = vmatpush.msrb.mxu3 %v186_v40  ;;  %378 = vmatpush.msrb.mxu0 %v252_v42  ;;  %v503_v15 = vsub.f32 %v420_v7, %v453_v11 }
  0x39   :  { %404 = vmatpush.msrb.mxu1 %v10364_v9  ;;  %9779 = vmatpush.msrb.mxu2 %v252_v42  ;;  %v492_v9 = vand.u32 4294901760, %v491_v5  ;;  %v488_v12 = vand.u32 4294901760, %v487_v8 }
  0x3a   :  { %v504_v18 = vand.u32 4294901760, %v503_v15 }
  0x3b   :  { %406 = vmatpush.msrb.mxu1 %v10368_v13  ;;  %v493_v13 = vsub.f32 %v491_v5, %v492_v9 }
  0x3c   :  { %v505_v20 = vsub.f32 %v503_v15, %v504_v18 }
  0x3d   :  { %408 = vmatpush.msrb.mxu1 %v10371_v14  ;;  %v498_v14 = vand.u32 4294901760, %v497_v10  ;;  %v494_v16 = vand.u32 4294901760, %v493_v13 }
  0x3e   :  { %v506_v21 = vand.u32 4294901760, %v505_v20 }
  0x3f   :  { %410 = vmatpush.msrb.mxu1 %v186_v40  ;;  %v499_v17 = vsub.f32 %v497_v10, %v498_v14 }
  0x41   :  { %v500_v19 = vand.u32 4294901760, %v499_v17 }
  0x8e   :  { %v141_v47 = vpop.permute.xlu0 %140 }
  0x8f   :  { %vm145_vm1 = vcmp.eq.s32.totalorder %v10404_v46, %v141_v47 }
  0x90   :  { %v9739_v49 = vsel %vm145_vm1, 1.0, %v13085_v48 }
  0x91   :  { %9741 = vmatmul.msk.f32.vlgmr.msra.gmra.mxu1 %vm158_vm0, %v9739_v49  ;;  %v160_v50 = vsel %vm158_vm0, %v9739_v49, 0 }
  0x92   :  { %v189_v51 = vsub.f32 %v160_v50, %v160_v50  ;;  %565 = vmatpush.msra.mxu1 %v447_v63 }
  0x94   :  { %297 = vmatmul.f32.vlgmr.msra.gmra.mxu2 %v189_v51  ;;  %v190_v52 = vand.u32 4294901760, %v189_v51  ;;  %567 = vmatpush.msra.mxu1 %v449_v2 }
  0x95   :  { %448 = vmatpush.msra.mxu2 %v447_v63 }
  0x96   :  { %332 = vmatmul.f32.vlgmr.msra.gmra.mxu3 %v190_v52  ;;  %v144_v53 = vpop.permute.xlu0 %143  ;;  %v191_v54 = vsub.f32 %v189_v51, %v190_v52  ;;  %569 = vmatpush.msra.mxu1 %v451_v6 }
  0x97   :  { %vm146_vm2 = vcmp.eq.s32.totalorder %v10404_v46, %v144_v53  ;;  %450 = vmatpush.msra.mxu2 %v449_v2  ;;  %489 = vmatpush.msra.mxu3 %v488_v12 }
  0x98   :  { %v9740_v55 = vsel %vm146_vm2, 1.0, %v13085_v48  ;;  %v192_v56 = vand.u32 4294901760, %v191_v54  ;;  %571 = vmatpush.msra.mxu1 %v453_v11 }
  0x99   :  { %9742 = vmatmul.msk.f32.gmra.mxu1 %vm158_vm0, %v9740_v55  ;;  %v163_v57 = vsel %vm158_vm0, %v9740_v55, 0  ;;  %452 = vmatpush.msra.mxu2 %v451_v6 }
  0x9a   :  { %193 = vmatmul.f32.vlgmr.msra.gmra.mxu0 %v192_v56  ;;  %v197_v58 = vsub.f32 %v163_v57, %v163_v57  ;;  %495 = vmatpush.msra.mxu3 %v494_v16 }
  0x9b   :  { %531 = vmatpush.msra.mxu0 %v485_v1  ;;  %454 = vmatpush.msra.mxu2 %v453_v11 }
  0x9c   :  { %302 = vmatmul.f32.gmra.mxu2 %v197_v58  ;;  %v198_v59 = vand.u32 4294901760, %v197_v58  ;;  %501 = vmatpush.msra.mxu3 %v500_v19 }
  0x9d   :  { %534 = vmatpush.msra.mxu0 %v491_v5 }
  0x9e   :  { %338 = vmatmul.f32.gmra.mxu3 %v198_v59  ;;  %v199_v60 = vsub.f32 %v197_v58, %v198_v59 }
  0x9f   :  { %537 = vmatpush.msra.mxu0 %v497_v10  ;;  %507 = vmatpush.msra.mxu3 %v506_v21  ;;  %v653_v21 = vld [vmem:[#allocation4] sm:$0xff] }
  0xa0   :  { %v200_v61 = vand.u32 4294901760, %v199_v60 }
  0xa1   :  { %9745 = vmatmul.msk.f32.vlgmr.msrb.gmra.mxu1 %vm158_vm0, %v9739_v49  ;;  %540 = vmatpush.msra.mxu0 %v503_v15 }
  0xa2   :  { %201 = vmatmul.f32.gmra.mxu0 %v200_v61 }
  0xa4   :  { %9744 = vmatmul.msk.f32.vlgmr.msrb.gmra.mxu2 %vm158_vm0, %v9740_v55 }
  0xa5   :  { %600 = vmatpush.msrb.mxu2 %v486_v4 }
  0xa6   :  { %9746 = vmatmul.msk.f32.vlgmr.msrb.gmra.mxu3 %vm158_vm0, %v9740_v55 }
  0xa7   :  { %604 = vmatpush.msrb.mxu2 %v492_v9  ;;  %635 = vmatpush.msrb.mxu3 %v447_v63 }
  0xa9   :  { %608 = vmatpush.msrb.mxu2 %v498_v14  ;;  %637 = vmatpush.msrb.mxu3 %v449_v2 }
  0xaa   :  { %9743 = vmatmul.msk.f32.vlgmr.msrb.gmra.mxu0 %vm158_vm0, %v9739_v49 }
  0xab   :  { %612 = vmatpush.msrb.mxu2 %v504_v18  ;;  %639 = vmatpush.msrb.mxu3 %v451_v6 }
  0xad   :  { %641 = vmatpush.msrb.mxu3 %v453_v11 }
 0x10e   :  { %v258_v22 = vpop.f32.mrf.mxu1 }
 0x116   :  { %v262_v26 = vpop.f32.mrf.mxu1 }
 0x117   :  { %v194_v23 = vpop.f32.mrf.mxu0  ;;  %v298_v24 = vpop.f32.mrf.mxu2 }
 0x118   :  { %v259_v27 = vadd.f32 %v258_v22, %v194_v23 }
 0x119   :  { %v333_v25 = vpop.f32.mrf.mxu3 }
 0x11a   :  { %v299_v32 = vadd.f32 %v298_v24, %v259_v27 }
 0x11c   :  { %v334_v34 = vadd.f32 %v333_v25, %v299_v32  ;;  %v654_v25 = vld [vmem:[#allocation4 + $0x8] sm:$0xff] }
 0x11e   :  { %v413_v40 = vpop.f32.mrf.mxu1 }
 0x11f   :  { %v202_v28 = vpop.f32.mrf.mxu0  ;;  %v303_v29 = vpop.f32.mrf.mxu2 }
 0x120   :  { %v263_v30 = vadd.f32 %v262_v26, %v202_v28 }
 0x121   :  { %v339_v31 = vpop.f32.mrf.mxu3 }
 0x122   :  { %v304_v33 = vadd.f32 %v303_v29, %v263_v30 }
 0x124   :  { %v340_v35 = vadd.f32 %v339_v31, %v304_v33  ;;  %v655_v33 = vld [vmem:[#allocation4 + $0x10] sm:$0xff] }
 0x127   :  { %v381_v36 = vpop.f32.mrf.mxu0  ;;  %v385_v37 = vpop.f32.mrf.mxu2 }
 0x128   :  { %v382_v38 = vadd.f32 %v381_v36, %v334_v34  ;;  %v386_v39 = vadd.f32 %v385_v37, %v340_v35 }
 0x129   :  { %v417_v41 = vpop.f32.mrf.mxu3 }
 0x12a   :  { %v414_v42 = vadd.f32 %v413_v40, %v382_v38  ;;  %v418_v43 = vadd.f32 %v417_v41, %v386_v39 }
 0x12c   :  { %v430_v44 = vsel %vm428_vm3, %v414_v42, 0  ;;  %v433_v47 = vsel %vm428_vm3, %v418_v43, 0 }
 0x12d   :  { %v455_v49 = vand.u32 4294901760, %v430_v44  ;;  %v463_v50 = vand.u32 4294901760, %v433_v47 }
 0x12f   :  { %v456_v51 = vsub.f32 %v430_v44, %v455_v49  ;;  %509 = vmatmul.f32.vlgmr.msra.gmra.mxu3 %v455_v49  ;;  %v464_v53 = vsub.f32 %v433_v47, %v463_v50 }
 0x131   :  { %543 = vmatmul.f32.vlgmr.msra.gmra.mxu0 %v456_v51  ;;  %v457_v52 = vand.u32 4294901760, %v456_v51  ;;  %v465_v56 = vand.u32 4294901760, %v464_v53 }
 0x133   :  { %575 = vmatmul.f32.vlgmr.msra.gmra.mxu1 %v457_v52  ;;  %v458_v54 = vsub.f32 %v456_v51, %v457_v52  ;;  %v466_v57 = vsub.f32 %v464_v53, %v465_v56 }
 0x135   :  { %v459_v55 = vand.u32 4294901760, %v458_v54  ;;  %v467_v58 = vand.u32 4294901760, %v466_v57 }
 0x137   :  { %460 = vmatmul.f32.vlgmr.msra.gmra.mxu2 %v459_v55  ;;  %513 = vmatmul.f32.gmra.mxu3 %v463_v50 }
 0x139   :  { %548 = vmatmul.f32.gmra.mxu0 %v464_v53 }
 0x13b   :  { %581 = vmatmul.f32.gmra.mxu1 %v465_v56 }
 0x13f   :  { %468 = vmatmul.f32.gmra.mxu2 %v467_v58  ;;  %643 = vmatmul.f32.vlgmr.msrb.gmra.mxu3 %v455_v49 }
 0x147   :  { %614 = vmatmul.f32.vlgmr.msrb.gmra.mxu2 %v455_v49  ;;  %647 = vmatmul.f32.gmra.mxu3 %v463_v50 }
 0x14f   :  { %618 = vmatmul.f32.gmra.mxu2 %v463_v50  ;;  %v656_v50 = vld [vmem:[#allocation4 + $0x18] sm:$0xff] }
 0x1ae   :  { %v544_v62 = vpop.f32.mrf.mxu0 }
 0x1b0   :  { %v576_v2 = vpop.f32.mrf.mxu1 }
 0x1b2   :  { %v510_v59 = vpop.f32.mrf.mxu3 }
 0x1b6   :  { %v549_v7 = vpop.f32.mrf.mxu0 }
 0x1b8   :  { %v582_v10 = vpop.f32.mrf.mxu1 }
 0x1ba   :  { %v461_v60 = vpop.f32.mrf.mxu2  ;;  %v514_v61 = vpop.f32.mrf.mxu3 }
 0x1bb   :  { %v462_v6 = vadd.f32 %v9801_v0, %v461_v60 }
 0x1bd   :  { %v511_v9 = vadd.f32 %v510_v59, %v462_v6  ;;  %v658_v6 = vld [vmem:[#allocation4 + $0x28] sm:$0xff] }
 0x1bf   :  { %v545_v13 = vadd.f32 %v544_v62, %v511_v9  ;;  %v657_v62 = vld [vmem:[#allocation4 + $0x20] sm:$0xff] }
 0x1c1   :  { %v577_v17 = vadd.f32 %v576_v2, %v545_v13 }
 0x1c2   :  { %v469_v63 = vpop.f32.mrf.mxu2  ;;  %v644_v4 = vpop.f32.mrf.mxu3 }
 0x1c3   :  { %v470_v1 = vadd.f32 %v9801_v0, %v469_v63 }
 0x1c5   :  { %v515_v3 = vadd.f32 %v514_v61, %v470_v1 }
 0x1c7   :  { %v550_v8 = vadd.f32 %v549_v7, %v515_v3 }
 0x1c9   :  { %v583_v11 = vadd.f32 %v582_v10, %v550_v8 }
 0x1ca   :  { %v615_v5 = vpop.f32.mrf.mxu2  ;;  %v648_v15 = vpop.f32.mrf.mxu3 }
 0x1cb   :  { %v616_v18 = vadd.f32 %v615_v5, %v577_v17 }
 0x1cd   :  { %v10426_v19 = vadd.f32 %v644_v4, %v616_v18 }
 0x1cf   :  { %v10430_v20 = vmul.f32 0.5, %v10426_v19 }
 0x1d1   :  { %v669_v22 = vmul.f32 %v653_v21, %v10430_v20  ;;  %v671_v38 = vmul.f32 %v655_v33, %v10430_v20  ;;  %v673_v2 = vmul.f32 %v657_v62, %v10430_v20 }
 0x1d2   :  { %v619_v12 = vpop.f32.mrf.mxu2 }
 0x1d3   :  { %v620_v14 = vadd.f32 %v619_v12, %v583_v11  ;;  %v948_v24 = vsel %vm428_vm3, %v669_v22, 0  ;;  %v954_v49 = vsel %vm428_vm3, %v671_v38, 0  ;;  %v960_v5 = vsel %vm428_vm3, %v673_v2, 0 }
 0x1d4   :  { %v10437_v26 = vand.u32 4294901760, %v948_v24  ;;  %v10449_v54 = vand.u32 4294901760, %v954_v49  ;;  %v10460_v9 = vand.u32 4294901760, %v960_v5 }
 0x1d5   :  { %v10423_v16 = vadd.f32 %v648_v15, %v620_v14  ;;  %v659_v14 = vld [vmem:[#allocation4 + $0x30] sm:$0xff] }
 0x1d6   :  { %v1018_v30 = vsub.f32 %v948_v24, %v10437_v26  ;;  %v1034_v59 = vsub.f32 %v954_v49, %v10449_v54  ;;  %v1050_v12 = vsub.f32 %v960_v5, %v10460_v9  ;;  %v675_v21 = vmul.f32 %v659_v14, %v10430_v20 }
 0x1d7   :  { %945 = vrot.lane.b32.xlu1 %v10423_v16, %s10251_s16  ;;  %v10434_v23 = vmul.f32 0.5, %v10423_v16 }
 0x1d8   :  { %v1019_v35 = vand.u32 4294901760, %v1018_v30  ;;  %v1035_v0 = vand.u32 4294901760, %v1034_v59  ;;  %v1051_v17 = vand.u32 4294901760, %v1050_v12 }
 0x1d9   :  { %v670_v27 = vmul.f32 %v654_v25, %v10434_v23  ;;  %v672_v56 = vmul.f32 %v656_v50, %v10434_v23  ;;  %v674_v10 = vmul.f32 %v658_v6, %v10434_v23  ;;  %v966_v25 = vsel %vm428_vm3, %v675_v21, 0 }
 0x1da   :  { %v1020_v42 = vsub.f32 %v1018_v30, %v1019_v35  ;;  %v1036_v3 = vsub.f32 %v1034_v59, %v1035_v0  ;;  %v1052_v22 = vsub.f32 %v1050_v12, %v1051_v17 }
 0x1db   :  { %v951_v32 = vsel %vm428_vm3, %v670_v27, 0  ;;  %v957_v61 = vsel %vm428_vm3, %v672_v56, 0  ;;  %v963_v13 = vsel %vm428_vm3, %v674_v10, 0  ;;  %v660_v27 = vld [vmem:[#allocation4 + $0x38] sm:$0xff]  ;;  %v663_v56 = vld [vmem:[#allocation4 + $0x50] sm:$0xff]  ;;  %v665_v10 = vld [vmem:[#allocation4 + $0x60] sm:$0xff] }
 0x1dc   :  { %v10443_v36 = vand.u32 4294901760, %v951_v32  ;;  %v1021_v52 = vand.u32 4294901760, %v1020_v42  ;;  %v10454_v1 = vand.u32 4294901760, %v957_v61  ;;  %v1037_v7 = vand.u32 4294901760, %v1036_v3 }
 0x1dd   :  { %v10466_v18 = vand.u32 4294901760, %v963_v13  ;;  %v681_v14 = vmul.f32 %v665_v10, %v10430_v20 }
 0x1de   :  { %v1026_v43 = vsub.f32 %v951_v32, %v10443_v36  ;;  %v1042_v4 = vsub.f32 %v957_v61, %v10454_v1 }
 0x1df   :  { %943 = vrot.lane.b32.xlu1 %v10426_v19, %s10251_s16  ;;  %v1058_v24 = vsub.f32 %v963_v13, %v10466_v18  ;;  %v984_v21 = vsel %vm428_vm3, %v681_v14, 0 }
 0x1e0   :  { %v1027_v53 = vand.u32 4294901760, %v1026_v43  ;;  %v1043_v8 = vand.u32 4294901760, %v1042_v4 }
 0x1e2   :  { %v1028_v58 = vsub.f32 %v1026_v43, %v1027_v53  ;;  %v1044_v11 = vsub.f32 %v1042_v4, %v1043_v8 }
 0x1e4   :  { %v1029_v63 = vand.u32 4294901760, %v1028_v58  ;;  %v1045_v15 = vand.u32 4294901760, %v1044_v11 }
 0x249   :  { %v946_v28 = vpop.permute.xlu1 %945 }
 0x24a   :  { %v997_v29 = vsel %vm428_vm3, %v946_v28, 0  ;;  %v1053_v28 = vand.u32 4294901760, %v1052_v22  ;;  %v666_v22 = vld [vmem:[#allocation4 + $0x68] sm:$0xff] }
 0x24b   :  { %v1013_v31 = vand.u32 4294901760, %v997_v29 }
 0x24d   :  { %v1161_v34 = vsub.f32 %v997_v29, %v1013_v31  ;;  %1014 = vmatpush.xpose.msrb.mxu0 %v1013_v31  ;;  %1353 = vmatpush.xpose.msra.mxu3 %v1013_v31  ;;  %v1059_v29 = vand.u32 4294901760, %v1058_v24 }
 0x24f   :  { %v1162_v37 = vand.u32 4294901760, %v1161_v34  ;;  %1253 = vmatpush.xpose.msra.mxu2 %v1161_v34  ;;  %v1060_v32 = vsub.f32 %v1058_v24, %v1059_v29 }
 0x251   :  { %v1163_v39 = vsub.f32 %v1161_v34, %v1162_v37  ;;  %v944_v40 = vpop.permute.xlu1 %943 }
 0x252   :  { %v995_v41 = vsel %vm428_vm3, %v944_v40, 0 }
 0x253   :  { %v1164_v44 = vand.u32 4294901760, %v1163_v39  ;;  %v1015_v47 = vand.u32 4294901760, %v995_v41 }
 0x255   :  { %v1167_v51 = vsub.f32 %v995_v41, %v1015_v47  ;;  %1016 = vmatpush.xpose.msrb.mxu0 %v1015_v47  ;;  %1165 = vmatpush.xpose.msrb.mxu1 %v1164_v44  ;;  %v662_v44 = vld [vmem:[#allocation4 + $0x48] sm:$0xff] }
 0x256   :  { %1355 = vmatpush.xpose.msra.mxu3 %v1015_v47 }
 0x257   :  { %1256 = vmatpush.xpose.msra.mxu2 %v1167_v51  ;;  %v1168_v55 = vand.u32 4294901760, %v1167_v51 }
 0x258   :  { %1022 = vmatmul.f32.vlgmr.msrb.gmra.mxu0 %v1021_v52 }
 0x259   :  { %1470 = vmatpush.xpose.msra.mxu0 %v1162_v37  ;;  %1359 = vmatmul.f32.vlgmr.msra.gmra.mxu3 %v1019_v35  ;;  %v1169_v57 = vsub.f32 %v1167_v51, %v1168_v55  ;;  %v661_v35 = vld [vmem:[#allocation4 + $0x40] sm:$0xff]  ;;  %v1061_v37 = vand.u32 4294901760, %v1060_v32  ;;  %v678_v51 = vmul.f32 %v662_v44, %v10434_v23 }
 0x25a   :  { %1259 = vmatmul.f32.vlgmr.msra.gmra.mxu2 %v1018_v30  ;;  %v10472_v30 = vand.u32 4294901760, %v966_v25  ;;  %v677_v40 = vmul.f32 %v661_v35, %v10430_v20 }
 0x25b   :  { %v1170_v60 = vand.u32 4294901760, %v1169_v57 }
 0x25c   :  { %v1066_v33 = vsub.f32 %v966_v25, %v10472_v30 }
 0x25d   :  { %1474 = vmatpush.xpose.msra.mxu0 %v1168_v55  ;;  %1171 = vmatpush.xpose.msrb.mxu1 %v1170_v60  ;;  %v975_v55 = vsel %vm428_vm3, %v678_v51, 0  ;;  %v679_v60 = vmul.f32 %v663_v56, %v10430_v20 }
 0x25e   :  { %v1067_v38 = vand.u32 4294901760, %v1066_v33 }
 0x260   :  { %1030 = vmatmul.f32.gmra.mxu0 %v1029_v63  ;;  %1173 = vmatmul.f32.vlgmr.msrb.gmra.mxu1 %v10437_v26  ;;  %v1068_v41 = vsub.f32 %v1066_v33, %v1067_v38  ;;  %v978_v63 = vsel %vm428_vm3, %v679_v60, 0 }
 0x261   :  { %1555 = vmatpush.xpose.msra.mxu1 %v1013_v31  ;;  %1365 = vmatmul.f32.gmra.mxu3 %v1027_v53  ;;  %v676_v31 = vmul.f32 %v660_v27, %v10434_v23  ;;  %v10508_v27 = vand.u32 4294901760, %v984_v21 }
 0x262   :  { %1264 = vmatmul.f32.gmra.mxu2 %v1026_v43  ;;  %v972_v43 = vsel %vm428_vm3, %v677_v40, 0 }
 0x263   :  { %v969_v34 = vsel %vm428_vm3, %v676_v31, 0  ;;  %v10484_v50 = vand.u32 4294901760, %v972_v43  ;;  %v1114_v31 = vsub.f32 %v984_v21, %v10508_v27 }
 0x264   :  { %v10478_v39 = vand.u32 4294901760, %v969_v34 }
 0x265   :  { %1557 = vmatpush.xpose.msra.mxu1 %v1015_v47  ;;  %v1069_v47 = vand.u32 4294901760, %v1068_v41  ;;  %v1082_v53 = vsub.f32 %v972_v43, %v10484_v50  ;;  %v1115_v35 = vand.u32 4294901760, %v1114_v31  ;;  %v668_v43 = vld [vmem:[#allocation4 + $0x78] sm:$0xff] }
 0x266   :  { %v1074_v42 = vsub.f32 %v969_v34, %v10478_v39  ;;  %v684_v51 = vmul.f32 %v668_v43, %v10434_v23  ;;  %v938_v43 = vld [vmem:[%s13073_s1] sm:$0x1]  ;;  %s10252_s1 = smov 64  }
 0x267   :  { %v1083_v58 = vand.u32 4294901760, %v1082_v53  ;;  %v1116_v40 = vsub.f32 %v1114_v31, %v1115_v35  ;;  %vm939_vm6 = vcmp.gt.s32.totalorder %v938_v43, 0 }
 0x268   :  { %1038 = vmatmul.f32.gmra.mxu0 %v1037_v7  ;;  %1177 = vmatmul.f32.gmra.mxu1 %v10443_v36  ;;  %v1075_v49 = vand.u32 4294901760, %v1074_v42 }
 0x269   :  { %1371 = vmatmul.f32.gmra.mxu3 %v1035_v0  ;;  %v1084_v61 = vsub.f32 %v1082_v53, %v1083_v58  ;;  %v664_v0 = vld [vmem:[#allocation4 + $0x58] sm:$0xff]  ;;  %v1117_v44 = vand.u32 4294901760, %v1116_v40 }
 0x26a   :  { %1269 = vmatmul.f32.gmra.mxu2 %v1034_v59  ;;  %v1076_v52 = vsub.f32 %v1074_v42, %v1075_v49  ;;  %v10490_v59 = vand.u32 4294901760, %v975_v55  ;;  %v680_v5 = vmul.f32 %v664_v0, %v10434_v23 }
 0x26b   :  { %v1085_v2 = vand.u32 4294901760, %v1084_v61 }
 0x26c   :  { %v1077_v57 = vand.u32 4294901760, %v1076_v52  ;;  %v1090_v62 = vsub.f32 %v975_v55, %v10490_v59 }
 0x26e   :  { %v1091_v3 = vand.u32 4294901760, %v1090_v62 }
 0x270   :  { %1046 = vmatmul.f32.gmra.mxu0 %v1045_v15  ;;  %1181 = vmatmul.f32.gmra.mxu1 %v10449_v54  ;;  %v1092_v6 = vsub.f32 %v1090_v62, %v1091_v3 }
 0x271   :  { %1377 = vmatmul.f32.gmra.mxu3 %v1043_v8  ;;  %v981_v8 = vsel %vm428_vm3, %v680_v5, 0 }
 0x272   :  { %1274 = vmatmul.f32.gmra.mxu2 %v1042_v4  ;;  %v10496_v4 = vand.u32 4294901760, %v978_v63  ;;  %v1093_v11 = vand.u32 4294901760, %v1092_v6  ;;  %v10502_v13 = vand.u32 4294901760, %v981_v8 }
 0x274   :  { %v1098_v7 = vsub.f32 %v978_v63, %v10496_v4 }
 0x278   :  { %1054 = vmatmul.f32.gmra.mxu0 %v1053_v28  ;;  %1185 = vmatmul.f32.gmra.mxu1 %v10454_v1  ;;  %v682_v28 = vmul.f32 %v666_v22, %v10434_v23 }
 0x279   :  { %1383 = vmatmul.f32.gmra.mxu3 %v1051_v17  ;;  %v1106_v17 = vsub.f32 %v981_v8, %v10502_v13 }
 0x27a   :  { %1279 = vmatmul.f32.gmra.mxu2 %v1050_v12  ;;  %v1099_v12 = vand.u32 4294901760, %v1098_v7  ;;  %v987_v32 = vsel %vm428_vm3, %v682_v28, 0 }
 0x27b   :  { %v1107_v25 = vand.u32 4294901760, %v1106_v17 }
 0x27c   :  { %v1100_v15 = vsub.f32 %v1098_v7, %v1099_v12 }
 0x280   :  { %1062 = vmatmul.f32.gmra.mxu0 %v1061_v37  ;;  %1189 = vmatmul.f32.gmra.mxu1 %v10460_v9  ;;  %v10514_v37 = vand.u32 4294901760, %v987_v32 }
 0x281   :  { %1389 = vmatmul.f32.gmra.mxu3 %v1059_v29  ;;  %v1108_v29 = vsub.f32 %v1106_v17, %v1107_v25 }
 0x282   :  { %1284 = vmatmul.f32.gmra.mxu2 %v1058_v24  ;;  %v1101_v24 = vand.u32 4294901760, %v1100_v15  ;;  %v1122_v41 = vsub.f32 %v987_v32, %v10514_v37  ;;  %v10622_v32 = vand.u32 1, %v10404_v46 }
 0x283   :  { %v1109_v34 = vand.u32 4294901760, %v1108_v29 }
 0x288   :  { %1070 = vmatmul.f32.gmra.mxu0 %v1069_v47  ;;  %1193 = vmatmul.f32.gmra.mxu1 %v10466_v18  ;;  %v1123_v47 = vand.u32 4294901760, %v1122_v41 }
 0x289   :  { %1395 = vmatmul.f32.gmra.mxu3 %v1067_v38 }
 0x28a   :  { %1289 = vmatmul.f32.gmra.mxu2 %v1066_v33  ;;  %v667_v33 = vld [vmem:[#allocation4 + $0x70] sm:$0xff] }
 0x28b   :  { %v683_v38 = vmul.f32 %v667_v33, %v10430_v20  ;;  %v1124_v20 = vsub.f32 %v1122_v41, %v1123_v47 }
 0x28d   :  { %v1125_v55 = vand.u32 4294901760, %v1124_v20 }
 0x290   :  { %1078 = vmatmul.f32.gmra.mxu0 %v1077_v57  ;;  %1197 = vmatmul.f32.gmra.mxu1 %v10472_v30 }
 0x291   :  { %1401 = vmatmul.f32.gmra.mxu3 %v1075_v49 }
 0x292   :  { %1294 = vmatmul.f32.gmra.mxu2 %v1074_v42  ;;  %v990_v42 = vsel %vm428_vm3, %v683_v38, 0 }
 0x293   :  { %v10520_v49 = vand.u32 4294901760, %v990_v42 }
 0x295   :  { %v1130_v52 = vsub.f32 %v990_v42, %v10520_v49 }
 0x297   :  { %v1131_v56 = vand.u32 4294901760, %v1130_v52 }
 0x298   :  { %1086 = vmatmul.f32.gmra.mxu0 %v1085_v2  ;;  %1201 = vmatmul.f32.gmra.mxu1 %v10478_v39 }
 0x299   :  { %1407 = vmatmul.f32.gmra.mxu3 %v1083_v58  ;;  %v1132_v23 = vsub.f32 %v1130_v52, %v1131_v56 }
 0x29a   :  { %1299 = vmatmul.f32.gmra.mxu2 %v1082_v53  ;;  %v993_v53 = vsel %vm428_vm3, %v684_v51, 0 }
 0x29b   :  { %v10526_v57 = vand.u32 4294901760, %v993_v53  ;;  %v1133_v60 = vand.u32 4294901760, %v1132_v23 }
 0x29d   :  { %v1138_v58 = vsub.f32 %v993_v53, %v10526_v57 }
 0x29f   :  { %v1139_v61 = vand.u32 4294901760, %v1138_v58 }
 0x2a0   :  { %1094 = vmatmul.f32.gmra.mxu0 %v1093_v11  ;;  %1205 = vmatmul.f32.gmra.mxu1 %v10484_v50 }
 0x2a1   :  { %1413 = vmatmul.f32.gmra.mxu3 %v1091_v3 }
 0x2a2   :  { %1304 = vmatmul.f32.gmra.mxu2 %v1090_v62  ;;  %v1140_v62 = vsub.f32 %v1138_v58, %v1139_v61 }
 0x2a4   :  { %v1141_v63 = vand.u32 4294901760, %v1140_v62 }
 0x2a8   :  { %1102 = vmatmul.f32.gmra.mxu0 %v1101_v24  ;;  %1209 = vmatmul.f32.gmra.mxu1 %v10490_v59 }
 0x2a9   :  { %1419 = vmatmul.f32.gmra.mxu3 %v1099_v12 }
 0x2aa   :  { %1309 = vmatmul.f32.gmra.mxu2 %v1098_v7 }
 0x2b0   :  { %1110 = vmatmul.f32.gmra.mxu0 %v1109_v34  ;;  %1213 = vmatmul.f32.gmra.mxu1 %v10496_v4 }
 0x2b1   :  { %1425 = vmatmul.f32.gmra.mxu3 %v1107_v25 }
 0x2b2   :  { %1314 = vmatmul.f32.gmra.mxu2 %v1106_v17 }
 0x2b8   :  { %1118 = vmatmul.f32.gmra.mxu0 %v1117_v44  ;;  %1217 = vmatmul.f32.gmra.mxu1 %v10502_v13 }
 0x2b9   :  { %1431 = vmatmul.f32.gmra.mxu3 %v1115_v35 }
 0x2ba   :  { %1319 = vmatmul.f32.gmra.mxu2 %v1114_v31 }
 0x2c0   :  { %1126 = vmatmul.f32.gmra.mxu0 %v1125_v55  ;;  %1221 = vmatmul.f32.gmra.mxu1 %v10508_v27  ;;  %v940_v55 = vsel %vm939_vm6, -1e+30, %v13085_v48 }
 0x2c1   :  { %1437 = vmatmul.f32.gmra.mxu3 %v1123_v47  ;;  %v10652_v62 = vperm.slane %v940_v55, 0 }
 0x2c2   :  { %1324 = vmatmul.f32.gmra.mxu2 %v1122_v41 }
 0x2c8   :  { %1134 = vmatmul.f32.gmra.mxu0 %v1133_v60  ;;  %1225 = vmatmul.f32.gmra.mxu1 %v10514_v37 }
 0x2c9   :  { %1443 = vmatmul.f32.gmra.mxu3 %v1131_v56 }
 0x2ca   :  { %1329 = vmatmul.f32.gmra.mxu2 %v1130_v52 }
 0x2d0   :  { %1142 = vmatmul.f32.gmra.mxu0 %v1141_v63  ;;  %1229 = vmatmul.f32.gmra.mxu1 %v10520_v49 }
 0x2d1   :  { %1449 = vmatmul.f32.gmra.mxu3 %v1139_v61 }
 0x2d2   :  { %1334 = vmatmul.f32.gmra.mxu2 %v1138_v58 }
 0x2d5   :  { %v10532_v0 = vpop.f32.mrf.mxu0 }
 0x2d8   :  { %1233 = vmatmul.f32.gmra.mxu1 %v10526_v57  ;;  %1476 = vmatmul.f32.vlgmr.msra.gmra.mxu0 %v10437_v26 }
 0x2dc   :  { %v1360_v33 = vpop.f32.mrf.mxu3 }
 0x2dd   :  { %v10536_v2 = vpop.f32.mrf.mxu0  ;;  %v10538_v3 = vpop.f32.mrf.mxu1 }
 0x2e0   :  { %1480 = vmatmul.f32.gmra.mxu0 %v10443_v36  ;;  %1559 = vmatmul.f32.vlgmr.msra.gmra.mxu1 %v10437_v26 }
 0x2e4   :  { %v1366_v41 = vpop.f32.mrf.mxu3 }
 0x2e5   :  { %v10542_v5 = vpop.f32.mrf.mxu0  ;;  %v10544_v6 = vpop.f32.mrf.mxu1 }
 0x2e8   :  { %1484 = vmatmul.f32.gmra.mxu0 %v10449_v54  ;;  %1563 = vmatmul.f32.gmra.mxu1 %v10443_v36 }
 0x2ec   :  { %v1372_v23 = vpop.f32.mrf.mxu3 }
 0x2ed   :  { %v10548_v7 = vpop.f32.mrf.mxu0  ;;  %v10550_v8 = vpop.f32.mrf.mxu1 }
 0x2f0   :  { %1488 = vmatmul.f32.gmra.mxu0 %v10454_v1  ;;  %1567 = vmatmul.f32.gmra.mxu1 %v10449_v54 }
 0x2f5   :  { %v10554_v10 = vpop.f32.mrf.mxu0  ;;  %v10556_v11 = vpop.f32.mrf.mxu1 }
 0x2f8   :  { %1492 = vmatmul.f32.gmra.mxu0 %v10460_v9  ;;  %1571 = vmatmul.f32.gmra.mxu1 %v10454_v1 }
 0x2fd   :  { %v10560_v26 = vpop.f32.mrf.mxu0  ;;  %v10562_v12 = vpop.f32.mrf.mxu1 }
 0x300   :  { %1496 = vmatmul.f32.gmra.mxu0 %v10466_v18  ;;  %1575 = vmatmul.f32.gmra.mxu1 %v10460_v9 }
 0x305   :  { %v10566_v36 = vpop.f32.mrf.mxu0  ;;  %v10568_v14 = vpop.f32.mrf.mxu1 }
 0x308   :  { %1500 = vmatmul.f32.gmra.mxu0 %v10472_v30  ;;  %1579 = vmatmul.f32.gmra.mxu1 %v10466_v18 }
 0x30d   :  { %v10572_v54 = vpop.f32.mrf.mxu0  ;;  %v10574_v15 = vpop.f32.mrf.mxu1 }
 0x310   :  { %1504 = vmatmul.f32.gmra.mxu0 %v10478_v39  ;;  %1583 = vmatmul.f32.gmra.mxu1 %v10472_v30 }
 0x315   :  { %v10578_v1 = vpop.f32.mrf.mxu0  ;;  %v10580_v17 = vpop.f32.mrf.mxu1 }
 0x318   :  { %1508 = vmatmul.f32.gmra.mxu0 %v10484_v50  ;;  %1587 = vmatmul.f32.gmra.mxu1 %v10478_v39 }
 0x31d   :  { %v10584_v9 = vpop.f32.mrf.mxu0  ;;  %v10586_v21 = vpop.f32.mrf.mxu1 }
 0x320   :  { %1512 = vmatmul.f32.gmra.mxu0 %v10490_v59  ;;  %1591 = vmatmul.f32.gmra.mxu1 %v10484_v50 }
 0x325   :  { %v10590_v18 = vpop.f32.mrf.mxu0  ;;  %v10592_v22 = vpop.f32.mrf.mxu1 }
 0x328   :  { %1516 = vmatmul.f32.gmra.mxu0 %v10496_v4  ;;  %1595 = vmatmul.f32.gmra.mxu1 %v10490_v59  ;;  %v10615_v59 = vshrl.u32 %v137_v45, 7 }
 0x32a   :  { %v687_v45 = vadd.s32 8, %v10615_v59  ;;  %v688_v42 = vadd.s32 16, %v10615_v59  ;;  %v689_v58 = vadd.s32 24, %v10615_v59 }
 0x32c   :  { %v713_v46 = vand.u32 1, %v687_v45  ;;  %v720_v52 = vand.u32 1, %v688_v42 }
 0x32d   :  { %v10596_v30 = vpop.f32.mrf.mxu0  ;;  %v10598_v24 = vpop.f32.mrf.mxu1 }
 0x32e   :  { %vm907_vm5 = vcmp.ne.s32.totalorder %v713_v46, %v10622_v32  ;;  %vm908_vm7 = vcmp.ne.s32.totalorder %v720_v52, %v10622_v32 }
 0x32f   :  { %v923_v44 = vsel %vm907_vm5, -1e+30, %v13085_v48  ;;  %v924_v63 = vsel %vm908_vm7, -1e+30, %v13085_v48 }
 0x330   :  { %1520 = vmatmul.f32.gmra.mxu0 %v10502_v13  ;;  %1599 = vmatmul.f32.gmra.mxu1 %v10496_v4  ;;  %v1260_v4 = vpop.f32.mrf.mxu2 }
 0x335   :  { %v10602_v39 = vpop.f32.mrf.mxu0  ;;  %v10604_v25 = vpop.f32.mrf.mxu1 }
 0x338   :  { %1524 = vmatmul.f32.gmra.mxu0 %v10508_v27  ;;  %1603 = vmatmul.f32.gmra.mxu1 %v10502_v13  ;;  %v706_v13 = vand.u32 1, %v10615_v59 }
 0x33a   :  { %vm906_vm4 = vcmp.ne.s32.totalorder %v706_v13, %v10622_v32  ;;  %v1040_v13 = vadd.f32 %v10542_v5, %v924_v63 }
 0x33b   :  { %v922_v34 = vsel %vm906_vm4, -1e+30, %v13085_v48 }
 0x33c   :  { %v1024_v40 = vadd.f32 %v10532_v0, %v922_v34  ;;  %v690_v34 = vadd.s32 32, %v10615_v59 }
 0x33d   :  { %v10608_v50 = vpop.f32.mrf.mxu0  ;;  %v10610_v28 = vpop.f32.mrf.mxu1 }
 0x33e   :  { %v734_v5 = vand.u32 1, %v690_v34 }
 0x340   :  { %1528 = vmatmul.f32.gmra.mxu0 %v10514_v37  ;;  %1607 = vmatmul.f32.gmra.mxu1 %v10508_v27  ;;  %v1265_v27 = vpop.f32.mrf.mxu2  ;;  %vm910_vm10 = vcmp.ne.s32.totalorder %v734_v5, %v10622_v32 }
 0x345   :  { %v10617_v29 = vpop.f32.mrf.mxu0  ;;  %v10619_v31 = vpop.f32.mrf.mxu1 }
 0x348   :  { %1532 = vmatmul.f32.gmra.mxu0 %v10520_v49  ;;  %1611 = vmatmul.f32.gmra.mxu1 %v10514_v37  ;;  %v1175_v37 = vadd.f32 %v10538_v3, %v1024_v40  ;;  %v1270_v53 = vpop.f32.mrf.mxu2 }
 0x34a   :  { %v1261_v20 = vadd.f32 %v1260_v4, %v1175_v37  ;;  %v727_v4 = vand.u32 1, %v689_v58 }
 0x34c   :  { %v1361_v60 = vadd.f32 %v1360_v33, %v1261_v20  ;;  %vm909_vm9 = vcmp.ne.s32.totalorder %v727_v4, %v10622_v32  ;;  %v1183_v33 = vadd.f32 %v10550_v8, %v1040_v13 }
 0x34d   :  { %v10630_v35 = vpop.f32.mrf.mxu0  ;;  %v10632_v38 = vpop.f32.mrf.mxu1  ;;  %v925_v42 = vsel %vm909_vm9, -1e+30, %v13085_v48 }
 0x34e   :  { %v1048_v52 = vadd.f32 %v10548_v7, %v925_v42 }
 0x350   :  { %1536 = vmatmul.f32.gmra.mxu0 %v10526_v57  ;;  %1615 = vmatmul.f32.gmra.mxu1 %v10520_v49  ;;  %v1032_v49 = vadd.f32 %v10536_v2, %v923_v44  ;;  %v1275_v45 = vpop.f32.mrf.mxu2  ;;  %v1187_v8 = vadd.f32 %v10556_v11, %v1048_v52 }
 0x352   :  { %v1179_v56 = vadd.f32 %v10544_v6, %v1032_v49  ;;  %v1276_v63 = vadd.f32 %v1275_v45, %v1187_v8 }
 0x354   :  { %v1266_v2 = vadd.f32 %v1265_v27, %v1179_v56  ;;  %v1378_v27 = vpop.f32.mrf.mxu3 }
 0x355   :  { %v10644_v47 = vpop.f32.mrf.mxu1  ;;  %v1477_v51 = vpop.f32.mrf.mxu0  ;;  %v1379_v13 = vadd.f32 %v1378_v27, %v1276_v63  ;;  %v693_v27 = vadd.s32 56, %v10615_v59 }
 0x356   :  { %v1478_v61 = vadd.f32 %v1477_v51, %v1361_v60  ;;  %v1367_v46 = vadd.f32 %v1366_v41, %v1266_v2  ;;  %v1271_v51 = vadd.f32 %v1270_v53, %v1183_v33  ;;  %v691_v41 = vadd.s32 40, %v10615_v59 }
 0x357   :  { %v926_v53 = vsel %vm910_vm10, -1e+30, %v13085_v48 }
 0x358   :  { %1619 = vmatmul.f32.gmra.mxu1 %v10526_v57  ;;  %v1280_v55 = vpop.f32.mrf.mxu2  ;;  %v1373_v56 = vadd.f32 %v1372_v23, %v1271_v51  ;;  %v1056_v4 = vadd.f32 %v10554_v10, %v926_v53  ;;  %v692_v23 = vadd.s32 48, %v10615_v59 }
 0x35d   :  { %v1481_v0 = vpop.f32.mrf.mxu0  ;;  %v1560_v3 = vpop.f32.mrf.mxu1 }
 0x35e   :  { %v1561_v57 = vadd.f32 %v1560_v3, %v1478_v61  ;;  %v1482_v37 = vadd.f32 %v1481_v0, %v1367_v46  ;;  %v1384_v0 = vpop.f32.mrf.mxu3  ;;  %v741_v3 = vand.u32 1, %v691_v41 }
 0x360   :  { %v10657_v6 = vadd.f32 %v10652_v62, %v1561_v57  ;;  %vm911_vm11 = vcmp.ne.s32.totalorder %v741_v3, %v10622_v32  ;;  %v1191_v57 = vadd.f32 %v10562_v12, %v1056_v4  ;;  %v1285_v45 = vpop.f32.mrf.mxu2 }
 0x361   :  { %v927_v46 = vsel %vm911_vm11, -1e+30, %v13085_v48 }
 0x362   :  { %v1643_v40 = vsel %vm1642_vm8, %v10657_v6, -inf  ;;  %v1281_v42 = vadd.f32 %v1280_v55, %v1191_v57 }
 0x363   :  { %1644 = vmax.xlane.f32.xlu2 %v1643_v40  ;;  %v748_v40 = vand.u32 1, %v692_v23 }
 0x365   :  { %v1485_v43 = vpop.f32.mrf.mxu0  ;;  %v1564_v44 = vpop.f32.mrf.mxu1  ;;  %vm912_vm12 = vcmp.ne.s32.totalorder %v748_v40, %v10622_v32 }
 0x366   :  { %v1565_v20 = vadd.f32 %v1564_v44, %v1482_v37  ;;  %v1486_v60 = vadd.f32 %v1485_v43, %v1373_v56  ;;  %v1064_v43 = vadd.f32 %v10560_v26, %v927_v46  ;;  %v1390_v44 = vpop.f32.mrf.mxu3  ;;  %v928_v41 = vsel %vm912_vm12, -1e+30, %v13085_v48 }
 0x368   :  { %v10667_v49 = vadd.f32 %v10652_v62, %v1565_v20  ;;  %v1195_v12 = vadd.f32 %v10568_v14, %v1064_v43  ;;  %v1385_v20 = vadd.f32 %v1384_v0, %v1281_v42  ;;  %v1290_v53 = vpop.f32.mrf.mxu2 }
 0x36a   :  { %v1646_v58 = vsel %vm1642_vm8, %v10667_v49, -inf  ;;  %v1286_v56 = vadd.f32 %v1285_v45, %v1195_v12 }
 0x36b   :  { %1647 = vmax.xlane.f32.xlu2 %v1646_v58  ;;  %v755_v58 = vand.u32 1, %v693_v27 }
 0x36c   :  { %v1391_v3 = vadd.f32 %v1390_v44, %v1286_v56 }
 0x36d   :  { %v1489_v61 = vpop.f32.mrf.mxu0  ;;  %v1568_v7 = vpop.f32.mrf.mxu1  ;;  %vm913_vm13 = vcmp.ne.s32.totalorder %v755_v58, %v10622_v32 }
 0x36e   :  { %v1569_v2 = vadd.f32 %v1568_v7, %v1486_v60  ;;  %v1490_v33 = vadd.f32 %v1489_v61, %v1379_v13  ;;  %v1072_v61 = vadd.f32 %v10566_v36, %v928_v41  ;;  %v694_v7 = vadd.s32 64, %v10615_v59  ;;  %v1396_v63 = vpop.f32.mrf.mxu3 }
 0x36f   :  { %v929_v23 = vsel %vm913_vm13, -1e+30, %v13085_v48 }
 0x370   :  { %v10677_v11 = vadd.f32 %v10652_v62, %v1569_v2  ;;  %v1199_v0 = vadd.f32 %v10574_v15, %v1072_v61  ;;  %v762_v57 = vand.u32 1, %v694_v7  ;;  %v1295_v15 = vpop.f32.mrf.mxu2 }
 0x372   :  { %v1649_v34 = vsel %vm1642_vm8, %v10677_v11, -inf  ;;  %vm914_vm14 = vcmp.ne.s32.totalorder %v762_v57, %v10622_v32 }
 0x373   :  { %1650 = vmax.xlane.f32.xlu0 %v1649_v34  ;;  %v1291_v34 = vadd.f32 %v1290_v53, %v1199_v0  ;;  %v930_v44 = vsel %vm914_vm14, -1e+30, %v13085_v48 }
 0x375   :  { %v1493_v10 = vpop.f32.mrf.mxu0  ;;  %v1572_v37 = vpop.f32.mrf.mxu1 }
 0x376   :  { %v1573_v5 = vadd.f32 %v1572_v37, %v1490_v33  ;;  %v1494_v8 = vadd.f32 %v1493_v10, %v1385_v20  ;;  %v1080_v33 = vadd.f32 %v10572_v54, %v929_v23  ;;  %v695_v10 = vadd.s32 72, %v10615_v59 }
 0x377   :  { %v1397_v37 = vadd.f32 %v1396_v63, %v1291_v34 }
 0x378   :  { %v10687_v51 = vadd.f32 %v10652_v62, %v1573_v5  ;;  %v1203_v40 = vadd.f32 %v10580_v17, %v1080_v33  ;;  %v1402_v5 = vpop.f32.mrf.mxu3  ;;  %v769_v20 = vand.u32 1, %v695_v10  ;;  %v1300_v56 = vpop.f32.mrf.mxu2 }
 0x37a   :  { %v1652_v52 = vsel %vm1642_vm8, %v10687_v51, -inf  ;;  %v1296_v27 = vadd.f32 %v1295_v15, %v1203_v40  ;;  %vm915_vm15 = vcmp.ne.s32.totalorder %v769_v20, %v10622_v32 }
 0x37b   :  { %1653 = vmax.xlane.f32.xlu1 %v1652_v52 }
 0x37d   :  { %v1497_v55 = vpop.f32.mrf.mxu0  ;;  %v1576_v26 = vpop.f32.mrf.mxu1 }
 0x37e   :  { %v1577_v60 = vadd.f32 %v1576_v26, %v1494_v8  ;;  %v1498_v4 = vadd.f32 %v1497_v55, %v1391_v3  ;;  %v1088_v8 = vadd.f32 %v10578_v1, %v930_v44  ;;  %v1403_v55 = vadd.f32 %v1402_v5, %v1296_v27 }
 0x380   :  { %v10697_v14 = vadd.f32 %v10652_v62, %v1577_v60  ;;  %v1207_v41 = vadd.f32 %v10586_v21, %v1088_v8  ;;  %v931_v60 = vsel %vm915_vm15, -1e+30, %v13085_v48  ;;  %v1408_v1 = vpop.f32.mrf.mxu3  ;;  %v1305_v57 = vpop.f32.mrf.mxu2 }
 0x381   :  { %v1096_v0 = vadd.f32 %v10584_v9, %v931_v60 }
 0x382   :  { %v1655_v2 = vsel %vm1642_vm8, %v10697_v14, -inf  ;;  %v1301_v61 = vadd.f32 %v1300_v56, %v1207_v41 }
 0x383   :  { %1656 = vmax.xlane.f32.xlu2 %v1655_v2  ;;  %v1211_v21 = vadd.f32 %v10592_v22, %v1096_v0 }
 0x384   :  { %v1409_v2 = vadd.f32 %v1408_v1, %v1301_v61 }
 0x385   :  { %v1501_v36 = vpop.f32.mrf.mxu0  ;;  %v1580_v13 = vpop.f32.mrf.mxu1 }
 0x386   :  { %v1581_v45 = vadd.f32 %v1580_v13, %v1498_v4  ;;  %v1502_v43 = vadd.f32 %v1501_v36, %v1397_v37  ;;  %v1306_v13 = vadd.f32 %v1305_v57, %v1211_v21 }
 0x388   :  { %v10707_v46 = vadd.f32 %v10652_v62, %v1581_v45  ;;  %v1414_v33 = vpop.f32.mrf.mxu3  ;;  %v1310_v44 = vpop.f32.mrf.mxu2 }
 0x389   :  { %v1415_v15 = vadd.f32 %v1414_v33, %v1306_v13 }
 0x38a   :  { %v1658_v42 = vsel %vm1642_vm8, %v10707_v46, -inf }
 0x38b   :  { %1659 = vmax.xlane.f32.xlu2 %v1658_v42 }
 0x38d   :  { %v1505_v54 = vpop.f32.mrf.mxu0  ;;  %v1584_v12 = vpop.f32.mrf.mxu1 }
 0x38e   :  { %v1585_v52 = vadd.f32 %v1584_v12, %v1502_v43  ;;  %v1506_v58 = vadd.f32 %v1505_v54, %v1403_v55  ;;  %v696_v43 = vadd.s32 80, %v10615_v59 }
 0x390   :  { %v10717_v17 = vadd.f32 %v10652_v62, %v1585_v52  ;;  %v776_v54 = vand.u32 1, %v696_v43  ;;  %v1420_v12 = vpop.f32.mrf.mxu3 }
 0x392   :  { %v1661_v26 = vsel %vm1642_vm8, %v10717_v17, -inf  ;;  %vm916_vm0 = vcmp.ne.s32.totalorder %v776_v54, %v10622_v32 }
 0x393   :  { %1662 = vmax.xlane.f32.xlu2 %v1661_v26  ;;  %v932_v41 = vsel %vm916_vm0, -1e+30, %v13085_v48  ;;  %v1315_v26 = vpop.f32.mrf.mxu2 }
 0x394   :  { %v1104_v56 = vadd.f32 %v10590_v18, %v932_v41  ;;  %v698_v18 = vadd.s32 96, %v10615_v59 }
 0x395   :  { %v1588_v53 = vpop.f32.mrf.mxu1  ;;  %v1509_v63 = vpop.f32.mrf.mxu0 }
 0x396   :  { %v1589_v7 = vadd.f32 %v1588_v53, %v1506_v58  ;;  %v1510_v23 = vadd.f32 %v1509_v63, %v1409_v2  ;;  %v1215_v58 = vadd.f32 %v10598_v24, %v1104_v56  ;;  %v790_v33 = vand.u32 1, %v698_v18 }
 0x398   :  { %v10726_v3 = vadd.f32 %v10652_v62, %v1589_v7  ;;  %v1426_v53 = vpop.f32.mrf.mxu3  ;;  %v1311_v21 = vadd.f32 %v1310_v44, %v1215_v58  ;;  %vm918_vm2 = vcmp.ne.s32.totalorder %v790_v33, %v10622_v32 }
 0x39a   :  { %v1664_v4 = vsel %vm1642_vm8, %v10726_v3, -inf }
 0x39b   :  { %1665 = vmax.xlane.f32.xlu2 %v1664_v4  ;;  %v1320_v24 = vpop.f32.mrf.mxu2  ;;  %v700_v4 = vadd.s32 112, %v10615_v59 }
 0x39d   :  { %v1592_v36 = vpop.f32.mrf.mxu1  ;;  %v1513_v9 = vpop.f32.mrf.mxu0 }
 0x39e   :  { %v1593_v34 = vadd.f32 %v1592_v36, %v1510_v23  ;;  %v1514_v22 = vadd.f32 %v1513_v9, %v1415_v15 }
 0x3a0   :  { %v10732_v45 = vadd.f32 %v10652_v62, %v1593_v34  ;;  %v1432_v9 = vpop.f32.mrf.mxu3 }
 0x3a2   :  { %v1667_v40 = vsel %vm1642_vm8, %v10732_v45, -inf }
 0x3a3   :  { %1668 = vmax.xlane.f32.xlu0 %v1667_v40 }
 0x3a5   :  { %v1596_v10 = vpop.f32.mrf.mxu1  ;;  %v1517_v27 = vpop.f32.mrf.mxu0 }
 0x3a6   :  { %v1597_v37 = vadd.f32 %v1596_v10, %v1514_v22  ;;  %v804_v22 = vand.u32 1, %v700_v4 }
 0x3a8   :  { %v10737_v42 = vadd.f32 %v10652_v62, %v1597_v37  ;;  %vm920_vm4 = vcmp.ne.s32.totalorder %v804_v22, %v10622_v32  ;;  %v1438_v58 = vpop.f32.mrf.mxu3 }
 0x3a9   :  { %v936_v41 = vsel %vm920_vm4, -1e+30, %v13085_v48 }
 0x3aa   :  { %v1670_v5 = vsel %vm1642_vm8, %v10737_v42, -inf }
 0x3ab   :  { %1671 = vmax.xlane.f32.xlu2 %v1670_v5 }
 0x3ad   :  { %v1600_v52 = vpop.f32.mrf.mxu1  ;;  %v1521_v61 = vpop.f32.mrf.mxu0 }
 0x3b5   :  { %v10753_v63 = vpop.f32.mrf.mxu1  ;;  %v1525_v15 = vpop.f32.mrf.mxu0 }
 0x3b7   :  { %2029 = vrot.lane.b32.xlu0 %v10423_v16, %s10252_s1  ;;  %v697_v16 = vadd.s32 88, %v10615_v59 }
 0x3b9   :  { %v783_v0 = vand.u32 1, %v697_v16 }
 0x3bb   :  { %vm917_vm1 = vcmp.ne.s32.totalorder %v783_v0, %v10622_v32 }
 0x3bc   :  { %v933_v34 = vsel %vm917_vm1, -1e+30, %v13085_v48 }
 0x3bd   :  { %v1608_v5 = vpop.f32.mrf.mxu1  ;;  %v1112_v43 = vadd.f32 %v10596_v30, %v933_v34 }
 0x3bf   :  { %v1219_v44 = vadd.f32 %v10604_v25, %v1112_v43 }
 0x3c1   :  { %v1316_v56 = vadd.f32 %v1315_v26, %v1219_v44 }
 0x3d6   :  { %v1645_v20 = vpop.xlane.xlu2 %1644 }
 0x3d7   :  { %v1691_v8 = vsub.f32 %v10657_v6, %v1645_v20 }
 0x3d9   :  { %v1707_v55 = vmul.f32 1.442695, %v1691_v8 }
 0x3db   :  { %9806 = vpow2.f32 %v1707_v55 }
 0x3de   :  { %v1648_v60 = vpop.xlane.xlu2 %1647 }
 0x3df   :  { %v1692_v7 = vsub.f32 %v10667_v49, %v1648_v60  ;;  %v1421_v49 = vadd.f32 %v1420_v12, %v1311_v21  ;;  %v1529_v60 = vpop.f32.mrf.mxu0  ;;  %v1427_v21 = vadd.f32 %v1426_v53, %v1316_v56  ;;  %v1444_v53 = vpop.f32.mrf.mxu3 }
 0x3e1   :  { %v10751_v1 = vpop.eup %9806  ;;  %v1709_v6 = vmul.f32 1.442695, %v1692_v7  ;;  %v1518_v36 = vadd.f32 %v1517_v27, %v1421_v49  ;;  %v1325_v27 = vpop.f32.mrf.mxu2  ;;  %v1136_v7 = vadd.f32 %v10617_v29, %v936_v41  ;;  %v1522_v49 = vadd.f32 %v1521_v61, %v1427_v21 }
 0x3e2   :  { %v1739_v2 = vsel %vm1642_vm8, %v10751_v1, 0.0 }
 0x3e3   :  { %9808 = vpow2.f32 %v1709_v6  ;;  %1740 = vadd.xlane.f32.xlu2 %v1739_v2  ;;  %v1601_v10 = vadd.f32 %v1600_v52, %v1518_v36  ;;  %v934_v52 = vsel %vm918_vm2, -1e+30, %v13085_v48  ;;  %v1612_v6 = vpop.f32.mrf.mxu1  ;;  %v1231_v0 = vadd.f32 %v10632_v38, %v1136_v7 }
 0x3e4   :  { %v1605_v34 = vadd.f32 %v10753_v63, %v1522_v49 }
 0x3e5   :  { %v10772_v12 = vadd.f32 %v10652_v62, %v1601_v10 }
 0x3e6   :  { %v1651_v23 = vpop.xlane.xlu0 %1650  ;;  %v10798_v10 = vadd.f32 %v10652_v62, %v1605_v34 }
 0x3e7   :  { %v1693_v57 = vsub.f32 %v10677_v11, %v1651_v23  ;;  %v699_v11 = vadd.s32 104, %v10615_v59  ;;  %v1673_v16 = vsel %vm1642_vm8, %v10772_v12, -inf  ;;  %v1533_v33 = vpop.f32.mrf.mxu0 }
 0x3e9   :  { %v10761_v13 = vpop.eup %9808  ;;  %v1711_v40 = vmul.f32 1.442695, %v1693_v57  ;;  %v797_v30 = vand.u32 1, %v699_v11  ;;  %v1330_v57 = vpop.f32.mrf.mxu2 }
 0x3ea   :  { %v1742_v37 = vsel %vm1642_vm8, %v10761_v13, 0.0  ;;  %v1331_v29 = vadd.f32 %v1330_v57, %v1231_v0 }
 0x3eb   :  { %9810 = vpow2.f32 %v1711_v40  ;;  %1743 = vadd.xlane.f32.xlu2 %v1742_v37  ;;  %vm919_vm5 = vcmp.ne.s32.totalorder %v797_v30, %v10622_v32 }
 0x3ec   :  { %v935_v4 = vsel %vm919_vm5, -1e+30, %v13085_v48  ;;  %v1445_v40 = vadd.f32 %v1444_v53, %v1331_v29  ;;  %v1450_v53 = vpop.f32.mrf.mxu3 }
 0x3ed   :  { %v1128_v38 = vadd.f32 %v10608_v50, %v935_v4 }
 0x3ee   :  { %v1654_v54 = vpop.xlane.xlu1 %1653  ;;  %v1534_v63 = vadd.f32 %v1533_v33, %v1445_v40 }
 0x3ef   :  { %v1694_v20 = vsub.f32 %v10687_v51, %v1654_v54  ;;  %v1120_v51 = vadd.f32 %v10602_v39, %v934_v52  ;;  %v1676_v54 = vsel %vm1642_vm8, %v10798_v10, -inf  ;;  %v1537_v33 = vpop.f32.mrf.mxu0 }
 0x3f1   :  { %v10776_v8 = vpop.eup %9810  ;;  %v1713_v55 = vmul.f32 1.442695, %v1694_v20  ;;  %v1223_v26 = vadd.f32 %v10610_v28, %v1120_v51 }
 0x3f2   :  { %v1745_v25 = vsel %vm1642_vm8, %v10776_v8, 0.0 }
 0x3f3   :  { %9812 = vpow2.f32 %v1713_v55  ;;  %1746 = vadd.xlane.f32.xlu1 %v1745_v25  ;;  %1674 = vmax.xlane.f32.xlu2 %v1673_v16  ;;  %v1321_v36 = vadd.f32 %v1320_v24, %v1223_v26  ;;  %v1616_v24 = vpop.f32.mrf.mxu1 }
 0x3f4   :  { %v1617_v50 = vadd.f32 %v1616_v24, %v1534_v63 }
 0x3f5   :  { %v1433_v61 = vadd.f32 %v1432_v9, %v1321_v36 }
 0x3f6   :  { %v1657_v2 = vpop.xlane.xlu2 %1656 }
 0x3f7   :  { %v1695_v18 = vsub.f32 %v10697_v14, %v1657_v2  ;;  %v1227_v14 = vadd.f32 %v10619_v31, %v1128_v38  ;;  %v1526_v37 = vadd.f32 %v1525_v15, %v1433_v61  ;;  %v10810_v15 = vadd.f32 %v10652_v62, %v1617_v50 }
 0x3f9   :  { %v10790_v23 = vpop.eup %9812  ;;  %v1715_v39 = vmul.f32 1.442695, %v1695_v18  ;;  %v1326_v11 = vadd.f32 %v1325_v27, %v1227_v14  ;;  %v1609_v44 = vadd.f32 %v1608_v5, %v1526_v37  ;;  %v1685_v55 = vsel %vm1642_vm8, %v10810_v15, -inf }
 0x3fa   :  { %v1748_v28 = vsel %vm1642_vm8, %v10790_v23, 0.0 }
 0x3fb   :  { %9814 = vpow2.f32 %v1715_v39  ;;  %1749 = vadd.xlane.f32.xlu2 %v1748_v28  ;;  %v1439_v9 = vadd.f32 %v1438_v58, %v1326_v11  ;;  %v10807_v52 = vadd.f32 %v10652_v62, %v1609_v44  ;;  %v1620_v24 = vpop.f32.mrf.mxu1 }
 0x3fd   :  { %v1530_v30 = vadd.f32 %v1529_v60, %v1439_v9  ;;  %v1679_v41 = vsel %vm1642_vm8, %v10807_v52, -inf }
 0x3fe   :  { %v1660_v22 = vpop.xlane.xlu2 %1659 }
 0x3ff   :  { %v1613_v27 = vadd.f32 %v1612_v6, %v1530_v30  ;;  %v701_v6 = vadd.s32 120, %v10615_v59  ;;  %v1696_v49 = vsub.f32 %v10707_v46, %v1660_v22  ;;  %v1335_v46 = vpop.f32.mrf.mxu2 }
 0x401   :  { %v10800_v43 = vpop.eup %9814  ;;  %v10820_v16 = vadd.f32 %v10652_v62, %v1613_v27  ;;  %v811_v0 = vand.u32 1, %v701_v6  ;;  %v1717_v36 = vmul.f32 1.442695, %v1696_v49 }
 0x402   :  { %v1751_v31 = vsel %vm1642_vm8, %v10800_v43, 0.0 }
 0x403   :  { %1677 = vmax.xlane.f32.xlu2 %v1676_v54  ;;  %1752 = vadd.xlane.f32.xlu0 %v1751_v31  ;;  %v1682_v58 = vsel %vm1642_vm8, %v10820_v16, -inf  ;;  %vm921_vm6 = vcmp.ne.s32.totalorder %v811_v0, %v10622_v32 }
 0x406   :  { %v1663_v20 = vpop.xlane.xlu2 %1662 }
 0x407   :  { %v1697_v5 = vsub.f32 %v10717_v17, %v1663_v20 }
 0x409   :  { %v1719_v56 = vmul.f32 1.442695, %v1697_v5 }
 0x40b   :  { %1680 = vmax.xlane.f32.xlu2 %v1679_v41  ;;  %1686 = vmax.xlane.f32.xlu0 %v1685_v55  ;;  %9816 = vpow2.f32 %v1719_v56 }
 0x40c   :  { %2027 = vrot.lane.b32.xlu1 %v10426_v19, %s10252_s1 }
 0x40e   :  { %v1666_v25 = vpop.xlane.xlu2 %1665 }
 0x40f   :  { %v1698_v17 = vsub.f32 %v10726_v3, %v1666_v25 }
 0x411   :  { %v1721_v60 = vmul.f32 1.442695, %v1698_v17  ;;  %v10825_v7 = vpop.eup %9816 }
 0x412   :  { %v1757_v26 = vsel %vm1642_vm8, %v10825_v7, 0.0 }
 0x413   :  { %1683 = vmax.xlane.f32.xlu2 %v1682_v58  ;;  %9818 = vpow2.f32 %v1721_v60 }
 0x416   :  { %v1669_v51 = vpop.xlane.xlu0 %1668 }
 0x417   :  { %v1699_v19 = vsub.f32 %v10732_v45, %v1669_v51  ;;  %v937_v45 = vsel %vm921_vm6, -1e+30, %v13085_v48 }
 0x418   :  { %v1144_v39 = vadd.f32 %v10630_v35, %v937_v45 }
 0x419   :  { %v1723_v21 = vmul.f32 1.442695, %v1699_v19  ;;  %v10831_v2 = vpop.eup %9818 }
 0x41a   :  { %v1760_v59 = vsel %vm1642_vm8, %v10831_v2, 0.0  ;;  %v1235_v32 = vadd.f32 %v10644_v47, %v1144_v39 }
 0x41b   :  { %1758 = vadd.xlane.f32.xlu2 %v1757_v26  ;;  %9820 = vpow2.f32 %v1723_v21 }
 0x41c   :  { %v1336_v47 = vadd.f32 %v1335_v46, %v1235_v32 }
 0x41e   :  { %v1672_v3 = vpop.xlane.xlu2 %1671  ;;  %v1451_v40 = vadd.f32 %v1450_v53, %v1336_v47 }
 0x41f   :  { %v1700_v18 = vsub.f32 %v10737_v42, %v1672_v3 }
 0x420   :  { %v1538_v63 = vadd.f32 %v1537_v33, %v1451_v40 }
 0x421   :  { %v1725_v4 = vmul.f32 1.442695, %v1700_v18  ;;  %v10839_v57 = vpop.eup %9820 }
 0x422   :  { %v1763_v28 = vsel %vm1642_vm8, %v10839_v57, 0.0  ;;  %v1621_v11 = vadd.f32 %v1620_v24, %v1538_v63 }
 0x423   :  { %9822 = vpow2.f32 %v1725_v4  ;;  %1761 = vadd.xlane.f32.xlu2 %v1760_v59 }
 0x424   :  { %9824 = vpow2.f32 %v1717_v36  ;;  %v10866_v50 = vadd.f32 %v10652_v62, %v1621_v11 }
 0x426   :  { %v1688_v54 = vsel %vm1642_vm8, %v10866_v50, -inf }
 0x429   :  { %v10842_v29 = vpop.eup %9822  ;;  %v2030_v42 = vpop.permute.xlu0 %2029 }
 0x42a   :  { %v10845_v34 = vand.u32 4294901760, %v2030_v42  ;;  %v1766_v38 = vsel %vm1642_vm8, %v10842_v29, 0.0  ;;  %v10861_v22 = vpop.eup %9824 }
 0x42b   :  { %1764 = vadd.xlane.f32.xlu2 %v1763_v28  ;;  %1767 = vadd.xlane.f32.xlu0 %v1766_v38  ;;  %v1754_v44 = vsel %vm1642_vm8, %v10861_v22, 0.0 }
 0x42c   :  { %v10852_v35 = vsub.f32 %v2030_v42, %v10845_v34  ;;  %2096 = vmatpush.msrb.mxu2 %v10845_v34  ;;  %2435 = vmatpush.msrb.mxu1 %v10845_v34 }
 0x42e   :  { %v2244_v14 = vand.u32 4294901760, %v10852_v35  ;;  %2335 = vmatpush.msrb.mxu0 %v10852_v35 }
 0x430   :  { %v2245_v61 = vsub.f32 %v10852_v35, %v2244_v14 }
 0x432   :  { %v2246_v37 = vand.u32 4294901760, %v2245_v61 }
 0x434   :  { %2247 = vmatpush.msrb.mxu3 %v2246_v37 }
 0x436   :  { %1755 = vadd.xlane.f32.xlu1 %v1754_v44 }
 0x43e   :  { %1689 = vmax.xlane.f32.xlu1 %v1688_v54 }
 0x456   :  { %v1741_v31 = vpop.xlane.xlu2 %1740 }
 0x457   :  { %9826 = vrcp.f32 %v1741_v31  ;;  %v1798_v27 = vand.u32 2147483648, %v1741_v31  ;;  %v1796_v55 = vand.u32 2147483647, %v1741_v31  ;;  %vm1792_vm9 = vweird.f32 %v1741_v31 }
 0x459   :  { %v1799_v62 = vor.u32 1.1754944e-38, %v1798_v27  ;;  %vm1797_vm11 = vcmp.eq.f32.partialorder %v1796_v55, 8.507059e+37 }
 0x45d   :  { %v9827_v9 = vpop.eup %9826 }
 0x45e   :  { %v1788_v20 = vmul.f32 %v9827_v9, %v1741_v31  ;;  %v1744_v30 = vpop.xlane.xlu2 %1743  ;;  %vm1793_vm7 = vweird.f32 %v9827_v9 }
 0x45f   :  { %9828 = vrcp.f32 %v1744_v30  ;;  %vm1794_vm10 = vmor %vm1792_vm9, %vm1793_vm7  ;;  %v1813_v3 = vand.u32 2147483648, %v1744_v30  ;;  %v1811_v4 = vand.u32 2147483647, %v1744_v30  ;;  %vm1807_vm13 = vweird.f32 %v1744_v30 }
 0x460   :  { %v1789_v5 = vsub.f32 1.0, %v1788_v20 }
 0x461   :  { %v1814_v36 = vor.u32 1.1754944e-38, %v1813_v3  ;;  %vm1812_vm15 = vcmp.eq.f32.partialorder %v1811_v4, 8.507059e+37 }
 0x462   :  { %v1790_v41 = vmul.f32 %v9827_v9, %v1789_v5 }
 0x464   :  { %v1791_v56 = vadd.f32 %v9827_v9, %v1790_v41 }
 0x465   :  { %v9829_v25 = vpop.eup %9828 }
 0x466   :  { %v1795_v17 = vsel %vm1794_vm10, %v9827_v9, %v1791_v56  ;;  %v1803_v58 = vmul.f32 %v9829_v25, %v1744_v30  ;;  %v1747_v60 = vpop.xlane.xlu1 %1746  ;;  %v1675_v51 = vpop.xlane.xlu2 %1674  ;;  %vm1808_vm12 = vweird.f32 %v9829_v25 }
 0x467   :  { %v1800_v6 = vsel %vm1797_vm11, %v1799_v62, %v1795_v17  ;;  %9830 = vrcp.f32 %v1747_v60  ;;  %v1701_v26 = vsub.f32 %v10772_v12, %v1675_v51  ;;  %vm1809_vm14 = vmor %vm1807_vm13, %vm1808_vm12  ;;  %v1828_v38 = vand.u32 2147483648, %v1747_v60 }
 0x468   :  { %v1804_v19 = vsub.f32 1.0, %v1803_v58  ;;  %v1801_v0 = vmul.f32 %v10751_v1, %v1800_v6  ;;  %v1826_v33 = vand.u32 2147483647, %v1747_v60  ;;  %vm1822_vm1 = vweird.f32 %v1747_v60 }
 0x469   :  { %v1727_v18 = vmul.f32 1.442695, %v1701_v26  ;;  %v1829_v63 = vor.u32 1.1754944e-38, %v1828_v38 }
 0x46a   :  { %v1805_v21 = vmul.f32 %v9829_v25, %v1804_v19  ;;  %v2034_v45 = vsel %vm1642_vm8, %v1801_v0, 0  ;;  %vm1827_vm4 = vcmp.eq.f32.partialorder %v1826_v33, 8.507059e+37 }
 0x46b   :  { %9832 = vpow2.f32 %v1727_v18  ;;  %v10873_v12 = vand.u32 4294901760, %v2034_v45 }
 0x46c   :  { %v1806_v59 = vadd.f32 %v9829_v25, %v1805_v21 }
 0x46d   :  { %v9831_v49 = vpop.eup %9830  ;;  %v10881_v40 = vsub.f32 %v2034_v45, %v10873_v12 }
 0x46e   :  { %v1810_v39 = vsel %vm1809_vm14, %v9829_v25, %v1806_v59  ;;  %v1818_v32 = vmul.f32 %v9831_v49, %v1747_v60  ;;  %v1750_v42 = vpop.xlane.xlu2 %1749  ;;  %vm1823_vm0 = vweird.f32 %v9831_v49 }
 0x46f   :  { %9834 = vrcp.f32 %v1750_v42  ;;  %v1815_v28 = vsel %vm1812_vm15, %v1814_v36, %v1810_v39  ;;  %vm1824_vm2 = vmor %vm1822_vm1, %vm1823_vm0  ;;  %v2101_v20 = vand.u32 4294901760, %v10881_v40  ;;  %v1843_v41 = vand.u32 2147483648, %v1750_v42 }
 0x470   :  { %v1819_v1 = vsub.f32 1.0, %v1818_v32  ;;  %v1816_v46 = vmul.f32 %v10761_v13, %v1815_v28  ;;  %v1841_v25 = vand.u32 2147483647, %v1750_v42  ;;  %vm1837_vm6 = vweird.f32 %v1750_v42 }
 0x471   :  { %v10876_v47 = vpop.eup %9832  ;;  %v2102_v17 = vsub.f32 %v10881_v40, %v2101_v20 }
 0x472   :  { %v1820_v53 = vmul.f32 %v9831_v49, %v1819_v1  ;;  %v1769_v61 = vsel %vm1642_vm8, %v10876_v47, 0.0  ;;  %v2037_v11 = vsel %vm1642_vm8, %v1816_v46, 0  ;;  %vm1842_vm9 = vcmp.eq.f32.partialorder %v1841_v25, 8.507059e+37 }
 0x473   :  { %1770 = vadd.xlane.f32.xlu2 %v1769_v61  ;;  %v10889_v27 = vand.u32 4294901760, %v2037_v11  ;;  %v2103_v59 = vand.u32 4294901760, %v2102_v17 }
 0x474   :  { %v1821_v24 = vadd.f32 %v9831_v49, %v1820_v53 }
 0x475   :  { %v9835_v37 = vpop.eup %9834  ;;  %v10894_v60 = vsub.f32 %v2037_v11, %v10889_v27 }
 0x476   :  { %v1825_v13 = vsel %vm1824_vm2, %v9831_v49, %v1821_v24  ;;  %v1833_v44 = vmul.f32 %v9835_v37, %v1750_v42  ;;  %v10884_v54 = vpop.xlane.xlu0 %1752  ;;  %v1678_v31 = vpop.xlane.xlu2 %1677  ;;  %vm1838_vm5 = vweird.f32 %v9835_v37 }
 0x477   :  { %v1830_v9 = vsel %vm1827_vm4, %v1829_v63, %v1825_v13  ;;  %9836 = vrcp.f32 %v10884_v54  ;;  %v1702_v5 = vsub.f32 %v10798_v10, %v1678_v31  ;;  %vm1839_vm7 = vmor %vm1837_vm6, %vm1838_vm5  ;;  %v1844_v10 = vor.u32 1.1754944e-38, %v1843_v41 }
 0x478   :  { %v1834_v30 = vsub.f32 1.0, %v1833_v44  ;;  %v1831_v55 = vmul.f32 %v10776_v8, %v1830_v9  ;;  %v2109_v39 = vand.u32 4294901760, %v10894_v60  ;;  %v1858_v32 = vand.u32 2147483648, %v10884_v54 }
 0x479   :  { %v1729_v62 = vmul.f32 1.442695, %v1702_v5  ;;  %vm1852_vm11 = vweird.f32 %v10884_v54 }
 0x47a   :  { %v1835_v56 = vmul.f32 %v9835_v37, %v1834_v30  ;;  %v2040_v6 = vsel %vm1642_vm8, %v1831_v55, 0  ;;  %v2110_v61 = vsub.f32 %v10894_v60, %v2109_v39 }
 0x47b   :  { %9838 = vpow2.f32 %v1729_v62  ;;  %v10903_v36 = vand.u32 4294901760, %v2040_v6 }
 0x47c   :  { %v1836_v58 = vadd.f32 %v9835_v37, %v1835_v56  ;;  %v2111_v31 = vand.u32 4294901760, %v2110_v61 }
 0x47d   :  { %v9837_v51 = vpop.eup %9836  ;;  %v2116_v24 = vsub.f32 %v2040_v6, %v10903_v36 }
 0x47e   :  { %v1840_v19 = vsel %vm1839_vm7, %v9835_v37, %v1836_v58  ;;  %v1848_v8 = vmul.f32 %v9837_v51, %v10884_v54  ;;  %v2028_v26 = vpop.permute.xlu1 %2027  ;;  %v1687_v0 = vpop.xlane.xlu0 %1686  ;;  %vm1853_vm10 = vweird.f32 %v9837_v51  ;;  %v1859_v37 = vor.u32 1.1754944e-38, %v1858_v32 }
 0x47f   :  { %v1845_v21 = vsel %vm1842_vm9, %v1844_v10, %v1840_v19  ;;  %v10898_v3 = vand.u32 4294901760, %v2028_v26  ;;  %v1705_v18 = vsub.f32 %v10810_v15, %v1687_v0  ;;  %v1681_v4 = vpop.xlane.xlu2 %1680  ;;  %vm1854_vm12 = vmor %vm1852_vm11, %vm1853_vm10 }
 0x480   :  { %v1849_v45 = vsub.f32 1.0, %v1848_v8  ;;  %v1703_v49 = vsub.f32 %v10807_v52, %v1681_v4  ;;  %v1846_v15 = vmul.f32 %v10790_v23, %v1845_v21  ;;  %v1856_v52 = vand.u32 2147483647, %v10884_v54 }
 0x481   :  { %v2249_v42 = vsub.f32 %v2028_v26, %v10898_v3  ;;  %v1735_v1 = vmul.f32 1.442695, %v1705_v18  ;;  %2098 = vmatpush.msrb.mxu2 %v10898_v3  ;;  %2437 = vmatpush.msrb.mxu1 %v10898_v3  ;;  %v10910_v28 = vpop.eup %9838 }
 0x482   :  { %v1850_v38 = vmul.f32 %v9837_v51, %v1849_v45  ;;  %v1731_v46 = vmul.f32 1.442695, %v1703_v49  ;;  %2104 = vmatmul.f32.vlgmr.msrb.gmra.mxu2 %v2103_v59  ;;  %2441 = vmatmul.f32.vlgmr.msrb.gmra.mxu1 %v2101_v20  ;;  %v1772_v53 = vsel %vm1642_vm8, %v10910_v28, 0.0  ;;  %vm1857_vm13 = vcmp.eq.f32.partialorder %v1856_v52, 8.507059e+37 }
 0x483   :  { %9840 = vpow2.f32 %v1735_v1  ;;  %2552 = vmatpush.msra.mxu2 %v2244_v14  ;;  %2338 = vmatpush.msrb.mxu0 %v2249_v42  ;;  %v2250_v23 = vand.u32 4294901760, %v2249_v42  ;;  %v2043_v14 = vsel %vm1642_vm8, %v1846_v15, 0 }
 0x484   :  { %v1851_v33 = vadd.f32 %v9837_v51, %v1850_v38  ;;  %9842 = vpow2.f32 %v1731_v46  ;;  %1773 = vadd.xlane.f32.xlu1 %v1772_v53  ;;  %2341 = vmatmul.f32.vlgmr.msrb.gmra.mxu0 %v10881_v40  ;;  %v2117_v40 = vand.u32 4294901760, %v2116_v24  ;;  %v10924_v9 = vand.u32 4294901760, %v2043_v14 }
 0x485   :  { %2556 = vmatpush.msra.mxu2 %v2250_v23  ;;  %v2251_v35 = vsub.f32 %v2249_v42, %v2250_v23 }
 0x486   :  { %v1855_v63 = vsel %vm1854_vm12, %v9837_v51, %v1851_v33  ;;  %v2118_v56 = vsub.f32 %v2116_v24, %v2117_v40 }
 0x487   :  { %v1860_v11 = vsel %vm1857_vm13, %v1859_v37, %v1855_v63  ;;  %v1684_v13 = vpop.xlane.xlu2 %1683  ;;  %v2252_v44 = vand.u32 4294901760, %v2251_v35 }
 0x488   :  { %v1704_v54 = vsub.f32 %v10820_v16, %v1684_v13  ;;  %v1861_v30 = vmul.f32 %v10800_v43, %v1860_v11  ;;  %v2124_v43 = vsub.f32 %v2043_v14, %v10924_v9  ;;  %v2119_v62 = vand.u32 4294901760, %v2118_v56 }
 0x489   :  { %v10926_v20 = vpop.eup %9840  ;;  %2253 = vmatpush.msrb.mxu3 %v2252_v44 }
 0x48a   :  { %v10929_v5 = vpop.eup %9842  ;;  %v1733_v41 = vmul.f32 1.442695, %v1704_v54  ;;  %2112 = vmatmul.f32.gmra.mxu2 %v2111_v31  ;;  %2255 = vmatmul.f32.vlgmr.msrb.gmra.mxu3 %v10873_v12  ;;  %v1781_v55 = vsel %vm1642_vm8, %v10926_v20, 0.0  ;;  %v2046_v25 = vsel %vm1642_vm8, %v1861_v30, 0  ;;  %v2125_v17 = vand.u32 4294901760, %v2124_v43 }
 0x48b   :  { %2447 = vmatmul.f32.gmra.mxu1 %v2109_v39  ;;  %2637 = vmatpush.msra.mxu3 %v10845_v34  ;;  %v1775_v16 = vsel %vm1642_vm8, %v10929_v5, 0.0  ;;  %v10941_v58 = vand.u32 4294901760, %v2046_v25 }
 0x48c   :  { %9844 = vpow2.f32 %v1733_v41  ;;  %1782 = vadd.xlane.f32.xlu1 %v1781_v55  ;;  %1776 = vadd.xlane.f32.xlu0 %v1775_v16 }
 0x48d   :  { %2346 = vmatmul.f32.gmra.mxu0 %v10894_v60  ;;  %2639 = vmatpush.msra.mxu3 %v10898_v3  ;;  %v2126_v60 = vsub.f32 %v2124_v43, %v2125_v17  ;;  %v2132_v6 = vsub.f32 %v2046_v25, %v10941_v58 }
 0x48f   :  { %v1759_v34 = vpop.xlane.xlu2 %1758  ;;  %v2127_v19 = vand.u32 4294901760, %v2126_v60  ;;  %v2133_v8 = vand.u32 4294901760, %v2132_v6 }
 0x490   :  { %9846 = vrcp.f32 %v1759_v34  ;;  %v1888_v52 = vand.u32 2147483648, %v1759_v34  ;;  %vm1882_vm15 = vweird.f32 %v1759_v34  ;;  %v1886_v46 = vand.u32 2147483647, %v1759_v34 }
 0x491   :  { %v2134_v0 = vsub.f32 %v2132_v6, %v2133_v8 }
 0x492   :  { %v10943_v51 = vpop.eup %9844  ;;  %2120 = vmatmul.f32.gmra.mxu2 %v2119_v62  ;;  %2259 = vmatmul.f32.gmra.mxu3 %v10889_v27  ;;  %v1889_v35 = vor.u32 1.1754944e-38, %v1888_v52  ;;  %vm1887_vm1 = vcmp.eq.f32.partialorder %v1886_v46, 8.507059e+37 }
 0x493   :  { %2453 = vmatmul.f32.gmra.mxu1 %v2117_v40  ;;  %v1778_v10 = vsel %vm1642_vm8, %v10943_v51, 0.0  ;;  %v2135_v3 = vand.u32 4294901760, %v2134_v0 }
 0x494   :  { %1779 = vadd.xlane.f32.xlu2 %v1778_v10 }
 0x495   :  { %2351 = vmatmul.f32.gmra.mxu0 %v2116_v24 }
 0x496   :  { %v9847_v21 = vpop.eup %9846 }
 0x497   :  { %v10950_v26 = vpop.xlane.xlu2 %1761  ;;  %v1878_v18 = vmul.f32 %v9847_v21, %v1759_v34  ;;  %vm1883_vm14 = vweird.f32 %v9847_v21 }
 0x498   :  { %9848 = vrcp.f32 %v10950_v26  ;;  %vm1884_vm0 = vmor %vm1882_vm15, %vm1883_vm14  ;;  %vm1897_vm5 = vweird.f32 %v10950_v26  ;;  %v1903_v55 = vand.u32 2147483648, %v10950_v26  ;;  %v1901_v16 = vand.u32 2147483647, %v10950_v26 }
 0x499   :  { %v1879_v59 = vsub.f32 1.0, %v1878_v18 }
 0x49a   :  { %2128 = vmatmul.f32.gmra.mxu2 %v2127_v19  ;;  %2263 = vmatmul.f32.gmra.mxu3 %v10903_v36  ;;  %v1904_v60 = vor.u32 1.1754944e-38, %v1903_v55  ;;  %vm1902_vm11 = vcmp.eq.f32.partialorder %v1901_v16, 8.507059e+37 }
 0x49b   :  { %2459 = vmatmul.f32.gmra.mxu1 %v2125_v17  ;;  %v1880_v39 = vmul.f32 %v9847_v21, %v1879_v59 }
 0x49d   :  { %2356 = vmatmul.f32.gmra.mxu0 %v2124_v43  ;;  %v1881_v15 = vadd.f32 %v9847_v21, %v1880_v39 }
 0x49e   :  { %v10954_v4 = vpop.eup %9848  ;;  %v10962_v1 = vpop.xlane.xlu0 %1767 }
 0x49f   :  { %v10956_v45 = vpop.xlane.xlu2 %1764  ;;  %v1893_v49 = vmul.f32 %v10954_v4, %v10950_v26  ;;  %v1885_v33 = vsel %vm1884_vm0, %v9847_v21, %v1881_v15  ;;  %vm1898_vm2 = vweird.f32 %v10954_v4 }
 0x4a0   :  { %9850 = vrcp.f32 %v10956_v45  ;;  %v1890_v11 = vsel %vm1887_vm1, %v1889_v35, %v1885_v33  ;;  %vm10977_vm6 = vmor %vm1897_vm5, %vm1898_vm2  ;;  %vm1912_vm13 = vweird.f32 %v10956_v45  ;;  %vm1927_vm1 = vweird.f32 %v10962_v1 }
 0x4a1   :  { %v1894_v42 = vsub.f32 1.0, %v1893_v49  ;;  %v1891_v43 = vmul.f32 %v10825_v7, %v1890_v11  ;;  %v1916_v49 = vand.u32 2147483647, %v10956_v45  ;;  %v1931_v35 = vand.u32 2147483647, %v10962_v1 }
 0x4a2   :  { %2136 = vmatmul.f32.gmra.mxu2 %v2135_v3  ;;  %2267 = vmatmul.f32.gmra.mxu3 %v10924_v9 }
 0x4a3   :  { %2465 = vmatmul.f32.gmra.mxu1 %v2133_v8  ;;  %v1895_v23 = vmul.f32 %v10954_v4, %v1894_v42  ;;  %v2052_v7 = vsel %vm1642_vm8, %v1891_v43, 0  ;;  %vm1917_vm15 = vcmp.eq.f32.partialorder %v1916_v49, 8.507059e+37 }
 0x4a5   :  { %2361 = vmatmul.f32.gmra.mxu0 %v2132_v6  ;;  %v1896_v13 = vadd.f32 %v10954_v4, %v1895_v23 }
 0x4a6   :  { %v10964_v38 = vpop.eup %9850 }
 0x4a7   :  { %v1908_v61 = vmul.f32 %v10964_v38, %v10956_v45  ;;  %v1900_v17 = vsel %vm10977_vm6, %v10954_v4, %v1896_v13  ;;  %vm1913_vm12 = vweird.f32 %v10964_v38  ;;  %v1918_v4 = vand.u32 2147483648, %v10956_v45 }
 0x4a8   :  { %v1905_v26 = vsel %vm1902_vm11, %v1904_v60, %v1900_v17  ;;  %vm1914_vm14 = vmor %vm1912_vm13, %vm1913_vm12 }
 0x4a9   :  { %v1756_v32 = vpop.xlane.xlu1 %1755  ;;  %v1909_v40 = vsub.f32 1.0, %v1908_v61  ;;  %v1906_v39 = vmul.f32 %v10831_v2, %v1905_v26  ;;  %v1919_v52 = vor.u32 1.1754944e-38, %v1918_v4  ;;  %v1933_v61 = vand.u32 2147483648, %v10962_v1 }
 0x4aa   :  { %9852 = vrcp.f32 %v1756_v32  ;;  %2271 = vmatmul.f32.gmra.mxu3 %v10941_v58  ;;  %v1873_v44 = vand.u32 2147483648, %v1756_v32  ;;  %v1871_v41 = vand.u32 2147483647, %v1756_v32  ;;  %vm1867_vm7 = vweird.f32 %v1756_v32 }
 0x4ab   :  { %9854 = vrcp.f32 %v10962_v1  ;;  %v1910_v34 = vmul.f32 %v10964_v38, %v1909_v40  ;;  %v2055_v23 = vsel %vm1642_vm8, %v1906_v39, 0  ;;  %v1934_v11 = vor.u32 1.1754944e-38, %v1933_v61 }
 0x4ac   :  { %v1874_v62 = vor.u32 1.1754944e-38, %v1873_v44  ;;  %vm1872_vm10 = vcmp.eq.f32.partialorder %v1871_v41, 8.507059e+37 }
 0x4ad   :  { %v1911_v21 = vadd.f32 %v10964_v38, %v1910_v34 }
 0x4af   :  { %v1915_v15 = vsel %vm1914_vm14, %v10964_v38, %v1911_v21  ;;  %v11015_v38 = vand.u32 4294901760, %v2055_v23 }
 0x4b0   :  { %v9853_v53 = vpop.eup %9852  ;;  %v1920_v45 = vsel %vm1917_vm15, %v1919_v52, %v1915_v15 }
 0x4b1   :  { %v1863_v24 = vmul.f32 %v9853_v53, %v1756_v32  ;;  %v1690_v37 = vpop.xlane.xlu1 %1689  ;;  %v10973_v31 = vpop.eup %9854  ;;  %vm1868_vm4 = vweird.f32 %v9853_v53  ;;  %v2156_v44 = vsub.f32 %v2055_v23, %v11015_v38 }
 0x4b2   :  { %v1706_v14 = vsub.f32 %v10866_v50, %v1690_v37  ;;  %v1923_v25 = vmul.f32 %v10973_v31, %v10962_v1  ;;  %vm1869_vm9 = vmor %vm1867_vm7, %vm1868_vm4  ;;  %vm1928_vm0 = vweird.f32 %v10973_v31  ;;  %vm1932_vm4 = vcmp.eq.f32.partialorder %v1931_v35, 8.507059e+37 }
 0x4b3   :  { %v1864_v63 = vsub.f32 1.0, %v1863_v24  ;;  %vm1929_vm2 = vmor %vm1927_vm1, %vm1928_vm0  ;;  %v2157_v1 = vand.u32 4294901760, %v2156_v44 }
 0x4b4   :  { %v1737_v54 = vmul.f32 1.442695, %v1706_v14  ;;  %v1924_v0 = vsub.f32 1.0, %v1923_v25  ;;  %v1921_v14 = vmul.f32 %v10839_v57, %v1920_v45 }
 0x4b5   :  { %v1865_v30 = vmul.f32 %v9853_v53, %v1864_v63 }
 0x4b6   :  { %9856 = vpow2.f32 %v1737_v54  ;;  %v1925_v42 = vmul.f32 %v10973_v31, %v1924_v0  ;;  %v2058_v54 = vsel %vm1642_vm8, %v1921_v14, 0 }
 0x4b7   :  { %v1866_v56 = vadd.f32 %v9853_v53, %v1865_v30  ;;  %v11024_v41 = vand.u32 4294901760, %v2058_v54 }
 0x4b8   :  { %v1926_v33 = vadd.f32 %v10973_v31, %v1925_v42 }
 0x4b9   :  { %v1870_v10 = vsel %vm1869_vm9, %v9853_v53, %v1866_v56  ;;  %v2164_v55 = vsub.f32 %v2058_v54, %v11024_v41 }
 0x4ba   :  { %v1875_v6 = vsel %vm1872_vm10, %v1874_v62, %v1870_v10  ;;  %v1930_v63 = vsel %vm1929_vm2, %v10973_v31, %v1926_v33  ;;  %v2158_v31 = vsub.f32 %v2156_v44, %v2157_v1 }
 0x4bb   :  { %v1876_v19 = vmul.f32 %v10861_v22, %v1875_v6  ;;  %v11001_v22 = vand.u32 4294901760, %v2052_v7  ;;  %v1935_v40 = vsel %vm1932_vm4, %v1934_v11, %v1930_v63  ;;  %v2165_v56 = vand.u32 4294901760, %v2164_v55 }
 0x4bc   :  { %v10991_v8 = vpop.eup %9856  ;;  %v1936_v57 = vmul.f32 %v10842_v29, %v1935_v40  ;;  %v2159_v16 = vand.u32 4294901760, %v2158_v31 }
 0x4bd   :  { %v1784_v3 = vsel %vm1642_vm8, %v10991_v8, 0.0  ;;  %v2049_v18 = vsel %vm1642_vm8, %v1876_v19, 0  ;;  %v2148_v53 = vsub.f32 %v2052_v7, %v11001_v22  ;;  %v2166_v25 = vsub.f32 %v2164_v55, %v2165_v56 }
 0x4be   :  { %1785 = vadd.xlane.f32.xlu0 %v1784_v3  ;;  %v10999_v59 = vand.u32 4294901760, %v2049_v18  ;;  %v2061_v50 = vsel %vm1642_vm8, %v1936_v57, 0 }
 0x4bf   :  { %v2149_v37 = vand.u32 4294901760, %v2148_v53  ;;  %v11030_v43 = vand.u32 4294901760, %v2061_v50  ;;  %v2167_v62 = vand.u32 4294901760, %v2166_v25 }
 0x4c0   :  { %2275 = vmatmul.f32.gmra.mxu3 %v10999_v59  ;;  %v2140_v32 = vsub.f32 %v2049_v18, %v10999_v59 }
 0x4c1   :  { %v2150_v13 = vsub.f32 %v2148_v53, %v2149_v37  ;;  %v2172_v29 = vsub.f32 %v2061_v50, %v11030_v43 }
 0x4c2   :  { %2366 = vmatmul.f32.gmra.mxu0 %v2140_v32  ;;  %v2141_v46 = vand.u32 4294901760, %v2140_v32 }
 0x4c3   :  { %v2151_v30 = vand.u32 4294901760, %v2150_v13  ;;  %v2173_v17 = vand.u32 4294901760, %v2172_v29 }
 0x4c4   :  { %2471 = vmatmul.f32.gmra.mxu1 %v2141_v46  ;;  %v2142_v2 = vsub.f32 %v2140_v32, %v2141_v46 }
 0x4c5   :  { %v2174_v34 = vsub.f32 %v2172_v29, %v2173_v17 }
 0x4c6   :  { %v2143_v24 = vand.u32 4294901760, %v2142_v2 }
 0x4c7   :  { %v2175_v10 = vand.u32 4294901760, %v2174_v34 }
 0x4c8   :  { %2144 = vmatmul.f32.gmra.mxu2 %v2143_v24  ;;  %2279 = vmatmul.f32.gmra.mxu3 %v11001_v22 }
 0x4ca   :  { %2371 = vmatmul.f32.gmra.mxu0 %v2148_v53 }
 0x4cc   :  { %2477 = vmatmul.f32.gmra.mxu1 %v2149_v37 }
 0x4d0   :  { %2152 = vmatmul.f32.gmra.mxu2 %v2151_v30  ;;  %2283 = vmatmul.f32.gmra.mxu3 %v11015_v38 }
 0x4d2   :  { %2376 = vmatmul.f32.gmra.mxu0 %v2156_v44 }
 0x4d4   :  { %2483 = vmatmul.f32.gmra.mxu1 %v2157_v1 }
 0x4d8   :  { %2160 = vmatmul.f32.gmra.mxu2 %v2159_v16  ;;  %2287 = vmatmul.f32.gmra.mxu3 %v11024_v41 }
 0x4da   :  { %2381 = vmatmul.f32.gmra.mxu0 %v2164_v55 }
 0x4dc   :  { %2489 = vmatmul.f32.gmra.mxu1 %v2165_v56 }
 0x4e0   :  { %2168 = vmatmul.f32.gmra.mxu2 %v2167_v62  ;;  %2291 = vmatmul.f32.gmra.mxu3 %v11030_v43 }
 0x4e2   :  { %2386 = vmatmul.f32.gmra.mxu0 %v2172_v29 }
 0x4e4   :  { %2495 = vmatmul.f32.gmra.mxu1 %v2173_v17 }
 0x4e6   :  { %v1771_v60 = vpop.xlane.xlu2 %1770 }
 0x4e7   :  { %9858 = vrcp.f32 %v1771_v60  ;;  %v1948_v26 = vand.u32 2147483648, %v1771_v60  ;;  %v1946_v21 = vand.u32 2147483647, %v1771_v60  ;;  %vm1942_vm6 = vweird.f32 %v1771_v60 }
 0x4e8   :  { %2176 = vmatmul.f32.gmra.mxu2 %v2175_v10 }
 0x4e9   :  { %v1949_v18 = vor.u32 1.1754944e-38, %v1948_v26  ;;  %vm1947_vm9 = vcmp.eq.f32.partialorder %v1946_v21, 8.507059e+37 }
 0x4ed   :  { %v9859_v6 = vpop.eup %9858 }
 0x4ee   :  { %v1938_v19 = vmul.f32 %v9859_v6, %v1771_v60  ;;  %vm1943_vm5 = vweird.f32 %v9859_v6 }
 0x4ef   :  { %vm1944_vm7 = vmor %vm1942_vm6, %vm1943_vm5 }
 0x4f0   :  { %v1939_v7 = vsub.f32 1.0, %v1938_v19 }
 0x4f2   :  { %v1940_v0 = vmul.f32 %v9859_v6, %v1939_v7 }
 0x4f4   :  { %v1941_v3 = vadd.f32 %v9859_v6, %v1940_v0 }
 0x4f6   :  { %v1945_v4 = vsel %vm1944_vm7, %v9859_v6, %v1941_v3 }
 0x4f7   :  { %v1774_v49 = vpop.xlane.xlu1 %1773  ;;  %v1950_v39 = vsel %vm1947_vm9, %v1949_v18, %v1945_v4 }
 0x4f8   :  { %9860 = vrcp.f32 %v1774_v49  ;;  %v1951_v32 = vmul.f32 %v10876_v47, %v1950_v39  ;;  %v1963_v33 = vand.u32 2147483648, %v1774_v49  ;;  %v1961_v47 = vand.u32 2147483647, %v1774_v49 }
 0x4f9   :  { %vm1957_vm11 = vweird.f32 %v1774_v49 }
 0x4fa   :  { %v2064_v42 = vsel %vm1642_vm8, %v1951_v32, 0  ;;  %v1964_v63 = vor.u32 1.1754944e-38, %v1963_v33  ;;  %vm1962_vm13 = vcmp.eq.f32.partialorder %v1961_v47, 8.507059e+37 }
 0x4fb   :  { %v11037_v15 = vand.u32 4294901760, %v2064_v42 }
 0x4fd   :  { %2295 = vmatmul.f32.gmra.mxu3 %v11037_v15  ;;  %v2180_v46 = vsub.f32 %v2064_v42, %v11037_v15 }
 0x4fe   :  { %v9861_v52 = vpop.eup %9860 }
 0x4ff   :  { %v1953_v53 = vmul.f32 %v9861_v52, %v1774_v49  ;;  %v1783_v23 = vpop.xlane.xlu1 %1782  ;;  %v1777_v45 = vpop.xlane.xlu0 %1776  ;;  %2391 = vmatmul.f32.gmra.mxu0 %v2180_v46  ;;  %v2181_v61 = vand.u32 4294901760, %v2180_v46  ;;  %vm1958_vm10 = vweird.f32 %v9861_v52 }
 0x500   :  { %9862 = vrcp.f32 %v1783_v23  ;;  %vm1959_vm12 = vmor %vm1957_vm11, %vm1958_vm10  ;;  %v1978_v16 = vand.u32 2147483648, %v1777_v45  ;;  %v1976_v25 = vand.u32 2147483647, %v1777_v45  ;;  %vm2002_vm0 = vweird.f32 %v1783_v23 }
 0x501   :  { %v1954_v2 = vsub.f32 1.0, %v1953_v53  ;;  %9864 = vrcp.f32 %v1777_v45  ;;  %2501 = vmatmul.f32.gmra.mxu1 %v2181_v61  ;;  %v2182_v37 = vsub.f32 %v2180_v46, %v2181_v61  ;;  %v2008_v17 = vand.u32 2147483648, %v1783_v23 }
 0x502   :  { %v2006_v6 = vand.u32 2147483647, %v1783_v23  ;;  %vm1972_vm2 = vweird.f32 %v1777_v45  ;;  %v1979_v19 = vor.u32 1.1754944e-38, %v1978_v16  ;;  %vm1977_vm5 = vcmp.eq.f32.partialorder %v1976_v25, 8.507059e+37 }
 0x503   :  { %v1955_v24 = vmul.f32 %v9861_v52, %v1954_v2  ;;  %v2183_v11 = vand.u32 4294901760, %v2182_v37  ;;  %v2009_v3 = vor.u32 1.1754944e-38, %v2008_v17 }
 0x504   :  { %vm2007_vm6 = vcmp.eq.f32.partialorder %v2006_v6, 8.507059e+37 }
 0x505   :  { %v1956_v35 = vadd.f32 %v9861_v52, %v1955_v24  ;;  %2184 = vmatmul.f32.gmra.mxu2 %v2183_v11 }
 0x506   :  { %v9863_v14 = vpop.eup %9862 }
 0x507   :  { %v9865_v13 = vpop.eup %9864  ;;  %v1960_v44 = vsel %vm1959_vm12, %v9861_v52, %v1956_v35  ;;  %v1998_v54 = vmul.f32 %v9863_v14, %v1783_v23  ;;  %v1780_v40 = vpop.xlane.xlu2 %1779  ;;  %vm2003_vm14 = vweird.f32 %v9863_v14 }
 0x508   :  { %v1965_v30 = vsel %vm1962_vm13, %v1964_v63, %v1960_v44  ;;  %v1968_v1 = vmul.f32 %v9865_v13, %v1777_v45  ;;  %9866 = vrcp.f32 %v1780_v40  ;;  %vm1973_vm15 = vweird.f32 %v9865_v13  ;;  %vm11045_vm1 = vmor %vm2002_vm0, %vm2003_vm14 }
 0x509   :  { %v1999_v57 = vsub.f32 1.0, %v1998_v54  ;;  %v1966_v55 = vmul.f32 %v10910_v28, %v1965_v30  ;;  %vm1974_vm4 = vmor %vm1972_vm2, %vm1973_vm15  ;;  %v1991_v39 = vand.u32 2147483647, %v1780_v40  ;;  %v1993_v32 = vand.u32 2147483648, %v1780_v40 }
 0x50a   :  { %v1969_v31 = vsub.f32 1.0, %v1968_v1  ;;  %vm1987_vm9 = vweird.f32 %v1780_v40 }
 0x50b   :  { %v2000_v50 = vmul.f32 %v9863_v14, %v1999_v57  ;;  %v2067_v29 = vsel %vm1642_vm8, %v1966_v55, 0  ;;  %v1994_v61 = vor.u32 1.1754944e-38, %v1993_v32  ;;  %vm1992_vm11 = vcmp.eq.f32.partialorder %v1991_v39, 8.507059e+37 }
 0x50c   :  { %v1970_v56 = vmul.f32 %v9865_v13, %v1969_v31  ;;  %v11043_v34 = vand.u32 4294901760, %v2067_v29 }
 0x50d   :  { %v2001_v62 = vadd.f32 %v9863_v14, %v2000_v50  ;;  %v11071_v17 = vpop.f32.mrf.mxu3 }
 0x50e   :  { %v9867_v10 = vpop.eup %9866  ;;  %v1971_v28 = vadd.f32 %v9865_v13, %v1970_v56  ;;  %2299 = vmatmul.f32.gmra.mxu3 %v11043_v34  ;;  %v2188_v26 = vsub.f32 %v2067_v29, %v11043_v34 }
 0x50f   :  { %v1983_v7 = vmul.f32 %v9867_v10, %v1780_v40  ;;  %v2005_v0 = vsel %vm11045_vm1, %v9863_v14, %v2001_v62  ;;  %vm1988_vm7 = vweird.f32 %v9867_v10 }
 0x510   :  { %v1975_v21 = vsel %vm1974_vm4, %v9865_v13, %v1971_v28  ;;  %2396 = vmatmul.f32.gmra.mxu0 %v2188_v26  ;;  %v2189_v49 = vand.u32 4294901760, %v2188_v26  ;;  %v2010_v52 = vsel %vm2007_vm6, %v2009_v3, %v2005_v0  ;;  %vm1989_vm10 = vmor %vm1987_vm9, %vm1988_vm7  ;;  %v11074_v0 = vpop.f32.mrf.mxu2  ;;  %vm3685_vm4 = vcmask 523264  }
 0x511   :  { %v1980_v18 = vsel %vm1977_vm5, %v1979_v19, %v1975_v21  ;;  %v1984_v4 = vsub.f32 1.0, %v1983_v7  ;;  %v2011_v24 = vmul.f32 %v10926_v20, %v2010_v52 }
 0x512   :  { %v1981_v42 = vmul.f32 %v10929_v5, %v1980_v18  ;;  %2507 = vmatmul.f32.gmra.mxu1 %v2189_v49  ;;  %v2190_v53 = vsub.f32 %v2188_v26, %v2189_v49 }
 0x513   :  { %v1985_v46 = vmul.f32 %v9867_v10, %v1984_v4  ;;  %v2076_v63 = vsel %vm1642_vm8, %v2011_v24, 0 }
 0x514   :  { %v2070_v23 = vsel %vm1642_vm8, %v1981_v42, 0  ;;  %v2191_v2 = vand.u32 4294901760, %v2190_v53  ;;  %v11065_v54 = vand.u32 4294901760, %v2076_v63 }
 0x515   :  { %v1986_v45 = vadd.f32 %v9867_v10, %v1985_v46  ;;  %v11055_v33 = vand.u32 4294901760, %v2070_v23  ;;  %v11079_v18 = vpop.f32.mrf.mxu3 }
 0x516   :  { %2192 = vmatmul.f32.gmra.mxu2 %v2191_v2 }
 0x517   :  { %v1990_v47 = vsel %vm1989_vm10, %v9867_v10, %v1986_v45  ;;  %2303 = vmatmul.f32.gmra.mxu3 %v11055_v33  ;;  %v2196_v5 = vsub.f32 %v2070_v23, %v11055_v33 }
 0x518   :  { %v1995_v37 = vsel %vm1992_vm11, %v1994_v61, %v1990_v47  ;;  %v11083_v42 = vpop.f32.mrf.mxu2 }
 0x519   :  { %2401 = vmatmul.f32.gmra.mxu0 %v2196_v5  ;;  %v2197_v35 = vand.u32 4294901760, %v2196_v5  ;;  %v1996_v14 = vmul.f32 %v10943_v51, %v1995_v37  ;;  %v2212_v51 = vsub.f32 %v2076_v63, %v11065_v54  ;;  %v11164_v63 = vpop.f32.mrf.mxu1 }
 0x51b   :  { %2513 = vmatmul.f32.gmra.mxu1 %v2197_v35  ;;  %v2198_v11 = vsub.f32 %v2196_v5, %v2197_v35  ;;  %v2073_v13 = vsel %vm1642_vm8, %v1996_v14, 0  ;;  %v2213_v31 = vand.u32 4294901760, %v2212_v51  ;;  %v11158_v14 = vpop.f32.mrf.mxu0 }
 0x51c   :  { %v11063_v44 = vand.u32 4294901760, %v2073_v13 }
 0x51d   :  { %v2199_v20 = vand.u32 4294901760, %v2198_v11  ;;  %v2214_v55 = vsub.f32 %v2212_v51, %v2213_v31 }
 0x51e   :  { %v2204_v40 = vsub.f32 %v2073_v13, %v11063_v44 }
 0x51f   :  { %2200 = vmatmul.f32.gmra.mxu2 %v2199_v20  ;;  %2307 = vmatmul.f32.gmra.mxu3 %v11063_v44  ;;  %v2215_v50 = vand.u32 4294901760, %v2214_v55 }
 0x520   :  { %v2205_v30 = vand.u32 4294901760, %v2204_v40  ;;  %v11090_v52 = vpop.f32.mrf.mxu2 }
 0x521   :  { %2406 = vmatmul.f32.gmra.mxu0 %v2204_v40 }
 0x522   :  { %v2206_v1 = vsub.f32 %v2204_v40, %v2205_v30 }
 0x523   :  { %2519 = vmatmul.f32.gmra.mxu1 %v2205_v30  ;;  %v11168_v11 = vpop.f32.mrf.mxu0  ;;  %v11183_v30 = vpop.f32.mrf.mxu1 }
 0x524   :  { %v2207_v57 = vand.u32 4294901760, %v2206_v1 }
 0x527   :  { %2208 = vmatmul.f32.gmra.mxu2 %v2207_v57  ;;  %2311 = vmatmul.f32.gmra.mxu3 %v11065_v54 }
 0x528   :  { %v11096_v53 = vpop.f32.mrf.mxu2 }
 0x529   :  { %2411 = vmatmul.f32.gmra.mxu0 %v2212_v51 }
 0x52b   :  { %2525 = vmatmul.f32.gmra.mxu1 %v2213_v31  ;;  %v11191_v57 = vpop.f32.mrf.mxu0 }
 0x52f   :  { %2216 = vmatmul.f32.gmra.mxu2 %v2215_v50  ;;  %v11197_v50 = vpop.f32.mrf.mxu1 }
 0x530   :  { %v11102_v45 = vpop.f32.mrf.mxu2 }
 0x531   :  { %v1786_v16 = vpop.xlane.xlu0 %1785 }
 0x532   :  { %9868 = vrcp.f32 %v1786_v16  ;;  %v2023_v62 = vand.u32 2147483648, %v1786_v16  ;;  %v2021_v60 = vand.u32 2147483647, %v1786_v16  ;;  %vm2017_vm13 = vweird.f32 %v1786_v16 }
 0x534   :  { %v2024_v28 = vor.u32 1.1754944e-38, %v2023_v62  ;;  %vm2022_vm15 = vcmp.eq.f32.partialorder %v2021_v60, 8.507059e+37 }
 0x538   :  { %v9869_v56 = vpop.eup %9868 }
 0x539   :  { %v2013_v25 = vmul.f32 %v9869_v56, %v1786_v16  ;;  %vm2018_vm12 = vweird.f32 %v9869_v56 }
 0x53a   :  { %vm2019_vm14 = vmor %vm2017_vm13, %vm2018_vm12 }
 0x53b   :  { %v2014_v29 = vsub.f32 1.0, %v2013_v25  ;;  %v11203_v25 = vpop.f32.mrf.mxu0 }
 0x53d   :  { %v2015_v10 = vmul.f32 %v9869_v56, %v2014_v29  ;;  %v11205_v29 = vpop.f32.mrf.mxu1 }
 0x53f   :  { %v2016_v6 = vadd.f32 %v9869_v56, %v2015_v10 }
 0x541   :  { %v2020_v19 = vsel %vm2019_vm14, %v9869_v56, %v2016_v6 }
 0x542   :  { %v2025_v7 = vsel %vm2022_vm15, %v2024_v28, %v2020_v19  ;;  %v2737_v28 = vld [vmem:[#allocation7 + $0x10] sm:$0xff] }
 0x543   :  { %v2026_v26 = vmul.f32 %v10991_v8, %v2025_v7  ;;  %v11086_v8 = vpop.f32.mrf.mxu3  ;;  %v11211_v60 = vpop.f32.mrf.mxu0 }
 0x545   :  { %v2079_v21 = vsel %vm1642_vm8, %v2026_v26, 0  ;;  %v11213_v6 = vpop.f32.mrf.mxu1  ;;  %v11219_v26 = vand.u32 4294901760, %v2737_v28 }
 0x546   :  { %v11077_v3 = vand.u32 4294901760, %v2079_v21 }
 0x548   :  { %2315 = vmatmul.f32.gmra.mxu3 %v11077_v3  ;;  %v2220_v4 = vsub.f32 %v2079_v21, %v11077_v3  ;;  %v2805_v21 = vsub.f32 %v2737_v28, %v11219_v26 }
 0x54a   :  { %2416 = vmatmul.f32.gmra.mxu0 %v2220_v4  ;;  %v2221_v49 = vand.u32 4294901760, %v2220_v4 }
 0x54b   :  { %v11092_v46 = vpop.f32.mrf.mxu3  ;;  %v11108_v2 = vpop.f32.mrf.mxu2 }
 0x54c   :  { %2531 = vmatmul.f32.gmra.mxu1 %v2221_v49  ;;  %v2222_v39 = vsub.f32 %v2220_v4, %v2221_v49  ;;  %v2806_v4 = vand.u32 4294901760, %v2805_v21 }
 0x54e   :  { %v2223_v32 = vand.u32 4294901760, %v2222_v39  ;;  %v2807_v49 = vsub.f32 %v2805_v21, %v2806_v4  ;;  %v11226_v39 = vpop.f32.mrf.mxu1 }
 0x54f   :  { %13258 = vst [vmem:[#allocation27_spill] sm:$0xff] %v11226_v39 }
 0x550   :  { %2224 = vmatmul.f32.gmra.mxu2 %v2223_v32  ;;  %2641 = vmatmul.f32.vlgmr.msra.gmra.mxu3 %v10873_v12 }
 0x553   :  { %v11098_v23 = vpop.f32.mrf.mxu3  ;;  %v11114_v61 = vpop.f32.mrf.mxu2 }
 0x558   :  { %2558 = vmatmul.f32.vlgmr.msra.gmra.mxu2 %v10873_v12  ;;  %2645 = vmatmul.f32.gmra.mxu3 %v10889_v27 }
 0x55b   :  { %v11104_v12 = vpop.f32.mrf.mxu3 }
 0x560   :  { %2562 = vmatmul.f32.gmra.mxu2 %v10889_v27  ;;  %2649 = vmatmul.f32.gmra.mxu3 %v10903_v36 }
 0x563   :  { %v11110_v27 = vpop.f32.mrf.mxu3 }
 0x568   :  { %2566 = vmatmul.f32.gmra.mxu2 %v10903_v36  ;;  %2653 = vmatmul.f32.gmra.mxu3 %v10924_v9 }
 0x56b   :  { %v11118_v36 = vpop.f32.mrf.mxu3 }
 0x570   :  { %2570 = vmatmul.f32.gmra.mxu2 %v10924_v9  ;;  %2657 = vmatmul.f32.gmra.mxu3 %v10941_v58  ;;  %v11122_v9 = vpop.f32.mrf.mxu2 }
 0x573   :  { %v11124_v24 = vpop.f32.mrf.mxu3 }
 0x578   :  { %2574 = vmatmul.f32.gmra.mxu2 %v10941_v58  ;;  %2661 = vmatmul.f32.gmra.mxu3 %v10999_v59  ;;  %v11128_v58 = vpop.f32.mrf.mxu2 }
 0x57b   :  { %v11130_v47 = vpop.f32.mrf.mxu3 }
 0x580   :  { %2578 = vmatmul.f32.gmra.mxu2 %v10999_v59  ;;  %2665 = vmatmul.f32.gmra.mxu3 %v11001_v22  ;;  %v11134_v59 = vpop.f32.mrf.mxu2 }
 0x588   :  { %2582 = vmatmul.f32.gmra.mxu2 %v11001_v22  ;;  %2669 = vmatmul.f32.gmra.mxu3 %v11015_v38  ;;  %v11136_v22 = vpop.f32.mrf.mxu3  ;;  %v11140_v5 = vpop.f32.mrf.mxu2 }
 0x590   :  { %2586 = vmatmul.f32.gmra.mxu2 %v11015_v38  ;;  %2673 = vmatmul.f32.gmra.mxu3 %v11024_v41 }
 0x591   :  { %v11142_v38 = vpop.f32.mrf.mxu3 }
 0x592   :  { %13247 = vst [vmem:[#allocation16_spill] sm:$0xff] %v11142_v38 }
 0x598   :  { %2590 = vmatmul.f32.gmra.mxu2 %v11024_v41  ;;  %2677 = vmatmul.f32.gmra.mxu3 %v11030_v43 }
 0x599   :  { %v11146_v37 = vpop.f32.mrf.mxu2 }
 0x59a   :  { %13248 = vst [vmem:[#allocation17_spill] sm:$0xff] %v11146_v37  ;;  %v11148_v41 = vpop.f32.mrf.mxu3 }
 0x5a0   :  { %2594 = vmatmul.f32.gmra.mxu2 %v11030_v43  ;;  %2681 = vmatmul.f32.gmra.mxu3 %v11037_v15 }
 0x5a2   :  { %v11152_v35 = vpop.f32.mrf.mxu2  ;;  %v11156_v43 = vpop.f32.mrf.mxu3 }
 0x5a3   :  { %13249 = vst [vmem:[#allocation18_spill] sm:$0xff] %v11156_v43 }
 0x5a8   :  { %2598 = vmatmul.f32.gmra.mxu2 %v11037_v15  ;;  %2685 = vmatmul.f32.gmra.mxu3 %v11043_v34 }
 0x5aa   :  { %v11162_v15 = vpop.f32.mrf.mxu2 }
 0x5ab   :  { %13250 = vst [vmem:[#allocation19_spill] sm:$0xff] %v11162_v15 }
 0x5b0   :  { %2602 = vmatmul.f32.gmra.mxu2 %v11043_v34  ;;  %2689 = vmatmul.f32.gmra.mxu3 %v11055_v33  ;;  %v11166_v34 = vpop.f32.mrf.mxu3 }
 0x5b1   :  { %13251 = vst [vmem:[#allocation20_spill] sm:$0xff] %v11166_v34 }
 0x5b2   :  { %v11174_v20 = vpop.f32.mrf.mxu2 }
 0x5b3   :  { %13252 = vst [vmem:[#allocation21_spill] sm:$0xff] %v11174_v20 }
 0x5b8   :  { %2606 = vmatmul.f32.gmra.mxu2 %v11055_v33  ;;  %2693 = vmatmul.f32.gmra.mxu3 %v11063_v44  ;;  %v2738_v33 = vld [vmem:[#allocation7 + $0x18] sm:$0xff] }
 0x5b9   :  { %v11172_v13 = vand.u32 4294901760, %v2738_v33 }
 0x5bb   :  { %2762 = vmatpush.msra.mxu0 %v11172_v13  ;;  %v11180_v40 = vsub.f32 %v2738_v33, %v11172_v13  ;;  %2879 = vmatpush.msrb.mxu3 %v11172_v13 }
 0x5bd   :  { %2845 = vmatpush.msrb.mxu2 %v11180_v40  ;;  %2764 = vmatpush.msra.mxu0 %v11219_v26 }
 0x5be   :  { %2881 = vmatpush.msrb.mxu3 %v11219_v26 }
 0x5bf   :  { %2848 = vmatpush.msrb.mxu2 %v2805_v21 }
 0x5c0   :  { %2610 = vmatmul.f32.gmra.mxu2 %v11063_v44  ;;  %2697 = vmatmul.f32.gmra.mxu3 %v11065_v54 }
 0x5c8   :  { %2614 = vmatmul.f32.gmra.mxu2 %v11065_v54  ;;  %2701 = vmatmul.f32.gmra.mxu3 %v11077_v3  ;;  %v13087_v54 = vand.u32 4294901760, %v11180_v40 }
 0x5ca   :  { %v2801_v51 = vsub.f32 %v11180_v40, %v13087_v54  ;;  %v11238_v54 = vpop.f32.mrf.mxu1 }
 0x5cb   :  { %v11176_v44 = vpop.f32.mrf.mxu3 }
 0x5cc   :  { %13253 = vst [vmem:[#allocation22_spill] sm:$0xff] %v11176_v44  ;;  %v2802_v1 = vand.u32 4294901760, %v2801_v51  ;;  %v2808_v51 = vand.u32 4294901760, %v2807_v49 }
 0x5ce   :  { %2803 = vmatpush.msra.mxu1 %v2802_v1 }
 0x5d0   :  { %2618 = vmatmul.f32.gmra.mxu2 %v11077_v3  ;;  %v11224_v3 = vpop.f32.mrf.mxu0  ;;  %2809 = vmatpush.msra.mxu1 %v2808_v51 }
 0x5d3   :  { %v11193_v31 = vpop.f32.mrf.mxu2  ;;  %v11195_v55 = vpop.f32.mrf.mxu3 }
 0x5d4   :  { %13254 = vst [vmem:[#allocation23_spill] sm:$0xff] %v11193_v31 }
 0x5d8   :  { %v11232_v1 = vpop.f32.mrf.mxu0 }
 0x5db   :  { %v11199_v16 = vpop.f32.mrf.mxu2  ;;  %v11201_v56 = vpop.f32.mrf.mxu3 }
 0x5dc   :  { %13255 = vst [vmem:[#allocation24_spill] sm:$0xff] %v11201_v56  ;;  %v11246_v56 = vpop.f32.mrf.mxu1 }
 0x5dd   :  { %13264 = vst [vmem:[#allocation33_spill] sm:$0xff] %v11246_v56 }
 0x5e0   :  { %v11240_v44 = vpop.f32.mrf.mxu0 }
 0x5e1   :  { %13261 = vst [vmem:[#allocation30_spill] sm:$0xff] %v11240_v44 }
 0x5e3   :  { %v11207_v62 = vpop.f32.mrf.mxu2  ;;  %v11209_v10 = vpop.f32.mrf.mxu3 }
 0x5e4   :  { %13256 = vst [vmem:[#allocation25_spill] sm:$0xff] %v11207_v62 }
 0x5e8   :  { %v2382_v34 = vpop.f32.mrf.mxu0 }
 0x5eb   :  { %v11215_v19 = vpop.f32.mrf.mxu2  ;;  %v11217_v7 = vpop.f32.mrf.mxu3 }
 0x5ec   :  { %13257 = vst [vmem:[#allocation26_spill] sm:$0xff] %v11217_v7  ;;  %v2736_v7 = vld [vmem:[#allocation7 + $0x8] sm:$0xff] }
 0x5ed   :  { %v11252_v51 = vand.u32 4294901760, %v2736_v7 }
 0x5ef   :  { %2766 = vmatpush.msra.mxu0 %v11252_v51  ;;  %2883 = vmatpush.msrb.mxu3 %v11252_v51 }
 0x5f3   :  { %v11228_v32 = vpop.f32.mrf.mxu2  ;;  %v11230_v33 = vpop.f32.mrf.mxu3 }
 0x5f4   :  { %13259 = vst [vmem:[#allocation28_spill] sm:$0xff] %v11228_v32 }
 0x5fb   :  { %v11234_v48 = vpop.f32.mrf.mxu2  ;;  %v11236_v28 = vpop.f32.mrf.mxu3 }
 0x5fc   :  { %13260 = vst [vmem:[#allocation29_spill] sm:$0xff] %v11236_v28  ;;  %v2811_v28 = vsub.f32 %v2736_v7, %v11252_v51 }
 0x5fe   :  { %v2812_v20 = vand.u32 4294901760, %v2811_v28  ;;  %2851 = vmatpush.msrb.mxu2 %v2811_v28 }
 0x603   :  { %v11242_v31 = vpop.f32.mrf.mxu2  ;;  %v11244_v21 = vpop.f32.mrf.mxu3 }
 0x604   :  { %13262 = vst [vmem:[#allocation31_spill] sm:$0xff] %v11242_v31  ;;  %v11257_v31 = vpop.f32.mrf.mxu1 }
 0x605   :  { %13263 = vst [vmem:[#allocation32_spill] sm:$0xff] %v11244_v21  ;;  %v2813_v21 = vsub.f32 %v2811_v28, %v2812_v20 }
 0x607   :  { %v2814_v43 = vand.u32 4294901760, %v2813_v21 }
 0x609   :  { %2815 = vmatpush.msra.mxu1 %v2814_v43 }
 0x60b   :  { %v11248_v62 = vpop.f32.mrf.mxu2  ;;  %v11250_v49 = vpop.f32.mrf.mxu3 }
 0x60c   :  { %13265 = vst [vmem:[#allocation34_spill] sm:$0xff] %v11250_v49  ;;  %v11263_v49 = vpop.f32.mrf.mxu0  ;;  %v11265_v15 = vpop.f32.mrf.mxu1 }
 0x60d   :  { %13268 = vst [vmem:[#allocation37_spill] sm:$0xff] %v11263_v49 }
 0x60e   :  { %13269 = vst [vmem:[#allocation38_spill] sm:$0xff] %v11265_v15 }
 0x613   :  { %v11259_v56 = vpop.f32.mrf.mxu2  ;;  %v11261_v32 = vpop.f32.mrf.mxu3 }
 0x614   :  { %13266 = vst [vmem:[#allocation35_spill] sm:$0xff] %v11259_v56  ;;  %v2392_v37 = vpop.f32.mrf.mxu0  ;;  %v11271_v44 = vpop.f32.mrf.mxu1 }
 0x615   :  { %13267 = vst [vmem:[#allocation36_spill] sm:$0xff] %v11261_v32  ;;  %v2735_v32 = vld [vmem:[#allocation7] sm:$0xff] }
 0x616   :  { %v2767_v49 = vand.u32 4294901760, %v2735_v32 }
 0x618   :  { %2768 = vmatpush.msra.mxu0 %v2767_v49  ;;  %2885 = vmatpush.msrb.mxu3 %v2767_v49 }
 0x61b   :  { %v11267_v38 = vpop.f32.mrf.mxu2  ;;  %v11269_v7 = vpop.f32.mrf.mxu3 }
 0x61c   :  { %13270 = vst [vmem:[#allocation39_spill] sm:$0xff] %v11267_v38  ;;  %v11277_v56 = vpop.f32.mrf.mxu0  ;;  %v11279_v21 = vpop.f32.mrf.mxu1  ;;  %v2817_v38 = vsub.f32 %v2735_v32, %v2767_v49 }
 0x61d   :  { %13271 = vst [vmem:[#allocation40_spill] sm:$0xff] %v11269_v7  ;;  %v13278_v7 = vand.u32 4294901760, %v11180_v40  ;;  %v2281_v40 = vadd.f32 %v11110_v27, %v11114_v61  ;;  %v2277_v27 = vadd.f32 %v11104_v12, %v11108_v2  ;;  %v2305_v2 = vadd.f32 %v11148_v41, %v11152_v35 }
 0x61e   :  { %13274 = vst [vmem:[#allocation43_spill] sm:$0xff] %v11277_v56  ;;  %2854 = vmatpush.msrb.mxu2 %v2817_v38  ;;  %v2257_v56 = vadd.f32 %v11071_v17, %v11074_v0  ;;  %v2289_v0 = vadd.f32 %v11124_v24, %v11128_v58  ;;  %v2297_v24 = vadd.f32 %v11136_v22, %v11140_v5 }
 0x61f   :  { %13275 = vst [vmem:[#allocation44_spill] sm:$0xff] %v11279_v21  ;;  %2914 = vmatpush.msrb.mxu0 %v13278_v7  ;;  %v2373_v61 = vadd.f32 %v11232_v1, %v2281_v40  ;;  %v2368_v5 = vadd.f32 %v11224_v3, %v2277_v27  ;;  %v13285_v3 = vld [vmem:[#allocation19_spill] sm:$0xff]  ;;  %v10066_v1 = vld [vmem:[#allocation4 + $0x10] sm:$0xff]  ;;  %v10068_v27 = vld [vmem:[#allocation4 + $0x20] sm:$0xff] }
 0x620   :  { %v2393_v41 = vadd.f32 %v2392_v37, %v2297_v24 }
 0x621   :  { %2918 = vmatpush.msrb.mxu0 %v2806_v4 }
 0x623   :  { %v11273_v39 = vpop.f32.mrf.mxu2  ;;  %v11275_v28 = vpop.f32.mrf.mxu3  ;;  %2922 = vmatpush.msrb.mxu0 %v2812_v20  ;;  %v2293_v20 = vadd.f32 %v11130_v47, %v11134_v59  ;;  %v13280_v59 = vld [vmem:[#allocation39_spill] sm:$0xff] }
 0x624   :  { %13272 = vst [vmem:[#allocation41_spill] sm:$0xff] %v11273_v39  ;;  %v2265_v39 = vadd.f32 %v11086_v8, %v11090_v52  ;;  %v2402_v21 = vpop.f32.mrf.mxu0  ;;  %v2343_v52 = vadd.f32 %v11158_v14, %v2257_v56  ;;  %v2514_v4 = vpop.f32.mrf.mxu1 }
 0x625   :  { %13273 = vst [vmem:[#allocation42_spill] sm:$0xff] %v11275_v28  ;;  %v2818_v28 = vand.u32 4294901760, %v2817_v38 }
 0x626   :  { %v2353_v32 = vadd.f32 %v11191_v57, %v2265_v39  ;;  %v2443_v58 = vadd.f32 %v11164_v63, %v2343_v52 }
 0x627   :  { %2926 = vmatpush.msrb.mxu0 %v2818_v28 }
 0x62b   :  { %v11281_v43 = vpop.f32.mrf.mxu2  ;;  %v11283_v15 = vpop.f32.mrf.mxu3 }
 0x62c   :  { %13276 = vst [vmem:[#allocation45_spill] sm:$0xff] %v11281_v43  ;;  %v2273_v43 = vadd.f32 %v11098_v23, %v11102_v45  ;;  %v2261_v23 = vadd.f32 %v11079_v18, %v11083_v42  ;;  %v2269_v45 = vadd.f32 %v11092_v46, %v11096_v53  ;;  %v2383_v18 = vadd.f32 %v2382_v34, %v2289_v0  ;;  %v2407_v12 = vpop.f32.mrf.mxu0  ;;  %v2520_v56 = vpop.f32.mrf.mxu1 }
 0x62d   :  { %13277 = vst [vmem:[#allocation46_spill] sm:$0xff] %v11283_v15  ;;  %v2819_v15 = vsub.f32 %v2817_v38, %v2818_v28  ;;  %v2455_v38 = vadd.f32 %v11197_v50, %v2353_v32  ;;  %v2479_v34 = vadd.f32 %v11238_v54, %v2373_v61  ;;  %v13290_v32 = vld [vmem:[#allocation20_spill] sm:$0xff] }
 0x62e   :  { %v2363_v17 = vadd.f32 %v11211_v60, %v2273_v43  ;;  %v2348_v53 = vadd.f32 %v11168_v11, %v2261_v23  ;;  %v2358_v22 = vadd.f32 %v11203_v25, %v2269_v45  ;;  %v2285_v11 = vadd.f32 %v11118_v36, %v11122_v9  ;;  %v13279_v9 = vld [vmem:[#allocation27_spill] sm:$0xff]  ;;  %v13281_v60 = vld [vmem:[#allocation30_spill] sm:$0xff]  ;;  %v13289_v43 = vld [vmem:[#allocation21_spill] sm:$0xff] }
 0x62f   :  { %v2820_v8 = vand.u32 4294901760, %v2819_v15  ;;  %v2568_v42 = vadd.f32 %v11215_v19, %v2455_v38  ;;  %v2560_v15 = vadd.f32 %v11199_v16, %v2443_v58  ;;  %v2584_v57 = vadd.f32 %v11248_v62, %v2479_v34  ;;  %v13283_v19 = vld [vmem:[#allocation17_spill] sm:$0xff]  ;;  %v13293_v38 = vld [vmem:[#allocation31_spill] sm:$0xff]  ;;  %v13294_v58 = vld [vmem:[#allocation36_spill] sm:$0xff] }
 0x630   :  { %v2467_v46 = vadd.f32 %v11213_v6, %v2363_v17  ;;  %v2491_v50 = vadd.f32 %v11257_v31, %v2383_v18  ;;  %v2403_v16 = vadd.f32 %v2402_v21, %v2305_v2  ;;  %v2449_v54 = vadd.f32 %v11183_v30, %v2348_v53  ;;  %v13282_v6 = vld [vmem:[#allocation37_spill] sm:$0xff]  ;;  %v13284_v31 = vld [vmem:[#allocation16_spill] sm:$0xff]  ;;  %v13286_v30 = vld [vmem:[#allocation18_spill] sm:$0xff] }
 0x631   :  { %2821 = vmatpush.msra.mxu1 %v2820_v8  ;;  %v2651_v35 = vadd.f32 %v11209_v10, %v2568_v42  ;;  %v2461_v25 = vadd.f32 %v11205_v29, %v2358_v22  ;;  %v2473_v47 = vadd.f32 %v13279_v9, %v2368_v5  ;;  %v2378_v10 = vadd.f32 %v13281_v60, %v2285_v11  ;;  %v10067_v8 = vld [vmem:[#allocation4] sm:$0xff]  ;;  %v13297_v11 = vld [vmem:[#allocation26_spill] sm:$0xff] }
 0x632   :  { %v2576_v63 = vadd.f32 %v11234_v48, %v2467_v46  ;;  %v2643_v48 = vadd.f32 %v11195_v55, %v2560_v15  ;;  %v2592_v37 = vadd.f32 %v13280_v59, %v2491_v50  ;;  %v2388_v62 = vadd.f32 %v13282_v6, %v2293_v20  ;;  %v13295_v46 = vld [vmem:[#allocation43_spill] sm:$0xff]  ;;  %v13296_v15 = vld [vmem:[#allocation33_spill] sm:$0xff]  ;;  %v10070_v60 = vld [vmem:[#allocation4 + $0x40] sm:$0xff] }
 0x633   :  { %v11296_v7 = vpop.f32.mrf.mxu2  ;;  %2949 = vmatpush.msrb.mxu1 %v11172_v13  ;;  %v11311_v14 = vpop.f32.mrf.mxu3  ;;  %v2503_v55 = vadd.f32 %v11271_v44, %v2393_v41  ;;  %v2309_v39 = vadd.f32 %v13286_v30, %v13285_v3  ;;  %v2707_v29 = vmul.f32 %v10066_v1, %v2651_v35  ;;  %v2313_v40 = vadd.f32 %v13290_v32, %v13289_v43  ;;  %v13291_v17 = vld [vmem:[#allocation45_spill] sm:$0xff]  ;;  %v13304_v6 = vld [vmem:[#allocation44_spill] sm:$0xff]  ;;  %v13306_v3 = vld [vmem:[#allocation22_spill] sm:$0xff] }
 0x634   :  { %v2659_v36 = vadd.f32 %v11230_v33, %v2576_v63  ;;  %v2705_v52 = vmul.f32 %v10067_v8, %v2643_v48  ;;  %v2515_v23 = vadd.f32 %v2514_v4, %v2403_v16  ;;  %v13292_v44 = vld [vmem:[#allocation25_spill] sm:$0xff]  ;;  %v2580_v24 = vadd.f32 %v13293_v38, %v2473_v47  ;;  %v2412_v2 = vpop.f32.mrf.mxu0  ;;  %v10069_v4 = vld [vmem:[#allocation4 + $0x30] sm:$0xff] }
 0x635   :  { %2951 = vmatpush.msrb.mxu1 %v11219_v26  ;;  %v2301_v26 = vadd.f32 %v13284_v31, %v13283_v19  ;;  %v2600_v0 = vadd.f32 %v13291_v17, %v2503_v55  ;;  %v2564_v45 = vadd.f32 %v13292_v44, %v2449_v54  ;;  %v2675_v18 = vadd.f32 %v13294_v58, %v2592_v37  ;;  %v13299_v16 = vld [vmem:[#allocation38_spill] sm:$0xff]  ;;  %v13302_v59 = vld [vmem:[#allocation29_spill] sm:$0xff]  ;;  %v13305_v55 = vld [vmem:[#allocation23_spill] sm:$0xff] }
 0x636   :  { %v2709_v61 = vmul.f32 %v10068_v27, %v2659_v36  ;;  %v2485_v22 = vadd.f32 %v13296_v15, %v2378_v10  ;;  %v2408_v63 = vadd.f32 %v2407_v12, %v2309_v39  ;;  %v2721_v34 = vadd.f32 %v2707_v29, %v2705_v52  ;;  %v13300_v54 = vld [vmem:[#allocation42_spill] sm:$0xff]  ;;  %v13301_v36 = vld [vmem:[#allocation24_spill] sm:$0xff]  ;;  %v13303_v12 = vld [vmem:[#allocation41_spill] sm:$0xff] }
 0x637   :  { %2953 = vmatpush.msrb.mxu1 %v11252_v51  ;;  %v13288_v51 = vld [vmem:[#allocation32_spill] sm:$0xff]  ;;  %v2398_v53 = vadd.f32 %v13295_v46, %v2301_v26  ;;  %v2413_v35 = vadd.f32 %v2412_v2, %v2313_v40  ;;  %v2497_v48 = vadd.f32 %v13299_v16, %v2388_v62  ;;  %v2647_v9 = vadd.f32 %v13301_v36, %v2564_v45  ;;  %v2526_v26 = vpop.f32.mrf.mxu1  ;;  %v10071_v62 = vld [vmem:[#allocation4 + $0x18] sm:$0xff]  ;;  %v10073_v40 = vld [vmem:[#allocation4 + $0x8] sm:$0xff] }
 0x638   :  { %v2667_v28 = vadd.f32 %v13288_v51, %v2584_v57  ;;  %v13298_v57 = vld [vmem:[#allocation35_spill] sm:$0xff]  ;;  %v2723_v47 = vadd.f32 %v2721_v34, %v2709_v61  ;;  %v2663_v37 = vadd.f32 %v13302_v59, %v2580_v24  ;;  %v2317_v30 = vadd.f32 %v13306_v3, %v13305_v55  ;;  %v10072_v51 = vld [vmem:[#allocation4 + $0x50] sm:$0xff]  ;;  %v10074_v52 = vld [vmem:[#allocation4 + $0x28] sm:$0xff] }
 0x639   :  { %2955 = vmatpush.msrb.mxu1 %v2767_v49  ;;  %v13287_v49 = vld [vmem:[#allocation28_spill] sm:$0xff]  ;;  %v2588_v50 = vadd.f32 %v13298_v57, %v2485_v22  ;;  %v2596_v10 = vadd.f32 %v13303_v12, %v2497_v48  ;;  %v2509_v19 = vadd.f32 %v13304_v6, %v2398_v53  ;;  %v2521_v29 = vadd.f32 %v2520_v56, %v2408_v63  ;;  %v10076_v46 = vld [vmem:[#allocation4 + $0x38] sm:$0xff]  ;;  %v13309_v2 = vld [vmem:[#allocation46_spill] sm:$0xff] }
 0x63a   :  { %v2572_v33 = vadd.f32 %v13287_v49, %v2461_v25  ;;  %v2711_v41 = vmul.f32 %v10069_v4, %v2667_v28  ;;  %v2683_v25 = vadd.f32 %v13300_v54, %v2600_v0  ;;  %v13307_v49 = vld [vmem:[#allocation34_spill] sm:$0xff]  ;;  %v2527_v32 = vadd.f32 %v2526_v26, %v2413_v35  ;;  %v13308_v45 = vld [vmem:[#allocation40_spill] sm:$0xff]  ;;  %v10077_v63 = vld [vmem:[#allocation4 + $0x48] sm:$0xff] }
 0x63b   :  { %v2607_v13 = vpop.f32.mrf.mxu2  ;;  %v11350_v21 = vpop.f32.mrf.mxu3  ;;  %v2604_v43 = vadd.f32 %v11296_v7, %v2509_v19  ;;  %v2706_v8 = vmul.f32 %v10073_v40, %v2647_v9  ;;  %v2710_v17 = vmul.f32 %v10074_v52, %v2663_v37  ;;  %v2679_v27 = vadd.f32 %v13308_v45, %v2596_v10  ;;  %v10075_v61 = vld [vmem:[#allocation4 + $0x60] sm:$0xff]  ;;  %v10078_v4 = vld [vmem:[#allocation4 + $0x70] sm:$0xff]  ;;  %v10080_v36 = vld [vmem:[#allocation4 + $0x68] sm:$0xff] }
 0x63c   :  { %v2608_v5 = vadd.f32 %v2607_v13, %v2515_v23  ;;  %v2655_v20 = vadd.f32 %v13297_v11, %v2572_v33  ;;  %v2713_v13 = vmul.f32 %v10070_v60, %v2675_v18  ;;  %v2725_v1 = vadd.f32 %v2723_v47, %v2711_v41  ;;  %v2417_v44 = vpop.f32.mrf.mxu0  ;;  %v10081_v6 = vld [vmem:[#allocation4 + $0x78] sm:$0xff] }
 0x63d   :  { %v2671_v33 = vadd.f32 %v13307_v49, %v2588_v50  ;;  %v2715_v28 = vmul.f32 %v10072_v51, %v2683_v25  ;;  %v2418_v58 = vadd.f32 %v2417_v44, %v2317_v30  ;;  %v2687_v15 = vadd.f32 %v13309_v2, %v2604_v43 }
 0x63e   :  { %v2691_v31 = vadd.f32 %v11311_v14, %v2608_v5  ;;  %v2708_v39 = vmul.f32 %v10071_v62, %v2655_v20  ;;  %v2727_v14 = vadd.f32 %v2725_v1, %v2713_v13  ;;  %v2714_v34 = vmul.f32 %v10077_v63, %v2679_v27 }
 0x63f   :  { %v2712_v53 = vmul.f32 %v10076_v46, %v2671_v33  ;;  %v2532_v35 = vpop.f32.mrf.mxu1  ;;  %v2968_v33 = vld [vmem:[#allocation9 + $0x18] sm:$0xff] }
 0x640   :  { %v2717_v38 = vmul.f32 %v10075_v61, %v2691_v31  ;;  %v2722_v18 = vadd.f32 %v2708_v39, %v2706_v8  ;;  %v2729_v7 = vadd.f32 %v2727_v14, %v2715_v28  ;;  %v2533_v48 = vadd.f32 %v2532_v35, %v2418_v58  ;;  %v2967_v28 = vld [vmem:[#allocation9 + $0x10] sm:$0xff]  ;;  %v2966_v8 = vld [vmem:[#allocation9 + $0x8] sm:$0xff] }
 0x641   :  { %v2991_v51 = vand.u32 4294901760, %v2968_v33  ;;  %v2993_v40 = vand.u32 4294901760, %v2967_v28  ;;  %v2995_v14 = vand.u32 4294901760, %v2966_v8 }
 0x642   :  { %v2724_v5 = vadd.f32 %v2722_v18, %v2710_v17  ;;  %v2731_v11 = vadd.f32 %v2729_v7, %v2717_v38 }
 0x643   :  { %v2611_v42 = vpop.f32.mrf.mxu2  ;;  %v2698_v0 = vpop.f32.mrf.mxu3  ;;  %2992 = vmatpush.msra.mxu2 %v2991_v51  ;;  %v3035_v17 = vsub.f32 %v2967_v28, %v2993_v40  ;;  %v3041_v38 = vsub.f32 %v2966_v8, %v2995_v14 }
 0x644   :  { %v2612_v56 = vadd.f32 %v2611_v42, %v2521_v29  ;;  %v2726_v57 = vadd.f32 %v2724_v5, %v2712_v53  ;;  %v10079_v42 = vld [vmem:[#allocation4 + $0x58] sm:$0xff] }
 0x645   :  { %v2716_v50 = vmul.f32 %v10079_v42, %v2687_v15  ;;  %2994 = vmatpush.msra.mxu2 %v2993_v40  ;;  %v3036_v61 = vand.u32 4294901760, %v3035_v17  ;;  %v3042_v18 = vand.u32 4294901760, %v3041_v38 }
 0x646   :  { %v2695_v20 = vadd.f32 %v11350_v21, %v2612_v56  ;;  %v2728_v25 = vadd.f32 %v2726_v57, %v2714_v34 }
 0x647   :  { %2996 = vmatpush.msra.mxu2 %v2995_v14  ;;  %v3037_v58 = vsub.f32 %v3035_v17, %v3036_v61  ;;  %v3043_v2 = vsub.f32 %v3041_v38, %v3042_v18 }
 0x648   :  { %v2718_v9 = vmul.f32 %v10080_v36, %v2695_v20  ;;  %v2730_v13 = vadd.f32 %v2728_v25, %v2716_v50 }
 0x649   :  { %v3038_v7 = vand.u32 4294901760, %v3037_v58  ;;  %v3044_v5 = vand.u32 4294901760, %v3043_v2 }
 0x64a   :  { %v2732_v10 = vadd.f32 %v2730_v13, %v2718_v9 }
 0x64b   :  { %v2615_v23 = vpop.f32.mrf.mxu2  ;;  %v2702_v60 = vpop.f32.mrf.mxu3 }
 0x64c   :  { %v2616_v24 = vadd.f32 %v2615_v23, %v2527_v32  ;;  %v3029_v32 = vsub.f32 %v2968_v33, %v2991_v51  ;;  %v9802_v23 = vld [vmem:[%s13079_s7] ss:$0 sm:$0xff] }
 0x64e   :  { %v2699_v22 = vadd.f32 %v2698_v0, %v2616_v24  ;;  %v3030_v52 = vand.u32 4294901760, %v3029_v32  ;;  %v2965_v0 = vld [vmem:[#allocation9] sm:$0xff] }
 0x64f   :  { %v2997_v44 = vand.u32 4294901760, %v2965_v0 }
 0x650   :  { %v2719_v41 = vmul.f32 %v10078_v4, %v2699_v22  ;;  %v3031_v27 = vsub.f32 %v3029_v32, %v3030_v52 }
 0x651   :  { %v3047_v56 = vsub.f32 %v2965_v0, %v2997_v44  ;;  %2998 = vmatpush.msra.mxu2 %v2997_v44 }
 0x652   :  { %v2733_v16 = vadd.f32 %v2731_v11, %v2719_v41  ;;  %v3032_v24 = vand.u32 4294901760, %v3031_v27 }
 0x653   :  { %v2619_v54 = vpop.f32.mrf.mxu2  ;;  %v3048_v53 = vand.u32 4294901760, %v3047_v56 }
 0x654   :  { %v2744_v47 = vsel %vm428_vm3, %v2733_v16, 0  ;;  %v2620_v59 = vadd.f32 %v2619_v54, %v2533_v48  ;;  %3033 = vmatpush.msra.mxu3 %v3032_v24  ;;  %v3198_v48 = vld [vmem:[%s13081_s9 + $0x18] sm:$0xff] }
 0x655   :  { %v2769_v37 = vand.u32 4294901760, %v2744_v47  ;;  %v3049_v15 = vsub.f32 %v3047_v56, %v3048_v53  ;;  %v11384_v25 = vand.u32 4294901760, %v3198_v48 }
 0x656   :  { %v2703_v12 = vadd.f32 %v2702_v60, %v2620_v59  ;;  %3039 = vmatpush.msra.mxu3 %v3038_v7 }
 0x657   :  { %v2770_v21 = vsub.f32 %v2744_v47, %v2769_v37  ;;  %2823 = vmatmul.f32.vlgmr.msra.gmra.mxu1 %v2769_v37  ;;  %v3050_v34 = vand.u32 4294901760, %v3049_v15  ;;  %13310 = vst [vmem:[#allocation27_spill] sm:$0xff] %v11384_v25  ;;  %v11390_v59 = vsub.f32 %v3198_v48, %v11384_v25 }
 0x658   :  { %v2720_v19 = vmul.f32 %v10081_v6, %v2703_v12  ;;  %3109 = vmatpush.msra.mxu1 %v2991_v51  ;;  %3045 = vmatpush.msra.mxu3 %v3044_v5 }
 0x659   :  { %2857 = vmatmul.f32.vlgmr.msrb.gmra.mxu2 %v2770_v21  ;;  %v2771_v31 = vand.u32 4294901760, %v2770_v21  ;;  %13312 = vst [vmem:[#allocation30_spill] sm:$0xff] %v11390_v59  ;;  %v11399_v6 = vand.u32 4294901760, %v11390_v59 }
 0x65a   :  { %v2734_v26 = vadd.f32 %v2732_v10, %v2720_v19  ;;  %3111 = vmatpush.msra.mxu1 %v2993_v40  ;;  %3144 = vmatpush.msrb.mxu2 %v3030_v52  ;;  %v3197_v19 = vld [vmem:[%s13081_s9 + $0x10] sm:$0xff] }
 0x65b   :  { %2889 = vmatmul.f32.vlgmr.msrb.gmra.mxu3 %v2771_v31  ;;  %v2772_v55 = vsub.f32 %v2770_v21, %v2771_v31  ;;  %13313 = vst [vmem:[#allocation37_spill] sm:$0xff] %v11399_v6  ;;  %v3196_v31 = vld [vmem:[%s13081_s9 + $0x8] sm:$0xff] }
 0x65c   :  { %v2747_v3 = vsel %vm428_vm3, %v2734_v26, 0  ;;  %3113 = vmatpush.msra.mxu1 %v2995_v14  ;;  %3148 = vmatpush.msrb.mxu2 %v3036_v61  ;;  %v3195_v26 = vld [vmem:[%s13081_s9] sm:$0xff] }
 0x65d   :  { %v2773_v30 = vand.u32 4294901760, %v2772_v55  ;;  %v2777_v62 = vand.u32 4294901760, %v2747_v3  ;;  %3051 = vmatpush.msra.mxu3 %v3050_v34 }
 0x65e   :  { %3115 = vmatpush.msra.mxu1 %v2997_v44  ;;  %3152 = vmatpush.msrb.mxu2 %v3042_v18 }
 0x65f   :  { %2774 = vmatmul.f32.vlgmr.msra.gmra.mxu0 %v2773_v30  ;;  %2827 = vmatmul.f32.gmra.mxu1 %v2777_v62  ;;  %v2778_v39 = vsub.f32 %v2747_v3, %v2777_v62  ;;  %v11411_v3 = vand.u32 4294901760, %v3197_v19  ;;  %v11413_v30 = vand.u32 4294901760, %v3196_v31 }
 0x660   :  { %3075 = vmatpush.msra.mxu0 %v3029_v32  ;;  %3179 = vmatpush.msrb.mxu3 %v2991_v51 }
 0x661   :  { %2862 = vmatmul.f32.gmra.mxu2 %v2778_v39  ;;  %v2779_v1 = vand.u32 4294901760, %v2778_v39  ;;  %13314 = vst [vmem:[#allocation17_spill] sm:$0xff] %v11411_v3  ;;  %v11422_v33 = vsub.f32 %v3197_v19, %v11411_v3 }
 0x662   :  { %3078 = vmatpush.msra.mxu0 %v3035_v17  ;;  %3156 = vmatpush.msrb.mxu2 %v3048_v53  ;;  %13315 = vst [vmem:[#allocation16_spill] sm:$0xff] %v11413_v30 }
 0x663   :  { %2895 = vmatmul.f32.gmra.mxu3 %v2779_v1  ;;  %v2780_v29 = vsub.f32 %v2778_v39, %v2779_v1  ;;  %13318 = vst [vmem:[#allocation28_spill] sm:$0xff] %v11422_v33  ;;  %v11437_v8 = vand.u32 4294901760, %v11422_v33 }
 0x664   :  { %3081 = vmatpush.msra.mxu0 %v3041_v38  ;;  %3181 = vmatpush.msrb.mxu3 %v2993_v40 }
 0x665   :  { %v2781_v49 = vand.u32 4294901760, %v2780_v29  ;;  %v3267_v29 = vsub.f32 %v11390_v59, %v11399_v6  ;;  %13322 = vst [vmem:[#allocation45_spill] sm:$0xff] %v11437_v8 }
 0x666   :  { %3084 = vmatpush.msra.mxu0 %v3047_v56  ;;  %3183 = vmatpush.msrb.mxu3 %v2995_v14  ;;  %v3273_v14 = vsub.f32 %v11422_v33, %v11437_v8 }
 0x667   :  { %2782 = vmatmul.f32.gmra.mxu0 %v2781_v49  ;;  %2957 = vmatmul.f32.vlgmr.msrb.gmra.mxu1 %v2769_v37  ;;  %v11426_v28 = vand.u32 4294901760, %v3267_v29 }
 0x668   :  { %3185 = vmatpush.msrb.mxu3 %v2997_v44 }
 0x669   :  { %13319 = vst [vmem:[#allocation32_spill] sm:$0xff] %v11426_v28  ;;  %3269 = vmatpush.msrb.mxu1 %v11426_v28 }
 0x66f   :  { %2928 = vmatmul.f32.vlgmr.msrb.gmra.mxu0 %v2769_v37  ;;  %2961 = vmatmul.f32.gmra.mxu1 %v2777_v62 }
 0x670   :  { %3236 = vmatpush.msrb.mxu0 %v11384_v25 }
 0x672   :  { %3238 = vmatpush.msrb.mxu0 %v11411_v3 }
 0x674   :  { %3240 = vmatpush.msrb.mxu0 %v11413_v30 }
 0x677   :  { %2932 = vmatmul.f32.gmra.mxu0 %v2777_v62  ;;  %v11415_v62 = vand.u32 4294901760, %v3195_v26 }
 0x679   :  { %13316 = vst [vmem:[#allocation19_spill] sm:$0xff] %v11415_v62  ;;  %v11432_v32 = vsub.f32 %v3195_v26, %v11415_v62  ;;  %3242 = vmatpush.msrb.mxu0 %v11415_v62 }
 0x67b   :  { %13321 = vst [vmem:[#allocation20_spill] sm:$0xff] %v11432_v32  ;;  %v11450_v44 = vand.u32 4294901760, %v11432_v32 }
 0x67d   :  { %13324 = vst [vmem:[#allocation31_spill] sm:$0xff] %v11450_v44  ;;  %v3285_v38 = vsub.f32 %v11432_v32, %v11450_v44 }
 0x67f   :  { %v11466_v58 = vand.u32 4294901760, %v3285_v38 }
 0x681   :  { %13327 = vst [vmem:[#allocation33_spill] sm:$0xff] %v11466_v58 }
 0x6d4   :  { %v2824_v43 = vpop.f32.mrf.mxu1 }
 0x6dc   :  { %v2775_v45 = vpop.f32.mrf.mxu0  ;;  %v2828_v22 = vpop.f32.mrf.mxu1 }
 0x6dd   :  { %v2776_v46 = vadd.f32 %v9802_v23, %v2775_v45  ;;  %v2858_v11 = vpop.f32.mrf.mxu2  ;;  %v11453_v45 = vand.u32 4294901760, %v3273_v14 }
 0x6de   :  { %v2890_v35 = vpop.f32.mrf.mxu3 }
 0x6df   :  { %v2825_v63 = vadd.f32 %v2824_v43, %v2776_v46  ;;  %v11429_v43 = vsub.f32 %v3196_v31, %v11413_v30  ;;  %13325 = vst [vmem:[#allocation36_spill] sm:$0xff] %v11453_v45  ;;  %3275 = vmatpush.msrb.mxu1 %v11453_v45  ;;  %v13328_v46 = vmov 0.0  }
 0x6e1   :  { %v2859_v4 = vadd.f32 %v2858_v11, %v2825_v63  ;;  %13320 = vst [vmem:[#allocation21_spill] sm:$0xff] %v11429_v43 }
 0x6e3   :  { %v2891_v57 = vadd.f32 %v2890_v35, %v2859_v4 }
 0x6e4   :  { %v2783_v20 = vpop.f32.mrf.mxu0  ;;  %v2958_v50 = vpop.f32.mrf.mxu1 }
 0x6e5   :  { %v2784_v41 = vadd.f32 %v9802_v23, %v2783_v20  ;;  %v2863_v36 = vpop.f32.mrf.mxu2  ;;  %v11447_v23 = vand.u32 4294901760, %v11429_v43  ;;  %v9803_v20 = vld [vmem:[%s13083_s11] ss:$0 sm:$0xff] }
 0x6e6   :  { %v2896_v60 = vpop.f32.mrf.mxu3 }
 0x6e7   :  { %v2829_v42 = vadd.f32 %v2828_v22, %v2784_v41  ;;  %13323 = vst [vmem:[#allocation25_spill] sm:$0xff] %v11447_v23  ;;  %v3279_v61 = vsub.f32 %v11429_v43, %v11447_v23 }
 0x6e9   :  { %v2864_v9 = vadd.f32 %v2863_v36, %v2829_v42  ;;  %v11462_v24 = vand.u32 4294901760, %v3279_v61 }
 0x6eb   :  { %v2897_v12 = vadd.f32 %v2896_v60, %v2864_v9  ;;  %13326 = vst [vmem:[#allocation43_spill] sm:$0xff] %v11462_v24  ;;  %3281 = vmatpush.msrb.mxu1 %v11462_v24 }
 0x6ec   :  { %v2929_v16 = vpop.f32.mrf.mxu0  ;;  %v2962_v1 = vpop.f32.mrf.mxu1 }
 0x6ed   :  { %v2930_v54 = vadd.f32 %v2929_v16, %v2891_v57  ;;  %3287 = vmatpush.msrb.mxu1 %v11466_v58 }
 0x6ef   :  { %v11386_v47 = vadd.f32 %v2958_v50, %v2930_v54 }
 0x6f1   :  { %13311 = vst [vmem:[#allocation39_spill] sm:$0xff] %v11386_v47  ;;  %v2974_v37 = vsel %vm428_vm3, %v11386_v47, 0 }
 0x6f2   :  { %v11394_v13 = vand.u32 4294901760, %v2974_v37 }
 0x6f4   :  { %v3000_v21 = vsub.f32 %v2974_v37, %v11394_v13  ;;  %v2933_v10 = vpop.f32.mrf.mxu0  ;;  %3053 = vmatmul.f32.vlgmr.msra.gmra.mxu3 %v11394_v13 }
 0x6f5   :  { %v2934_v55 = vadd.f32 %v2933_v10, %v2897_v12  ;;  %3336 = vmatpush.msra.mxu3 %v11384_v25 }
 0x6f6   :  { %v3001_v39 = vand.u32 4294901760, %v3000_v21  ;;  %3087 = vmatmul.f32.vlgmr.msra.gmra.mxu0 %v3000_v21 }
 0x6f7   :  { %v11419_v49 = vadd.f32 %v2962_v1, %v2934_v55  ;;  %3338 = vmatpush.msra.mxu3 %v11411_v3  ;;  %3365 = vmatpush.msra.mxu0 %v11399_v6 }
 0x6f8   :  { %v3002_v51 = vsub.f32 %v3000_v21, %v3001_v39  ;;  %3119 = vmatmul.f32.vlgmr.msra.gmra.mxu1 %v3001_v39 }
 0x6f9   :  { %13317 = vst [vmem:[#allocation18_spill] sm:$0xff] %v11419_v49  ;;  %v2977_v40 = vsel %vm428_vm3, %v11419_v49, 0  ;;  %3340 = vmatpush.msra.mxu3 %v11413_v30  ;;  %3369 = vmatpush.msra.mxu0 %v11437_v8 }
 0x6fa   :  { %v3003_v52 = vand.u32 4294901760, %v3002_v51  ;;  %v3007_v17 = vand.u32 4294901760, %v2977_v40  ;;  %3396 = vmatpush.msra.mxu1 %v11384_v25 }
 0x6fb   :  { %3342 = vmatpush.msra.mxu3 %v11415_v62  ;;  %3373 = vmatpush.msra.mxu0 %v11447_v23 }
 0x6fc   :  { %3004 = vmatmul.f32.vlgmr.msra.gmra.mxu2 %v3003_v52  ;;  %3057 = vmatmul.f32.gmra.mxu3 %v3007_v17  ;;  %v3008_v0 = vsub.f32 %v2977_v40, %v3007_v17 }
 0x6fd   :  { %3307 = vmatpush.msra.mxu2 %v11390_v59  ;;  %3377 = vmatpush.msra.mxu0 %v11450_v44 }
 0x6fe   :  { %3092 = vmatmul.f32.gmra.mxu0 %v3008_v0  ;;  %v3009_v27 = vand.u32 4294901760, %v3008_v0  ;;  %3398 = vmatpush.msra.mxu1 %v11411_v3 }
 0x6ff   :  { %3310 = vmatpush.msra.mxu2 %v11422_v33 }
 0x700   :  { %3125 = vmatmul.f32.gmra.mxu1 %v3009_v27  ;;  %v3010_v56 = vsub.f32 %v3008_v0, %v3009_v27 }
 0x701   :  { %3313 = vmatpush.msra.mxu2 %v11429_v43  ;;  %3400 = vmatpush.msra.mxu1 %v11413_v30 }
 0x702   :  { %v3011_v18 = vand.u32 4294901760, %v3010_v56 }
 0x703   :  { %3316 = vmatpush.msra.mxu2 %v11432_v32  ;;  %3402 = vmatpush.msra.mxu1 %v11415_v62 }
 0x704   :  { %3012 = vmatmul.f32.gmra.mxu2 %v3011_v18  ;;  %3187 = vmatmul.f32.vlgmr.msrb.gmra.mxu3 %v11394_v13 }
 0x705   :  { %3497 = vmatpush.msrb.mxu3 %v11426_v28 }
 0x706   :  { %3248 = vmatmul.f32.vlgmr.msrb.gmra.mxu0 %v13328_v46 }
 0x707   :  { %3535 = vmatpush.msrb.mxu0 %v11390_v59  ;;  %3503 = vmatpush.msrb.mxu3 %v11453_v45 }
 0x708   :  { %3289 = vmatmul.f32.vlgmr.msrb.gmra.mxu1 %v13328_v46 }
 0x709   :  { %3538 = vmatpush.msrb.mxu0 %v11422_v33  ;;  %3564 = vmatpush.msrb.mxu1 %v11384_v25 }
 0x70a   :  { %3509 = vmatpush.msrb.mxu3 %v11462_v24 }
 0x70b   :  { %3541 = vmatpush.msrb.mxu0 %v11429_v43  ;;  %3566 = vmatpush.msrb.mxu1 %v11411_v3 }
 0x70c   :  { %3158 = vmatmul.f32.vlgmr.msrb.gmra.mxu2 %v11394_v13  ;;  %3191 = vmatmul.f32.gmra.mxu3 %v3007_v17 }
 0x70d   :  { %3544 = vmatpush.msrb.mxu0 %v11432_v32  ;;  %3464 = vmatpush.msrb.mxu2 %v11384_v25 }
 0x70e   :  { %3379 = vmatmul.f32.vlgmr.msra.gmra.mxu0 %v13328_v46  ;;  %3515 = vmatpush.msrb.mxu3 %v11466_v58 }
 0x70f   :  { %3466 = vmatpush.msrb.mxu2 %v11411_v3  ;;  %3568 = vmatpush.msrb.mxu1 %v11413_v30 }
 0x710   :  { %3404 = vmatmul.f32.vlgmr.msra.gmra.mxu1 %v13328_v46 }
 0x711   :  { %3570 = vmatpush.msrb.mxu1 %v11415_v62  ;;  %3468 = vmatpush.msrb.mxu2 %v11413_v30 }
 0x713   :  { %3470 = vmatpush.msrb.mxu2 %v11415_v62 }
 0x714   :  { %3162 = vmatmul.f32.gmra.mxu2 %v3007_v17  ;;  %3346 = vmatmul.f32.vlgmr.msra.gmra.mxu3 %v13328_v46 }
 0x715   :  { %3624 = vmatpush.msra.mxu3 %v11384_v25 }
 0x717   :  { %3626 = vmatpush.msra.mxu3 %v11411_v3 }
 0x719   :  { %3628 = vmatpush.msra.mxu3 %v11413_v30 }
 0x71b   :  { %3630 = vmatpush.msra.mxu3 %v11415_v62 }
 0x71c   :  { %3319 = vmatmul.f32.vlgmr.msra.gmra.mxu2 %v13328_v46 }
 0x71d   :  { %3593 = vmatpush.msra.mxu2 %v11399_v6 }
 0x71f   :  { %3597 = vmatpush.msra.mxu2 %v11437_v8 }
 0x721   :  { %3601 = vmatpush.msra.mxu2 %v11447_v23 }
 0x723   :  { %3605 = vmatpush.msra.mxu2 %v11450_v44 }
 0x773   :  { %v3088_v15 = vpop.f32.mrf.mxu0 }
 0x775   :  { %v3120_v5 = vpop.f32.mrf.mxu1 }
 0x777   :  { %v3054_v53 = vpop.f32.mrf.mxu3 }
 0x77b   :  { %v11513_v34 = vpop.f32.mrf.mxu0 }
 0x77c   :  { %13331 = vst [vmem:[#allocation38_spill] sm:$0xff] %v11513_v34 }
 0x77d   :  { %v11518_v4 = vpop.f32.mrf.mxu1 }
 0x77e   :  { %13332 = vst [vmem:[#allocation42_spill] sm:$0xff] %v11518_v4 }
 0x77f   :  { %v3005_v7 = vpop.f32.mrf.mxu2  ;;  %v11509_v2 = vpop.f32.mrf.mxu3 }
 0x780   :  { %13329 = vst [vmem:[#allocation26_spill] sm:$0xff] %v11509_v2  ;;  %v3006_v41 = vadd.f32 %v9803_v20, %v3005_v7  ;;  %v3205_v20 = vld [vmem:[#allocation10 + $0x30] sm:$0xff] }
 0x782   :  { %v3055_v50 = vadd.f32 %v3054_v53, %v3006_v41  ;;  %v3204_v41 = vld [vmem:[#allocation10 + $0x28] sm:$0xff] }
 0x783   :  { %v3249_v35 = vpop.f32.mrf.mxu0 }
 0x784   :  { %v3089_v48 = vadd.f32 %v3088_v15, %v3055_v50  ;;  %v11535_v50 = vand.u32 4294901760, %v3205_v20 }
 0x785   :  { %v3290_v16 = vpop.f32.mrf.mxu1 }
 0x786   :  { %v3291_v54 = vadd.f32 %v3290_v16, %v3249_v35  ;;  %v3121_v37 = vadd.f32 %v3120_v5, %v3089_v48  ;;  %v11537_v16 = vand.u32 4294901760, %v3204_v41  ;;  %v3203_v48 = vld [vmem:[#allocation10 + $0x20] sm:$0xff] }
 0x787   :  { %v11511_v22 = vpop.f32.mrf.mxu2  ;;  %v3188_v63 = vpop.f32.mrf.mxu3 }
 0x788   :  { %13330 = vst [vmem:[#allocation35_spill] sm:$0xff] %v11511_v22 }
 0x78b   :  { %v3380_v13 = vpop.f32.mrf.mxu0 }
 0x78d   :  { %v3405_v10 = vpop.f32.mrf.mxu1 }
 0x78f   :  { %v3159_v11 = vpop.f32.mrf.mxu2  ;;  %v11520_v57 = vpop.f32.mrf.mxu3 }
 0x790   :  { %13333 = vst [vmem:[#allocation24_spill] sm:$0xff] %v11520_v57  ;;  %v3160_v12 = vadd.f32 %v3159_v11, %v3121_v37  ;;  %v3206_v11 = vld [vmem:[#allocation10 + $0x38] sm:$0xff]  ;;  %v11549_v37 = vsub.f32 %v3204_v41, %v11537_v16 }
 0x791   :  { %v11533_v35 = vand.u32 4294901760, %v3206_v11 }
 0x792   :  { %v11524_v31 = vadd.f32 %v3188_v63, %v3160_v12  ;;  %13338 = vst [vmem:[#allocation22_spill] sm:$0xff] %v11549_v37 }
 0x793   :  { %3698 = vmatpush.msra.mxu0 %v11533_v35 }
 0x794   :  { %13335 = vst [vmem:[#allocation41_spill] sm:$0xff] %v11524_v31 }
 0x795   :  { %3700 = vmatpush.msra.mxu0 %v11535_v50 }
 0x797   :  { %v11522_v42 = vpop.f32.mrf.mxu2  ;;  %v3347_v9 = vpop.f32.mrf.mxu3  ;;  %3702 = vmatpush.msra.mxu0 %v11537_v16 }
 0x798   :  { %13334 = vst [vmem:[#allocation29_spill] sm:$0xff] %v11522_v42 }
 0x79f   :  { %v3320_v36 = vpop.f32.mrf.mxu2 }
 0x7a0   :  { %v3321_v60 = vadd.f32 %v3320_v36, %v3291_v54  ;;  %v11539_v54 = vand.u32 4294901760, %v3203_v48  ;;  %v11543_v36 = vsub.f32 %v3206_v11, %v11533_v35 }
 0x7a2   :  { %v3348_v21 = vadd.f32 %v3347_v9, %v3321_v60  ;;  %13336 = vst [vmem:[#allocation44_spill] sm:$0xff] %v11543_v36  ;;  %v11546_v9 = vsub.f32 %v3205_v20, %v11535_v50  ;;  %v11552_v60 = vsub.f32 %v3203_v48, %v11539_v54  ;;  %3704 = vmatpush.msra.mxu0 %v11539_v54 }
 0x7a4   :  { %v3381_v19 = vadd.f32 %v3380_v13, %v3348_v21  ;;  %13337 = vst [vmem:[#allocation23_spill] sm:$0xff] %v11546_v9  ;;  %v11556_v13 = vand.u32 4294901760, %v11543_v36  ;;  %v11559_v12 = vand.u32 4294901760, %v11546_v9  ;;  %v11562_v21 = vand.u32 4294901760, %v11549_v37 }
 0x7a5   :  { %13339 = vst [vmem:[#allocation34_spill] sm:$0xff] %v11552_v60 }
 0x7a6   :  { %v3406_v26 = vadd.f32 %v3405_v10, %v3381_v19  ;;  %v3202_v10 = vld [vmem:[#allocation10 + $0x18] sm:$0xff]  ;;  %v11565_v19 = vand.u32 4294901760, %v11552_v60 }
 0x7a8   :  { %v3408_v55 = vadd.f32 %v3406_v26, %v11524_v31  ;;  %v3733_v26 = vsub.f32 %v11543_v36, %v11556_v13 }
 0x7aa   :  { %9870 = vtanh.f32 %v3408_v55  ;;  %v9749_v1 = vmul.f32 -1.442695, %v3408_v55  ;;  %v3739_v55 = vsub.f32 %v11546_v9, %v11559_v12 }
 0x7ac   :  { %9872 = vpow2.f32 %v9749_v1  ;;  %v11574_v1 = vand.u32 4294901760, %v3733_v26 }
 0x7ae   :  { %13340 = vst [vmem:[#allocation40_spill] sm:$0xff] %v11574_v1  ;;  %3735 = vmatpush.msra.mxu1 %v11574_v1 }
 0x7b0   :  { %v9871_v39 = vpop.eup %9870 }
 0x7b1   :  { %3431 = vrot.lane.b32.xlu2 %v9871_v39, %s10252_s1  ;;  %v3745_v39 = vsub.f32 %v11549_v37, %v11562_v21 }
 0x7b2   :  { %v9873_v29 = vpop.eup %9872 }
 0x7b3   :  { %v3412_v51 = vadd.f32 1.0, %v9873_v29  ;;  %v11576_v29 = vand.u32 4294901760, %v3739_v55 }
 0x7b5   :  { %9874 = vrcp.f32 %v3412_v51  ;;  %v3424_v27 = vand.u32 2147483648, %v3412_v51  ;;  %vm3418_vm0 = vweird.f32 %v3412_v51  ;;  %v3422_v61 = vand.u32 2147483647, %v3412_v51  ;;  %13341 = vst [vmem:[#allocation46_spill] sm:$0xff] %v11576_v29  ;;  %3741 = vmatpush.msra.mxu1 %v11576_v29 }
 0x7b7   :  { %v3425_v56 = vor.u32 1.1754944e-38, %v3424_v27  ;;  %vm3423_vm2 = vcmp.eq.f32.partialorder %v3422_v61, 8.507059e+37  ;;  %v3201_v27 = vld [vmem:[#allocation10 + $0x10] sm:$0xff] }
 0x7bb   :  { %v9875_v40 = vpop.eup %9874 }
 0x7bc   :  { %v3414_v52 = vmul.f32 %v9875_v40, %v3412_v51  ;;  %vm3419_vm8 = vweird.f32 %v9875_v40  ;;  %v11579_v51 = vand.u32 4294901760, %v3202_v10 }
 0x7bd   :  { %vm3420_vm1 = vmor %vm3418_vm0, %vm3419_vm8 }
 0x7be   :  { %v3415_v17 = vsub.f32 1.0, %v3414_v52  ;;  %v11584_v52 = vand.u32 4294901760, %v3745_v39  ;;  %3706 = vmatpush.msra.mxu0 %v11579_v51  ;;  %v11594_v61 = vsub.f32 %v3202_v10, %v11579_v51 }
 0x7c0   :  { %v3416_v14 = vmul.f32 %v9875_v40, %v3415_v17  ;;  %13342 = vst [vmem:[#allocation47_spill] sm:$0xff] %v11584_v52  ;;  %3747 = vmatpush.msra.mxu1 %v11584_v52 }
 0x7c1   :  { %13344 = vst [vmem:[#allocation49_spill] sm:$0xff] %v11594_v61 }
 0x7c2   :  { %v3417_v0 = vadd.f32 %v9875_v40, %v3416_v14 }
 0x7c4   :  { %v3421_v38 = vsel %vm3420_vm1, %v9875_v40, %v3417_v0  ;;  %v3751_v40 = vsub.f32 %v11552_v60, %v11565_v19 }
 0x7c5   :  { %v3426_v46 = vsel %vm3423_vm2, %v3425_v56, %v3421_v38  ;;  %v3200_v38 = vld [vmem:[#allocation10 + $0x8] sm:$0xff]  ;;  %v3199_v56 = vld [vmem:[#allocation10] sm:$0xff] }
 0x7c6   :  { %v3429_v7 = vmul.f32 0.0, %v3426_v46  ;;  %v11588_v17 = vand.u32 4294901760, %v3751_v40 }
 0x7c8   :  { %13343 = vst [vmem:[#allocation48_spill] sm:$0xff] %v11588_v17  ;;  %3753 = vmatpush.msra.mxu1 %v11588_v17 }
 0x80b   :  { %v3432_v18 = vpop.permute.xlu2 %3431 }
 0x80c   :  { %v3434_v53 = vmul.f32 %v3432_v18, %v3426_v46  ;;  %v11596_v18 = vand.u32 4294901760, %v3201_v27 }
 0x80e   :  { %3436 = vrot.lane.b32.xlu1 %v3434_v53, %s10253_s4  ;;  %v11598_v53 = vand.u32 4294901760, %v3200_v38  ;;  %3708 = vmatpush.msra.mxu0 %v11596_v18 }
 0x810   :  { %3710 = vmatpush.msra.mxu0 %v11598_v53 }
 0x880   :  { %v3437_v15 = vpop.permute.xlu1 %3436 }
 0x881   :  { %v11529_v5 = vadd.f32 %v3437_v15, %v3429_v7  ;;  %v11600_v7 = vand.u32 4294901760, %v3199_v56  ;;  %v11603_v15 = vand.u32 4294901760, %v11594_v61 }
 0x883   :  { %9876 = vtanh.f32 %v11529_v5  ;;  %v11613_v11 = vsub.f32 %v3199_v56, %v11600_v7  ;;  %v3757_v20 = vsub.f32 %v11594_v61, %v11603_v15  ;;  %3712 = vmatpush.msra.mxu0 %v11600_v7 }
 0x885   :  { %13347 = vst [vmem:[#allocation52_spill] sm:$0xff] %v11613_v11  ;;  %v11625_v10 = vand.u32 4294901760, %v11613_v11  ;;  %v11627_v26 = vand.u32 4294901760, %v3757_v20 }
 0x887   :  { %13348 = vst [vmem:[#allocation53_spill] sm:$0xff] %v11627_v26  ;;  %v3775_v40 = vsub.f32 %v11613_v11, %v11625_v10  ;;  %3759 = vmatpush.msra.mxu1 %v11627_v26 }
 0x889   :  { %v9877_v63 = vpop.eup %9876 }
 0x88a   :  { %3442 = vrot.lane.b32.xlu0 %v9877_v63, %s10252_s1  ;;  %v11610_v63 = vsub.f32 %v3200_v38, %v11598_v53 }
 0x88c   :  { %13346 = vst [vmem:[#allocation51_spill] sm:$0xff] %v11610_v63  ;;  %v11622_v48 = vand.u32 4294901760, %v11610_v63 }
 0x88e   :  { %v3769_v39 = vsub.f32 %v11610_v63, %v11622_v48 }
 0x8fc   :  { %v3443_v14 = vpop.permute.xlu0 %3442 }
 0x8fd   :  { %v3445_v0 = vmul.f32 %v3443_v14, %v3426_v46  ;;  %v11607_v46 = vsub.f32 %v3201_v27, %v11596_v18  ;;  %v11642_v27 = vand.u32 4294901760, %v3775_v40 }
 0x8ff   :  { %3447 = vrot.lane.b32.xlu2 %v3445_v0, %s10253_s4  ;;  %13345 = vst [vmem:[#allocation50_spill] sm:$0xff] %v11607_v46  ;;  %v11619_v41 = vand.u32 4294901760, %v11607_v46  ;;  %v11639_v0 = vand.u32 4294901760, %v3769_v39 }
 0x900   :  { %13351 = vst [vmem:[#allocation56_spill] sm:$0xff] %v11642_v27 }
 0x901   :  { %v3763_v55 = vsub.f32 %v11607_v46, %v11619_v41  ;;  %13350 = vst [vmem:[#allocation55_spill] sm:$0xff] %v11639_v0 }
 0x903   :  { %v11637_v14 = vand.u32 4294901760, %v3763_v55 }
 0x905   :  { %13349 = vst [vmem:[#allocation54_spill] sm:$0xff] %v11637_v14  ;;  %3765 = vmatpush.msra.mxu1 %v11637_v14 }
 0x907   :  { %3771 = vmatpush.msra.mxu1 %v11639_v0 }
 0x909   :  { %3777 = vmatpush.msra.mxu1 %v11642_v27 }
 0x959   :  { %v3448_v38 = vpop.permute.xlu2 %3447 }
 0x95a   :  { %v3449_v56 = vsel %vm428_vm3, %v3448_v38, 0  ;;  %v3681_v20 = vsel %vm428_vm3, %v3448_v38, 0.0 }
 0x95b   :  { %v3471_v49 = vand.u32 4294901760, %v3449_v56  ;;  %v3687_v55 = vsel %vm3685_vm4, %v3681_v20, 0  ;;  %v11724_v20 = vld [vmem:[%s13083_s11 + $0x1] ss:$0 sm:$0xff] }
 0x95c   :  { %v3713_v47 = vand.u32 4294901760, %v3687_v55  ;;  %13352 = vst [vmem:[#allocation57_spill] sm:$0xff] %v11724_v20 }
 0x95d   :  { %v3472_v39 = vsub.f32 %v3449_v56, %v3471_v49  ;;  %3517 = vmatmul.f32.vlgmr.msrb.gmra.mxu3 %v3471_v49 }
 0x95e   :  { %v3714_v57 = vsub.f32 %v3687_v55, %v3713_v47  ;;  %3830 = vmatpush.msrb.mxu3 %v11533_v35 }
 0x95f   :  { %v3473_v40 = vand.u32 4294901760, %v3472_v39  ;;  %3547 = vmatmul.f32.vlgmr.msrb.gmra.mxu0 %v3472_v39 }
 0x960   :  { %v3715_v42 = vand.u32 4294901760, %v3714_v57  ;;  %3832 = vmatpush.msrb.mxu3 %v11535_v50  ;;  %3863 = vmatpush.msrb.mxu0 %v11556_v13 }
 0x961   :  { %v3474_v4 = vsub.f32 %v3472_v39, %v3473_v40  ;;  %3574 = vmatmul.f32.vlgmr.msrb.gmra.mxu1 %v3473_v40 }
 0x962   :  { %v3716_v34 = vsub.f32 %v3714_v57, %v3715_v42  ;;  %3834 = vmatpush.msrb.mxu3 %v11537_v16  ;;  %3867 = vmatpush.msrb.mxu0 %v11559_v12 }
 0x963   :  { %v3475_v38 = vand.u32 4294901760, %v3474_v4  ;;  %3906 = vmatpush.msrb.mxu1 %v11533_v35 }
 0x964   :  { %v3717_v56 = vand.u32 4294901760, %v3716_v34  ;;  %3836 = vmatpush.msrb.mxu3 %v11539_v54  ;;  %3871 = vmatpush.msrb.mxu0 %v11562_v21 }
 0x965   :  { %3908 = vmatpush.msrb.mxu1 %v11535_v50  ;;  %3476 = vmatmul.f32.vlgmr.msrb.gmra.mxu2 %v3475_v38 }
 0x966   :  { %3632 = vmatmul.f32.vlgmr.msra.gmra.mxu3 %v3471_v49  ;;  %3793 = vmatpush.msrb.mxu2 %v11543_v36 }
 0x967   :  { %3838 = vmatpush.msrb.mxu3 %v11579_v51  ;;  %3875 = vmatpush.msrb.mxu0 %v11565_v19 }
 0x968   :  { %3910 = vmatpush.msrb.mxu1 %v11537_v16  ;;  %3718 = vmatmul.f32.vlgmr.msra.gmra.mxu0 %v3717_v56 }
 0x969   :  { %3796 = vmatpush.msrb.mxu2 %v11546_v9  ;;  %3840 = vmatpush.msrb.mxu3 %v11596_v18 }
 0x96a   :  { %3879 = vmatpush.msrb.mxu0 %v11603_v15  ;;  %3912 = vmatpush.msrb.mxu1 %v11539_v54 }
 0x96b   :  { %3779 = vmatmul.f32.vlgmr.msra.gmra.mxu1 %v3713_v47  ;;  %3799 = vmatpush.msrb.mxu2 %v11549_v37 }
 0x96c   :  { %3842 = vmatpush.msrb.mxu3 %v11598_v53  ;;  %3883 = vmatpush.msrb.mxu0 %v11619_v41 }
 0x96d   :  { %3914 = vmatpush.msrb.mxu1 %v11579_v51  ;;  %3802 = vmatpush.msrb.mxu2 %v11552_v60 }
 0x96e   :  { %3844 = vmatpush.msrb.mxu3 %v11600_v7  ;;  %3887 = vmatpush.msrb.mxu0 %v11622_v48 }
 0x96f   :  { %3916 = vmatpush.msrb.mxu1 %v11596_v18  ;;  %3607 = vmatmul.f32.vlgmr.msra.gmra.mxu2 %v3471_v49 }
 0x970   :  { %3848 = vmatmul.f32.vlgmr.msrb.gmra.mxu3 %v3715_v42  ;;  %3805 = vmatpush.msrb.mxu2 %v11594_v61 }
 0x971   :  { %3891 = vmatpush.msrb.mxu0 %v11625_v10  ;;  %3918 = vmatpush.msrb.mxu1 %v11598_v53 }
 0x972   :  { %3893 = vmatmul.f32.vlgmr.msrb.gmra.mxu0 %v3713_v47  ;;  %3808 = vmatpush.msrb.mxu2 %v11607_v46 }
 0x973   :  { %3920 = vmatpush.msrb.mxu1 %v11600_v7  ;;  %4111 = vmatpush.msra.mxu0 %v11399_v6 }
 0x974   :  { %3922 = vmatmul.f32.vlgmr.msrb.gmra.mxu1 %v3713_v47  ;;  %3811 = vmatpush.msrb.mxu2 %v11610_v63 }
 0x975   :  { %4142 = vmatpush.msra.mxu1 %v11384_v25  ;;  %4115 = vmatpush.msra.mxu0 %v11437_v8 }
 0x976   :  { %3814 = vmatpush.msrb.mxu2 %v11613_v11  ;;  %4015 = vmatpush.msra.mxu3 %v11426_v28 }
 0x977   :  { %3817 = vmatmul.f32.vlgmr.msrb.gmra.mxu2 %v3714_v57  ;;  %4144 = vmatpush.msra.mxu1 %v11411_v3 }
 0x978   :  { %4119 = vmatpush.msra.mxu0 %v11447_v23  ;;  %4021 = vmatpush.msra.mxu3 %v11453_v45 }
 0x979   :  { %4146 = vmatpush.msra.mxu1 %v11413_v30  ;;  %3982 = vmatpush.msra.mxu2 %v11384_v25 }
 0x97a   :  { %4123 = vmatpush.msra.mxu0 %v11450_v44  ;;  %4027 = vmatpush.msra.mxu3 %v11462_v24 }
 0x97b   :  { %4148 = vmatpush.msra.mxu1 %v11415_v62  ;;  %3984 = vmatpush.msra.mxu2 %v11411_v3 }
 0x97c   :  { %4315 = vmatpush.msrb.mxu0 %v11543_v36  ;;  %4033 = vmatpush.msra.mxu3 %v11466_v58 }
 0x97d   :  { %4352 = vmatpush.msrb.mxu1 %v11533_v35  ;;  %3986 = vmatpush.msra.mxu2 %v11413_v30 }
 0x97e   :  { %4318 = vmatpush.msrb.mxu0 %v11546_v9  ;;  %4082 = vmatpush.msrb.mxu3 %v11384_v25 }
 0x97f   :  { %4354 = vmatpush.msrb.mxu1 %v11535_v50  ;;  %3988 = vmatpush.msra.mxu2 %v11415_v62 }
 0x980   :  { %4321 = vmatpush.msrb.mxu0 %v11549_v37  ;;  %4084 = vmatpush.msrb.mxu3 %v11411_v3 }
 0x981   :  { %4356 = vmatpush.msrb.mxu1 %v11537_v16  ;;  %4053 = vmatpush.msrb.mxu2 %v11390_v59 }
 0x982   :  { %4324 = vmatpush.msrb.mxu0 %v11552_v60  ;;  %4086 = vmatpush.msrb.mxu3 %v11413_v30 }
 0x983   :  { %4358 = vmatpush.msrb.mxu1 %v11539_v54  ;;  %4056 = vmatpush.msrb.mxu2 %v11422_v33 }
 0x984   :  { %4327 = vmatpush.msrb.mxu0 %v11594_v61  ;;  %4088 = vmatpush.msrb.mxu3 %v11415_v62 }
 0x985   :  { %4360 = vmatpush.msrb.mxu1 %v11579_v51  ;;  %4059 = vmatpush.msrb.mxu2 %v11429_v43 }
 0x986   :  { %4330 = vmatpush.msrb.mxu0 %v11607_v46 }
 0x987   :  { %4362 = vmatpush.msrb.mxu1 %v11596_v18  ;;  %4062 = vmatpush.msrb.mxu2 %v11432_v32 }
 0x988   :  { %4333 = vmatpush.msrb.mxu0 %v11610_v63 }
 0x989   :  { %4364 = vmatpush.msrb.mxu1 %v11598_v53 }
 0x98a   :  { %4336 = vmatpush.msrb.mxu0 %v11613_v11 }
 0x98b   :  { %4366 = vmatpush.msrb.mxu1 %v11600_v7 }
 0x9dc   :  { %v3548_v47 = vpop.f32.mrf.mxu0 }
 0x9de   :  { %v3575_v57 = vpop.f32.mrf.mxu1 }
 0x9e0   :  { %v3518_v49 = vpop.f32.mrf.mxu3 }
 0x9e5   :  { %v3719_v55 = vpop.f32.mrf.mxu0 }
 0x9e6   :  { %v3720_v2 = vadd.f32 %v11724_v20, %v3719_v55 }
 0x9e8   :  { %v3477_v34 = vpop.f32.mrf.mxu2  ;;  %v3780_v11 = vpop.f32.mrf.mxu1 }
 0x9e9   :  { %v3519_v4 = vadd.f32 %v3518_v49, %v3477_v34  ;;  %v3633_v40 = vpop.f32.mrf.mxu3  ;;  %v3781_v46 = vadd.f32 %v3780_v11, %v3720_v2 }
 0x9eb   :  { %v3549_v42 = vadd.f32 %v3548_v47, %v3519_v4 }
 0x9ed   :  { %v3576_v39 = vadd.f32 %v3575_v57, %v3549_v42 }
 0x9ef   :  { %v3894_v60 = vpop.f32.mrf.mxu0 }
 0x9f1   :  { %v3923_v9 = vpop.f32.mrf.mxu1 }
 0x9f2   :  { %v3608_v38 = vpop.f32.mrf.mxu2 }
 0x9f3   :  { %v3609_v56 = vadd.f32 %v3608_v38, %v3576_v39  ;;  %v3849_v4 = vpop.f32.mrf.mxu3 }
 0x9f5   :  { %v3634_v22 = vadd.f32 %v3633_v40, %v3609_v56 }
 0x9f7   :  { %v3637_v63 = vrot.slane %v3634_v22, 6 }
 0x9f9   :  { %v3639_v49 = vadd.f32 %v3637_v63, %v11524_v31 }
 0x9fa   :  { %v3818_v34 = vpop.f32.mrf.mxu2 }
 0x9fb   :  { %9878 = vtanh.f32 %v3639_v49  ;;  %v3819_v47 = vadd.f32 %v3818_v34, %v3781_v46  ;;  %v9750_v22 = vmul.f32 -1.442695, %v3639_v49 }
 0x9fd   :  { %v3850_v61 = vadd.f32 %v3849_v4, %v3819_v47 }
 0x9ff   :  { %v3895_v37 = vadd.f32 %v3894_v60, %v3850_v61 }
 0xa01   :  { %v9879_v57 = vpop.eup %9878  ;;  %v3924_v42 = vadd.f32 %v3923_v9, %v3895_v37 }
 0xa02   :  { %3665 = vrot.lane.b32.xlu0 %v9879_v57, %s10252_s1 }
 0xa03   :  { %9880 = vtanh.f32 %v3924_v42  ;;  %v9751_v2 = vmul.f32 -1.442695, %v3924_v42 }
 0xa04   :  { %9882 = vpow2.f32 %v9750_v22 }
 0xa05   :  { %9884 = vpow2.f32 %v9751_v2 }
 0xa09   :  { %v9881_v55 = vpop.eup %9880 }
 0xa0a   :  { %3948 = vrot.lane.b32.xlu1 %v9881_v55, %s10252_s1  ;;  %v9883_v63 = vpop.eup %9882 }
 0xa0b   :  { %v3643_v11 = vadd.f32 1.0, %v9883_v63  ;;  %v9885_v46 = vpop.eup %9884 }
 0xa0c   :  { %v3929_v39 = vadd.f32 1.0, %v9885_v46 }
 0xa0d   :  { %9886 = vrcp.f32 %v3643_v11  ;;  %v3655_v47 = vand.u32 2147483648, %v3643_v11  ;;  %vm3649_vm6 = vweird.f32 %v3643_v11  ;;  %v3653_v49 = vand.u32 2147483647, %v3643_v11 }
 0xa0e   :  { %9888 = vrcp.f32 %v3929_v39  ;;  %v3941_v46 = vand.u32 2147483648, %v3929_v39  ;;  %vm3935_vm11 = vweird.f32 %v3929_v39 }
 0xa0f   :  { %v3656_v42 = vor.u32 1.1754944e-38, %v3655_v47  ;;  %vm3654_vm9 = vcmp.eq.f32.partialorder %v3653_v49, 8.507059e+37 }
 0xa13   :  { %v9887_v40 = vpop.eup %9886 }
 0xa14   :  { %v3645_v60 = vmul.f32 %v9887_v40, %v3643_v11  ;;  %v9889_v9 = vpop.eup %9888  ;;  %vm3650_vm5 = vweird.f32 %v9887_v40 }
 0xa15   :  { %v3931_v38 = vmul.f32 %v9889_v9, %v3929_v39  ;;  %vm3651_vm7 = vmor %vm3649_vm6, %vm3650_vm5  ;;  %vm3936_vm10 = vweird.f32 %v9889_v9 }
 0xa16   :  { %v3646_v61 = vsub.f32 1.0, %v3645_v60  ;;  %v3939_v60 = vand.u32 2147483647, %v3929_v39  ;;  %vm3937_vm12 = vmor %vm3935_vm11, %vm3936_vm10 }
 0xa17   :  { %v3932_v34 = vsub.f32 1.0, %v3931_v38 }
 0xa18   :  { %v3647_v37 = vmul.f32 %v9887_v40, %v3646_v61  ;;  %vm3940_vm13 = vcmp.eq.f32.partialorder %v3939_v60, 8.507059e+37 }
 0xa19   :  { %v3933_v57 = vmul.f32 %v9889_v9, %v3932_v34 }
 0xa1a   :  { %v3648_v56 = vadd.f32 %v9887_v40, %v3647_v37  ;;  %v3942_v37 = vor.u32 1.1754944e-38, %v3941_v46 }
 0xa1b   :  { %v3934_v63 = vadd.f32 %v9889_v9, %v3933_v57 }
 0xa1c   :  { %v3652_v4 = vsel %vm3651_vm7, %v9887_v40, %v3648_v56  ;;  %v3661_v56 = vrot.slane %v11529_v5, 6 }
 0xa1d   :  { %v3657_v22 = vsel %vm3654_vm9, %v3656_v42, %v3652_v4  ;;  %v3938_v61 = vsel %vm3937_vm12, %v9889_v9, %v3934_v63 }
 0xa1e   :  { %v3943_v38 = vsel %vm3940_vm13, %v3942_v37, %v3938_v61  ;;  %v3663_v34 = vmul.f32 %v3661_v56, %v3657_v22  ;;  %v3215_v61 = vld [vmem:[#allocation10 + $0x78] sm:$0xff]  ;;  %v3214_v37 = vld [vmem:[#allocation10 + $0x70] sm:$0xff] }
 0xa1f   :  { %v3946_v39 = vmul.f32 0.0, %v3943_v38  ;;  %v11747_v56 = vand.u32 4294901760, %v3214_v37 }
 0xa74   :  { %v3666_v55 = vpop.permute.xlu0 %3665 }
 0xa75   :  { %v3668_v2 = vmul.f32 %v3666_v55, %v3657_v22 }
 0xa77   :  { %3670 = vrot.lane.b32.xlu2 %v3668_v2, %s10253_s4 }
 0xa7c   :  { %v3949_v11 = vpop.permute.xlu1 %3948 }
 0xa7d   :  { %v3951_v40 = vmul.f32 %v3949_v11, %v3943_v38  ;;  %v11745_v11 = vand.u32 4294901760, %v3215_v61 }
 0xa7f   :  { %3953 = vrot.lane.b32.xlu0 %v3951_v40, %s10253_s4  ;;  %v3213_v40 = vld [vmem:[#allocation10 + $0x68] sm:$0xff] }
 0xad1   :  { %v3671_v47 = vpop.permute.xlu2 %3670 }
 0xad2   :  { %v11733_v49 = vadd.f32 %v3671_v47, %v3663_v34  ;;  %v11752_v34 = vand.u32 4294901760, %v3213_v40  ;;  %v3212_v47 = vld [vmem:[#allocation10 + $0x60] sm:$0xff] }
 0xad4   :  { %13353 = vst [vmem:[#allocation58_spill] sm:$0xff] %v11733_v49  ;;  %9890 = vtanh.f32 %v11733_v49 }
 0xada   :  { %v9891_v4 = vpop.eup %9890 }
 0xadb   :  { %3676 = vrot.lane.b32.xlu1 %v9891_v4, %s10252_s1  ;;  %v11757_v4 = vand.u32 4294901760, %v3212_v47 }
 0xadd   :  { %13357 = vst [vmem:[#allocation62_spill] sm:$0xff] %v11757_v4 }
 0xaf1   :  { %v3954_v9 = vpop.permute.xlu0 %3953 }
 0xaf2   :  { %v11737_v57 = vadd.f32 %v3954_v9, %v3946_v39  ;;  %v11763_v9 = vsub.f32 %v3213_v40, %v11752_v34 }
 0xaf4   :  { %13354 = vst [vmem:[#allocation59_spill] sm:$0xff] %v11737_v57  ;;  %9892 = vtanh.f32 %v11737_v57 }
 0xaf5   :  { %13359 = vst [vmem:[#allocation64_spill] sm:$0xff] %v11763_v9 }
 0xafa   :  { %v9893_v42 = vpop.eup %9892 }
 0xafb   :  { %3959 = vrot.lane.b32.xlu2 %v9893_v42, %s10252_s1  ;;  %v3211_v42 = vld [vmem:[#allocation10 + $0x58] sm:$0xff] }
 0xb4d   :  { %v3677_v55 = vpop.permute.xlu1 %3676 }
 0xb4e   :  { %v3679_v5 = vmul.f32 %v3677_v55, %v3657_v22  ;;  %v11750_v22 = vsub.f32 %v3215_v61, %v11745_v11  ;;  %v3209_v61 = vld [vmem:[#allocation10 + $0x48] sm:$0xff] }
 0xb4f   :  { %v11789_v8 = vand.u32 4294901760, %v3209_v61 }
 0xb50   :  { %v3964_v2 = vrot.slane %v3679_v5, 2  ;;  %4198 = vrot.lane.b32.xlu1 %v3679_v5, %s10253_s4  ;;  %13355 = vst [vmem:[#allocation60_spill] sm:$0xff] %v11750_v22  ;;  %v11760_v39 = vand.u32 4294901760, %v11750_v22  ;;  %v3210_v5 = vld [vmem:[#allocation10 + $0x50] sm:$0xff] }
 0xb51   :  { %v11778_v36 = vand.u32 4294901760, %v3210_v5  ;;  %13367 = vst [vmem:[#allocation72_spill] sm:$0xff] %v11789_v8 }
 0xb52   :  { %3965 = vrot.lane.b32.xlu0 %v3964_v2, %s10253_s4  ;;  %13358 = vst [vmem:[#allocation63_spill] sm:$0xff] %v11760_v39  ;;  %v11769_v2 = vsub.f32 %v3212_v47, %v11757_v4  ;;  %v3208_v47 = vld [vmem:[#allocation10 + $0x40] sm:$0xff] }
 0xb53   :  { %13364 = vst [vmem:[#allocation69_spill] sm:$0xff] %v11778_v36  ;;  %v11800_v45 = vand.u32 4294901760, %v3208_v47 }
 0xb54   :  { %13361 = vst [vmem:[#allocation66_spill] sm:$0xff] %v11769_v2  ;;  %v11784_v44 = vand.u32 4294901760, %v11769_v2 }
 0xb55   :  { %v3960_v63 = vpop.permute.xlu2 %3959  ;;  %13370 = vst [vmem:[#allocation75_spill] sm:$0xff] %v11800_v45 }
 0xb56   :  { %v3962_v46 = vmul.f32 %v3960_v63, %v3943_v38  ;;  %v11755_v38 = vsub.f32 %v3214_v37, %v11747_v56  ;;  %v11771_v63 = vand.u32 4294901760, %v3211_v42  ;;  %13365 = vst [vmem:[#allocation70_spill] sm:$0xff] %v11784_v44 }
 0xb58   :  { %v4202_v60 = vrot.slane %v3962_v46, 6  ;;  %13356 = vst [vmem:[#allocation61_spill] sm:$0xff] %v11755_v38  ;;  %v11766_v55 = vand.u32 4294901760, %v11755_v38  ;;  %v11787_v23 = vsub.f32 %v3211_v42, %v11771_v63 }
 0xb59   :  { %13362 = vst [vmem:[#allocation67_spill] sm:$0xff] %v11771_v63 }
 0xb5a   :  { %4203 = vrot.lane.b32.xlu2 %v4202_v60, %s10252_s1  ;;  %4485 = vrot.lane.b32.xlu0 %v3962_v46, %s10253_s4  ;;  %13360 = vst [vmem:[#allocation65_spill] sm:$0xff] %v11766_v55  ;;  %v4539_v46 = vsub.f32 %v11750_v22, %v11760_v39  ;;  %v11776_v60 = vand.u32 4294901760, %v11763_v9  ;;  %v4545_v57 = vsub.f32 %v11755_v38, %v11766_v55 }
 0xb5b   :  { %13366 = vst [vmem:[#allocation71_spill] sm:$0xff] %v11787_v23 }
 0xb5c   :  { %13363 = vst [vmem:[#allocation68_spill] sm:$0xff] %v11776_v60  ;;  %v11792_v58 = vand.u32 4294901760, %v4539_v46  ;;  %v11802_v28 = vand.u32 4294901760, %v4545_v57  ;;  %v11809_v46 = vand.u32 4294901760, %v11787_v23 }
 0xb5e   :  { %13368 = vst [vmem:[#allocation73_spill] sm:$0xff] %v11792_v58 }
 0xb5f   :  { %13371 = vst [vmem:[#allocation76_spill] sm:$0xff] %v11802_v28 }
 0xb60   :  { %13372 = vst [vmem:[#allocation77_spill] sm:$0xff] %v11809_v46 }
 0xbb4   :  { %v4204_v37 = vpop.permute.xlu2 %4203 }
 0xbc2   :  { %v4199_v40 = vpop.permute.xlu1 %4198 }
 0xbc3   :  { %v4206_v49 = vsel %vm428_vm3, %v4199_v40, %v4204_v37  ;;  %v4551_v37 = vsub.f32 %v11763_v9, %v11776_v60 }
 0xbc4   :  { %v4208_v20 = vrot.slane %v4206_v49, 2  ;;  %v3966_v31 = vpop.permute.xlu0 %3965  ;;  %v11798_v49 = vsub.f32 %v3210_v5, %v11778_v36 }
 0xbc5   :  { %v3967_v6 = vsel %vm428_vm3, %v3966_v31, 0  ;;  %v4557_v31 = vsub.f32 %v11769_v2, %v11784_v44  ;;  %v11826_v2 = vsub.f32 %v3208_v47, %v11800_v45 }
 0xbc6   :  { %v4209_v40 = vsel %vm3685_vm4, %v4208_v20, 0  ;;  %v3989_v24 = vand.u32 4294901760, %v3967_v6  ;;  %13369 = vst [vmem:[#allocation74_spill] sm:$0xff] %v11798_v49  ;;  %v11812_v20 = vsub.f32 %v3209_v61, %v11789_v8  ;;  %v11823_v5 = vand.u32 4294901760, %v11798_v49 }
 0xbc7   :  { %v11814_v9 = vand.u32 4294901760, %v4209_v40  ;;  %13376 = vst [vmem:[#allocation81_spill] sm:$0xff] %v11826_v2 }
 0xbc8   :  { %v11804_v42 = vsub.f32 %v3967_v6, %v3989_v24  ;;  %4035 = vmatmul.f32.vlgmr.msra.gmra.mxu3 %v3989_v24  ;;  %4125 = vmatmul.f32.vlgmr.msra.gmra.mxu0 %v3989_v24  ;;  %13373 = vst [vmem:[#allocation78_spill] sm:$0xff] %v11812_v20  ;;  %v11820_v6 = vand.u32 4294901760, %v4551_v37  ;;  %v4563_v37 = vsub.f32 %v11787_v23, %v11809_v46  ;;  %v11848_v23 = vand.u32 4294901760, %v11826_v2 }
 0xbc9   :  { %4150 = vmatmul.f32.vlgmr.msra.gmra.mxu1 %v3989_v24  ;;  %4257 = vmatpush.msra.mxu3 %v11574_v1  ;;  %13375 = vst [vmem:[#allocation80_spill] sm:$0xff] %v11823_v5  ;;  %v11832_v1 = vand.u32 4294901760, %v4557_v31  ;;  %v4236_v47 = vsub.f32 %v4209_v40, %v11814_v9 }
 0xbca   :  { %v3991_v57 = vand.u32 4294901760, %v11804_v42  ;;  %4504 = vmatpush.msra.mxu0 %v11745_v11  ;;  %4541 = vmatpush.msra.mxu1 %v11792_v58  ;;  %13374 = vst [vmem:[#allocation79_spill] sm:$0xff] %v11820_v6  ;;  %v11837_v58 = vand.u32 4294901760, %v11812_v20  ;;  %v11855_v40 = vand.u32 4294901760, %v4563_v37 }
 0xbcb   :  { %4263 = vmatpush.msra.mxu3 %v11576_v29  ;;  %13377 = vst [vmem:[#allocation82_spill] sm:$0xff] %v11832_v1 }
 0xbcc   :  { %v3992_v24 = vsub.f32 %v11804_v42, %v3991_v57  ;;  %4506 = vmatpush.msra.mxu0 %v11747_v56  ;;  %4547 = vmatpush.msra.mxu1 %v11802_v28  ;;  %v4486_v61 = vpop.permute.xlu0 %4485  ;;  %13378 = vst [vmem:[#allocation83_spill] sm:$0xff] %v11837_v58  ;;  %v4569_v28 = vsub.f32 %v11798_v49, %v11823_v5 }
 0xbcd   :  { %4269 = vmatpush.msra.mxu3 %v11584_v52  ;;  %v4488_v29 = vsel %vm428_vm3, %v4486_v61, 0.0  ;;  %13379 = vst [vmem:[#allocation84_spill] sm:$0xff] %v11848_v23 }
 0xbce   :  { %v3993_v62 = vand.u32 4294901760, %v3992_v24  ;;  %4508 = vmatpush.msra.mxu0 %v11752_v34  ;;  %4553 = vmatpush.msra.mxu1 %v11820_v6  ;;  %v4493_v31 = vsel %vm3685_vm4, %v4488_v29, 0  ;;  %v4575_v24 = vsub.f32 %v11812_v20, %v11837_v58  ;;  %v4237_v29 = vand.u32 4294901760, %v4236_v47 }
 0xbcf   :  { %v11850_v38 = vand.u32 4294901760, %v4493_v31  ;;  %4275 = vmatpush.msra.mxu3 %v11588_v17  ;;  %v11864_v6 = vand.u32 4294901760, %v4569_v28 }
 0xbd0   :  { %4510 = vmatpush.msra.mxu0 %v11757_v4  ;;  %4559 = vmatpush.msra.mxu1 %v11832_v1  ;;  %v4581_v1 = vsub.f32 %v11826_v2, %v11848_v23 }
 0xbd1   :  { %v11860_v61 = vsub.f32 %v4493_v31, %v11850_v38  ;;  %3994 = vmatmul.f32.vlgmr.msra.gmra.mxu2 %v3993_v62  ;;  %4092 = vmatmul.f32.vlgmr.msrb.gmra.mxu3 %v3991_v57  ;;  %v11871_v31 = vand.u32 4294901760, %v4575_v24  ;;  %v4238_v57 = vsub.f32 %v4236_v47, %v4237_v29  ;;  %v13384_v24 = vld [vmem:[#allocation64_spill] sm:$0xff] }
 0xbd2   :  { %4220 = vmatpush.msra.mxu2 %v11533_v35  ;;  %4281 = vmatpush.msra.mxu3 %v11627_v26  ;;  %v11877_v62 = vand.u32 4294901760, %v4581_v1 }
 0xbd3   :  { %v4521_v37 = vand.u32 4294901760, %v11860_v61  ;;  %4339 = vmatmul.f32.vlgmr.msrb.gmra.mxu0 %v4236_v47  ;;  %4370 = vmatmul.f32.vlgmr.msrb.gmra.mxu1 %v4237_v29  ;;  %13380 = vst [vmem:[#allocation85_spill] sm:$0xff] %v11871_v31  ;;  %v13383_v47 = vld [vmem:[#allocation19_spill] sm:$0xff]  ;;  %v13386_v29 = vld [vmem:[#allocation66_spill] sm:$0xff] }
 0xbd4   :  { %4512 = vmatpush.msra.mxu0 %v11771_v63  ;;  %4565 = vmatpush.msra.mxu1 %v11855_v40  ;;  %13381 = vst [vmem:[#allocation86_spill] sm:$0xff] %v11877_v62 }
 0xbd5   :  { %4222 = vmatpush.msra.mxu2 %v11535_v50  ;;  %4287 = vmatpush.msra.mxu3 %v11637_v14  ;;  %v4522_v28 = vsub.f32 %v11860_v61, %v4521_v37 }
 0xbd6   :  { %4514 = vmatpush.msra.mxu0 %v11778_v36  ;;  %4571 = vmatpush.msra.mxu1 %v11864_v6 }
 0xbd7   :  { %4224 = vmatpush.msra.mxu2 %v11537_v16  ;;  %4293 = vmatpush.msra.mxu3 %v11639_v0  ;;  %v4523_v1 = vand.u32 4294901760, %v4522_v28  ;;  %v13387_v28 = vld [vmem:[#allocation32_spill] sm:$0xff] }
 0xbd8   :  { %4516 = vmatpush.msra.mxu0 %v11789_v8  ;;  %4577 = vmatpush.msra.mxu1 %v11871_v31 }
 0xbd9   :  { %4226 = vmatpush.msra.mxu2 %v11539_v54  ;;  %4299 = vmatpush.msra.mxu3 %v11642_v27 }
 0xbda   :  { %4518 = vmatpush.msra.mxu0 %v11800_v45  ;;  %4583 = vmatpush.msra.mxu1 %v11877_v62 }
 0xbdb   :  { %4428 = vmatpush.msrb.mxu3 %v11533_v35  ;;  %4065 = vmatmul.f32.vlgmr.msrb.gmra.mxu2 %v11804_v42  ;;  %v4239_v42 = vand.u32 4294901760, %v4238_v57  ;;  %v13389_v57 = vld [vmem:[#allocation71_spill] sm:$0xff] }
 0xbdc   :  { %4669 = vmatpush.msrb.mxu0 %v11760_v39  ;;  %4712 = vmatpush.msrb.mxu1 %v11745_v11 }
 0xbdd   :  { %4228 = vmatpush.msra.mxu2 %v11579_v51  ;;  %4301 = vmatmul.f32.vlgmr.msra.gmra.mxu3 %v11814_v9 }
 0xbde   :  { %4585 = vmatmul.f32.vlgmr.msra.gmra.mxu1 %v11850_v38  ;;  %4430 = vmatpush.msrb.mxu3 %v11535_v50 }
 0xbdf   :  { %4524 = vmatmul.f32.vlgmr.msra.gmra.mxu0 %v4523_v1  ;;  %4714 = vmatpush.msrb.mxu1 %v11747_v56  ;;  %v13388_v1 = vld [vmem:[#allocation46_spill] sm:$0xff] }
 0xbe0   :  { %4673 = vmatpush.msrb.mxu0 %v11766_v55  ;;  %4230 = vmatpush.msra.mxu2 %v11596_v18 }
 0xbe1   :  { %4432 = vmatpush.msrb.mxu3 %v11537_v16  ;;  %4716 = vmatpush.msrb.mxu1 %v11752_v34 }
 0xbe2   :  { %4677 = vmatpush.msrb.mxu0 %v11776_v60  ;;  %4232 = vmatpush.msra.mxu2 %v11598_v53 }
 0xbe3   :  { %4434 = vmatpush.msrb.mxu3 %v11539_v54  ;;  %4718 = vmatpush.msrb.mxu1 %v11757_v4 }
 0xbe4   :  { %4681 = vmatpush.msrb.mxu0 %v11784_v44  ;;  %4234 = vmatpush.msra.mxu2 %v11600_v7  ;;  %v13397_v44 = vld [vmem:[#allocation41_spill] sm:$0xff] }
 0xbe5   :  { %4436 = vmatpush.msrb.mxu3 %v11579_v51  ;;  %4720 = vmatpush.msrb.mxu1 %v11771_v63 }
 0xbe6   :  { %4385 = vmatpush.msrb.mxu2 %v11556_v13  ;;  %4685 = vmatpush.msrb.mxu0 %v11809_v46 }
 0xbe7   :  { %4240 = vmatmul.f32.vlgmr.msra.gmra.mxu2 %v4239_v42  ;;  %4438 = vmatpush.msrb.mxu3 %v11596_v18  ;;  %v13390_v42 = vld [vmem:[#allocation36_spill] sm:$0xff] }
 0xbe8   :  { %4389 = vmatpush.msrb.mxu2 %v11559_v12  ;;  %4689 = vmatpush.msrb.mxu0 %v11823_v5 }
 0xbe9   :  { %4722 = vmatpush.msrb.mxu1 %v11778_v36  ;;  %4440 = vmatpush.msrb.mxu3 %v11598_v53 }
 0xbea   :  { %4393 = vmatpush.msrb.mxu2 %v11562_v21  ;;  %4693 = vmatpush.msrb.mxu0 %v11837_v58 }
 0xbeb   :  { %4724 = vmatpush.msrb.mxu1 %v11789_v8  ;;  %4442 = vmatpush.msrb.mxu3 %v11600_v7 }
 0xbec   :  { %4397 = vmatpush.msrb.mxu2 %v11565_v19  ;;  %4697 = vmatpush.msrb.mxu0 %v11848_v23 }
 0xbed   :  { %4726 = vmatpush.msrb.mxu1 %v11800_v45  ;;  %4444 = vmatmul.f32.vlgmr.msrb.gmra.mxu3 %v11814_v9 }
 0xbee   :  { %4636 = vmatpush.msra.mxu3 %v11745_v11  ;;  %4699 = vmatmul.f32.vlgmr.msrb.gmra.mxu0 %v11850_v38 }
 0xbef   :  { %4728 = vmatmul.f32.vlgmr.msrb.gmra.mxu1 %v11850_v38  ;;  %4401 = vmatpush.msrb.mxu2 %v11603_v15  ;;  %v13382_v38 = vld [vmem:[#allocation61_spill] sm:$0xff] }
 0xbf0   :  { %4638 = vmatpush.msra.mxu3 %v11747_v56  ;;  %4859 = vmatpush.msra.mxu0 %v11390_v59 }
 0xbf1   :  { %4405 = vmatpush.msrb.mxu2 %v11619_v41  ;;  %4888 = vmatpush.msra.mxu1 %v11384_v25 }
 0xbf2   :  { %4640 = vmatpush.msra.mxu3 %v11752_v34  ;;  %4862 = vmatpush.msra.mxu0 %v11422_v33 }
 0xbf3   :  { %4409 = vmatpush.msrb.mxu2 %v11622_v48  ;;  %4890 = vmatpush.msra.mxu1 %v11411_v3 }
 0xbf4   :  { %4642 = vmatpush.msra.mxu3 %v11757_v4  ;;  %4865 = vmatpush.msra.mxu0 %v11429_v43 }
 0xbf5   :  { %4413 = vmatpush.msrb.mxu2 %v11625_v10  ;;  %4892 = vmatpush.msra.mxu1 %v11413_v30 }
 0xbf6   :  { %4415 = vmatmul.f32.vlgmr.msrb.gmra.mxu2 %v11814_v9  ;;  %4644 = vmatpush.msra.mxu3 %v11771_v63  ;;  %v13385_v9 = vld [vmem:[#allocation40_spill] sm:$0xff] }
 0xbf7   :  { %4599 = vmatpush.msra.mxu2 %v11750_v22  ;;  %4868 = vmatpush.msra.mxu0 %v11432_v32  ;;  %v13391_v32 = vld [vmem:[#allocation43_spill] sm:$0xff] }
 0xbf8   :  { %4646 = vmatpush.msra.mxu3 %v11778_v36  ;;  %4894 = vmatpush.msra.mxu1 %v13383_v47 }
 0xbf9   :  { %5026 = vmatpush.msrb.mxu0 %v11533_v35  ;;  %4602 = vmatpush.msra.mxu2 %v13382_v38 }
 0xbfa   :  { %4648 = vmatpush.msra.mxu3 %v11789_v8  ;;  %5063 = vmatpush.msrb.mxu1 %v13385_v9 }
 0xbfb   :  { %5028 = vmatpush.msrb.mxu0 %v11535_v50  ;;  %4605 = vmatpush.msra.mxu2 %v13384_v24 }
 0xbfc   :  { %4650 = vmatpush.msra.mxu3 %v11800_v45  ;;  %5069 = vmatpush.msrb.mxu1 %v13388_v1 }
 0xbfd   :  { %5030 = vmatpush.msrb.mxu0 %v11537_v16  ;;  %4608 = vmatpush.msra.mxu2 %v13386_v29 }
 0xbfe   :  { %4654 = vmatmul.f32.vlgmr.msra.gmra.mxu3 %v4521_v37  ;;  %5075 = vmatpush.msrb.mxu1 %v11584_v52  ;;  %v13392_v37 = vld [vmem:[#allocation33_spill] sm:$0xff] }
 0xbff   :  { %4821 = vmatpush.msrb.mxu3 %v13387_v28  ;;  %4611 = vmatpush.msra.mxu2 %v13389_v57 }
 0xc00   :  { %5032 = vmatpush.msrb.mxu0 %v11539_v54  ;;  %5081 = vmatpush.msrb.mxu1 %v11588_v17  ;;  %v13396_v17 = vld [vmem:[#allocation31_spill] sm:$0xff] }
 0xc01   :  { %4827 = vmatpush.msrb.mxu3 %v13390_v42  ;;  %4614 = vmatpush.msra.mxu2 %v11798_v49 }
 0xc02   :  { %5034 = vmatpush.msrb.mxu0 %v11579_v51  ;;  %5087 = vmatpush.msrb.mxu1 %v11627_v26  ;;  %v13394_v26 = vld [vmem:[#allocation45_spill] sm:$0xff] }
 0xc03   :  { %4833 = vmatpush.msrb.mxu3 %v13391_v32  ;;  %4617 = vmatpush.msra.mxu2 %v11812_v20 }
 0xc04   :  { %5036 = vmatpush.msrb.mxu0 %v11596_v18  ;;  %5093 = vmatpush.msrb.mxu1 %v11637_v14  ;;  %v13395_v14 = vld [vmem:[#allocation25_spill] sm:$0xff] }
 0xc05   :  { %4839 = vmatpush.msrb.mxu3 %v13392_v37  ;;  %4620 = vmatpush.msra.mxu2 %v11826_v2 }
 0xc06   :  { %4623 = vmatmul.f32.vlgmr.msra.gmra.mxu2 %v11860_v61  ;;  %5038 = vmatpush.msrb.mxu0 %v11598_v53  ;;  %v13393_v61 = vld [vmem:[#allocation37_spill] sm:$0xff] }
 0xc07   :  { %4948 = vmatpush.msra.mxu3 %v11384_v25  ;;  %4788 = vmatpush.msrb.mxu2 %v11384_v25 }
 0xc08   :  { %5040 = vmatpush.msrb.mxu0 %v11600_v7  ;;  %5099 = vmatpush.msrb.mxu1 %v11639_v0 }
 0xc09   :  { %4950 = vmatpush.msra.mxu3 %v11411_v3  ;;  %4790 = vmatpush.msrb.mxu2 %v11411_v3 }
 0xc0a   :  { %5105 = vmatpush.msrb.mxu1 %v11642_v27 }
 0xc0b   :  { %4952 = vmatpush.msra.mxu3 %v11413_v30  ;;  %4792 = vmatpush.msrb.mxu2 %v11413_v30 }
 0xc0d   :  { %4954 = vmatpush.msra.mxu3 %v13383_v47  ;;  %4794 = vmatpush.msrb.mxu2 %v13383_v47 }
 0xc0f   :  { %4917 = vmatpush.msra.mxu2 %v13393_v61 }
 0xc11   :  { %4921 = vmatpush.msra.mxu2 %v13394_v26  ;;  %v13398_v26 = vld [vmem:[#allocation57_spill] sm:$0xff] }
 0xc13   :  { %4925 = vmatpush.msra.mxu2 %v13395_v14 }
 0xc15   :  { %4929 = vmatpush.msra.mxu2 %v13396_v17 }
 0xc45   :  { %v4126_v23 = vpop.f32.mrf.mxu0 }
 0xc46   :  { %v4151_v27 = vpop.f32.mrf.mxu1 }
 0xc4b   :  { %v4036_v52 = vpop.f32.mrf.mxu3 }
 0xc50   :  { %v4340_v55 = vpop.f32.mrf.mxu0 }
 0xc54   :  { %v3995_v43 = vpop.f32.mrf.mxu2  ;;  %v4093_v59 = vpop.f32.mrf.mxu3 }
 0xc55   :  { %v4037_v33 = vadd.f32 %v4036_v52, %v3995_v43  ;;  %v4371_v43 = vpop.f32.mrf.mxu1 }
 0xc5e   :  { %v4066_v0 = vpop.f32.mrf.mxu2 }
 0xc5f   :  { %v4067_v1 = vadd.f32 %v4066_v0, %v4037_v33 }
 0xc60   :  { %v4302_v60 = vpop.f32.mrf.mxu3 }
 0xc61   :  { %v4094_v9 = vadd.f32 %v4093_v59, %v4067_v1 }
 0xc63   :  { %v4127_v58 = vadd.f32 %v4126_v23, %v4094_v9 }
 0xc65   :  { %v4152_v5 = vadd.f32 %v4151_v27, %v4127_v58  ;;  %v11998_v27 = vld [vmem:[%s13083_s11 + $0x2] ss:$0 sm:$0xff] }
 0xc66   :  { %13399 = vst [vmem:[#allocation57_spill] sm:$0xff] %v11998_v27 }
 0xc67   :  { %v4155_v46 = vrot.slane %v4152_v5, 4 }
 0xc69   :  { %v4157_v61 = vadd.f32 %v4155_v46, %v13397_v44 }
 0xc6a   :  { %v4241_v47 = vpop.f32.mrf.mxu2 }
 0xc6b   :  { %9894 = vtanh.f32 %v4157_v61  ;;  %v4242_v14 = vadd.f32 %v13398_v26, %v4241_v47  ;;  %v4525_v26 = vpop.f32.mrf.mxu0 }
 0xc6d   :  { %v4303_v17 = vadd.f32 %v4302_v60, %v4242_v14  ;;  %v4526_v14 = vadd.f32 %v11998_v27, %v4525_v26  ;;  %v4586_v60 = vpop.f32.mrf.mxu1 }
 0xc6f   :  { %v4341_v33 = vadd.f32 %v4340_v55, %v4303_v17  ;;  %v4587_v17 = vadd.f32 %v4586_v60, %v4526_v14 }
 0xc70   :  { %v4445_v0 = vpop.f32.mrf.mxu3 }
 0xc71   :  { %v9895_v37 = vpop.eup %9894  ;;  %v4372_v59 = vadd.f32 %v4371_v43, %v4341_v33 }
 0xc72   :  { %4183 = vrot.lane.b32.xlu1 %v9895_v37, %s10252_s1 }
 0xc73   :  { %v4700_v1 = vpop.f32.mrf.mxu0 }
 0xc75   :  { %v4729_v33 = vpop.f32.mrf.mxu1 }
 0xc79   :  { %v4416_v52 = vpop.f32.mrf.mxu2 }
 0xc7a   :  { %v4417_v23 = vadd.f32 %v4416_v52, %v4372_v59 }
 0xc7c   :  { %v4446_v58 = vadd.f32 %v4445_v0, %v4417_v23  ;;  %v9752_v23 = vmul.f32 -1.442695, %v4157_v61 }
 0xc7e   :  { %9896 = vtanh.f32 %v4446_v58  ;;  %v9753_v52 = vmul.f32 -1.442695, %v4446_v58 }
 0xc81   :  { %v4655_v47 = vpop.f32.mrf.mxu3 }
 0xc84   :  { %v9897_v46 = vpop.eup %9896 }
 0xc85   :  { %4470 = vrot.lane.b32.xlu2 %v9897_v46, %s10252_s1 }
 0xc89   :  { %v4624_v55 = vpop.f32.mrf.mxu2 }
 0xc8a   :  { %v4625_v5 = vadd.f32 %v4624_v55, %v4587_v17 }
 0xc8c   :  { %v4656_v9 = vadd.f32 %v4655_v47, %v4625_v5 }
 0xc8e   :  { %v4701_v37 = vadd.f32 %v4700_v1, %v4656_v9 }
 0xc90   :  { %v4730_v43 = vadd.f32 %v4729_v33, %v4701_v37 }
 0xc92   :  { %9898 = vtanh.f32 %v4730_v43 }
 0xc93   :  { %9900 = vpow2.f32 %v9753_v52 }
 0xc94   :  { %9902 = vpow2.f32 %v9752_v23  ;;  %v9754_v23 = vmul.f32 -1.442695, %v4730_v43 }
 0xc98   :  { %v9899_v59 = vpop.eup %9898 }
 0xc99   :  { %4754 = vrot.lane.b32.xlu1 %v9899_v59, %s10252_s1  ;;  %v9901_v0 = vpop.eup %9900 }
 0xc9a   :  { %v4451_v26 = vadd.f32 1.0, %v9901_v0  ;;  %v9903_v46 = vpop.eup %9902 }
 0xc9b   :  { %v4161_v14 = vadd.f32 1.0, %v9903_v46 }
 0xc9c   :  { %9904 = vrcp.f32 %v4451_v26  ;;  %v4463_v33 = vand.u32 2147483648, %v4451_v26  ;;  %vm4457_vm15 = vweird.f32 %v4451_v26  ;;  %v4461_v58 = vand.u32 2147483647, %v4451_v26 }
 0xc9d   :  { %9906 = vrcp.f32 %v4161_v14  ;;  %v4173_v44 = vand.u32 2147483648, %v4161_v14  ;;  %vm4167_vm2 = vweird.f32 %v4161_v14 }
 0xc9e   :  { %v4464_v52 = vor.u32 1.1754944e-38, %v4463_v33  ;;  %vm4462_vm0 = vcmp.eq.f32.partialorder %v4461_v58, 8.507059e+37  ;;  %9908 = vpow2.f32 %v9754_v23 }
 0xca2   :  { %v9905_v60 = vpop.eup %9904 }
 0xca3   :  { %v4453_v17 = vmul.f32 %v9905_v60, %v4451_v26  ;;  %v9907_v55 = vpop.eup %9906  ;;  %vm4458_vm14 = vweird.f32 %v9905_v60  ;;  %v4174_v26 = vor.u32 1.1754944e-38, %v4173_v44 }
 0xca4   :  { %v4163_v47 = vmul.f32 %v9907_v55, %v4161_v14  ;;  %vm4459_vm8 = vmor %vm4457_vm15, %vm4458_vm14  ;;  %vm4168_vm1 = vweird.f32 %v9907_v55  ;;  %v9909_v43 = vpop.eup %9908 }
 0xca5   :  { %v4454_v5 = vsub.f32 1.0, %v4453_v17  ;;  %vm4169_vm5 = vmor %vm4167_vm2, %vm4168_vm1 }
 0xca6   :  { %v4164_v1 = vsub.f32 1.0, %v4163_v47 }
 0xca7   :  { %v4455_v9 = vmul.f32 %v9905_v60, %v4454_v5  ;;  %v4171_v5 = vand.u32 2147483647, %v4161_v14 }
 0xca8   :  { %v4165_v61 = vmul.f32 %v9907_v55, %v4164_v1 }
 0xca9   :  { %v4456_v37 = vadd.f32 %v9905_v60, %v4455_v9  ;;  %vm4172_vm6 = vcmp.eq.f32.partialorder %v4171_v5, 8.507059e+37  ;;  %v13400_v5 = vld [vmem:[#allocation59_spill] sm:$0xff] }
 0xcaa   :  { %v4166_v0 = vadd.f32 %v9907_v55, %v4165_v61 }
 0xcab   :  { %v4460_v59 = vsel %vm4459_vm8, %v9905_v60, %v4456_v37  ;;  %v4735_v37 = vadd.f32 1.0, %v9909_v43  ;;  %v13401_v43 = vld [vmem:[#allocation58_spill] sm:$0xff] }
 0xcac   :  { %v4465_v27 = vsel %vm4462_vm0, %v4464_v52, %v4460_v59  ;;  %v4170_v47 = vsel %vm4169_vm5, %v9907_v55, %v4166_v0 }
 0xcad   :  { %v4175_v60 = vsel %vm4172_vm6, %v4174_v26, %v4170_v47  ;;  %9910 = vrcp.f32 %v4735_v37  ;;  %v4747_v52 = vand.u32 2147483648, %v4735_v37  ;;  %vm4741_vm9 = vweird.f32 %v4735_v37 }
 0xcae   :  { %v4745_v23 = vand.u32 2147483647, %v4735_v37  ;;  %v4468_v47 = vmul.f32 %v4465_v27, %v13400_v5 }
 0xcaf   :  { %v4748_v55 = vor.u32 1.1754944e-38, %v4747_v52 }
 0xcb0   :  { %vm4746_vm11 = vcmp.eq.f32.partialorder %v4745_v23, 8.507059e+37 }
 0xcb3   :  { %v9911_v33 = vpop.eup %9910 }
 0xcb4   :  { %v4737_v58 = vmul.f32 %v9911_v33, %v4735_v37  ;;  %vm4742_vm7 = vweird.f32 %v9911_v33  ;;  %v4179_v37 = vrot.slane %v13401_v43, 6 }
 0xcb5   :  { %vm4743_vm10 = vmor %vm4741_vm9, %vm4742_vm7 }
 0xcb6   :  { %v4738_v61 = vsub.f32 1.0, %v4737_v58 }
 0xcb8   :  { %v4739_v59 = vmul.f32 %v9911_v33, %v4738_v61 }
 0xcba   :  { %v4740_v14 = vadd.f32 %v9911_v33, %v4739_v59 }
 0xcbc   :  { %v4744_v44 = vsel %vm4743_vm10, %v9911_v33, %v4740_v14  ;;  %v4181_v33 = vmul.f32 %v4179_v37, %v4175_v60 }
 0xcdf   :  { %v4471_v46 = vpop.permute.xlu2 %4470 }
 0xce0   :  { %v4473_v17 = vmul.f32 %v4471_v46, %v4465_v27  ;;  %v4749_v46 = vsel %vm4746_vm11, %v4748_v55, %v4744_v44 }
 0xce1   :  { %v4752_v14 = vmul.f32 0.0, %v4749_v46 }
 0xce2   :  { %4475 = vrot.lane.b32.xlu2 %v4473_v17, %s10253_s4 }
 0xce4   :  { %v4184_v9 = vpop.permute.xlu1 %4183 }
 0xce5   :  { %v4186_v1 = vmul.f32 %v4184_v9, %v4175_v60 }
 0xce7   :  { %4188 = vrot.lane.b32.xlu0 %v4186_v1, %s10253_s4 }
 0xd0b   :  { %v4755_v0 = vpop.permute.xlu1 %4754 }
 0xd0c   :  { %v4757_v17 = vmul.f32 %v4755_v0, %v4749_v46 }
 0xd0e   :  { %4759 = vrot.lane.b32.xlu0 %v4757_v17, %s10253_s4 }
 0xd3c   :  { %v4476_v26 = vpop.permute.xlu2 %4475 }
 0xd3d   :  { %v12007_v9 = vadd.f32 %v4476_v26, %v4468_v47 }
 0xd3f   :  { %9912 = vtanh.f32 %v12007_v9 }
 0xd45   :  { %v9913_v1 = vpop.eup %9912 }
 0xd46   :  { %4481 = vrot.lane.b32.xlu2 %v9913_v1, %s10252_s1 }
 0xd59   :  { %v4189_v58 = vpop.permute.xlu0 %4188 }
 0xd5a   :  { %v12012_v61 = vadd.f32 %v4189_v58, %v4181_v33 }
 0xd5c   :  { %9914 = vtanh.f32 %v12012_v61 }
 0xd62   :  { %v9915_v59 = vpop.eup %9914 }
 0xd63   :  { %4194 = vrot.lane.b32.xlu1 %v9915_v59, %s10252_s1 }
 0xd80   :  { %v4760_v52 = vpop.permute.xlu0 %4759 }
 0xd81   :  { %v12016_v23 = vadd.f32 %v4760_v52, %v4752_v14 }
 0xd83   :  { %9916 = vtanh.f32 %v12016_v23 }
 0xd89   :  { %v9917_v44 = vpop.eup %9916 }
 0xd8a   :  { %4765 = vrot.lane.b32.xlu0 %v9917_v44, %s10252_s1 }
 0xda0   :  { %v4482_v55 = vpop.permute.xlu2 %4481 }
 0xda1   :  { %v4484_v0 = vmul.f32 %v4482_v55, %v4465_v27 }
 0xda3   :  { %v5008_v17 = vrot.slane %v4484_v0, 4 }
 0xda5   :  { %5009 = vrot.lane.b32.xlu0 %v5008_v17, %s10252_s1 }
 0xdd5   :  { %v4195_v5 = vpop.permute.xlu1 %4194 }
 0xdd6   :  { %v4197_v47 = vmul.f32 %v4195_v5, %v4175_v60 }
 0xdd8   :  { %v4770_v26 = vrot.slane %v4197_v47, 4  ;;  %5004 = vrot.lane.b32.xlu2 %v4197_v47, %s10253_s4 }
 0xdda   :  { %4771 = vrot.lane.b32.xlu1 %v4770_v26, %s10253_s4 }
 0xde2   :  { %5291 = vrot.lane.b32.xlu1 %v4484_v0, %s10253_s4 }
 0xdfc   :  { %v4766_v1 = vpop.permute.xlu0 %4765 }
 0xdfd   :  { %v12024_v43 = vmul.f32 %v4766_v1, %v4749_v46 }
 0xdff   :  { %13402 = vst [vmem:[#allocation59_spill] sm:$0xff] %v12024_v43  ;;  %5295 = vrot.lane.b32.xlu2 %v12024_v43, %s10252_s1  ;;  %v13419_v43 = vld [vmem:[#allocation70_spill] sm:$0xff] }
 0xe17   :  { %v5010_v27 = vpop.permute.xlu0 %5009 }
 0xe32   :  { %v5005_v37 = vpop.permute.xlu2 %5004 }
 0xe33   :  { %v5012_v33 = vsel %vm428_vm3, %v5005_v37, %v5010_v27  ;;  %v13403_v37 = vld [vmem:[#allocation44_spill] sm:$0xff]  ;;  %v13404_v27 = vld [vmem:[#allocation23_spill] sm:$0xff] }
 0xe34   :  { %v5014_v58 = vrot.slane %v5012_v33, 4  ;;  %v13405_v33 = vld [vmem:[#allocation22_spill] sm:$0xff] }
 0xe36   :  { %v5015_v60 = vsel %vm3685_vm4, %v5014_v58, 0  ;;  %v13406_v58 = vld [vmem:[#allocation34_spill] sm:$0xff] }
 0xe37   :  { %v5041_v59 = vand.u32 4294901760, %v5015_v60 }
 0xe39   :  { %v12030_v52 = vsub.f32 %v5015_v60, %v5041_v59  ;;  %v13407_v60 = vld [vmem:[#allocation73_spill] sm:$0xff] }
 0xe3b   :  { %v5043_v46 = vand.u32 4294901760, %v12030_v52 }
 0xe3d   :  { %v5044_v47 = vsub.f32 %v12030_v52, %v5043_v46 }
 0xe3f   :  { %v5045_v1 = vand.u32 4294901760, %v5044_v47  ;;  %v13410_v47 = vld [vmem:[#allocation50_spill] sm:$0xff] }
 0xe4c   :  { %v4772_v14 = vpop.permute.xlu1 %4771 }
 0xe4d   :  { %v4773_v44 = vsel %vm428_vm3, %v4772_v14, 0 }
 0xe4e   :  { %v4795_v55 = vand.u32 4294901760, %v4773_v44 }
 0xe50   :  { %v4796_v0 = vsub.f32 %v4773_v44, %v4795_v55  ;;  %4841 = vmatmul.f32.vlgmr.msrb.gmra.mxu3 %v4795_v55 }
 0xe51   :  { %5158 = vmatpush.msrb.mxu3 %v11533_v35 }
 0xe52   :  { %v4797_v17 = vand.u32 4294901760, %v4796_v0  ;;  %4871 = vmatmul.f32.vlgmr.msra.gmra.mxu0 %v4796_v0 }
 0xe53   :  { %5160 = vmatpush.msrb.mxu3 %v11535_v50  ;;  %5191 = vmatpush.msra.mxu0 %v11556_v13 }
 0xe54   :  { %v4798_v5 = vsub.f32 %v4796_v0, %v4797_v17  ;;  %4898 = vmatmul.f32.vlgmr.msra.gmra.mxu1 %v4797_v17  ;;  %v5292_v44 = vpop.permute.xlu1 %5291  ;;  %v13408_v0 = vld [vmem:[#allocation49_spill] sm:$0xff]  ;;  %v13409_v17 = vld [vmem:[#allocation76_spill] sm:$0xff] }
 0xe55   :  { %5162 = vmatpush.msrb.mxu3 %v11537_v16  ;;  %5195 = vmatpush.msra.mxu0 %v11559_v12 }
 0xe56   :  { %v4799_v26 = vand.u32 4294901760, %v4798_v5  ;;  %5234 = vmatpush.msra.mxu1 %v11533_v35 }
 0xe57   :  { %5164 = vmatpush.msrb.mxu3 %v11539_v54  ;;  %5199 = vmatpush.msra.mxu0 %v11562_v21 }
 0xe58   :  { %5236 = vmatpush.msra.mxu1 %v11535_v50  ;;  %4800 = vmatmul.f32.vlgmr.msrb.gmra.mxu2 %v4799_v26  ;;  %v13411_v26 = vld [vmem:[#allocation79_spill] sm:$0xff] }
 0xe59   :  { %4956 = vmatmul.f32.vlgmr.msra.gmra.mxu3 %v4795_v55  ;;  %5121 = vmatpush.msrb.mxu2 %v13403_v37  ;;  %v5296_v14 = vpop.permute.xlu2 %5295 }
 0xe5a   :  { %5166 = vmatpush.msrb.mxu3 %v11579_v51  ;;  %5203 = vmatpush.msra.mxu0 %v11565_v19  ;;  %v5298_v5 = vsel %vm428_vm3, %v5292_v44, %v5296_v14  ;;  %v13414_v44 = vld [vmem:[#allocation52_spill] sm:$0xff] }
 0xe5b   :  { %5238 = vmatpush.msra.mxu1 %v11537_v16  ;;  %5046 = vmatmul.f32.vlgmr.msrb.gmra.mxu0 %v5045_v1  ;;  %v13413_v1 = vld [vmem:[#allocation82_spill] sm:$0xff] }
 0xe5c   :  { %5124 = vmatpush.msrb.mxu2 %v13404_v27  ;;  %5168 = vmatpush.msrb.mxu3 %v11596_v18 }
 0xe5d   :  { %5207 = vmatpush.msra.mxu0 %v11603_v15  ;;  %5240 = vmatpush.msra.mxu1 %v11539_v54 }
 0xe5e   :  { %5107 = vmatmul.f32.vlgmr.msrb.gmra.mxu1 %v5041_v59  ;;  %5127 = vmatpush.msrb.mxu2 %v13405_v33 }
 0xe5f   :  { %5170 = vmatpush.msrb.mxu3 %v11598_v53  ;;  %5211 = vmatpush.msra.mxu0 %v11619_v41 }
 0xe60   :  { %5242 = vmatpush.msra.mxu1 %v11579_v51  ;;  %5130 = vmatpush.msrb.mxu2 %v13406_v58 }
 0xe61   :  { %5172 = vmatpush.msrb.mxu3 %v11600_v7  ;;  %5215 = vmatpush.msra.mxu0 %v11622_v48 }
 0xe62   :  { %5244 = vmatpush.msra.mxu1 %v11596_v18  ;;  %4931 = vmatmul.f32.vlgmr.msra.gmra.mxu2 %v4795_v55  ;;  %v5300_v55 = vsel %vm3685_vm4, %v5298_v5, 0 }
 0xe63   :  { %5348 = vmatpush.msra.mxu3 %v13407_v60  ;;  %5133 = vmatpush.msrb.mxu2 %v13408_v0  ;;  %v12077_v14 = vand.u32 4294901760, %v5300_v55 }
 0xe64   :  { %5176 = vmatmul.f32.vlgmr.msrb.gmra.mxu3 %v5043_v46  ;;  %5219 = vmatpush.msra.mxu0 %v11625_v10  ;;  %v13412_v46 = vld [vmem:[#allocation51_spill] sm:$0xff] }
 0xe65   :  { %5246 = vmatpush.msra.mxu1 %v11598_v53  ;;  %5354 = vmatpush.msra.mxu3 %v13409_v17 }
 0xe66   :  { %5406 = vmatpush.msrb.mxu0 %v11750_v22  ;;  %5136 = vmatpush.msrb.mxu2 %v13410_v47 }
 0xe67   :  { %5221 = vmatmul.f32.vlgmr.msra.gmra.mxu0 %v5041_v59  ;;  %5248 = vmatpush.msra.mxu1 %v11600_v7 }
 0xe68   :  { %5360 = vmatpush.msra.mxu3 %v13411_v26  ;;  %5409 = vmatpush.msrb.mxu0 %v13382_v38 }
 0xe69   :  { %5443 = vmatpush.msrb.mxu1 %v11745_v11  ;;  %5139 = vmatpush.msrb.mxu2 %v13412_v46 }
 0xe6a   :  { %5250 = vmatmul.f32.vlgmr.msra.gmra.mxu1 %v5041_v59  ;;  %5366 = vmatpush.msra.mxu3 %v13413_v1  ;;  %v5327_v59 = vsub.f32 %v5300_v55, %v12077_v14 }
 0xe6b   :  { %5412 = vmatpush.msrb.mxu0 %v13384_v24  ;;  %5445 = vmatpush.msrb.mxu1 %v11747_v56 }
 0xe6c   :  { %5142 = vmatpush.msrb.mxu2 %v13414_v44  ;;  %5372 = vmatpush.msra.mxu3 %v11855_v40 }
 0xe6d   :  { %5415 = vmatpush.msrb.mxu0 %v13386_v29  ;;  %5447 = vmatpush.msrb.mxu1 %v11752_v34 }
 0xe6e   :  { %5311 = vmatpush.msra.mxu2 %v11745_v11  ;;  %5378 = vmatpush.msra.mxu3 %v11864_v6 }
 0xe6f   :  { %5145 = vmatmul.f32.vlgmr.msrb.gmra.mxu2 %v12030_v52  ;;  %5418 = vmatpush.msrb.mxu0 %v13389_v57  ;;  %v5328_v52 = vand.u32 4294901760, %v5327_v59 }
 0xe70   :  { %5313 = vmatpush.msra.mxu2 %v11747_v56  ;;  %5449 = vmatpush.msrb.mxu1 %v11757_v4 }
 0xe71   :  { %5384 = vmatpush.msra.mxu3 %v11871_v31  ;;  %5421 = vmatpush.msrb.mxu0 %v11798_v49  ;;  %v5329_v5 = vsub.f32 %v5327_v59, %v5328_v52 }
 0xe72   :  { %5315 = vmatpush.msra.mxu2 %v11752_v34  ;;  %5451 = vmatpush.msrb.mxu1 %v11771_v63 }
 0xe73   :  { %5390 = vmatpush.msra.mxu3 %v11877_v62  ;;  %5424 = vmatpush.msrb.mxu0 %v11812_v20  ;;  %v5330_v55 = vand.u32 4294901760, %v5329_v5  ;;  %v13417_v5 = vld [vmem:[#allocation68_spill] sm:$0xff] }
 0xe74   :  { %5317 = vmatpush.msra.mxu2 %v11757_v4  ;;  %5453 = vmatpush.msrb.mxu1 %v11778_v36 }
 0xe75   :  { %5392 = vmatmul.f32.vlgmr.msra.gmra.mxu3 %v12077_v14  ;;  %5427 = vmatpush.msrb.mxu0 %v11826_v2 }
 0xe76   :  { %5319 = vmatpush.msra.mxu2 %v11771_v63  ;;  %5519 = vmatpush.msrb.mxu3 %v11745_v11 }
 0xe77   :  { %5455 = vmatpush.msrb.mxu1 %v11789_v8  ;;  %5430 = vmatmul.f32.vlgmr.msrb.gmra.mxu0 %v5327_v59  ;;  %v13415_v59 = vld [vmem:[#allocation65_spill] sm:$0xff] }
 0xe78   :  { %5521 = vmatpush.msrb.mxu3 %v11747_v56  ;;  %5321 = vmatpush.msra.mxu2 %v11778_v36 }
 0xe79   :  { %5457 = vmatpush.msrb.mxu1 %v11800_v45  ;;  %5595 = vmatpush.msra.mxu0 %v11384_v25 }
 0xe7a   :  { %5461 = vmatmul.f32.vlgmr.msrb.gmra.mxu1 %v5328_v52  ;;  %5523 = vmatpush.msrb.mxu3 %v11752_v34  ;;  %v13416_v52 = vld [vmem:[#allocation33_spill] sm:$0xff] }
 0xe7b   :  { %5323 = vmatpush.msra.mxu2 %v11789_v8  ;;  %5628 = vmatpush.msra.mxu1 %v13387_v28 }
 0xe7c   :  { %5525 = vmatpush.msrb.mxu3 %v11757_v4  ;;  %5597 = vmatpush.msra.mxu0 %v11411_v3 }
 0xe7d   :  { %5325 = vmatpush.msra.mxu2 %v11800_v45  ;;  %5634 = vmatpush.msra.mxu1 %v13390_v42  ;;  %v13426_v42 = vld [vmem:[#allocation84_spill] sm:$0xff] }
 0xe7e   :  { %5331 = vmatmul.f32.vlgmr.msra.gmra.mxu2 %v5330_v55  ;;  %5527 = vmatpush.msrb.mxu3 %v11771_v63  ;;  %v13418_v55 = vld [vmem:[#allocation19_spill] sm:$0xff] }
 0xe7f   :  { %5476 = vmatpush.msrb.mxu2 %v11760_v39  ;;  %5640 = vmatpush.msra.mxu1 %v13391_v32  ;;  %v13423_v32 = vld [vmem:[#allocation45_spill] sm:$0xff] }
 0xe80   :  { %5529 = vmatpush.msrb.mxu3 %v11778_v36  ;;  %5599 = vmatpush.msra.mxu0 %v11413_v30  ;;  %v13425_v39 = vld [vmem:[#allocation25_spill] sm:$0xff] }
 0xe81   :  { %5480 = vmatpush.msrb.mxu2 %v13415_v59  ;;  %5646 = vmatpush.msra.mxu1 %v13416_v52  ;;  %v13420_v52 = vld [vmem:[#allocation77_spill] sm:$0xff] }
 0xe82   :  { %5531 = vmatpush.msrb.mxu3 %v11789_v8  ;;  %5601 = vmatpush.msra.mxu0 %v13418_v55  ;;  %v13421_v59 = vld [vmem:[#allocation37_spill] sm:$0xff] }
 0xe83   :  { %5755 = vmatpush.msrb.mxu1 %v11384_v25  ;;  %5484 = vmatpush.msrb.mxu2 %v13417_v5  ;;  %v13422_v5 = vld [vmem:[#allocation80_spill] sm:$0xff]  ;;  %v13441_v36 = vld [vmem:[#allocation41_spill] sm:$0xff] }
 0xe84   :  { %5533 = vmatpush.msrb.mxu3 %v11800_v45  ;;  %5724 = vmatpush.msrb.mxu0 %v13421_v59  ;;  %v13428_v59 = vld [vmem:[#allocation31_spill] sm:$0xff]  ;;  %v12167_v45 = vld [vmem:[%s13083_s11 + $0x1] ss:$0 sm:$0xff] }
 0xe85   :  { %5757 = vmatpush.msrb.mxu1 %v11411_v3  ;;  %5488 = vmatpush.msrb.mxu2 %v13419_v43  ;;  %v13424_v43 = vld [vmem:[#allocation83_spill] sm:$0xff]  ;;  %13440 = vst [vmem:[#allocation58_spill] sm:$0xff] %v12167_v45 }
 0xe86   :  { %5535 = vmatmul.f32.vlgmr.msrb.gmra.mxu3 %v12077_v14  ;;  %5728 = vmatpush.msrb.mxu0 %v13423_v32  ;;  %v13431_v32 = vld [vmem:[#allocation28_spill] sm:$0xff] }
 0xe87   :  { %5695 = vmatpush.msra.mxu3 %v11384_v25  ;;  %5759 = vmatpush.msrb.mxu1 %v11413_v30 }
 0xe88   :  { %5492 = vmatpush.msrb.mxu2 %v13420_v52  ;;  %5732 = vmatpush.msrb.mxu0 %v13425_v39  ;;  %v13427_v52 = vld [vmem:[#allocation40_spill] sm:$0xff] }
 0xe89   :  { %5697 = vmatpush.msra.mxu3 %v11411_v3  ;;  %5761 = vmatpush.msrb.mxu1 %v13418_v55  ;;  %v13429_v3 = vld [vmem:[#allocation30_spill] sm:$0xff]  ;;  %v13434_v39 = vld [vmem:[#allocation48_spill] sm:$0xff] }
 0xe8a   :  { %5496 = vmatpush.msrb.mxu2 %v13422_v5  ;;  %5736 = vmatpush.msrb.mxu0 %v13428_v59  ;;  %v13430_v5 = vld [vmem:[#allocation46_spill] sm:$0xff] }
 0xe8b   :  { %5699 = vmatpush.msra.mxu3 %v11413_v30  ;;  %v13432_v30 = vld [vmem:[#allocation47_spill] sm:$0xff] }
 0xe8c   :  { %5500 = vmatpush.msrb.mxu2 %v13424_v43  ;;  %v13433_v43 = vld [vmem:[#allocation21_spill] sm:$0xff] }
 0xe8d   :  { %5701 = vmatpush.msra.mxu3 %v13418_v55  ;;  %v13435_v55 = vld [vmem:[#allocation20_spill] sm:$0xff] }
 0xe8e   :  { %5504 = vmatpush.msrb.mxu2 %v13426_v42  ;;  %v13436_v42 = vld [vmem:[#allocation53_spill] sm:$0xff] }
 0xe8f   :  { %5867 = vmatpush.msrb.mxu3 %v13427_v52  ;;  %5506 = vmatmul.f32.vlgmr.msrb.gmra.mxu2 %v12077_v14  ;;  %v13437_v14 = vld [vmem:[#allocation54_spill] sm:$0xff] }
 0xe90   :  { %5666 = vmatpush.msra.mxu2 %v13429_v3  ;;  %v13438_v3 = vld [vmem:[#allocation55_spill] sm:$0xff] }
 0xe91   :  { %5873 = vmatpush.msrb.mxu3 %v13430_v5 }
 0xe92   :  { %5669 = vmatpush.msra.mxu2 %v13431_v32  ;;  %v13439_v32 = vld [vmem:[#allocation56_spill] sm:$0xff] }
 0xe93   :  { %5879 = vmatpush.msrb.mxu3 %v13432_v30 }
 0xe94   :  { %5672 = vmatpush.msra.mxu2 %v13433_v43 }
 0xe95   :  { %5885 = vmatpush.msrb.mxu3 %v13434_v39 }
 0xe96   :  { %5675 = vmatpush.msra.mxu2 %v13435_v55 }
 0xe97   :  { %5891 = vmatpush.msrb.mxu3 %v13436_v42 }
 0xe98   :  { %5830 = vmatpush.msrb.mxu2 %v11533_v35 }
 0xe99   :  { %5897 = vmatpush.msrb.mxu3 %v13437_v14 }
 0xe9a   :  { %5832 = vmatpush.msrb.mxu2 %v11535_v50 }
 0xe9b   :  { %5903 = vmatpush.msrb.mxu3 %v13438_v3 }
 0xe9c   :  { %5834 = vmatpush.msrb.mxu2 %v11537_v16 }
 0xe9d   :  { %5909 = vmatpush.msrb.mxu3 %v13439_v32 }
 0xe9e   :  { %5836 = vmatpush.msrb.mxu2 %v11539_v54 }
 0xea0   :  { %5838 = vmatpush.msrb.mxu2 %v11579_v51 }
 0xea2   :  { %5840 = vmatpush.msrb.mxu2 %v11596_v18 }
 0xea4   :  { %5842 = vmatpush.msrb.mxu2 %v11598_v53 }
 0xea6   :  { %5844 = vmatpush.msrb.mxu2 %v11600_v7 }
 0xecf   :  { %v4872_v39 = vpop.f32.mrf.mxu0 }
 0xed1   :  { %v4899_v3 = vpop.f32.mrf.mxu1 }
 0xed3   :  { %v4842_v14 = vpop.f32.mrf.mxu3 }
 0xed8   :  { %v5047_v59 = vpop.f32.mrf.mxu0 }
 0xed9   :  { %v5048_v8 = vadd.f32 %v12167_v45, %v5047_v59  ;;  %v13442_v59 = vld [vmem:[#allocation57_spill] sm:$0xff] }
 0xedb   :  { %v4801_v42 = vpop.f32.mrf.mxu2  ;;  %v5108_v2 = vpop.f32.mrf.mxu1 }
 0xedc   :  { %v4843_v55 = vadd.f32 %v4842_v14, %v4801_v42  ;;  %v4957_v32 = vpop.f32.mrf.mxu3 }
 0xede   :  { %v4873_v43 = vadd.f32 %v4872_v39, %v4843_v55  ;;  %v5109_v39 = vadd.f32 %v5108_v2, %v5048_v8 }
 0xee0   :  { %v4900_v30 = vadd.f32 %v4899_v3, %v4873_v43 }
 0xee4   :  { %v5222_v14 = vpop.f32.mrf.mxu0 }
 0xee5   :  { %v4932_v5 = vpop.f32.mrf.mxu2 }
 0xee6   :  { %v4933_v52 = vadd.f32 %v4932_v5, %v4900_v30 }
 0xee7   :  { %v5177_v43 = vpop.f32.mrf.mxu3 }
 0xee8   :  { %v4958_v28 = vadd.f32 %v4957_v32, %v4933_v52 }
 0xeea   :  { %v4961_v25 = vrot.slane %v4958_v28, 2  ;;  %v5251_v28 = vpop.f32.mrf.mxu1 }
 0xeec   :  { %v4963_v42 = vadd.f32 %v4961_v25, %v13441_v36 }
 0xeee   :  { %9918 = vtanh.f32 %v4963_v42 }
 0xef2   :  { %v5146_v55 = vpop.f32.mrf.mxu2 }
 0xef3   :  { %v5147_v3 = vadd.f32 %v5146_v55, %v5109_v39 }
 0xef4   :  { %v9919_v5 = vpop.eup %9918  ;;  %v5431_v2 = vpop.f32.mrf.mxu0 }
 0xef5   :  { %v5178_v30 = vadd.f32 %v5177_v43, %v5147_v3  ;;  %4989 = vrot.lane.b32.xlu0 %v9919_v5, %s10252_s1 }
 0xef7   :  { %v5223_v32 = vadd.f32 %v5222_v14, %v5178_v30  ;;  %v5462_v55 = vpop.f32.mrf.mxu1 }
 0xef8   :  { %v5393_v36 = vpop.f32.mrf.mxu3 }
 0xef9   :  { %v5252_v52 = vadd.f32 %v5251_v28, %v5223_v32  ;;  %v9755_v32 = vmul.f32 -1.442695, %v4963_v42 }
 0xefb   :  { %9920 = vtanh.f32 %v5252_v52 }
 0xf01   :  { %v9921_v20 = vpop.eup %9920  ;;  %v5332_v62 = vpop.f32.mrf.mxu2 }
 0xf02   :  { %5276 = vrot.lane.b32.xlu1 %v9921_v20, %s10252_s1  ;;  %v5333_v25 = vadd.f32 %v13442_v59, %v5332_v62  ;;  %v9756_v20 = vmul.f32 -1.442695, %v5252_v52 }
 0xf04   :  { %v5394_v8 = vadd.f32 %v5393_v36, %v5333_v25 }
 0xf06   :  { %v5432_v39 = vadd.f32 %v5431_v2, %v5394_v8 }
 0xf08   :  { %v5463_v3 = vadd.f32 %v5462_v55, %v5432_v39 }
 0xf09   :  { %v5536_v30 = vpop.f32.mrf.mxu3 }
 0xf12   :  { %v5507_v43 = vpop.f32.mrf.mxu2 }
 0xf13   :  { %v5508_v45 = vadd.f32 %v5507_v43, %v5463_v3 }
 0xf15   :  { %v5537_v14 = vadd.f32 %v5536_v30, %v5508_v45 }
 0xf17   :  { %9922 = vtanh.f32 %v5537_v14  ;;  %v9757_v62 = vmul.f32 -1.442695, %v5537_v14 }
 0xf18   :  { %9924 = vpow2.f32 %v9755_v32 }
 0xf19   :  { %9926 = vpow2.f32 %v9756_v20 }
 0xf1d   :  { %v9923_v5 = vpop.eup %9922 }
 0xf1e   :  { %5561 = vrot.lane.b32.xlu2 %v9923_v5, %s10252_s1  ;;  %v9925_v28 = vpop.eup %9924 }
 0xf1f   :  { %v4967_v63 = vadd.f32 1.0, %v9925_v28  ;;  %v9927_v59 = vpop.eup %9926 }
 0xf20   :  { %v5257_v8 = vadd.f32 1.0, %v9927_v59 }
 0xf21   :  { %9928 = vrcp.f32 %v4967_v63  ;;  %v4979_v30 = vand.u32 2147483648, %v4967_v63  ;;  %vm4973_vm13 = vweird.f32 %v4967_v63  ;;  %v4977_v14 = vand.u32 2147483647, %v4967_v63 }
 0xf22   :  { %9930 = vpow2.f32 %v9757_v62  ;;  %v5269_v31 = vand.u32 2147483648, %v5257_v8  ;;  %vm5263_vm0 = vweird.f32 %v5257_v8  ;;  %v5267_v4 = vand.u32 2147483647, %v5257_v8 }
 0xf23   :  { %9932 = vrcp.f32 %v5257_v8  ;;  %v4980_v20 = vor.u32 1.1754944e-38, %v4979_v30  ;;  %vm4978_vm15 = vcmp.eq.f32.partialorder %v4977_v14, 8.507059e+37 }
 0xf24   :  { %vm5268_vm6 = vcmp.eq.f32.partialorder %v5267_v4, 8.507059e+37  ;;  %v4985_v4 = vrot.slane %v12012_v61, 6 }
 0xf27   :  { %v9929_v25 = vpop.eup %9928 }
 0xf28   :  { %v9931_v36 = vpop.eup %9930  ;;  %v4969_v2 = vmul.f32 %v9929_v25, %v4967_v63  ;;  %vm4974_vm12 = vweird.f32 %v9929_v25 }
 0xf29   :  { %v5542_v39 = vadd.f32 1.0, %v9931_v36  ;;  %v9933_v3 = vpop.eup %9932  ;;  %vm4975_vm14 = vmor %vm4973_vm13, %vm4974_vm12 }
 0xf2a   :  { %v4970_v45 = vsub.f32 1.0, %v4969_v2  ;;  %v5259_v52 = vmul.f32 %v9933_v3, %v5257_v8  ;;  %vm5264_vm8 = vweird.f32 %v9933_v3 }
 0xf2b   :  { %9934 = vrcp.f32 %v5542_v39  ;;  %vm5265_vm1 = vmor %vm5263_vm0, %vm5264_vm8  ;;  %vm5548_vm5 = vweird.f32 %v5542_v39  ;;  %v5552_v30 = vand.u32 2147483647, %v5542_v39 }
 0xf2c   :  { %v4971_v55 = vmul.f32 %v9929_v25, %v4970_v45  ;;  %v5260_v28 = vsub.f32 1.0, %v5259_v52  ;;  %v5270_v52 = vor.u32 1.1754944e-38, %v5269_v31 }
 0xf2d   :  { %vm5553_vm9 = vcmp.eq.f32.partialorder %v5552_v30, 8.507059e+37 }
 0xf2e   :  { %v4972_v43 = vadd.f32 %v9929_v25, %v4971_v55  ;;  %v5261_v49 = vmul.f32 %v9933_v3, %v5260_v28 }
 0xf30   :  { %v4976_v32 = vsel %vm4975_vm14, %v9929_v25, %v4972_v43  ;;  %v5262_v55 = vadd.f32 %v9933_v3, %v5261_v49  ;;  %v5554_v43 = vand.u32 2147483648, %v5542_v39 }
 0xf31   :  { %v9935_v42 = vpop.eup %9934  ;;  %v4981_v62 = vsel %vm4978_vm15, %v4980_v20, %v4976_v32 }
 0xf32   :  { %v5544_v5 = vmul.f32 %v9935_v42, %v5542_v39  ;;  %vm5549_vm2 = vweird.f32 %v9935_v42  ;;  %v5266_v25 = vsel %vm5265_vm1, %v9933_v3, %v5262_v55  ;;  %v5555_v20 = vor.u32 1.1754944e-38, %v5554_v43 }
 0xf33   :  { %vm5550_vm7 = vmor %vm5548_vm5, %vm5549_vm2  ;;  %v4987_v39 = vmul.f32 %v4985_v4, %v4981_v62 }
 0xf34   :  { %v5545_v36 = vsub.f32 1.0, %v5544_v5  ;;  %v5271_v5 = vsel %vm5268_vm6, %v5270_v52, %v5266_v25 }
 0xf36   :  { %v5546_v45 = vmul.f32 %v9935_v42, %v5545_v36 }
 0xf38   :  { %v5547_v63 = vadd.f32 %v9935_v42, %v5546_v45 }
 0xf3a   :  { %v5551_v32 = vsel %vm5550_vm7, %v9935_v42, %v5547_v63  ;;  %vm9668_vm7 = vcmask 1041408  }
 0xf67   :  { %v4990_v59 = vpop.permute.xlu0 %4989 }
 0xf68   :  { %v4992_v2 = vmul.f32 %v4990_v59, %v4981_v62  ;;  %v5556_v59 = vsel %vm5553_vm9, %v5555_v20, %v5551_v32  ;;  %vm9670_vm9 = vcmask 1043456  }
 0xf69   :  { %v5559_v3 = vmul.f32 %v5556_v59, %v12016_v23  ;;  %v5274_v23 = vmul.f32 %v5271_v5, %v12007_v9 }
 0xf6a   :  { %4994 = vrot.lane.b32.xlu0 %v4992_v2, %s10253_s4 }
 0xf74   :  { %v5277_v14 = vpop.permute.xlu1 %5276 }
 0xf75   :  { %v5279_v28 = vmul.f32 %v5277_v14, %v5271_v5 }
 0xf77   :  { %5281 = vrot.lane.b32.xlu1 %v5279_v28, %s10253_s4 }
 0xf78   :  { %v5562_v49 = vpop.permute.xlu2 %5561 }
 0xf79   :  { %v5564_v8 = vmul.f32 %v5562_v49, %v5556_v59 }
 0xf7b   :  { %5566 = vrot.lane.b32.xlu2 %v5564_v8, %s10253_s4 }
 0xfd5   :  { %v5567_v31 = vpop.permute.xlu2 %5566 }
 0xfd6   :  { %v12179_v36 = vadd.f32 %v5567_v31, %v5559_v3 }
 0xfd8   :  { %9936 = vtanh.f32 %v12179_v36 }
 0xfdc   :  { %v4995_v2 = vpop.permute.xlu0 %4994 }
 0xfdd   :  { %v12184_v45 = vadd.f32 %v4995_v2, %v4987_v39 }
 0xfde   :  { %v9937_v42 = vpop.eup %9936 }
 0xfdf   :  { %5572 = vrot.lane.b32.xlu2 %v9937_v42, %s10252_s1  ;;  %9938 = vtanh.f32 %v12184_v45 }
 0xfe5   :  { %v9939_v55 = vpop.eup %9938 }
 0xfe6   :  { %5000 = vrot.lane.b32.xlu0 %v9939_v55, %s10252_s1 }
 0xfe9   :  { %v5282_v63 = vpop.permute.xlu1 %5281 }
 0xfea   :  { %v12189_v25 = vadd.f32 %v5282_v63, %v5274_v23 }
 0xfec   :  { %9940 = vtanh.f32 %v12189_v25 }
 0xff2   :  { %v9941_v61 = vpop.eup %9940 }
 0xff3   :  { %5287 = vrot.lane.b32.xlu1 %v9941_v61, %s10252_s1 }
0x1039   :  { %v5573_v14 = vpop.permute.xlu2 %5572 }
0x103a   :  { %v12195_v32 = vmul.f32 %v5573_v14, %v5556_v59 }
0x1058   :  { %v5001_v43 = vpop.permute.xlu0 %5000 }
0x1059   :  { %v5003_v52 = vmul.f32 %v5001_v43, %v4981_v62 }
0x105b   :  { %v5577_v30 = vrot.slane %v5003_v52, 6  ;;  %5808 = vrot.lane.b32.xlu1 %v5003_v52, %s10253_s4 }
0x105d   :  { %5578 = vrot.lane.b32.xlu0 %v5577_v30, %s10253_s4 }
0x1063   :  { %6099 = vrot.lane.b32.xlu1 %v12195_v32, %s10252_s1 }
0x1065   :  { %v5288_v9 = vpop.permute.xlu1 %5287 }
0x1066   :  { %v5290_v28 = vmul.f32 %v5288_v9, %v5271_v5 }
0x1068   :  { %v5812_v20 = vrot.slane %v5290_v28, 2  ;;  %6095 = vrot.lane.b32.xlu0 %v5290_v28, %s10253_s4 }
0x106a   :  { %5813 = vrot.lane.b32.xlu2 %v5812_v20, %s10252_s1 }
0x10c4   :  { %v5814_v49 = vpop.permute.xlu2 %5813 }
0x10cd   :  { %v5809_v62 = vpop.permute.xlu1 %5808 }
0x10ce   :  { %v5816_v8 = vsel %vm428_vm3, %v5809_v62, %v5814_v49  ;;  %v13443_v62 = vld [vmem:[#allocation62_spill] sm:$0xff] }
0x10cf   :  { %v5818_v3 = vrot.slane %v5816_v8, 6  ;;  %v5579_v31 = vpop.permute.xlu0 %5578  ;;  %v13444_v8 = vld [vmem:[#allocation85_spill] sm:$0xff] }
0x10d0   :  { %v5580_v4 = vsel %vm428_vm3, %v5579_v31, 0  ;;  %v13446_v31 = vld [vmem:[#allocation67_spill] sm:$0xff] }
0x10d1   :  { %v5819_v59 = vsel %vm3685_vm4, %v5818_v3, 0  ;;  %v5602_v39 = vand.u32 4294901760, %v5580_v4  ;;  %v13445_v3 = vld [vmem:[#allocation74_spill] sm:$0xff] }
0x10d2   :  { %v5845_v42 = vand.u32 4294901760, %v5819_v59 }
0x10d3   :  { %v5603_v2 = vsub.f32 %v5580_v4, %v5602_v39  ;;  %5648 = vmatmul.f32.vlgmr.msra.gmra.mxu1 %v5602_v39  ;;  %v13447_v4 = vld [vmem:[#allocation86_spill] sm:$0xff] }
0x10d4   :  { %v12204_v5 = vsub.f32 %v5819_v59, %v5845_v42  ;;  %5962 = vmatpush.msra.mxu1 %v11533_v35 }
0x10d5   :  { %v5604_v55 = vand.u32 4294901760, %v5603_v2  ;;  %5678 = vmatmul.f32.vlgmr.msra.gmra.mxu2 %v5603_v2  ;;  %v6100_v14 = vpop.permute.xlu1 %6099 }
0x10d6   :  { %v5847_v23 = vand.u32 4294901760, %v12204_v5  ;;  %5964 = vmatpush.msra.mxu1 %v11535_v50  ;;  %5995 = vmatpush.msra.mxu2 %v11556_v13 }
0x10d7   :  { %v5605_v63 = vsub.f32 %v5603_v2, %v5604_v55  ;;  %5705 = vmatmul.f32.vlgmr.msra.gmra.mxu3 %v5604_v55  ;;  %v13450_v2 = vld [vmem:[#allocation81_spill] sm:$0xff] }
0x10d8   :  { %v5848_v61 = vsub.f32 %v12204_v5, %v5847_v23  ;;  %5966 = vmatpush.msra.mxu1 %v11537_v16  ;;  %5999 = vmatpush.msra.mxu2 %v11559_v12 }
0x10d9   :  { %v5606_v43 = vand.u32 4294901760, %v5605_v63  ;;  %6038 = vmatpush.msra.mxu3 %v11533_v35  ;;  %v13453_v63 = vld [vmem:[#allocation27_spill] sm:$0xff] }
0x10da   :  { %v5849_v52 = vand.u32 4294901760, %v5848_v61  ;;  %5968 = vmatpush.msra.mxu1 %v11539_v54  ;;  %6003 = vmatpush.msra.mxu2 %v11562_v21  ;;  %v6096_v30 = vpop.permute.xlu0 %6095  ;;  %v13454_v61 = vld [vmem:[#allocation32_spill] sm:$0xff] }
0x10db   :  { %6040 = vmatpush.msra.mxu3 %v11535_v50  ;;  %5607 = vmatmul.f32.vlgmr.msra.gmra.mxu0 %v5606_v43  ;;  %v6102_v9 = vsel %vm428_vm3, %v6096_v30, %v6100_v14  ;;  %v13456_v30 = vld [vmem:[#allocation36_spill] sm:$0xff]  ;;  %v13457_v14 = vld [vmem:[#allocation63_spill] sm:$0xff] }
0x10dc   :  { %5763 = vmatmul.f32.vlgmr.msrb.gmra.mxu1 %v5602_v39  ;;  %5925 = vmatpush.msra.mxu0 %v13403_v37  ;;  %v6104_v28 = vsel %vm3685_vm4, %v6102_v9, 0  ;;  %v13458_v9 = vld [vmem:[#allocation43_spill] sm:$0xff] }
0x10dd   :  { %5970 = vmatpush.msra.mxu1 %v11579_v51  ;;  %6007 = vmatpush.msra.mxu2 %v11565_v19  ;;  %v12250_v20 = vand.u32 4294901760, %v6104_v28 }
0x10de   :  { %6042 = vmatpush.msra.mxu3 %v11537_v16  ;;  %5850 = vmatmul.f32.vlgmr.msrb.gmra.mxu2 %v5849_v52  ;;  %v13455_v52 = vld [vmem:[#allocation17_spill] sm:$0xff] }
0x10df   :  { %5928 = vmatpush.msra.mxu0 %v13404_v27  ;;  %5972 = vmatpush.msra.mxu1 %v11596_v18  ;;  %v6131_v49 = vsub.f32 %v6104_v28, %v12250_v20  ;;  %v13459_v28 = vld [vmem:[#allocation16_spill] sm:$0xff] }
0x10e0   :  { %6011 = vmatpush.msra.mxu2 %v11603_v15  ;;  %6044 = vmatpush.msra.mxu3 %v11539_v54 }
0x10e1   :  { %5911 = vmatmul.f32.vlgmr.msrb.gmra.mxu3 %v5845_v42  ;;  %5931 = vmatpush.msra.mxu0 %v13405_v33  ;;  %v6132_v59 = vand.u32 4294901760, %v6131_v49 }
0x10e2   :  { %5974 = vmatpush.msra.mxu1 %v11598_v53  ;;  %6015 = vmatpush.msra.mxu2 %v11619_v41 }
0x10e3   :  { %6046 = vmatpush.msra.mxu3 %v11579_v51  ;;  %5934 = vmatpush.msra.mxu0 %v13406_v58  ;;  %v6133_v55 = vsub.f32 %v6131_v49, %v6132_v59 }
0x10e4   :  { %5976 = vmatpush.msra.mxu1 %v11600_v7  ;;  %6019 = vmatpush.msra.mxu2 %v11622_v48 }
0x10e5   :  { %6048 = vmatpush.msra.mxu3 %v11596_v18  ;;  %5738 = vmatmul.f32.vlgmr.msrb.gmra.mxu0 %v5602_v39  ;;  %v13448_v39 = vld [vmem:[#allocation78_spill] sm:$0xff]  ;;  %v6134_v43 = vand.u32 4294901760, %v6133_v55  ;;  %v13462_v55 = vld [vmem:[#allocation68_spill] sm:$0xff] }
0x10e6   :  { %6152 = vmatpush.msrb.mxu1 %v13407_v60  ;;  %5937 = vmatpush.msra.mxu0 %v13408_v0 }
0x10e7   :  { %5980 = vmatmul.f32.vlgmr.msra.gmra.mxu1 %v5847_v23  ;;  %6023 = vmatpush.msra.mxu2 %v11625_v10  ;;  %v13452_v23 = vld [vmem:[#allocation75_spill] sm:$0xff] }
0x10e8   :  { %6050 = vmatpush.msra.mxu3 %v11598_v53  ;;  %6158 = vmatpush.msrb.mxu1 %v13409_v17 }
0x10e9   :  { %6210 = vmatpush.msrb.mxu2 %v11750_v22  ;;  %5940 = vmatpush.msra.mxu0 %v13410_v47 }
0x10ea   :  { %6025 = vmatmul.f32.vlgmr.msra.gmra.mxu2 %v5845_v42  ;;  %6052 = vmatpush.msra.mxu3 %v11600_v7 }
0x10eb   :  { %6164 = vmatpush.msrb.mxu1 %v13411_v26  ;;  %6213 = vmatpush.msrb.mxu2 %v13382_v38 }
0x10ec   :  { %6247 = vmatpush.msrb.mxu3 %v11745_v11  ;;  %5943 = vmatpush.msra.mxu0 %v13412_v46 }
0x10ed   :  { %6054 = vmatmul.f32.vlgmr.msra.gmra.mxu3 %v5845_v42  ;;  %6170 = vmatpush.msrb.mxu1 %v13413_v1  ;;  %v13449_v42 = vld [vmem:[#allocation69_spill] sm:$0xff] }
0x10ee   :  { %6216 = vmatpush.msrb.mxu2 %v13384_v24  ;;  %6249 = vmatpush.msrb.mxu3 %v11747_v56  ;;  %v13488_v24 = vld [vmem:[#allocation42_spill] sm:$0xff] }
0x10ef   :  { %5946 = vmatpush.msra.mxu0 %v13414_v44  ;;  %6176 = vmatpush.msrb.mxu1 %v11855_v40 }
0x10f0   :  { %6219 = vmatpush.msrb.mxu2 %v13386_v29  ;;  %6251 = vmatpush.msrb.mxu3 %v11752_v34  ;;  %v13475_v29 = vld [vmem:[#allocation46_spill] sm:$0xff] }
0x10f1   :  { %6115 = vmatpush.msrb.mxu0 %v11745_v11  ;;  %6182 = vmatpush.msrb.mxu1 %v11864_v6 }
0x10f2   :  { %5949 = vmatmul.f32.vlgmr.msra.gmra.mxu0 %v12204_v5  ;;  %6222 = vmatpush.msrb.mxu2 %v13389_v57  ;;  %v13451_v5 = vld [vmem:[#allocation72_spill] sm:$0xff]  ;;  %v13472_v57 = vld [vmem:[#allocation31_spill] sm:$0xff] }
0x10f3   :  { %6117 = vmatpush.msrb.mxu0 %v11747_v56  ;;  %6253 = vmatpush.msrb.mxu3 %v13443_v62 }
0x10f4   :  { %6188 = vmatpush.msrb.mxu1 %v13444_v8  ;;  %6225 = vmatpush.msrb.mxu2 %v13445_v3  ;;  %v13470_v3 = vld [vmem:[#allocation25_spill] sm:$0xff] }
0x10f5   :  { %6119 = vmatpush.msrb.mxu0 %v11752_v34  ;;  %6255 = vmatpush.msrb.mxu3 %v13446_v31 }
0x10f6   :  { %6194 = vmatpush.msrb.mxu1 %v13447_v4  ;;  %6228 = vmatpush.msrb.mxu2 %v13448_v39  ;;  %v13468_v39 = vld [vmem:[#allocation45_spill] sm:$0xff] }
0x10f7   :  { %6121 = vmatpush.msrb.mxu0 %v13443_v62  ;;  %6257 = vmatpush.msrb.mxu3 %v13449_v42 }
0x10f8   :  { %6196 = vmatmul.f32.vlgmr.msrb.gmra.mxu1 %v12250_v20  ;;  %6231 = vmatpush.msrb.mxu2 %v13450_v2  ;;  %v13466_v2 = vld [vmem:[#allocation37_spill] sm:$0xff] }
0x10f9   :  { %6123 = vmatpush.msrb.mxu0 %v13446_v31  ;;  %6323 = vmatpush.msra.mxu1 %v11745_v11 }
0x10fa   :  { %6259 = vmatpush.msrb.mxu3 %v13451_v5  ;;  %6234 = vmatmul.f32.vlgmr.msrb.gmra.mxu2 %v6131_v49  ;;  %v13460_v49 = vld [vmem:[#allocation65_spill] sm:$0xff] }
0x10fb   :  { %6325 = vmatpush.msra.mxu1 %v11747_v56  ;;  %6125 = vmatpush.msrb.mxu0 %v13449_v42 }
0x10fc   :  { %6261 = vmatpush.msrb.mxu3 %v13452_v23  ;;  %6398 = vmatpush.msra.mxu2 %v13453_v63 }
0x10fd   :  { %6265 = vmatmul.f32.vlgmr.msrb.gmra.mxu3 %v6132_v59  ;;  %6327 = vmatpush.msra.mxu1 %v11752_v34  ;;  %v13461_v59 = vld [vmem:[#allocation33_spill] sm:$0xff] }
0x10fe   :  { %6127 = vmatpush.msrb.mxu0 %v13451_v5  ;;  %6431 = vmatpush.msra.mxu3 %v13454_v61  ;;  %v13469_v61 = vld [vmem:[#allocation83_spill] sm:$0xff] }
0x10ff   :  { %6329 = vmatpush.msra.mxu1 %v13443_v62  ;;  %6400 = vmatpush.msra.mxu2 %v13455_v52 }
0x1100   :  { %6129 = vmatpush.msrb.mxu0 %v13452_v23  ;;  %6437 = vmatpush.msra.mxu3 %v13456_v30  ;;  %v13467_v30 = vld [vmem:[#allocation80_spill] sm:$0xff] }
0x1101   :  { %6135 = vmatmul.f32.vlgmr.msrb.gmra.mxu0 %v6134_v43  ;;  %6331 = vmatpush.msra.mxu1 %v13446_v31  ;;  %v13463_v43 = vld [vmem:[#allocation19_spill] sm:$0xff] }
0x1102   :  { %6280 = vmatpush.msra.mxu0 %v13457_v14  ;;  %6443 = vmatpush.msra.mxu3 %v13458_v9  ;;  %v13464_v9 = vld [vmem:[#allocation70_spill] sm:$0xff] }
0x1103   :  { %6333 = vmatpush.msra.mxu1 %v13449_v42  ;;  %6402 = vmatpush.msra.mxu2 %v13459_v28 }
0x1104   :  { %6284 = vmatpush.msra.mxu0 %v13460_v49  ;;  %6449 = vmatpush.msra.mxu3 %v13461_v59  ;;  %v13465_v59 = vld [vmem:[#allocation77_spill] sm:$0xff] }
0x1105   :  { %6335 = vmatpush.msra.mxu1 %v13451_v5  ;;  %6404 = vmatpush.msra.mxu2 %v13463_v43  ;;  %v13490_v5 = vld [vmem:[#allocation24_spill] sm:$0xff] }
0x1106   :  { %6558 = vmatpush.msrb.mxu3 %v13453_v63  ;;  %6288 = vmatpush.msra.mxu0 %v13462_v55 }
0x1107   :  { %6337 = vmatpush.msra.mxu1 %v13452_v23  ;;  %6527 = vmatpush.msrb.mxu2 %v13466_v2  ;;  %v13473_v2 = vld [vmem:[#allocation40_spill] sm:$0xff] }
0x1108   :  { %6560 = vmatpush.msrb.mxu3 %v13455_v52  ;;  %6292 = vmatpush.msra.mxu0 %v13464_v9  ;;  %v13489_v9 = vld [vmem:[#allocation29_spill] sm:$0xff] }
0x1109   :  { %6339 = vmatmul.f32.vlgmr.msra.gmra.mxu1 %v12250_v20  ;;  %6531 = vmatpush.msrb.mxu2 %v13468_v39  ;;  %v13476_v39 = vld [vmem:[#allocation28_spill] sm:$0xff] }
0x110a   :  { %6498 = vmatpush.msrb.mxu1 %v13453_v63  ;;  %6562 = vmatpush.msrb.mxu3 %v13459_v28  ;;  %v13471_v63 = vld [vmem:[#allocation84_spill] sm:$0xff] }
0x110b   :  { %6296 = vmatpush.msra.mxu0 %v13465_v59  ;;  %6535 = vmatpush.msrb.mxu2 %v13470_v3  ;;  %v13479_v3 = vld [vmem:[#allocation48_spill] sm:$0xff] }
0x110c   :  { %6500 = vmatpush.msrb.mxu1 %v13455_v52  ;;  %6564 = vmatpush.msrb.mxu3 %v13463_v43  ;;  %v13474_v52 = vld [vmem:[#allocation30_spill] sm:$0xff] }
0x110d   :  { %6300 = vmatpush.msra.mxu0 %v13467_v30  ;;  %6539 = vmatpush.msrb.mxu2 %v13472_v57  ;;  %v13481_v57 = vld [vmem:[#allocation53_spill] sm:$0xff] }
0x110e   :  { %6502 = vmatpush.msrb.mxu1 %v13459_v28  ;;  %v13477_v28 = vld [vmem:[#allocation47_spill] sm:$0xff] }
0x110f   :  { %6304 = vmatpush.msra.mxu0 %v13469_v61  ;;  %v13478_v61 = vld [vmem:[#allocation21_spill] sm:$0xff] }
0x1110   :  { %6504 = vmatpush.msrb.mxu1 %v13463_v43  ;;  %v13480_v43 = vld [vmem:[#allocation20_spill] sm:$0xff] }
0x1111   :  { %6308 = vmatpush.msra.mxu0 %v13471_v63 }
0x1112   :  { %6310 = vmatmul.f32.vlgmr.msra.gmra.mxu0 %v12250_v20  ;;  %6669 = vmatpush.msra.mxu1 %v13473_v2  ;;  %v13482_v20 = vld [vmem:[#allocation54_spill] sm:$0xff] }
0x1113   :  { %6469 = vmatpush.msrb.mxu0 %v13474_v52  ;;  %v13486_v2 = vld [vmem:[#allocation26_spill] sm:$0xff] }
0x1114   :  { %6675 = vmatpush.msra.mxu1 %v13475_v29  ;;  %v13483_v29 = vld [vmem:[#allocation55_spill] sm:$0xff] }
0x1115   :  { %6472 = vmatpush.msrb.mxu0 %v13476_v39 }
0x1116   :  { %6681 = vmatpush.msra.mxu1 %v13477_v28  ;;  %v13484_v28 = vld [vmem:[#allocation56_spill] sm:$0xff] }
0x1117   :  { %6475 = vmatpush.msrb.mxu0 %v13478_v61 }
0x1118   :  { %6687 = vmatpush.msra.mxu1 %v13479_v3 }
0x1119   :  { %6478 = vmatpush.msrb.mxu0 %v13480_v43 }
0x111a   :  { %6693 = vmatpush.msra.mxu1 %v13481_v57  ;;  %v13485_v57 = vld [vmem:[#allocation35_spill] sm:$0xff] }
0x111b   :  { %6632 = vmatpush.msra.mxu0 %v11533_v35 }
0x111c   :  { %6699 = vmatpush.msra.mxu1 %v13482_v20  ;;  %v10083_v20 = vld [vmem:[%s13083_s11] ss:$0 sm:$0xff] }
0x111d   :  { %6634 = vmatpush.msra.mxu0 %v11535_v50  ;;  %v3014_v3 = vadd.f32 %v10083_v20, %v13485_v57 }
0x111e   :  { %6705 = vmatpush.msra.mxu1 %v13483_v29 }
0x111f   :  { %6636 = vmatpush.msra.mxu0 %v11537_v16  ;;  %v3059_v29 = vadd.f32 %v13486_v2, %v3014_v3 }
0x1120   :  { %6711 = vmatpush.msra.mxu1 %v13484_v28  ;;  %v13487_v28 = vld [vmem:[#allocation38_spill] sm:$0xff] }
0x1121   :  { %6638 = vmatpush.msra.mxu0 %v11539_v54  ;;  %v3094_v52 = vadd.f32 %v13487_v28, %v3059_v29 }
0x1123   :  { %6640 = vmatpush.msra.mxu0 %v11579_v51  ;;  %v3127_v59 = vadd.f32 %v13488_v24, %v3094_v52 }
0x1125   :  { %6642 = vmatpush.msra.mxu0 %v11596_v18  ;;  %v3164_v22 = vadd.f32 %v13489_v9, %v3127_v59  ;;  %v12355_v59 = vld [vmem:[%s13083_s11 + $0x2] ss:$0 sm:$0xff] }
0x1127   :  { %6644 = vmatpush.msra.mxu0 %v11598_v53  ;;  %v12346_v57 = vadd.f32 %v13490_v5, %v3164_v22 }
0x1129   :  { %6646 = vmatpush.msra.mxu0 %v11600_v7  ;;  %13491 = vst [vmem:[#allocation44_spill] sm:$0xff] %v12346_v57 }
0x1150   :  { %v5649_v61 = vpop.f32.mrf.mxu1 }
0x1158   :  { %v5608_v43 = vpop.f32.mrf.mxu0  ;;  %v5679_v63 = vpop.f32.mrf.mxu2 }
0x1159   :  { %v5650_v39 = vadd.f32 %v5649_v61, %v5608_v43  ;;  %v5764_v23 = vpop.f32.mrf.mxu1  ;;  %v13492_v43 = vld [vmem:[#allocation58_spill] sm:$0xff] }
0x115a   :  { %v5706_v38 = vpop.f32.mrf.mxu3 }
0x115b   :  { %v5680_v30 = vadd.f32 %v5679_v63, %v5650_v39 }
0x115d   :  { %v5707_v55 = vadd.f32 %v5706_v38, %v5680_v30 }
0x1161   :  { %v5851_v2 = vpop.f32.mrf.mxu2 }
0x1162   :  { %v5739_v49 = vpop.f32.mrf.mxu0  ;;  %v5852_v29 = vadd.f32 %v13492_v43, %v5851_v2 }
0x1163   :  { %v5740_v14 = vadd.f32 %v5739_v49, %v5707_v55 }
0x1164   :  { %v5912_v39 = vpop.f32.mrf.mxu3  ;;  %v5981_v9 = vpop.f32.mrf.mxu1 }
0x1165   :  { %v5765_v3 = vadd.f32 %v5764_v23, %v5740_v14  ;;  %v5913_v63 = vadd.f32 %v5912_v39, %v5852_v29 }
0x1167   :  { %v5767_v61 = vadd.f32 %v5765_v3, %v12346_v57 }
0x1169   :  { %9942 = vtanh.f32 %v5767_v61 }
0x116d   :  { %v6026_v30 = vpop.f32.mrf.mxu2 }
0x116f   :  { %v5950_v24 = vpop.f32.mrf.mxu0  ;;  %v9943_v28 = vpop.eup %9942 }
0x1170   :  { %v5951_v52 = vadd.f32 %v5950_v24, %v5913_v63  ;;  %5793 = vrot.lane.b32.xlu2 %v9943_v28, %s10252_s1  ;;  %v6055_v22 = vpop.f32.mrf.mxu3 }
0x1172   :  { %v5982_v38 = vadd.f32 %v5981_v9, %v5951_v52 }
0x1174   :  { %v6027_v49 = vadd.f32 %v6026_v30, %v5982_v38  ;;  %v9758_v38 = vmul.f32 -1.442695, %v5767_v61 }
0x1175   :  { %v6197_v20 = vpop.f32.mrf.mxu1 }
0x1176   :  { %v6056_v5 = vadd.f32 %v6055_v22, %v6027_v49 }
0x1178   :  { %9944 = vtanh.f32 %v6056_v5 }
0x117d   :  { %v6235_v2 = vpop.f32.mrf.mxu2 }
0x117e   :  { %v9945_v23 = vpop.eup %9944  ;;  %v6136_v14 = vpop.f32.mrf.mxu0 }
0x117f   :  { %6080 = vrot.lane.b32.xlu0 %v9945_v23, %s10252_s1  ;;  %v6137_v55 = vadd.f32 %v12355_v59, %v6136_v14 }
0x1180   :  { %v6266_v29 = vpop.f32.mrf.mxu3 }
0x1181   :  { %v6198_v3 = vadd.f32 %v6197_v20, %v6137_v55  ;;  %v9759_v20 = vmul.f32 -1.442695, %v6056_v5 }
0x1183   :  { %v6236_v43 = vadd.f32 %v6235_v2, %v6198_v3 }
0x1185   :  { %v6267_v39 = vadd.f32 %v6266_v29, %v6236_v43 }
0x1186   :  { %v6340_v52 = vpop.f32.mrf.mxu1 }
0x118f   :  { %v6311_v63 = vpop.f32.mrf.mxu0 }
0x1190   :  { %v6312_v24 = vadd.f32 %v6311_v63, %v6267_v39 }
0x1192   :  { %v6341_v28 = vadd.f32 %v6340_v52, %v6312_v24 }
0x1194   :  { %9946 = vtanh.f32 %v6341_v28 }
0x1195   :  { %9948 = vpow2.f32 %v9758_v38 }
0x119a   :  { %v9947_v9 = vpop.eup %9946 }
0x119b   :  { %6365 = vrot.lane.b32.xlu1 %v9947_v9, %s10252_s1  ;;  %v9949_v30 = vpop.eup %9948 }
0x119c   :  { %v5771_v49 = vadd.f32 1.0, %v9949_v30  ;;  %v9760_v30 = vmul.f32 -1.442695, %v6341_v28 }
0x119e   :  { %9950 = vrcp.f32 %v5771_v49  ;;  %v5783_v2 = vand.u32 2147483648, %v5771_v49  ;;  %vm5777_vm11 = vweird.f32 %v5771_v49  ;;  %v5781_v43 = vand.u32 2147483647, %v5771_v49 }
0x119f   :  { %9952 = vpow2.f32 %v9759_v20 }
0x11a0   :  { %v5784_v39 = vor.u32 1.1754944e-38, %v5783_v2  ;;  %vm5782_vm13 = vcmp.eq.f32.partialorder %v5781_v43, 8.507059e+37 }
0x11a4   :  { %v9951_v22 = vpop.eup %9950 }
0x11a5   :  { %v5773_v23 = vmul.f32 %v9951_v22, %v5771_v49  ;;  %vm5778_vm10 = vweird.f32 %v9951_v22  ;;  %v9953_v52 = vpop.eup %9952 }
0x11a6   :  { %vm5779_vm12 = vmor %vm5777_vm11, %vm5778_vm10  ;;  %v6061_v9 = vadd.f32 1.0, %v9953_v52 }
0x11a7   :  { %v5774_v14 = vsub.f32 1.0, %v5773_v23 }
0x11a8   :  { %9954 = vrcp.f32 %v6061_v9  ;;  %vm6067_vm15 = vweird.f32 %v6061_v9  ;;  %v6071_v20 = vand.u32 2147483647, %v6061_v9 }
0x11a9   :  { %v5775_v55 = vmul.f32 %v9951_v22, %v5774_v14  ;;  %9956 = vpow2.f32 %v9760_v30 }
0x11aa   :  { %vm6072_vm0 = vcmp.eq.f32.partialorder %v6071_v20, 8.507059e+37  ;;  %v5789_v20 = vrot.slane %v12184_v45, 6 }
0x11ab   :  { %v5776_v3 = vadd.f32 %v9951_v22, %v5775_v55  ;;  %v6073_v55 = vand.u32 2147483648, %v6061_v9 }
0x11ad   :  { %v5780_v29 = vsel %vm5779_vm12, %v9951_v22, %v5776_v3  ;;  %v6074_v43 = vor.u32 1.1754944e-38, %v6073_v55 }
0x11ae   :  { %v12359_v63 = vsel %vm5782_vm13, %v5784_v39, %v5780_v29  ;;  %v9955_v5 = vpop.eup %9954 }
0x11af   :  { %v6063_v38 = vmul.f32 %v9955_v5, %v6061_v9  ;;  %v9957_v14 = vpop.eup %9956  ;;  %vm6068_vm14 = vweird.f32 %v9955_v5 }
0x11b0   :  { %v6346_v3 = vadd.f32 1.0, %v9957_v14  ;;  %vm6069_vm8 = vmor %vm6067_vm15, %vm6068_vm14 }
0x11b1   :  { %v6064_v23 = vsub.f32 1.0, %v6063_v38 }
0x11b2   :  { %9958 = vrcp.f32 %v6346_v3  ;;  %vm6352_vm2 = vweird.f32 %v6346_v3  ;;  %v6356_v9 = vand.u32 2147483647, %v6346_v3 }
0x11b3   :  { %v6065_v49 = vmul.f32 %v9955_v5, %v6064_v23  ;;  %v6358_v23 = vand.u32 2147483648, %v6346_v3 }
0x11b4   :  { %vm6357_vm6 = vcmp.eq.f32.partialorder %v6356_v9, 8.507059e+37 }
0x11b5   :  { %v6066_v22 = vadd.f32 %v9955_v5, %v6065_v49 }
0x11b7   :  { %v6070_v2 = vsel %vm6069_vm8, %v9955_v5, %v6066_v22  ;;  %v6359_v5 = vor.u32 1.1754944e-38, %v6358_v23 }
0x11b8   :  { %v6075_v29 = vsel %vm6072_vm0, %v6074_v43, %v6070_v2  ;;  %v9959_v28 = vpop.eup %9958  ;;  %v5791_v2 = vmul.f32 %v5789_v20, %v12359_v63 }
0x11b9   :  { %vm6353_vm1 = vweird.f32 %v9959_v28 }
0x11ba   :  { %vm6354_vm5 = vmor %vm6352_vm2, %vm6353_vm1 }
0x11ca   :  { %v5794_v61 = vpop.permute.xlu2 %5793 }
0x11cb   :  { %v5796_v24 = vmul.f32 %v5794_v61, %v12359_v63 }
0x11cd   :  { %5798 = vrot.lane.b32.xlu2 %v5796_v24, %s10253_s4  ;;  %v6348_v24 = vmul.f32 %v9959_v28, %v6346_v3 }
0x11cf   :  { %v6349_v52 = vsub.f32 1.0, %v6348_v24 }
0x11d1   :  { %v6350_v38 = vmul.f32 %v9959_v28, %v6349_v52 }
0x11d3   :  { %v6351_v30 = vadd.f32 %v9959_v28, %v6350_v38 }
0x11d5   :  { %v6355_v49 = vsel %vm6354_vm5, %v9959_v28, %v6351_v30 }
0x11d6   :  { %v12364_v22 = vsel %vm6357_vm6, %v6359_v5, %v6355_v49 }
0x11d7   :  { %v6363_v45 = vmul.f32 %v12364_v22, %v12179_v36 }
0x11f1   :  { %v6081_v39 = vpop.permute.xlu0 %6080 }
0x11f2   :  { %v6083_v61 = vmul.f32 %v6081_v39, %v6075_v29 }
0x11f4   :  { %6085 = vrot.lane.b32.xlu0 %v6083_v61, %s10253_s4  ;;  %v6078_v61 = vmul.f32 %v6075_v29, %v12189_v25 }
0x120d   :  { %v6366_v14 = vpop.permute.xlu1 %6365 }
0x120e   :  { %v6368_v55 = vmul.f32 %v6366_v14, %v12364_v22 }
0x1210   :  { %6370 = vrot.lane.b32.xlu1 %v6368_v55, %s10253_s4 }
0x1227   :  { %v5799_v43 = vpop.permute.xlu2 %5798 }
0x1228   :  { %v12370_v39 = vadd.f32 %v5799_v43, %v5791_v2  ;;  %v9655_v43 = vrot.slane %v12195_v32, 6  ;;  %v13493_v32 = vld [vmem:[#allocation59_spill] sm:$0xff] }
0x122a   :  { %9960 = vtanh.f32 %v12370_v39 }
0x1230   :  { %v9961_v3 = vpop.eup %9960 }
0x1231   :  { %5804 = vrot.lane.b32.xlu2 %v9961_v3, %s10252_s1 }
0x1266   :  { %v6086_v28 = vpop.permute.xlu0 %6085 }
0x1267   :  { %v12375_v24 = vadd.f32 %v6086_v28, %v6078_v61 }
0x1269   :  { %9962 = vtanh.f32 %v12375_v24 }
0x126f   :  { %v9963_v52 = vpop.eup %9962 }
0x1270   :  { %6091 = vrot.lane.b32.xlu0 %v9963_v52, %s10252_s1  ;;  %v9669_v52 = vsel %vm9668_vm7, %v13493_v32, %v9655_v43  ;;  %v13496_v43 = vld [vmem:[#allocation63_spill] sm:$0xff] }
0x1282   :  { %v6371_v38 = vpop.permute.xlu1 %6370 }
0x1283   :  { %v12381_v30 = vadd.f32 %v6371_v38, %v6363_v45  ;;  %v13494_v45 = vld [vmem:[#allocation72_spill] sm:$0xff]  ;;  %v13495_v38 = vld [vmem:[#allocation75_spill] sm:$0xff] }
0x1285   :  { %9964 = vtanh.f32 %v12381_v30 }
0x128b   :  { %v9965_v23 = vpop.eup %9964  ;;  %v5805_v25 = vpop.permute.xlu2 %5804 }
0x128c   :  { %6376 = vrot.lane.b32.xlu1 %v9965_v23, %s10252_s1  ;;  %v5807_v9 = vmul.f32 %v5805_v25, %v12359_v63 }
0x128e   :  { %6381 = vrot.lane.b32.xlu2 %v5807_v9, %s10253_s4 }
0x12e2   :  { %v6092_v49 = vpop.permute.xlu0 %6091 }
0x12e3   :  { %v6094_v5 = vmul.f32 %v6092_v49, %v6075_v29 }
0x12e5   :  { %6897 = vrot.lane.b32.xlu1 %v6094_v5, %s10253_s4  ;;  %6616 = vrot.lane.b32.xlu0 %v6094_v5, %s10252_s1 }
0x12e8   :  { %v12389_v36 = vpop.permute.xlu2 %6381 }
0x12e9   :  { %v6383_v14 = vsel %vm428_vm3, %v12389_v36, 0 }
0x12ea   :  { %v6405_v55 = vand.u32 4294901760, %v6383_v14 }
0x12ec   :  { %v6406_v20 = vsub.f32 %v6383_v14, %v6405_v55  ;;  %6451 = vmatmul.f32.vlgmr.msra.gmra.mxu3 %v6405_v55 }
0x12ed   :  { %6764 = vmatpush.msra.mxu3 %v11533_v35 }
0x12ee   :  { %v6407_v2 = vand.u32 4294901760, %v6406_v20  ;;  %6481 = vmatmul.f32.vlgmr.msrb.gmra.mxu0 %v6406_v20 }
0x12ef   :  { %6766 = vmatpush.msra.mxu3 %v11535_v50  ;;  %6797 = vmatpush.msrb.mxu0 %v11556_v13 }
0x12f0   :  { %v6408_v63 = vsub.f32 %v6406_v20, %v6407_v2  ;;  %6508 = vmatmul.f32.vlgmr.msrb.gmra.mxu1 %v6407_v2 }
0x12f1   :  { %6768 = vmatpush.msra.mxu3 %v11537_v16  ;;  %6840 = vmatpush.msrb.mxu1 %v11533_v35 }
0x12f2   :  { %v6409_v29 = vand.u32 4294901760, %v6408_v63  ;;  %6801 = vmatpush.msrb.mxu0 %v11559_v12 }
0x12f3   :  { %6770 = vmatpush.msra.mxu3 %v11539_v54  ;;  %6842 = vmatpush.msrb.mxu1 %v11535_v50 }
0x12f4   :  { %6410 = vmatmul.f32.vlgmr.msra.gmra.mxu2 %v6409_v29  ;;  %6566 = vmatmul.f32.vlgmr.msrb.gmra.mxu3 %v6405_v55 }
0x12f5   :  { %6727 = vmatpush.msra.mxu2 %v13403_v37  ;;  %6772 = vmatpush.msra.mxu3 %v11579_v51 }
0x12f6   :  { %6844 = vmatpush.msrb.mxu1 %v11537_v16  ;;  %6805 = vmatpush.msrb.mxu0 %v11562_v21 }
0x12f7   :  { %6730 = vmatpush.msra.mxu2 %v13404_v27  ;;  %6774 = vmatpush.msra.mxu3 %v11596_v18 }
0x12f8   :  { %6846 = vmatpush.msrb.mxu1 %v11539_v54  ;;  %6809 = vmatpush.msrb.mxu0 %v11565_v19 }
0x12f9   :  { %6733 = vmatpush.msra.mxu2 %v13405_v33  ;;  %6776 = vmatpush.msra.mxu3 %v11598_v53 }
0x12fa   :  { %6848 = vmatpush.msrb.mxu1 %v11579_v51  ;;  %6813 = vmatpush.msrb.mxu0 %v11603_v15 }
0x12fb   :  { %6736 = vmatpush.msra.mxu2 %v13406_v58  ;;  %6778 = vmatpush.msra.mxu3 %v11600_v7 }
0x12fc   :  { %6541 = vmatmul.f32.vlgmr.msrb.gmra.mxu2 %v6405_v55  ;;  %6850 = vmatpush.msrb.mxu1 %v11596_v18 }
0x12fd   :  { %6954 = vmatpush.msrb.mxu3 %v13407_v60  ;;  %6739 = vmatpush.msra.mxu2 %v13408_v0 }
0x12fe   :  { %v6377_v3 = vpop.permute.xlu1 %6376  ;;  %6817 = vmatpush.msrb.mxu0 %v11619_v41  ;;  %6852 = vmatpush.msrb.mxu1 %v11598_v53 }
0x12ff   :  { %v6379_v61 = vmul.f32 %v6377_v3, %v12364_v22  ;;  %6960 = vmatpush.msrb.mxu3 %v13409_v17  ;;  %6742 = vmatpush.msra.mxu2 %v13410_v47 }
0x1300   :  { %6821 = vmatpush.msrb.mxu0 %v11622_v48  ;;  %6854 = vmatpush.msrb.mxu1 %v11600_v7 }
0x1301   :  { %v9657_v28 = vrot.slane %v6379_v61, 4  ;;  %6901 = vrot.lane.b32.xlu2 %v6379_v61, %s10252_s1  ;;  %6966 = vmatpush.msrb.mxu3 %v13411_v26  ;;  %v13497_v61 = vld [vmem:[#allocation65_spill] sm:$0xff] }
0x1302   :  { %6745 = vmatpush.msra.mxu2 %v13412_v46  ;;  %6825 = vmatpush.msrb.mxu0 %v11625_v10 }
0x1303   :  { %v12429_v22 = vsel %vm9670_vm9, %v9669_v52, %v9657_v28  ;;  %6972 = vmatpush.msrb.mxu3 %v13413_v1  ;;  %v13498_v52 = vld [vmem:[#allocation68_spill] sm:$0xff] }
0x1304   :  { %6748 = vmatpush.msra.mxu2 %v13414_v44 }
0x1305   :  { %6978 = vmatpush.msrb.mxu3 %v11855_v40 }
0x1306   :  { %6917 = vmatpush.msrb.mxu2 %v11745_v11 }
0x1307   :  { %6984 = vmatpush.msrb.mxu3 %v11864_v6 }
0x1308   :  { %6919 = vmatpush.msrb.mxu2 %v11747_v56 }
0x1309   :  { %6990 = vmatpush.msrb.mxu3 %v13444_v8 }
0x130a   :  { %6921 = vmatpush.msrb.mxu2 %v11752_v34 }
0x130b   :  { %6996 = vmatpush.msrb.mxu3 %v13447_v4 }
0x130c   :  { %6923 = vmatpush.msrb.mxu2 %v13443_v62 }
0x130e   :  { %6925 = vmatpush.msrb.mxu2 %v13446_v31 }
0x1310   :  { %6927 = vmatpush.msrb.mxu2 %v13449_v42 }
0x1312   :  { %6929 = vmatpush.msrb.mxu2 %v13494_v45 }
0x1314   :  { %6931 = vmatpush.msrb.mxu2 %v13495_v38 }
0x1357   :  { %v6617_v23 = vpop.permute.xlu0 %6616  ;;  %v6898_v9 = vpop.permute.xlu1 %6897 }
0x1358   :  { %v6619_v25 = vsel %vm428_vm3, %v12389_v36, %v6617_v23 }
0x1359   :  { %v6621_v49 = vsel %vm3685_vm4, %v6619_v25, 0  ;;  %v13499_v25 = vld [vmem:[#allocation60_spill] sm:$0xff] }
0x135a   :  { %v6647_v5 = vand.u32 4294901760, %v6621_v49 }
0x135b   :  { %v6902_v14 = vpop.permute.xlu2 %6901 }
0x135c   :  { %v6648_v55 = vsub.f32 %v6621_v49, %v6647_v5  ;;  %v6904_v20 = vsel %vm428_vm3, %v6898_v9, %v6902_v14  ;;  %6713 = vmatmul.f32.vlgmr.msra.gmra.mxu1 %v6647_v5  ;;  %v13500_v49 = vld [vmem:[#allocation70_spill] sm:$0xff]  ;;  %v13501_v14 = vld [vmem:[#allocation61_spill] sm:$0xff] }
0x135d   :  { %v6906_v2 = vsel %vm3685_vm4, %v6904_v20, 0  ;;  %7049 = vmatpush.msra.mxu1 %v11745_v11  ;;  %v13503_v20 = vld [vmem:[#allocation64_spill] sm:$0xff] }
0x135e   :  { %v6649_v63 = vand.u32 4294901760, %v6648_v55  ;;  %v6932_v29 = vand.u32 4294901760, %v6906_v2  ;;  %6751 = vmatmul.f32.vlgmr.msra.gmra.mxu2 %v6648_v55 }
0x135f   :  { %7051 = vmatpush.msra.mxu1 %v11747_v56  ;;  %7082 = vmatpush.msra.mxu2 %v13496_v43 }
0x1360   :  { %v6650_v36 = vsub.f32 %v6648_v55, %v6649_v63  ;;  %v6933_v3 = vsub.f32 %v6906_v2, %v6932_v29  ;;  %6782 = vmatmul.f32.vlgmr.msra.gmra.mxu3 %v6649_v63  ;;  %v13502_v55 = vld [vmem:[#allocation77_spill] sm:$0xff]  ;;  %v13504_v2 = vld [vmem:[#allocation80_spill] sm:$0xff]  ;;  %v13505_v63 = vld [vmem:[#allocation66_spill] sm:$0xff] }
0x1361   :  { %7053 = vmatpush.msra.mxu1 %v11752_v34  ;;  %7086 = vmatpush.msra.mxu2 %v13497_v61 }
0x1362   :  { %v6651_v28 = vand.u32 4294901760, %v6650_v36  ;;  %v6934_v32 = vand.u32 4294901760, %v6933_v3  ;;  %7125 = vmatpush.msra.mxu3 %v11745_v11  ;;  %v13506_v36 = vld [vmem:[#allocation83_spill] sm:$0xff] }
0x1363   :  { %7055 = vmatpush.msra.mxu1 %v13443_v62  ;;  %7090 = vmatpush.msra.mxu2 %v13498_v52 }
0x1364   :  { %v6935_v23 = vsub.f32 %v6933_v3, %v6934_v32  ;;  %7127 = vmatpush.msra.mxu3 %v11747_v56  ;;  %6652 = vmatmul.f32.vlgmr.msra.gmra.mxu0 %v6651_v28  ;;  %v13507_v28 = vld [vmem:[#allocation71_spill] sm:$0xff] }
0x1365   :  { %6856 = vmatmul.f32.vlgmr.msrb.gmra.mxu1 %v6647_v5  ;;  %7012 = vmatpush.msra.mxu0 %v13499_v25 }
0x1366   :  { %v6936_v9 = vand.u32 4294901760, %v6935_v23  ;;  %7057 = vmatpush.msra.mxu1 %v13446_v31  ;;  %7094 = vmatpush.msra.mxu2 %v13500_v49  ;;  %v13508_v23 = vld [vmem:[#allocation84_spill] sm:$0xff] }
0x1367   :  { %7129 = vmatpush.msra.mxu3 %v11752_v34  ;;  %7015 = vmatpush.msra.mxu0 %v13501_v14  ;;  %v13530_v49 = vld [vmem:[#allocation48_spill] sm:$0xff] }
0x1368   :  { %6937 = vmatmul.f32.vlgmr.msrb.gmra.mxu2 %v6936_v9  ;;  %7059 = vmatpush.msra.mxu1 %v13449_v42  ;;  %v13509_v9 = vld [vmem:[#allocation74_spill] sm:$0xff] }
0x1369   :  { %7098 = vmatpush.msra.mxu2 %v13502_v55  ;;  %7131 = vmatpush.msra.mxu3 %v13443_v62  ;;  %v13517_v55 = vld [vmem:[#allocation28_spill] sm:$0xff] }
0x136a   :  { %6998 = vmatmul.f32.vlgmr.msrb.gmra.mxu3 %v6932_v29  ;;  %7018 = vmatpush.msra.mxu0 %v13503_v20  ;;  %v13519_v20 = vld [vmem:[#allocation33_spill] sm:$0xff] }
0x136b   :  { %7061 = vmatpush.msra.mxu1 %v13494_v45  ;;  %7102 = vmatpush.msra.mxu2 %v13504_v2  ;;  %v13510_v2 = vld [vmem:[#allocation32_spill] sm:$0xff] }
0x136c   :  { %7133 = vmatpush.msra.mxu3 %v13446_v31  ;;  %7021 = vmatpush.msra.mxu0 %v13505_v63  ;;  %v13511_v63 = vld [vmem:[#allocation78_spill] sm:$0xff] }
0x136d   :  { %7063 = vmatpush.msra.mxu1 %v13495_v38  ;;  %7106 = vmatpush.msra.mxu2 %v13506_v36  ;;  %v13512_v36 = vld [vmem:[#allocation36_spill] sm:$0xff] }
0x136e   :  { %7135 = vmatpush.msra.mxu3 %v13449_v42  ;;  %6827 = vmatmul.f32.vlgmr.msrb.gmra.mxu0 %v6647_v5  ;;  %v13513_v5 = vld [vmem:[#allocation30_spill] sm:$0xff] }
0x136f   :  { %7067 = vmatmul.f32.vlgmr.msra.gmra.mxu1 %v6934_v32  ;;  %7024 = vmatpush.msra.mxu0 %v13507_v28  ;;  %v13514_v32 = vld [vmem:[#allocation81_spill] sm:$0xff]  ;;  %v13515_v28 = vld [vmem:[#allocation27_spill] sm:$0xff] }
0x1370   :  { %7110 = vmatpush.msra.mxu2 %v13508_v23  ;;  %7137 = vmatpush.msra.mxu3 %v13494_v45  ;;  %v13516_v23 = vld [vmem:[#allocation43_spill] sm:$0xff] }
0x1371   :  { %7112 = vmatmul.f32.vlgmr.msra.gmra.mxu2 %v6932_v29  ;;  %7027 = vmatpush.msra.mxu0 %v13509_v9  ;;  %v13518_v9 = vld [vmem:[#allocation17_spill] sm:$0xff] }
0x1372   :  { %7139 = vmatpush.msra.mxu3 %v13495_v38  ;;  %7234 = vmatpush.msrb.mxu1 %v13510_v2 }
0x1373   :  { %7141 = vmatmul.f32.vlgmr.msra.gmra.mxu3 %v6932_v29  ;;  %7030 = vmatpush.msra.mxu0 %v13511_v63  ;;  %v6452_v29 = vpop.f32.mrf.mxu3 }
0x1374   :  { %7240 = vmatpush.msrb.mxu1 %v13512_v36  ;;  %7272 = vmatpush.msrb.mxu2 %v13513_v5  ;;  %v13520_v36 = vld [vmem:[#allocation21_spill] sm:$0xff]  ;;  %v13521_v5 = vld [vmem:[#allocation16_spill] sm:$0xff] }
0x1375   :  { %7033 = vmatpush.msra.mxu0 %v13514_v32  ;;  %7301 = vmatpush.msrb.mxu3 %v13515_v28 }
0x1376   :  { %7036 = vmatmul.f32.vlgmr.msra.gmra.mxu0 %v6933_v3  ;;  %7246 = vmatpush.msrb.mxu1 %v13516_v23  ;;  %v6482_v3 = vpop.f32.mrf.mxu0  ;;  %v13522_v23 = vld [vmem:[#allocation20_spill] sm:$0xff] }
0x1377   :  { %7275 = vmatpush.msrb.mxu2 %v13517_v55  ;;  %7303 = vmatpush.msrb.mxu3 %v13518_v9  ;;  %v6411_v63 = vpop.f32.mrf.mxu2  ;;  %v13523_v55 = vld [vmem:[#allocation19_spill] sm:$0xff] }
0x1378   :  { %7252 = vmatpush.msrb.mxu1 %v13519_v20  ;;  %7201 = vmatpush.msrb.mxu0 %v13515_v28  ;;  %v6453_v32 = vadd.f32 %v6452_v29, %v6411_v63  ;;  %v13524_v20 = vld [vmem:[#allocation40_spill] sm:$0xff]  ;;  %v6509_v63 = vpop.f32.mrf.mxu1  ;;  %v13525_v29 = vld [vmem:[#allocation37_spill] sm:$0xff] }
0x1379   :  { %7278 = vmatpush.msrb.mxu2 %v13520_v36  ;;  %7305 = vmatpush.msrb.mxu3 %v13521_v5  ;;  %v13526_v36 = vld [vmem:[#allocation46_spill] sm:$0xff] }
0x137a   :  { %7361 = vmatpush.msra.mxu1 %v13515_v28  ;;  %7203 = vmatpush.msrb.mxu0 %v13518_v9  ;;  %v6483_v2 = vadd.f32 %v6482_v3, %v6453_v32  ;;  %v13527_v3 = vld [vmem:[#allocation45_spill] sm:$0xff] }
0x137b   :  { %7281 = vmatpush.msrb.mxu2 %v13522_v23  ;;  %7307 = vmatpush.msrb.mxu3 %v13523_v55  ;;  %v13529_v28 = vld [vmem:[#allocation25_spill] sm:$0xff] }
0x137c   :  { %7363 = vmatpush.msra.mxu1 %v13518_v9  ;;  %7205 = vmatpush.msrb.mxu0 %v13521_v5  ;;  %v6510_v23 = vadd.f32 %v6509_v63, %v6483_v2  ;;  %v13531_v2 = vld [vmem:[#allocation31_spill] sm:$0xff]  ;;  %v13532_v63 = vld [vmem:[#allocation53_spill] sm:$0xff] }
0x137d   :  { %7476 = vmatpush.msra.mxu3 %v13524_v20  ;;  %7439 = vmatpush.msra.mxu2 %v11533_v35  ;;  %v13528_v20 = vld [vmem:[#allocation47_spill] sm:$0xff] }
0x137e   :  { %7365 = vmatpush.msra.mxu1 %v13521_v5  ;;  %7207 = vmatpush.msrb.mxu0 %v13523_v55  ;;  %v6567_v5 = vpop.f32.mrf.mxu3 }
0x137f   :  { %7482 = vmatpush.msra.mxu3 %v13526_v36  ;;  %7441 = vmatpush.msra.mxu2 %v11535_v50  ;;  %v6542_v32 = vpop.f32.mrf.mxu2 }
0x1380   :  { %7330 = vmatpush.msra.mxu0 %v13525_v29  ;;  %7367 = vmatpush.msra.mxu1 %v13523_v55  ;;  %v6543_v9 = vadd.f32 %v6542_v32, %v6510_v23  ;;  %v13534_v32 = vld [vmem:[#allocation55_spill] sm:$0xff] }
0x1381   :  { %7488 = vmatpush.msra.mxu3 %v13528_v20  ;;  %7443 = vmatpush.msra.mxu2 %v11537_v16 }
0x1382   :  { %7334 = vmatpush.msra.mxu0 %v13527_v3  ;;  %v6568_v29 = vadd.f32 %v6567_v5, %v6543_v9  ;;  %v13533_v3 = vld [vmem:[#allocation54_spill] sm:$0xff]  ;;  %v13535_v9 = vld [vmem:[#allocation56_spill] sm:$0xff] }
0x1383   :  { %7494 = vmatpush.msra.mxu3 %v13530_v49  ;;  %7445 = vmatpush.msra.mxu2 %v11539_v54 }
0x1384   :  { %7338 = vmatpush.msra.mxu0 %v13529_v28  ;;  %v6571_v36 = vrot.slane %v6568_v29, 6 }
0x1385   :  { %7500 = vmatpush.msra.mxu3 %v13532_v63  ;;  %7447 = vmatpush.msra.mxu2 %v11579_v51 }
0x1386   :  { %7342 = vmatpush.msra.mxu0 %v13531_v2  ;;  %v6573_v23 = vadd.f32 %v6571_v36, %v12346_v57  ;;  %v12531_v57 = vld [vmem:[%s13083_s11 + $0x1] ss:$0 sm:$0xff] }
0x1387   :  { %7506 = vmatpush.msra.mxu3 %v13533_v3  ;;  %7449 = vmatpush.msra.mxu2 %v11596_v18 }
0x1388   :  { %9966 = vtanh.f32 %v6573_v23  ;;  %v9761_v29 = vmul.f32 -1.442695, %v6573_v23 }
0x1389   :  { %7512 = vmatpush.msra.mxu3 %v13534_v32  ;;  %7451 = vmatpush.msra.mxu2 %v11598_v53 }
0x138a   :  { %9968 = vpow2.f32 %v9761_v29 }
0x138b   :  { %7518 = vmatpush.msra.mxu3 %v13535_v9  ;;  %7453 = vmatpush.msra.mxu2 %v11600_v7 }
0x138e   :  { %v9967_v5 = vpop.eup %9966 }
0x138f   :  { %6599 = vrot.lane.b32.xlu0 %v9967_v5, %s10252_s1 }
0x1390   :  { %v9969_v63 = vpop.eup %9968 }
0x1391   :  { %v6577_v49 = vadd.f32 1.0, %v9969_v63 }
0x1393   :  { %9970 = vrcp.f32 %v6577_v49  ;;  %vm6583_vm11 = vweird.f32 %v6577_v49 }
0x1399   :  { %v9971_v52 = vpop.eup %9970 }
0x139a   :  { %v6579_v38 = vmul.f32 %v9971_v52, %v6577_v49  ;;  %vm6584_vm10 = vweird.f32 %v9971_v52 }
0x139b   :  { %vm6585_vm12 = vmor %vm6583_vm11, %vm6584_vm10  ;;  %vm9672_vm10 = vcmask 1045504  }
0x139c   :  { %v6580_v63 = vsub.f32 1.0, %v6579_v38 }
0x13d9   :  { %v6714_v3 = vpop.f32.mrf.mxu1 }
0x13e1   :  { %v6653_v2 = vpop.f32.mrf.mxu0  ;;  %v6752_v36 = vpop.f32.mrf.mxu2 }
0x13e2   :  { %v6654_v32 = vadd.f32 %v12531_v57, %v6653_v2  ;;  %v6857_v5 = vpop.f32.mrf.mxu1 }
0x13e3   :  { %v6783_v28 = vpop.f32.mrf.mxu3 }
0x13e4   :  { %v6715_v9 = vadd.f32 %v6714_v3, %v6654_v32 }
0x13e6   :  { %v6753_v20 = vadd.f32 %v6752_v36, %v6715_v9 }
0x13e8   :  { %v6784_v55 = vadd.f32 %v6783_v28, %v6753_v20  ;;  %v6581_v28 = vmul.f32 %v9971_v52, %v6580_v63 }
0x13eb   :  { %v6828_v23 = vpop.f32.mrf.mxu0  ;;  %v6938_v29 = vpop.f32.mrf.mxu2 }
0x13ec   :  { %v6829_v14 = vadd.f32 %v6828_v23, %v6784_v55  ;;  %v6939_v61 = vadd.f32 %v12355_v59, %v6938_v29  ;;  %v7068_v3 = vpop.f32.mrf.mxu1  ;;  %v6589_v59 = vand.u32 2147483648, %v6577_v49 }
0x13ed   :  { %v6999_v43 = vpop.f32.mrf.mxu3 }
0x13ee   :  { %v6858_v25 = vadd.f32 %v6857_v5, %v6829_v14  ;;  %v7000_v45 = vadd.f32 %v6999_v43, %v6939_v61  ;;  %v6582_v14 = vadd.f32 %v9971_v52, %v6581_v28  ;;  %v6587_v5 = vand.u32 2147483647, %v6577_v49 }
0x13f0   :  { %9972 = vtanh.f32 %v6858_v25  ;;  %v6586_v43 = vsel %vm6585_vm12, %v9971_v52, %v6582_v14  ;;  %vm6588_vm13 = vcmp.eq.f32.partialorder %v6587_v5, 8.507059e+37 }
0x13f3   :  { %v7037_v42 = vpop.f32.mrf.mxu0 }
0x13f4   :  { %v7038_v2 = vadd.f32 %v7037_v42, %v7000_v45  ;;  %v7113_v36 = vpop.f32.mrf.mxu2  ;;  %v6590_v42 = vor.u32 1.1754944e-38, %v6589_v59 }
0x13f6   :  { %v9973_v32 = vpop.eup %9972  ;;  %v7069_v9 = vadd.f32 %v7068_v3, %v7038_v2  ;;  %v7142_v55 = vpop.f32.mrf.mxu3  ;;  %v12537_v61 = vsel %vm6588_vm13, %v6590_v42, %v6586_v43  ;;  %v9762_v3 = vmul.f32 -1.442695, %v6858_v25 }
0x13f7   :  { %6882 = vrot.lane.b32.xlu1 %v9973_v32, %s10252_s1 }
0x13f8   :  { %v7114_v20 = vadd.f32 %v7113_v36, %v7069_v9 }
0x13fa   :  { %v7143_v23 = vadd.f32 %v7142_v55, %v7114_v20 }
0x13fc   :  { %9974 = vtanh.f32 %v7143_v23  ;;  %v9763_v2 = vmul.f32 -1.442695, %v7143_v23 }
0x13fe   :  { %9976 = vpow2.f32 %v9763_v2 }
0x13ff   :  { %9978 = vpow2.f32 %v9762_v3 }
0x1401   :  { %v6600_v38 = vpop.permute.xlu0 %6599 }
0x1402   :  { %v9975_v45 = vpop.eup %9974  ;;  %v6602_v29 = vmul.f32 %v6600_v38, %v12537_v61 }
0x1403   :  { %7167 = vrot.lane.b32.xlu2 %v9975_v45, %s10252_s1 }
0x1404   :  { %6604 = vrot.lane.b32.xlu0 %v6602_v29, %s10253_s4  ;;  %v9977_v63 = vpop.eup %9976 }
0x1405   :  { %v7148_v32 = vadd.f32 1.0, %v9977_v63  ;;  %v9979_v52 = vpop.eup %9978 }
0x1406   :  { %v6863_v9 = vadd.f32 1.0, %v9979_v52 }
0x1407   :  { %9980 = vrcp.f32 %v7148_v32  ;;  %v7160_v5 = vand.u32 2147483648, %v7148_v32  ;;  %vm7154_vm15 = vweird.f32 %v7148_v32  ;;  %v7158_v23 = vand.u32 2147483647, %v7148_v32 }
0x1408   :  { %9982 = vrcp.f32 %v6863_v9  ;;  %v6875_v3 = vand.u32 2147483648, %v6863_v9  ;;  %vm6869_vm2 = vweird.f32 %v6863_v9  ;;  %v6873_v52 = vand.u32 2147483647, %v6863_v9 }
0x1409   :  { %v7161_v42 = vor.u32 1.1754944e-38, %v7160_v5  ;;  %vm7159_vm0 = vcmp.eq.f32.partialorder %v7158_v23, 8.507059e+37 }
0x140a   :  { %vm6874_vm6 = vcmp.eq.f32.partialorder %v6873_v52, 8.507059e+37 }
0x140d   :  { %v9981_v49 = vpop.eup %9980 }
0x140e   :  { %v7150_v36 = vmul.f32 %v9981_v49, %v7148_v32  ;;  %v9983_v55 = vpop.eup %9982  ;;  %vm7155_vm14 = vweird.f32 %v9981_v49 }
0x140f   :  { %v6865_v59 = vmul.f32 %v9983_v55, %v6863_v9  ;;  %vm7156_vm8 = vmor %vm7154_vm15, %vm7155_vm14  ;;  %vm6870_vm1 = vweird.f32 %v9983_v55 }
0x1410   :  { %v7151_v20 = vsub.f32 1.0, %v7150_v36  ;;  %vm6871_vm5 = vmor %vm6869_vm2, %vm6870_vm1 }
0x1411   :  { %v6866_v25 = vsub.f32 1.0, %v6865_v59 }
0x1412   :  { %v7152_v28 = vmul.f32 %v9981_v49, %v7151_v20  ;;  %v6876_v20 = vor.u32 1.1754944e-38, %v6875_v3 }
0x1413   :  { %v6867_v2 = vmul.f32 %v9983_v55, %v6866_v25 }
0x1414   :  { %v7153_v14 = vadd.f32 %v9981_v49, %v7152_v28 }
0x1415   :  { %v6868_v63 = vadd.f32 %v9983_v55, %v6867_v2 }
0x1416   :  { %v7157_v43 = vsel %vm7156_vm8, %v9981_v49, %v7153_v14  ;;  %v6595_v14 = vrot.slane %v12370_v39, 6 }
0x1417   :  { %v7162_v38 = vsel %vm7159_vm0, %v7161_v42, %v7157_v43  ;;  %v6872_v36 = vsel %vm6871_vm5, %v9983_v55, %v6868_v63 }
0x1418   :  { %v6877_v49 = vsel %vm6874_vm6, %v6876_v20, %v6872_v36  ;;  %v6597_v59 = vmul.f32 %v6595_v14, %v12537_v61  ;;  %v7165_v9 = vmul.f32 %v7162_v38, %v12381_v30 }
0x1419   :  { %v6880_v39 = vmul.f32 %v6877_v49, %v12375_v24 }
0x145d   :  { %v7168_v45 = vpop.permute.xlu2 %7167 }
0x145e   :  { %v7170_v29 = vmul.f32 %v7168_v45, %v7162_v38 }
0x1460   :  { %7172 = vrot.lane.b32.xlu2 %v7170_v29, %s10253_s4 }
0x1469   :  { %v6883_v32 = vpop.permute.xlu1 %6882 }
0x146a   :  { %v6885_v28 = vmul.f32 %v6883_v32, %v6877_v49 }
0x146c   :  { %6887 = vrot.lane.b32.xlu1 %v6885_v28, %s10253_s4 }
0x1476   :  { %v6605_v5 = vpop.permute.xlu0 %6604 }
0x1477   :  { %v12545_v23 = vadd.f32 %v6605_v5, %v6597_v59 }
0x1479   :  { %9984 = vtanh.f32 %v12545_v23 }
0x147f   :  { %v9985_v43 = vpop.eup %9984 }
0x1480   :  { %6610 = vrot.lane.b32.xlu0 %v9985_v43, %s10252_s1 }
0x14ba   :  { %v7173_v55 = vpop.permute.xlu2 %7172 }
0x14bb   :  { %v12550_v25 = vadd.f32 %v7173_v55, %v7165_v9  ;;  %v13537_v9 = vld [vmem:[#allocation69_spill] sm:$0xff]  ;;  %v13538_v55 = vld [vmem:[#allocation72_spill] sm:$0xff] }
0x14bd   :  { %9986 = vtanh.f32 %v12550_v25 }
0x14c3   :  { %v9987_v42 = vpop.eup %9986 }
0x14c4   :  { %7178 = vrot.lane.b32.xlu2 %v9987_v42, %s10252_s1  ;;  %v13539_v42 = vld [vmem:[#allocation75_spill] sm:$0xff] }
0x14de   :  { %v6888_v45 = vpop.permute.xlu1 %6887 }
0x14df   :  { %v12555_v29 = vadd.f32 %v6888_v45, %v6880_v39 }
0x14e1   :  { %9988 = vtanh.f32 %v12555_v29 }
0x14e7   :  { %v9989_v2 = vpop.eup %9988 }
0x14e8   :  { %6893 = vrot.lane.b32.xlu1 %v9989_v2, %s10252_s1 }
0x14f2   :  { %v6611_v63 = vpop.permute.xlu0 %6610 }
0x14f3   :  { %v6613_v30 = vmul.f32 %v6611_v63, %v12537_v61 }
0x14f5   :  { %v7183_v3 = vrot.slane %v6613_v30, 2  ;;  %7417 = vrot.lane.b32.xlu1 %v6613_v30, %s10253_s4 }
0x14f7   :  { %7184 = vrot.lane.b32.xlu0 %v7183_v3, %s10253_s4 }
0x151e   :  { %v7179_v52 = vpop.permute.xlu2 %7178 }
0x151f   :  { %v7181_v36 = vmul.f32 %v7179_v52, %v7162_v38 }
0x1521   :  { %v9659_v24 = vrot.slane %v7181_v36, 2  ;;  %7708 = vrot.lane.b32.xlu1 %v7181_v36, %s10252_s1 }
0x1523   :  { %v12565_v20 = vsel %vm9672_vm10, %v12429_v22, %v9659_v24  ;;  %v13540_v24 = vld [vmem:[#allocation63_spill] sm:$0xff] }
0x1524   :  { %13536 = vst [vmem:[#allocation23_spill] sm:$0xff] %v12565_v20  ;;  %v13553_v20 = vld [vmem:[#allocation83_spill] sm:$0xff] }
0x155a   :  { %v6894_v32 = vpop.permute.xlu1 %6893 }
0x155b   :  { %v6896_v28 = vmul.f32 %v6894_v32, %v6877_v49 }
0x155d   :  { %v7421_v14 = vrot.slane %v6896_v28, 6  ;;  %7704 = vrot.lane.b32.xlu0 %v6896_v28, %s10253_s4 }
0x155f   :  { %7422 = vrot.lane.b32.xlu2 %v7421_v14, %s10252_s1  ;;  %v13541_v14 = vld [vmem:[#allocation65_spill] sm:$0xff] }
0x1567   :  { %v7418_v39 = vpop.permute.xlu1 %7417 }
0x1569   :  { %v7185_v61 = vpop.permute.xlu0 %7184 }
0x156a   :  { %v7186_v59 = vsel %vm428_vm3, %v7185_v61, 0  ;;  %v13542_v61 = vld [vmem:[#allocation60_spill] sm:$0xff] }
0x156b   :  { %v7208_v5 = vand.u32 4294901760, %v7186_v59 }
0x156d   :  { %v7209_v38 = vsub.f32 %v7186_v59, %v7208_v5  ;;  %7254 = vmatmul.f32.vlgmr.msrb.gmra.mxu1 %v7208_v5  ;;  %v13543_v59 = vld [vmem:[#allocation68_spill] sm:$0xff] }
0x156e   :  { %7571 = vmatpush.msrb.mxu1 %v11533_v35 }
0x156f   :  { %v7210_v43 = vand.u32 4294901760, %v7209_v38  ;;  %7284 = vmatmul.f32.vlgmr.msrb.gmra.mxu2 %v7209_v38 }
0x1570   :  { %7573 = vmatpush.msrb.mxu1 %v11535_v50  ;;  %7604 = vmatpush.msrb.mxu2 %v11556_v13 }
0x1571   :  { %v7211_v22 = vsub.f32 %v7209_v38, %v7210_v43  ;;  %7311 = vmatmul.f32.vlgmr.msrb.gmra.mxu3 %v7210_v43  ;;  %v13545_v38 = vld [vmem:[#allocation70_spill] sm:$0xff]  ;;  %v13546_v43 = vld [vmem:[#allocation64_spill] sm:$0xff] }
0x1572   :  { %7575 = vmatpush.msrb.mxu1 %v11537_v16  ;;  %7647 = vmatpush.msrb.mxu3 %v11533_v35 }
0x1573   :  { %v7212_v49 = vand.u32 4294901760, %v7211_v22  ;;  %7608 = vmatpush.msrb.mxu2 %v11559_v12  ;;  %v13547_v22 = vld [vmem:[#allocation77_spill] sm:$0xff] }
0x1574   :  { %7577 = vmatpush.msrb.mxu1 %v11539_v54  ;;  %7649 = vmatpush.msrb.mxu3 %v11535_v50 }
0x1575   :  { %7213 = vmatmul.f32.vlgmr.msrb.gmra.mxu0 %v7212_v49  ;;  %7369 = vmatmul.f32.vlgmr.msra.gmra.mxu1 %v7208_v5 }
0x1576   :  { %7534 = vmatpush.msrb.mxu0 %v13403_v37  ;;  %7579 = vmatpush.msrb.mxu1 %v11579_v51 }
0x1577   :  { %7651 = vmatpush.msrb.mxu3 %v11537_v16  ;;  %7612 = vmatpush.msrb.mxu2 %v11562_v21 }
0x1578   :  { %7537 = vmatpush.msrb.mxu0 %v13404_v27  ;;  %7581 = vmatpush.msrb.mxu1 %v11596_v18 }
0x1579   :  { %7653 = vmatpush.msrb.mxu3 %v11539_v54  ;;  %7616 = vmatpush.msrb.mxu2 %v11565_v19 }
0x157a   :  { %7540 = vmatpush.msrb.mxu0 %v13405_v33  ;;  %7583 = vmatpush.msrb.mxu1 %v11598_v53 }
0x157b   :  { %7655 = vmatpush.msrb.mxu3 %v11579_v51  ;;  %7620 = vmatpush.msrb.mxu2 %v11603_v15 }
0x157c   :  { %7543 = vmatpush.msrb.mxu0 %v13406_v58  ;;  %7585 = vmatpush.msrb.mxu1 %v11600_v7 }
0x157d   :  { %7344 = vmatmul.f32.vlgmr.msra.gmra.mxu0 %v7208_v5  ;;  %7657 = vmatpush.msrb.mxu3 %v11596_v18  ;;  %v13544_v5 = vld [vmem:[#allocation61_spill] sm:$0xff] }
0x157e   :  { %7761 = vmatpush.msra.mxu1 %v13407_v60  ;;  %7546 = vmatpush.msrb.mxu0 %v13408_v0 }
0x157f   :  { %7624 = vmatpush.msrb.mxu2 %v11619_v41  ;;  %7659 = vmatpush.msrb.mxu3 %v11598_v53 }
0x1580   :  { %7767 = vmatpush.msra.mxu1 %v13409_v17  ;;  %7549 = vmatpush.msrb.mxu0 %v13410_v47 }
0x1581   :  { %7628 = vmatpush.msrb.mxu2 %v11622_v48  ;;  %7661 = vmatpush.msrb.mxu3 %v11600_v7 }
0x1582   :  { %7773 = vmatpush.msra.mxu1 %v13411_v26  ;;  %7552 = vmatpush.msrb.mxu0 %v13412_v46 }
0x1583   :  { %7632 = vmatpush.msrb.mxu2 %v11625_v10 }
0x1584   :  { %7779 = vmatpush.msra.mxu1 %v13413_v1  ;;  %7555 = vmatpush.msrb.mxu0 %v13414_v44 }
0x1586   :  { %7724 = vmatpush.msra.mxu0 %v11745_v11  ;;  %7785 = vmatpush.msra.mxu1 %v11855_v40 }
0x1588   :  { %7726 = vmatpush.msra.mxu0 %v11747_v56  ;;  %7791 = vmatpush.msra.mxu1 %v11864_v6 }
0x158a   :  { %7728 = vmatpush.msra.mxu0 %v11752_v34  ;;  %7797 = vmatpush.msra.mxu1 %v13444_v8 }
0x158c   :  { %7730 = vmatpush.msra.mxu0 %v13443_v62  ;;  %7803 = vmatpush.msra.mxu1 %v13447_v4 }
0x158e   :  { %7732 = vmatpush.msra.mxu0 %v13446_v31 }
0x1590   :  { %7734 = vmatpush.msra.mxu0 %v13537_v9 }
0x1592   :  { %7736 = vmatpush.msra.mxu0 %v13538_v55 }
0x1593   :  { %v7709_v49 = vpop.permute.xlu1 %7708 }
0x1594   :  { %7738 = vmatpush.msra.mxu0 %v13539_v42 }
0x15b9   :  { %v7423_v45 = vpop.permute.xlu2 %7422 }
0x15ba   :  { %v7425_v2 = vsel %vm428_vm3, %v7418_v39, %v7423_v45  ;;  %v13548_v45 = vld [vmem:[#allocation66_spill] sm:$0xff] }
0x15bb   :  { %v7427_v63 = vrot.slane %v7425_v2, 2 }
0x15bd   :  { %v7428_v30 = vsel %vm3685_vm4, %v7427_v63, 0 }
0x15be   :  { %v7454_v3 = vand.u32 4294901760, %v7428_v30 }
0x15c0   :  { %v7455_v52 = vsub.f32 %v7428_v30, %v7454_v3  ;;  %7520 = vmatmul.f32.vlgmr.msra.gmra.mxu3 %v7454_v3  ;;  %v13549_v30 = vld [vmem:[#allocation71_spill] sm:$0xff] }
0x15c1   :  { %7856 = vmatpush.msra.mxu3 %v11745_v11 }
0x15c2   :  { %v7456_v36 = vand.u32 4294901760, %v7455_v52  ;;  %7558 = vmatmul.f32.vlgmr.msrb.gmra.mxu0 %v7455_v52 }
0x15c3   :  { %7858 = vmatpush.msra.mxu3 %v11747_v56  ;;  %7889 = vmatpush.msrb.mxu0 %v13540_v24  ;;  %v12700_v24 = vld [vmem:[%s13083_s11 + $0x2] ss:$0 sm:$0xff] }
0x15c4   :  { %v7457_v32 = vsub.f32 %v7455_v52, %v7456_v36  ;;  %7589 = vmatmul.f32.vlgmr.msrb.gmra.mxu1 %v7456_v36  ;;  %v13550_v52 = vld [vmem:[#allocation80_spill] sm:$0xff] }
0x15c5   :  { %7860 = vmatpush.msra.mxu3 %v11752_v34  ;;  %7932 = vmatpush.msrb.mxu1 %v11745_v11 }
0x15c6   :  { %v7458_v28 = vand.u32 4294901760, %v7457_v32  ;;  %7893 = vmatpush.msrb.mxu0 %v13541_v14  ;;  %v13551_v32 = vld [vmem:[#allocation32_spill] sm:$0xff] }
0x15c7   :  { %7862 = vmatpush.msra.mxu3 %v13443_v62  ;;  %7934 = vmatpush.msrb.mxu1 %v11747_v56 }
0x15c8   :  { %7459 = vmatmul.f32.vlgmr.msra.gmra.mxu2 %v7458_v28  ;;  %7663 = vmatmul.f32.vlgmr.msrb.gmra.mxu3 %v7454_v3  ;;  %v13552_v28 = vld [vmem:[#allocation74_spill] sm:$0xff] }
0x15c9   :  { %7819 = vmatpush.msra.mxu2 %v13542_v61  ;;  %7864 = vmatpush.msra.mxu3 %v13446_v31 }
0x15ca   :  { %7936 = vmatpush.msrb.mxu1 %v11752_v34  ;;  %7897 = vmatpush.msrb.mxu0 %v13543_v59 }
0x15cb   :  { %7822 = vmatpush.msra.mxu2 %v13544_v5  ;;  %7866 = vmatpush.msra.mxu3 %v13537_v9 }
0x15cc   :  { %7938 = vmatpush.msrb.mxu1 %v13443_v62  ;;  %7901 = vmatpush.msrb.mxu0 %v13545_v38 }
0x15cd   :  { %7825 = vmatpush.msra.mxu2 %v13546_v43  ;;  %7868 = vmatpush.msra.mxu3 %v13538_v55  ;;  %v13580_v43 = vld [vmem:[#allocation44_spill] sm:$0xff] }
0x15ce   :  { %7940 = vmatpush.msrb.mxu1 %v13446_v31  ;;  %7905 = vmatpush.msrb.mxu0 %v13547_v22 }
0x15cf   :  { %v7705_v39 = vpop.permute.xlu0 %7704  ;;  %7828 = vmatpush.msra.mxu2 %v13548_v45  ;;  %7870 = vmatpush.msra.mxu3 %v13539_v42 }
0x15d0   :  { %v7711_v2 = vsel %vm428_vm3, %v7705_v39, %v7709_v49  ;;  %7634 = vmatmul.f32.vlgmr.msrb.gmra.mxu2 %v7454_v3  ;;  %7942 = vmatpush.msrb.mxu1 %v13537_v9  ;;  %v13554_v3 = vld [vmem:[#allocation36_spill] sm:$0xff]  ;;  %v13555_v49 = vld [vmem:[#allocation78_spill] sm:$0xff] }
0x15d1   :  { %v7713_v63 = vsel %vm3685_vm4, %v7711_v2, 0  ;;  %7831 = vmatpush.msra.mxu2 %v13549_v30  ;;  %7909 = vmatpush.msrb.mxu0 %v13550_v52  ;;  %v13556_v2 = vld [vmem:[#allocation84_spill] sm:$0xff]  ;;  %v13557_v52 = vld [vmem:[#allocation43_spill] sm:$0xff]  ;;  %v13558_v30 = vld [vmem:[#allocation81_spill] sm:$0xff] }
0x15d2   :  { %v7739_v36 = vand.u32 4294901760, %v7713_v63  ;;  %7944 = vmatpush.msrb.mxu1 %v13538_v55  ;;  %8041 = vmatpush.msrb.mxu3 %v13551_v32  ;;  %v13559_v32 = vld [vmem:[#allocation27_spill] sm:$0xff] }
0x15d3   :  { %7834 = vmatpush.msra.mxu2 %v13552_v28  ;;  %7913 = vmatpush.msrb.mxu0 %v13553_v20  ;;  %v13561_v20 = vld [vmem:[#allocation17_spill] sm:$0xff] }
0x15d4   :  { %v7740_v22 = vsub.f32 %v7713_v63, %v7739_v36  ;;  %7805 = vmatmul.f32.vlgmr.msra.gmra.mxu1 %v7739_v36  ;;  %8047 = vmatpush.msrb.mxu3 %v13554_v3  ;;  %v13560_v63 = vld [vmem:[#allocation33_spill] sm:$0xff] }
0x15d5   :  { %7837 = vmatpush.msra.mxu2 %v13555_v49  ;;  %7946 = vmatpush.msrb.mxu1 %v13539_v42  ;;  %v13562_v49 = vld [vmem:[#allocation16_spill] sm:$0xff] }
0x15d6   :  { %v7741_v39 = vand.u32 4294901760, %v7740_v22  ;;  %7917 = vmatpush.msrb.mxu0 %v13556_v2  ;;  %8053 = vmatpush.msrb.mxu3 %v13557_v52  ;;  %v13563_v52 = vld [vmem:[#allocation30_spill] sm:$0xff]  ;;  %v13564_v2 = vld [vmem:[#allocation19_spill] sm:$0xff] }
0x15d7   :  { %7840 = vmatpush.msra.mxu2 %v13558_v30  ;;  %8108 = vmatpush.msra.mxu1 %v13559_v32 }
0x15d8   :  { %v7742_v28 = vsub.f32 %v7740_v22, %v7741_v39  ;;  %7843 = vmatmul.f32.vlgmr.msra.gmra.mxu2 %v7740_v22  ;;  %7874 = vmatmul.f32.vlgmr.msra.gmra.mxu3 %v7741_v39  ;;  %v13565_v22 = vld [vmem:[#allocation28_spill] sm:$0xff]  ;;  %v13567_v39 = vld [vmem:[#allocation21_spill] sm:$0xff] }
0x15d9   :  { %8059 = vmatpush.msrb.mxu3 %v13560_v63  ;;  %8110 = vmatpush.msra.mxu1 %v13561_v20  ;;  %v13569_v63 = vld [vmem:[#allocation20_spill] sm:$0xff] }
0x15da   :  { %v7743_v3 = vand.u32 4294901760, %v7742_v28  ;;  %8008 = vmatpush.msrb.mxu2 %v13559_v32  ;;  %v13566_v28 = vld [vmem:[#allocation40_spill] sm:$0xff] }
0x15db   :  { %8168 = vmatpush.msra.mxu3 %v13559_v32  ;;  %8112 = vmatpush.msra.mxu1 %v13562_v49  ;;  %v13568_v32 = vld [vmem:[#allocation37_spill] sm:$0xff] }
0x15dc   :  { %7744 = vmatmul.f32.vlgmr.msra.gmra.mxu0 %v7743_v3  ;;  %7948 = vmatmul.f32.vlgmr.msrb.gmra.mxu1 %v7739_v36  ;;  %v13570_v3 = vld [vmem:[#allocation46_spill] sm:$0xff] }
0x15dd   :  { %8079 = vmatpush.msra.mxu0 %v13563_v52  ;;  %8010 = vmatpush.msrb.mxu2 %v13561_v20  ;;  %v13572_v52 = vld [vmem:[#allocation47_spill] sm:$0xff] }
0x15de   :  { %8114 = vmatpush.msra.mxu1 %v13564_v2  ;;  %8170 = vmatpush.msra.mxu3 %v13561_v20  ;;  %v13571_v20 = vld [vmem:[#allocation45_spill] sm:$0xff] }
0x15df   :  { %8082 = vmatpush.msra.mxu0 %v13565_v22  ;;  %8012 = vmatpush.msrb.mxu2 %v13562_v49  ;;  %v13574_v22 = vld [vmem:[#allocation48_spill] sm:$0xff] }
0x15e0   :  { %8172 = vmatpush.msra.mxu3 %v13562_v49  ;;  %8283 = vmatpush.msrb.mxu1 %v13566_v28  ;;  %v13573_v49 = vld [vmem:[#allocation25_spill] sm:$0xff] }
0x15e1   :  { %8085 = vmatpush.msra.mxu0 %v13567_v39  ;;  %8014 = vmatpush.msrb.mxu2 %v13564_v2  ;;  %v13576_v39 = vld [vmem:[#allocation53_spill] sm:$0xff] }
0x15e2   :  { %8174 = vmatpush.msra.mxu3 %v13564_v2  ;;  %8289 = vmatpush.msrb.mxu1 %v13570_v3  ;;  %v13575_v2 = vld [vmem:[#allocation31_spill] sm:$0xff] }
0x15e3   :  { %8137 = vmatpush.msra.mxu2 %v13568_v32  ;;  %8088 = vmatpush.msra.mxu0 %v13569_v63  ;;  %v13577_v32 = vld [vmem:[#allocation54_spill] sm:$0xff]  ;;  %v13579_v63 = vld [vmem:[#allocation56_spill] sm:$0xff] }
0x15e4   :  { %7919 = vmatmul.f32.vlgmr.msrb.gmra.mxu0 %v7739_v36  ;;  %8295 = vmatpush.msrb.mxu1 %v13572_v52  ;;  %v13578_v36 = vld [vmem:[#allocation55_spill] sm:$0xff] }
0x15e5   :  { %8141 = vmatpush.msra.mxu2 %v13571_v20  ;;  %8246 = vmatpush.msrb.mxu0 %v11533_v35 }
0x15e6   :  { %8301 = vmatpush.msrb.mxu1 %v13574_v22 }
0x15e7   :  { %8145 = vmatpush.msra.mxu2 %v13573_v49  ;;  %8248 = vmatpush.msrb.mxu0 %v11535_v50 }
0x15e8   :  { %8307 = vmatpush.msrb.mxu1 %v13576_v39 }
0x15e9   :  { %8149 = vmatpush.msra.mxu2 %v13575_v2  ;;  %8250 = vmatpush.msrb.mxu0 %v11537_v16 }
0x15ea   :  { %8313 = vmatpush.msrb.mxu1 %v13577_v32  ;;  %v7255_v20 = vpop.f32.mrf.mxu1 }
0x15eb   :  { %8252 = vmatpush.msrb.mxu0 %v11539_v54 }
0x15ec   :  { %8319 = vmatpush.msrb.mxu1 %v13578_v36 }
0x15ed   :  { %8254 = vmatpush.msrb.mxu0 %v11579_v51 }
0x15ee   :  { %8325 = vmatpush.msrb.mxu1 %v13579_v63 }
0x15ef   :  { %8256 = vmatpush.msrb.mxu0 %v11596_v18 }
0x15f1   :  { %8258 = vmatpush.msrb.mxu0 %v11598_v53 }
0x15f2   :  { %v7214_v49 = vpop.f32.mrf.mxu0  ;;  %v7285_v39 = vpop.f32.mrf.mxu2 }
0x15f3   :  { %8260 = vmatpush.msrb.mxu0 %v11600_v7  ;;  %v7256_v2 = vadd.f32 %v7255_v20, %v7214_v49  ;;  %v7370_v36 = vpop.f32.mrf.mxu1 }
0x15f4   :  { %v7312_v32 = vpop.f32.mrf.mxu3 }
0x15f5   :  { %v7286_v22 = vadd.f32 %v7285_v39, %v7256_v2 }
0x15f7   :  { %v7313_v52 = vadd.f32 %v7312_v32, %v7286_v22 }
0x15fa   :  { %v7345_v30 = vpop.f32.mrf.mxu0 }
0x15fb   :  { %v7346_v3 = vadd.f32 %v7345_v30, %v7313_v52 }
0x15fd   :  { %v7371_v28 = vadd.f32 %v7370_v36, %v7346_v3 }
0x15ff   :  { %v7374_v45 = vrot.slane %v7371_v28, 4 }
0x1601   :  { %v7376_v63 = vadd.f32 %v7374_v45, %v13580_v43 }
0x1603   :  { %9990 = vtanh.f32 %v7376_v63  ;;  %v9764_v5 = vmul.f32 -1.442695, %v7376_v63 }
0x1605   :  { %9992 = vpow2.f32 %v9764_v5 }
0x1609   :  { %v9991_v38 = vpop.eup %9990 }
0x160a   :  { %7402 = vrot.lane.b32.xlu2 %v9991_v38, %s10252_s1 }
0x160b   :  { %v9993_v59 = vpop.eup %9992 }
0x160c   :  { %v7380_v61 = vadd.f32 1.0, %v9993_v59 }
0x160e   :  { %9994 = vrcp.f32 %v7380_v61  ;;  %vm7386_vm12 = vweird.f32 %v7380_v61 }
0x1614   :  { %v9995_v52 = vpop.eup %9994 }
0x1615   :  { %v7382_v49 = vmul.f32 %v9995_v52, %v7380_v61  ;;  %vm7387_vm11 = vweird.f32 %v9995_v52 }
0x1616   :  { %vm7388_vm13 = vmor %vm7386_vm12, %vm7387_vm11 }
0x1617   :  { %v7383_v63 = vsub.f32 1.0, %v7382_v49  ;;  %v7390_v49 = vand.u32 2147483647, %v7380_v61 }
0x1619   :  { %vm7391_vm14 = vcmp.eq.f32.partialorder %v7390_v49, 8.507059e+37 }
0x163f   :  { %v7559_v30 = vpop.f32.mrf.mxu0 }
0x1641   :  { %v7590_v28 = vpop.f32.mrf.mxu1 }
0x1643   :  { %v7521_v20 = vpop.f32.mrf.mxu3 }
0x164b   :  { %v7460_v39 = vpop.f32.mrf.mxu2  ;;  %v7664_v14 = vpop.f32.mrf.mxu3 }
0x164c   :  { %v7461_v22 = vadd.f32 %v12531_v57, %v7460_v39 }
0x164e   :  { %v7522_v32 = vadd.f32 %v7521_v20, %v7461_v22  ;;  %v7384_v20 = vmul.f32 %v9995_v52, %v7383_v63 }
0x1650   :  { %v7560_v3 = vadd.f32 %v7559_v30, %v7522_v32 }
0x1651   :  { %v7806_v5 = vpop.f32.mrf.mxu1 }
0x1652   :  { %v7591_v36 = vadd.f32 %v7590_v28, %v7560_v3 }
0x1653   :  { %v7635_v45 = vpop.f32.mrf.mxu2 }
0x1654   :  { %v7636_v2 = vadd.f32 %v7635_v45, %v7591_v36  ;;  %v7392_v36 = vand.u32 2147483648, %v7380_v61 }
0x1656   :  { %v7665_v38 = vadd.f32 %v7664_v14, %v7636_v2  ;;  %v7385_v14 = vadd.f32 %v9995_v52, %v7384_v20  ;;  %v7393_v63 = vor.u32 1.1754944e-38, %v7392_v36 }
0x1658   :  { %9996 = vtanh.f32 %v7665_v38  ;;  %v7389_v42 = vsel %vm7388_vm13, %v9995_v52, %v7385_v14 }
0x1659   :  { %v7745_v59 = vpop.f32.mrf.mxu0  ;;  %v7949_v43 = vpop.f32.mrf.mxu1 }
0x165a   :  { %v7746_v57 = vadd.f32 %v12700_v24, %v7745_v59 }
0x165b   :  { %v7844_v22 = vpop.f32.mrf.mxu2  ;;  %v7875_v3 = vpop.f32.mrf.mxu3 }
0x165c   :  { %v7807_v39 = vadd.f32 %v7806_v5, %v7746_v57  ;;  %v7394_v5 = vsel %vm7391_vm14, %v7393_v63, %v7389_v42  ;;  %v7398_v42 = vrot.slane %v12545_v23, 6 }
0x165e   :  { %v9997_v32 = vpop.eup %9996  ;;  %v7845_v30 = vadd.f32 %v7844_v22, %v7807_v39  ;;  %v9765_v22 = vmul.f32 -1.442695, %v7665_v38 }
0x165f   :  { %7689 = vrot.lane.b32.xlu0 %v9997_v32, %s10252_s1 }
0x1660   :  { %v7876_v28 = vadd.f32 %v7875_v3, %v7845_v30 }
0x1661   :  { %v7920_v45 = vpop.f32.mrf.mxu0 }
0x1662   :  { %v7921_v2 = vadd.f32 %v7920_v45, %v7876_v28  ;;  %v7400_v28 = vmul.f32 %v7398_v42, %v7394_v5 }
0x1664   :  { %v7950_v59 = vadd.f32 %v7949_v43, %v7921_v2  ;;  %v7403_v57 = vpop.permute.xlu2 %7402 }
0x1665   :  { %v7405_v39 = vmul.f32 %v7403_v57, %v7394_v5 }
0x1666   :  { %9998 = vtanh.f32 %v7950_v59  ;;  %v9766_v30 = vmul.f32 -1.442695, %v7950_v59 }
0x1667   :  { %7407 = vrot.lane.b32.xlu2 %v7405_v39, %s10253_s4  ;;  %10000 = vpow2.f32 %v9765_v22 }
0x166c   :  { %v9999_v20 = vpop.eup %9998 }
0x166d   :  { %7974 = vrot.lane.b32.xlu1 %v9999_v20, %s10252_s1  ;;  %v10001_v32 = vpop.eup %10000 }
0x166e   :  { %v7670_v61 = vadd.f32 1.0, %v10001_v32 }
0x1670   :  { %10002 = vrcp.f32 %v7670_v61  ;;  %v7682_v59 = vand.u32 2147483648, %v7670_v61  ;;  %vm7676_vm8 = vweird.f32 %v7670_v61  ;;  %v7680_v39 = vand.u32 2147483647, %v7670_v61 }
0x1671   :  { %10004 = vpow2.f32 %v9766_v30 }
0x1672   :  { %v7683_v22 = vor.u32 1.1754944e-38, %v7682_v59  ;;  %vm7681_vm1 = vcmp.eq.f32.partialorder %v7680_v39, 8.507059e+37 }
0x1676   :  { %v10003_v52 = vpop.eup %10002 }
0x1677   :  { %v10005_v43 = vpop.eup %10004  ;;  %v7672_v3 = vmul.f32 %v10003_v52, %v7670_v61  ;;  %vm7677_vm15 = vweird.f32 %v10003_v52 }
0x1678   :  { %v7955_v14 = vadd.f32 1.0, %v10005_v43  ;;  %vm7678_vm0 = vmor %vm7676_vm8, %vm7677_vm15 }
0x1679   :  { %v7673_v36 = vsub.f32 1.0, %v7672_v3 }
0x167a   :  { %10006 = vrcp.f32 %v7955_v14  ;;  %vm7961_vm5 = vweird.f32 %v7955_v14  ;;  %v7965_v61 = vand.u32 2147483647, %v7955_v14 }
0x167b   :  { %v7674_v38 = vmul.f32 %v10003_v52, %v7673_v36  ;;  %v7967_v36 = vand.u32 2147483648, %v7955_v14 }
0x167c   :  { %vm7966_vm11 = vcmp.eq.f32.partialorder %v7965_v61, 8.507059e+37 }
0x167d   :  { %v7675_v63 = vadd.f32 %v10003_v52, %v7674_v38  ;;  %v7968_v38 = vor.u32 1.1754944e-38, %v7967_v36 }
0x167f   :  { %v7679_v23 = vsel %vm7678_vm0, %v10003_v52, %v7675_v63 }
0x1680   :  { %v10007_v2 = vpop.eup %10006  ;;  %v12711_v43 = vsel %vm7681_vm1, %v7683_v22, %v7679_v23 }
0x1681   :  { %v7957_v20 = vmul.f32 %v10007_v2, %v7955_v14  ;;  %vm7962_vm2 = vweird.f32 %v10007_v2  ;;  %v7687_v23 = vmul.f32 %v12711_v43, %v12555_v29 }
0x1682   :  { %vm7963_vm6 = vmor %vm7961_vm5, %vm7962_vm2 }
0x1683   :  { %v7958_v32 = vsub.f32 1.0, %v7957_v20 }
0x1685   :  { %v7959_v42 = vmul.f32 %v10007_v2, %v7958_v32 }
0x16c1   :  { %v7408_v45 = vpop.permute.xlu2 %7407 }
0x16c2   :  { %v12707_v49 = vadd.f32 %v7408_v45, %v7400_v28  ;;  %v7960_v28 = vadd.f32 %v10007_v2, %v7959_v42 }
0x16c4   :  { %10008 = vtanh.f32 %v12707_v49  ;;  %v7964_v45 = vsel %vm7963_vm6, %v10007_v2, %v7960_v28 }
0x16c5   :  { %v12715_v63 = vsel %vm7966_vm11, %v7968_v38, %v7964_v45  ;;  %v13581_v38 = vld [vmem:[#allocation75_spill] sm:$0xff] }
0x16c6   :  { %v7972_v32 = vmul.f32 %v12715_v63, %v12550_v25 }
0x16ca   :  { %v10009_v57 = vpop.eup %10008 }
0x16cb   :  { %7413 = vrot.lane.b32.xlu2 %v10009_v57, %s10252_s1 }
0x16d1   :  { %v7690_v30 = vpop.permute.xlu0 %7689 }
0x16d2   :  { %v7692_v3 = vmul.f32 %v7690_v30, %v12711_v43 }
0x16d4   :  { %7694 = vrot.lane.b32.xlu0 %v7692_v3, %s10253_s4 }
0x16df   :  { %v7975_v52 = vpop.permute.xlu1 %7974 }
0x16e0   :  { %v7977_v59 = vmul.f32 %v7975_v52, %v12715_v63 }
0x16e2   :  { %7979 = vrot.lane.b32.xlu1 %v7977_v59, %s10253_s4 }
0x1725   :  { %v7414_v57 = vpop.permute.xlu2 %7413 }
0x1726   :  { %v7416_v39 = vmul.f32 %v7414_v57, %v7394_v5 }
0x1728   :  { %v7990_v20 = vrot.slane %v7416_v39, 4 }
0x172a   :  { %7991 = vrot.lane.b32.xlu2 %v7990_v20, %s10253_s4 }
0x1746   :  { %v7695_v14 = vpop.permute.xlu0 %7694 }
0x1747   :  { %v12722_v22 = vadd.f32 %v7695_v14, %v7687_v23 }
0x1749   :  { %10010 = vtanh.f32 %v12722_v22 }
0x174f   :  { %v10011_v2 = vpop.eup %10010 }
0x1750   :  { %7700 = vrot.lane.b32.xlu0 %v10011_v2, %s10252_s1 }
0x1754   :  { %v7980_v30 = vpop.permute.xlu1 %7979 }
0x1755   :  { %v12728_v3 = vadd.f32 %v7980_v30, %v7972_v32 }
0x1757   :  { %10012 = vtanh.f32 %v12728_v3 }
0x1758   :  { %8224 = vrot.lane.b32.xlu0 %v7416_v39, %s10253_s4 }
0x175d   :  { %v10013_v5 = vpop.eup %10012 }
0x175e   :  { %7985 = vrot.lane.b32.xlu1 %v10013_v5, %s10252_s1 }
0x1784   :  { %v7992_v29 = vpop.permute.xlu2 %7991 }
0x1785   :  { %v7993_v42 = vsel %vm428_vm3, %v7992_v29, 0 }
0x1786   :  { %v8015_v28 = vand.u32 4294901760, %v7993_v42 }
0x1788   :  { %v8016_v36 = vsub.f32 %v7993_v42, %v8015_v28  ;;  %8061 = vmatmul.f32.vlgmr.msrb.gmra.mxu3 %v8015_v28 }
0x1789   :  { %8378 = vmatpush.msrb.mxu3 %v11533_v35 }
0x178a   :  { %v8017_v61 = vand.u32 4294901760, %v8016_v36  ;;  %8091 = vmatmul.f32.vlgmr.msra.gmra.mxu0 %v8016_v36 }
0x178b   :  { %8380 = vmatpush.msrb.mxu3 %v11535_v50  ;;  %8411 = vmatpush.msra.mxu0 %v11556_v13 }
0x178c   :  { %v8018_v25 = vsub.f32 %v8016_v36, %v8017_v61  ;;  %8118 = vmatmul.f32.vlgmr.msra.gmra.mxu1 %v8017_v61 }
0x178d   :  { %8382 = vmatpush.msrb.mxu3 %v11537_v16  ;;  %8454 = vmatpush.msra.mxu1 %v11533_v35 }
0x178e   :  { %v8019_v45 = vand.u32 4294901760, %v8018_v25  ;;  %8415 = vmatpush.msra.mxu0 %v11559_v12  ;;  %v13583_v25 = vld [vmem:[#allocation44_spill] sm:$0xff] }
0x178f   :  { %8384 = vmatpush.msrb.mxu3 %v11539_v54  ;;  %8456 = vmatpush.msra.mxu1 %v11535_v50 }
0x1790   :  { %8020 = vmatmul.f32.vlgmr.msrb.gmra.mxu2 %v8019_v45  ;;  %8176 = vmatmul.f32.vlgmr.msra.gmra.mxu3 %v8015_v28 }
0x1791   :  { %8341 = vmatpush.msrb.mxu2 %v13403_v37  ;;  %8386 = vmatpush.msrb.mxu3 %v11579_v51 }
0x1792   :  { %8458 = vmatpush.msra.mxu1 %v11537_v16  ;;  %8419 = vmatpush.msra.mxu0 %v11562_v21 }
0x1793   :  { %8344 = vmatpush.msrb.mxu2 %v13404_v27  ;;  %8388 = vmatpush.msrb.mxu3 %v11596_v18 }
0x1794   :  { %8460 = vmatpush.msra.mxu1 %v11539_v54  ;;  %8423 = vmatpush.msra.mxu0 %v11565_v19 }
0x1795   :  { %8347 = vmatpush.msrb.mxu2 %v13405_v33  ;;  %8390 = vmatpush.msrb.mxu3 %v11598_v53 }
0x1796   :  { %8462 = vmatpush.msra.mxu1 %v11579_v51  ;;  %8427 = vmatpush.msra.mxu0 %v11603_v15 }
0x1797   :  { %8350 = vmatpush.msrb.mxu2 %v13406_v58  ;;  %8392 = vmatpush.msrb.mxu3 %v11600_v7 }
0x1798   :  { %8151 = vmatmul.f32.vlgmr.msra.gmra.mxu2 %v8015_v28  ;;  %8464 = vmatpush.msra.mxu1 %v11596_v18 }
0x1799   :  { %8568 = vmatpush.msra.mxu3 %v13407_v60  ;;  %8353 = vmatpush.msrb.mxu2 %v13408_v0 }
0x179a   :  { %8431 = vmatpush.msra.mxu0 %v11619_v41  ;;  %8466 = vmatpush.msra.mxu1 %v11598_v53 }
0x179b   :  { %8574 = vmatpush.msra.mxu3 %v13409_v17  ;;  %8356 = vmatpush.msrb.mxu2 %v13410_v47 }
0x179c   :  { %8435 = vmatpush.msra.mxu0 %v11622_v48  ;;  %8468 = vmatpush.msra.mxu1 %v11600_v7 }
0x179d   :  { %8580 = vmatpush.msra.mxu3 %v13411_v26  ;;  %8359 = vmatpush.msrb.mxu2 %v13412_v46 }
0x179e   :  { %8439 = vmatpush.msra.mxu0 %v11625_v10 }
0x179f   :  { %8586 = vmatpush.msra.mxu3 %v13413_v1  ;;  %8362 = vmatpush.msrb.mxu2 %v13414_v44 }
0x17a1   :  { %8531 = vmatpush.msra.mxu2 %v11745_v11  ;;  %8592 = vmatpush.msra.mxu3 %v11855_v40 }
0x17a3   :  { %8533 = vmatpush.msra.mxu2 %v11747_v56  ;;  %8598 = vmatpush.msra.mxu3 %v11864_v6 }
0x17a5   :  { %8535 = vmatpush.msra.mxu2 %v11752_v34  ;;  %8604 = vmatpush.msra.mxu3 %v13444_v8 }
0x17a7   :  { %8537 = vmatpush.msra.mxu2 %v13443_v62  ;;  %8610 = vmatpush.msra.mxu3 %v13447_v4 }
0x17a9   :  { %8539 = vmatpush.msra.mxu2 %v13446_v31 }
0x17ab   :  { %8541 = vmatpush.msra.mxu2 %v13537_v9 }
0x17ad   :  { %8543 = vmatpush.msra.mxu2 %v13538_v55 }
0x17af   :  { %8545 = vmatpush.msra.mxu2 %v13581_v38 }
0x17c2   :  { %v7701_v52 = vpop.permute.xlu0 %7700 }
0x17c3   :  { %v7703_v59 = vmul.f32 %v7701_v52, %v12711_v43 }
0x17c5   :  { %v8228_v57 = vrot.slane %v7703_v59, 4  ;;  %8511 = vrot.lane.b32.xlu2 %v7703_v59, %s10253_s4 }
0x17c7   :  { %8229 = vrot.lane.b32.xlu1 %v8228_v57, %s10252_s1 }
0x17ca   :  { %v8225_v52 = vpop.permute.xlu0 %8224 }
0x17d0   :  { %v7986_v39 = vpop.permute.xlu1 %7985 }
0x17d1   :  { %v12786_v20 = vmul.f32 %v7986_v39, %v12715_v63 }
0x17d3   :  { %13582 = vst [vmem:[#allocation22_spill] sm:$0xff] %v12786_v20  ;;  %8515 = vrot.lane.b32.xlu0 %v12786_v20, %s10252_s1  ;;  %v13596_v20 = vld [vmem:[#allocation80_spill] sm:$0xff] }
0x1807   :  { %v8092_v32 = vpop.f32.mrf.mxu0 }
0x1809   :  { %v8119_v5 = vpop.f32.mrf.mxu1 }
0x180b   :  { %v8062_v23 = vpop.f32.mrf.mxu3 }
0x1813   :  { %v8021_v14 = vpop.f32.mrf.mxu2  ;;  %v8177_v28 = vpop.f32.mrf.mxu3 }
0x1814   :  { %v8063_v2 = vadd.f32 %v8062_v23, %v8021_v14 }
0x1816   :  { %v8093_v30 = vadd.f32 %v8092_v32, %v8063_v2 }
0x1818   :  { %v8120_v29 = vadd.f32 %v8119_v5, %v8093_v30  ;;  %v13584_v30 = vld [vmem:[#allocation63_spill] sm:$0xff] }
0x181b   :  { %v8152_v43 = vpop.f32.mrf.mxu2 }
0x181c   :  { %v8153_v42 = vadd.f32 %v8152_v43, %v8120_v29 }
0x181e   :  { %v8178_v36 = vadd.f32 %v8177_v28, %v8153_v42 }
0x181f   :  { %v8512_v29 = vpop.permute.xlu2 %8511 }
0x1820   :  { %v8181_v61 = vrot.slane %v8178_v36, 2  ;;  %v13585_v36 = vld [vmem:[#allocation65_spill] sm:$0xff] }
0x1822   :  { %v12791_v45 = vadd.f32 %v8181_v61, %v13583_v25 }
0x1824   :  { %10014 = vtanh.f32 %v12791_v45 }
0x182a   :  { %v10015_v63 = vpop.eup %10014 }
0x182b   :  { %8209 = vrot.lane.b32.xlu2 %v10015_v63, %s10252_s1  ;;  %v13586_v63 = vld [vmem:[#allocation60_spill] sm:$0xff] }
0x1839   :  { %v8230_v59 = vpop.permute.xlu1 %8229 }
0x183a   :  { %v8232_v57 = vsel %vm428_vm3, %v8225_v52, %v8230_v59  ;;  %v13587_v59 = vld [vmem:[#allocation68_spill] sm:$0xff] }
0x183b   :  { %v8234_v39 = vrot.slane %v8232_v57, 4  ;;  %v13588_v57 = vld [vmem:[#allocation61_spill] sm:$0xff] }
0x183d   :  { %v8235_v23 = vsel %vm3685_vm4, %v8234_v39, 0 }
0x183e   :  { %v8261_v14 = vand.u32 4294901760, %v8235_v23 }
0x1840   :  { %v8262_v2 = vsub.f32 %v8235_v23, %v8261_v14  ;;  %8327 = vmatmul.f32.vlgmr.msrb.gmra.mxu1 %v8261_v14  ;;  %v13589_v23 = vld [vmem:[#allocation70_spill] sm:$0xff] }
0x1841   :  { %8663 = vmatpush.msrb.mxu1 %v11745_v11 }
0x1842   :  { %v8263_v32 = vand.u32 4294901760, %v8262_v2  ;;  %8365 = vmatmul.f32.vlgmr.msrb.gmra.mxu2 %v8262_v2 }
0x1843   :  { %8665 = vmatpush.msrb.mxu1 %v11747_v56  ;;  %8696 = vmatpush.msrb.mxu2 %v13584_v30 }
0x1844   :  { %v8264_v5 = vsub.f32 %v8262_v2, %v8263_v32  ;;  %8396 = vmatmul.f32.vlgmr.msrb.gmra.mxu3 %v8263_v32  ;;  %v13590_v2 = vld [vmem:[#allocation64_spill] sm:$0xff] }
0x1845   :  { %v8516_v43 = vpop.permute.xlu0 %8515  ;;  %8667 = vmatpush.msrb.mxu1 %v11752_v34  ;;  %8739 = vmatpush.msrb.mxu3 %v11745_v11 }
0x1846   :  { %v8265_v42 = vand.u32 4294901760, %v8264_v5  ;;  %v8518_v28 = vsel %vm428_vm3, %v8512_v29, %v8516_v43  ;;  %8700 = vmatpush.msrb.mxu2 %v13585_v36  ;;  %v13591_v5 = vld [vmem:[#allocation66_spill] sm:$0xff]  ;;  %v13592_v29 = vld [vmem:[#allocation77_spill] sm:$0xff] }
0x1847   :  { %v8520_v61 = vsel %vm3685_vm4, %v8518_v28, 0  ;;  %8669 = vmatpush.msrb.mxu1 %v13443_v62  ;;  %8741 = vmatpush.msrb.mxu3 %v11747_v56  ;;  %v13594_v28 = vld [vmem:[#allocation40_spill] sm:$0xff] }
0x1848   :  { %v8546_v25 = vand.u32 4294901760, %v8520_v61  ;;  %8266 = vmatmul.f32.vlgmr.msrb.gmra.mxu0 %v8265_v42  ;;  %8470 = vmatmul.f32.vlgmr.msra.gmra.mxu1 %v8261_v14  ;;  %v13593_v42 = vld [vmem:[#allocation71_spill] sm:$0xff] }
0x1849   :  { %8626 = vmatpush.msrb.mxu0 %v13586_v63  ;;  %8671 = vmatpush.msrb.mxu1 %v13446_v31 }
0x184a   :  { %v8547_v52 = vsub.f32 %v8520_v61, %v8546_v25  ;;  %8743 = vmatpush.msrb.mxu3 %v11752_v34  ;;  %8704 = vmatpush.msrb.mxu2 %v13587_v59  ;;  %v13595_v61 = vld [vmem:[#allocation74_spill] sm:$0xff] }
0x184b   :  { %8629 = vmatpush.msrb.mxu0 %v13588_v57  ;;  %8673 = vmatpush.msrb.mxu1 %v13537_v9 }
0x184c   :  { %v8548_v39 = vand.u32 4294901760, %v8547_v52  ;;  %8745 = vmatpush.msrb.mxu3 %v13443_v62  ;;  %8708 = vmatpush.msrb.mxu2 %v13589_v23 }
0x184d   :  { %8612 = vmatmul.f32.vlgmr.msra.gmra.mxu3 %v8546_v25  ;;  %8632 = vmatpush.msrb.mxu0 %v13590_v2 }
0x184e   :  { %v8549_v32 = vsub.f32 %v8547_v52, %v8548_v39  ;;  %8675 = vmatpush.msrb.mxu1 %v13538_v55  ;;  %8747 = vmatpush.msrb.mxu3 %v13446_v31 }
0x184f   :  { %8635 = vmatpush.msrb.mxu0 %v13591_v5  ;;  %8712 = vmatpush.msrb.mxu2 %v13592_v29  ;;  %v13598_v5 = vld [vmem:[#allocation46_spill] sm:$0xff] }
0x1850   :  { %v8550_v43 = vand.u32 4294901760, %v8549_v32  ;;  %8677 = vmatpush.msrb.mxu1 %v13581_v38  ;;  %8749 = vmatpush.msrb.mxu3 %v13537_v9  ;;  %v13597_v32 = vld [vmem:[#allocation78_spill] sm:$0xff] }
0x1851   :  { %8441 = vmatmul.f32.vlgmr.msra.gmra.mxu0 %v8261_v14  ;;  %8681 = vmatmul.f32.vlgmr.msrb.gmra.mxu1 %v8548_v39  ;;  %v13599_v14 = vld [vmem:[#allocation83_spill] sm:$0xff]  ;;  %v13600_v39 = vld [vmem:[#allocation81_spill] sm:$0xff] }
0x1852   :  { %8638 = vmatpush.msrb.mxu0 %v13593_v42  ;;  %8751 = vmatpush.msrb.mxu3 %v13538_v55  ;;  %v13603_v42 = vld [vmem:[#allocation48_spill] sm:$0xff] }
0x1853   :  { %8551 = vmatmul.f32.vlgmr.msra.gmra.mxu2 %v8550_v43  ;;  %8856 = vmatpush.msra.mxu1 %v13594_v28  ;;  %v13601_v43 = vld [vmem:[#allocation47_spill] sm:$0xff]  ;;  %v13602_v28 = vld [vmem:[#allocation84_spill] sm:$0xff] }
0x1854   :  { %8641 = vmatpush.msrb.mxu0 %v13595_v61  ;;  %8753 = vmatpush.msrb.mxu3 %v13581_v38  ;;  %v9767_v61 = vmul.f32 -1.442695, %v12791_v45  ;;  %v13606_v45 = vld [vmem:[#allocation55_spill] sm:$0xff] }
0x1855   :  { %8755 = vmatmul.f32.vlgmr.msrb.gmra.mxu3 %v8546_v25  ;;  %8716 = vmatpush.msrb.mxu2 %v13596_v20 }
0x1856   :  { %8644 = vmatpush.msrb.mxu0 %v13597_v32  ;;  %8862 = vmatpush.msra.mxu1 %v13598_v5  ;;  %v13604_v5 = vld [vmem:[#allocation53_spill] sm:$0xff]  ;;  %10016 = vpow2.f32 %v9767_v61 }
0x1857   :  { %8720 = vmatpush.msrb.mxu2 %v13599_v14  ;;  %8951 = vmatpush.msra.mxu3 %v11533_v35 }
0x1858   :  { %8647 = vmatpush.msrb.mxu0 %v13600_v39  ;;  %8868 = vmatpush.msra.mxu1 %v13601_v43 }
0x1859   :  { %8650 = vmatmul.f32.vlgmr.msrb.gmra.mxu0 %v8547_v52  ;;  %8724 = vmatpush.msrb.mxu2 %v13602_v28  ;;  %v13605_v52 = vld [vmem:[#allocation54_spill] sm:$0xff] }
0x185a   :  { %8874 = vmatpush.msra.mxu1 %v13603_v42  ;;  %8819 = vmatpush.msra.mxu0 %v11533_v35 }
0x185b   :  { %8726 = vmatmul.f32.vlgmr.msrb.gmra.mxu2 %v8546_v25  ;;  %8953 = vmatpush.msra.mxu3 %v11535_v50 }
0x185c   :  { %8880 = vmatpush.msra.mxu1 %v13604_v5  ;;  %8914 = vmatpush.msra.mxu2 %v13403_v37  ;;  %v13607_v37 = vld [vmem:[#allocation56_spill] sm:$0xff] }
0x185d   :  { %8821 = vmatpush.msra.mxu0 %v11535_v50  ;;  %8955 = vmatpush.msra.mxu3 %v11537_v16 }
0x185e   :  { %8886 = vmatpush.msra.mxu1 %v13605_v52  ;;  %8917 = vmatpush.msra.mxu2 %v13404_v27  ;;  %v10017_v27 = vpop.eup %10016 }
0x185f   :  { %8823 = vmatpush.msra.mxu0 %v11537_v16  ;;  %8957 = vmatpush.msra.mxu3 %v11539_v54 }
0x1860   :  { %8892 = vmatpush.msra.mxu1 %v13606_v45  ;;  %8920 = vmatpush.msra.mxu2 %v13405_v33  ;;  %v8187_v33 = vadd.f32 1.0, %v10017_v27 }
0x1861   :  { %8825 = vmatpush.msra.mxu0 %v11539_v54  ;;  %8959 = vmatpush.msra.mxu3 %v11579_v51 }
0x1862   :  { %8898 = vmatpush.msra.mxu1 %v13607_v37  ;;  %8923 = vmatpush.msra.mxu2 %v13406_v58  ;;  %10018 = vrcp.f32 %v8187_v33  ;;  %vm8193_vm13 = vweird.f32 %v8187_v33 }
0x1863   :  { %8827 = vmatpush.msra.mxu0 %v11579_v51  ;;  %8961 = vmatpush.msra.mxu3 %v11596_v18 }
0x1864   :  { %9027 = vmatpush.msrb.mxu1 %v11533_v35  ;;  %8926 = vmatpush.msra.mxu2 %v13408_v0 }
0x1865   :  { %8829 = vmatpush.msra.mxu0 %v11596_v18  ;;  %8963 = vmatpush.msra.mxu3 %v11598_v53 }
0x1866   :  { %9029 = vmatpush.msrb.mxu1 %v11535_v50  ;;  %8929 = vmatpush.msra.mxu2 %v13410_v47 }
0x1867   :  { %8831 = vmatpush.msra.mxu0 %v11598_v53  ;;  %8965 = vmatpush.msra.mxu3 %v11600_v7 }
0x1868   :  { %9031 = vmatpush.msrb.mxu1 %v11537_v16  ;;  %8932 = vmatpush.msra.mxu2 %v13412_v46  ;;  %v10019_v35 = vpop.eup %10018 }
0x1869   :  { %8833 = vmatpush.msra.mxu0 %v11600_v7  ;;  %9141 = vmatpush.msrb.mxu3 %v13407_v60  ;;  %v8189_v50 = vmul.f32 %v10019_v35, %v8187_v33  ;;  %vm8194_vm12 = vweird.f32 %v10019_v35 }
0x186a   :  { %9033 = vmatpush.msrb.mxu1 %v11539_v54  ;;  %8935 = vmatpush.msra.mxu2 %v13414_v44  ;;  %vm8195_vm14 = vmor %vm8193_vm13, %vm8194_vm12 }
0x186b   :  { %8984 = vmatpush.msrb.mxu0 %v11556_v13  ;;  %9147 = vmatpush.msrb.mxu3 %v13409_v17  ;;  %v8190_v16 = vsub.f32 1.0, %v8189_v50 }
0x186c   :  { %9035 = vmatpush.msrb.mxu1 %v11579_v51  ;;  %9104 = vmatpush.msrb.mxu2 %v11745_v11 }
0x186d   :  { %8988 = vmatpush.msrb.mxu0 %v11559_v12  ;;  %9153 = vmatpush.msrb.mxu3 %v13411_v26  ;;  %v8191_v54 = vmul.f32 %v10019_v35, %v8190_v16  ;;  %v8199_v12 = vand.u32 2147483648, %v8187_v33 }
0x186e   :  { %9037 = vmatpush.msrb.mxu1 %v11596_v18  ;;  %9106 = vmatpush.msrb.mxu2 %v11747_v56 }
0x186f   :  { %8992 = vmatpush.msrb.mxu0 %v11562_v21  ;;  %9159 = vmatpush.msrb.mxu3 %v13413_v1  ;;  %v8192_v13 = vadd.f32 %v10019_v35, %v8191_v54  ;;  %v8197_v21 = vand.u32 2147483647, %v8187_v33  ;;  %v8200_v51 = vor.u32 1.1754944e-38, %v8199_v12 }
0x1870   :  { %9039 = vmatpush.msrb.mxu1 %v11598_v53  ;;  %9108 = vmatpush.msrb.mxu2 %v11752_v34 }
0x1871   :  { %8996 = vmatpush.msrb.mxu0 %v11565_v19  ;;  %9165 = vmatpush.msrb.mxu3 %v11855_v40  ;;  %v8196_v19 = vsel %vm8195_vm14, %v10019_v35, %v8192_v13  ;;  %vm8198_vm15 = vcmp.eq.f32.partialorder %v8197_v21, 8.507059e+37  ;;  %v8205_v21 = vrot.slane %v12707_v49, 6 }
0x1872   :  { %9041 = vmatpush.msrb.mxu1 %v11600_v7  ;;  %9110 = vmatpush.msrb.mxu2 %v13443_v62  ;;  %v12896_v18 = vsel %vm8198_vm15, %v8200_v51, %v8196_v19 }
0x1873   :  { %9000 = vmatpush.msrb.mxu0 %v11603_v15  ;;  %9171 = vmatpush.msrb.mxu3 %v11864_v6  ;;  %v8207_v51 = vmul.f32 %v8205_v21, %v12896_v18 }
0x1874   :  { %9112 = vmatpush.msrb.mxu2 %v13446_v31 }
0x1875   :  { %9004 = vmatpush.msrb.mxu0 %v11619_v41  ;;  %9177 = vmatpush.msrb.mxu3 %v13444_v8 }
0x1876   :  { %9114 = vmatpush.msrb.mxu2 %v13537_v9 }
0x1877   :  { %9008 = vmatpush.msrb.mxu0 %v11622_v48  ;;  %9183 = vmatpush.msrb.mxu3 %v13447_v4  ;;  %v12903_v48 = vld [vmem:[%s13083_s11 + $0x1] ss:$0 sm:$0xff] }
0x1878   :  { %9116 = vmatpush.msrb.mxu2 %v13538_v55 }
0x1879   :  { %9012 = vmatpush.msrb.mxu0 %v11625_v10 }
0x187a   :  { %9118 = vmatpush.msrb.mxu2 %v13581_v38 }
0x1885   :  { %v8210_v53 = vpop.permute.xlu2 %8209 }
0x1886   :  { %v8212_v7 = vmul.f32 %v8210_v53, %v12896_v18 }
0x1888   :  { %8214 = vrot.lane.b32.xlu2 %v8212_v7, %s10253_s4 }
0x18bd   :  { %v8328_v41 = vpop.f32.mrf.mxu1 }
0x18c5   :  { %v8267_v15 = vpop.f32.mrf.mxu0  ;;  %v8366_v0 = vpop.f32.mrf.mxu2 }
0x18c6   :  { %v8268_v10 = vadd.f32 %v12903_v48, %v8267_v15  ;;  %v8471_v61 = vpop.f32.mrf.mxu1 }
0x18c7   :  { %v8397_v46 = vpop.f32.mrf.mxu3 }
0x18c8   :  { %v8329_v58 = vadd.f32 %v8328_v41, %v8268_v10 }
0x18ca   :  { %v8367_v47 = vadd.f32 %v8366_v0, %v8329_v58 }
0x18cc   :  { %v8398_v44 = vadd.f32 %v8397_v46, %v8367_v47 }
0x18ce   :  { %v8442_v25 = vpop.f32.mrf.mxu0  ;;  %v8682_v50 = vpop.f32.mrf.mxu1 }
0x18cf   :  { %v8443_v42 = vadd.f32 %v8442_v25, %v8398_v44 }
0x18d0   :  { %v8613_v5 = vpop.f32.mrf.mxu3 }
0x18d1   :  { %v8472_v43 = vadd.f32 %v8471_v61, %v8443_v42 }
0x18d3   :  { %10020 = vtanh.f32 %v8472_v43  ;;  %v9768_v41 = vmul.f32 -1.442695, %v8472_v43 }
0x18d6   :  { %v8552_v52 = vpop.f32.mrf.mxu2  ;;  %v8651_v33 = vpop.f32.mrf.mxu0 }
0x18d7   :  { %v8553_v45 = vadd.f32 %v12700_v24, %v8552_v52 }
0x18d8   :  { %v8756_v12 = vpop.f32.mrf.mxu3 }
0x18d9   :  { %v10021_v37 = vpop.eup %10020  ;;  %v8614_v27 = vadd.f32 %v8613_v5, %v8553_v45 }
0x18da   :  { %8496 = vrot.lane.b32.xlu1 %v10021_v37, %s10252_s1 }
0x18db   :  { %v8652_v35 = vadd.f32 %v8651_v33, %v8614_v27 }
0x18dd   :  { %v8683_v16 = vadd.f32 %v8682_v50, %v8652_v35 }
0x18de   :  { %v8727_v54 = vpop.f32.mrf.mxu2 }
0x18df   :  { %v8728_v13 = vadd.f32 %v8727_v54, %v8683_v16 }
0x18e1   :  { %v8757_v19 = vadd.f32 %v8756_v12, %v8728_v13 }
0x18e2   :  { %v8215_v53 = vpop.permute.xlu2 %8214 }
0x18e3   :  { %10022 = vtanh.f32 %v8757_v19  ;;  %v8217_v7 = vadd.f32 %v8215_v53, %v8207_v51  ;;  %v9769_v0 = vmul.f32 -1.442695, %v8757_v19 }
0x18e5   :  { %10024 = vtanh.f32 %v8217_v7 }
0x18e6   :  { %10026 = vpow2.f32 %v9768_v41 }
0x18e9   :  { %v10023_v24 = vpop.eup %10022 }
0x18ea   :  { %8781 = vrot.lane.b32.xlu0 %v10023_v24, %s10252_s1 }
0x18eb   :  { %v10025_v15 = vpop.eup %10024 }
0x18ec   :  { %8220 = vrot.lane.b32.xlu2 %v10025_v15, %s10252_s1  ;;  %v10027_v10 = vpop.eup %10026 }
0x18ed   :  { %v8477_v58 = vadd.f32 1.0, %v10027_v10 }
0x18ef   :  { %10028 = vrcp.f32 %v8477_v58  ;;  %v8489_v52 = vand.u32 2147483648, %v8477_v58  ;;  %vm8483_vm0 = vweird.f32 %v8477_v58  ;;  %v8487_v45 = vand.u32 2147483647, %v8477_v58 }
0x18f0   :  { %10030 = vpow2.f32 %v9769_v0 }
0x18f1   :  { %v8490_v27 = vor.u32 1.1754944e-38, %v8489_v52  ;;  %vm8488_vm2 = vcmp.eq.f32.partialorder %v8487_v45, 8.507059e+37 }
0x18f5   :  { %v10029_v49 = vpop.eup %10028 }
0x18f6   :  { %v10031_v47 = vpop.eup %10030  ;;  %v8479_v46 = vmul.f32 %v10029_v49, %v8477_v58  ;;  %vm8484_vm8 = vweird.f32 %v10029_v49 }
0x18f7   :  { %v8762_v44 = vadd.f32 1.0, %v10031_v47  ;;  %vm8485_vm1 = vmor %vm8483_vm0, %vm8484_vm8 }
0x18f8   :  { %v8480_v25 = vsub.f32 1.0, %v8479_v46 }
0x18f9   :  { %10032 = vrcp.f32 %v8762_v44  ;;  %v8774_v12 = vand.u32 2147483648, %v8762_v44  ;;  %vm8768_vm6 = vweird.f32 %v8762_v44  ;;  %v8772_v21 = vand.u32 2147483647, %v8762_v44 }
0x18fa   :  { %v8481_v42 = vmul.f32 %v10029_v49, %v8480_v25 }
0x18fb   :  { %v8775_v51 = vor.u32 1.1754944e-38, %v8774_v12  ;;  %vm8773_vm12 = vcmp.eq.f32.partialorder %v8772_v21, 8.507059e+37  ;;  %v13610_v12 = vld [vmem:[#allocation74_spill] sm:$0xff] }
0x18fc   :  { %v8482_v61 = vadd.f32 %v10029_v49, %v8481_v42 }
0x18fe   :  { %v8486_v43 = vsel %vm8485_vm1, %v10029_v49, %v8482_v61 }
0x18ff   :  { %v10033_v5 = vpop.eup %10032  ;;  %v8491_v35 = vsel %vm8488_vm2, %v8490_v27, %v8486_v43 }
0x1900   :  { %v8764_v37 = vmul.f32 %v10033_v5, %v8762_v44  ;;  %vm8769_vm5 = vweird.f32 %v10033_v5  ;;  %v8494_v15 = vmul.f32 %v8491_v35, %v12722_v22 }
0x1901   :  { %vm8770_vm11 = vmor %vm8768_vm6, %vm8769_vm5 }
0x1902   :  { %v8765_v16 = vsub.f32 1.0, %v8764_v37 }
0x1904   :  { %v8766_v54 = vmul.f32 %v10033_v5, %v8765_v16 }
0x1906   :  { %v8767_v13 = vadd.f32 %v10033_v5, %v8766_v54  ;;  %v13608_v54 = vld [vmem:[#allocation66_spill] sm:$0xff] }
0x1908   :  { %v8771_v19 = vsel %vm8770_vm11, %v10033_v5, %v8767_v13  ;;  %v13609_v13 = vld [vmem:[#allocation71_spill] sm:$0xff] }
0x1909   :  { %v8776_v7 = vsel %vm8773_vm12, %v8775_v51, %v8771_v19 }
0x190a   :  { %v8779_v49 = vmul.f32 %v8776_v7, %v12728_v3 }
0x1946   :  { %v8221_v0 = vpop.permute.xlu2 %8220 }
0x1947   :  { %v8223_v47 = vmul.f32 %v8221_v0, %v12896_v18 }
0x194c   :  { %v8497_v33 = vpop.permute.xlu1 %8496 }
0x194d   :  { %v8499_v50 = vmul.f32 %v8497_v33, %v8491_v35 }
0x194f   :  { %8501 = vrot.lane.b32.xlu1 %v8499_v50, %s10253_s4 }
0x195c   :  { %v8782_v53 = vpop.permute.xlu0 %8781 }
0x195d   :  { %v8784_v24 = vmul.f32 %v8782_v53, %v8776_v7 }
0x195f   :  { %8786 = vrot.lane.b32.xlu0 %v8784_v24, %s10253_s4 }
0x19c1   :  { %v8502_v41 = vpop.permute.xlu1 %8501 }
0x19c2   :  { %v12915_v10 = vadd.f32 %v8502_v41, %v8494_v15 }
0x19c4   :  { %10034 = vtanh.f32 %v12915_v10 }
0x19ca   :  { %v10035_v58 = vpop.eup %10034 }
0x19cb   :  { %8507 = vrot.lane.b32.xlu1 %v10035_v58, %s10252_s1 }
0x19d1   :  { %v8787_v46 = vpop.permute.xlu0 %8786 }
0x19d2   :  { %v12921_v44 = vadd.f32 %v8787_v46, %v8779_v49 }
0x19d3   :  { %8797 = vrot.lane.b32.xlu1 %v8223_v47, %s10253_s4 }
0x19d4   :  { %10036 = vtanh.f32 %v12921_v44 }
0x19da   :  { %v10037_v22 = vpop.eup %10036 }
0x19db   :  { %8792 = vrot.lane.b32.xlu0 %v10037_v22, %s10252_s1 }
0x1a3d   :  { %v8508_v25 = vpop.permute.xlu1 %8507 }
0x1a3e   :  { %v8510_v42 = vmul.f32 %v8508_v25, %v8491_v35 }
0x1a40   :  { %v8801_v61 = vrot.slane %v8510_v42, 2  ;;  %9084 = vrot.lane.b32.xlu0 %v8510_v42, %s10253_s4 }
0x1a42   :  { %8802 = vrot.lane.b32.xlu2 %v8801_v61, %s10252_s1 }
0x1a45   :  { %v8798_v18 = vpop.permute.xlu1 %8797 }
0x1a4d   :  { %v8793_v3 = vpop.permute.xlu0 %8792 }
0x1a4e   :  { %v12928_v5 = vmul.f32 %v8793_v3, %v8776_v7 }
0x1a50   :  { %9088 = vrot.lane.b32.xlu1 %v12928_v5, %s10252_s1 }
0x1a9c   :  { %v8803_v52 = vpop.permute.xlu2 %8802 }
0x1a9d   :  { %v8805_v45 = vsel %vm428_vm3, %v8798_v18, %v8803_v52 }
0x1a9e   :  { %v8807_v43 = vrot.slane %v8805_v45, 6 }
0x1aa0   :  { %v8808_v37 = vsel %vm3685_vm4, %v8807_v43, 0 }
0x1aa1   :  { %v8834_v27 = vand.u32 4294901760, %v8808_v37 }
0x1aa3   :  { %v8835_v33 = vsub.f32 %v8808_v37, %v8834_v27  ;;  %8900 = vmatmul.f32.vlgmr.msra.gmra.mxu1 %v8834_v27 }
0x1aa4   :  { %9236 = vmatpush.msra.mxu1 %v11745_v11 }
0x1aa5   :  { %v8836_v35 = vand.u32 4294901760, %v8835_v33  ;;  %8938 = vmatmul.f32.vlgmr.msra.gmra.mxu2 %v8835_v33 }
0x1aa6   :  { %9238 = vmatpush.msra.mxu1 %v11747_v56  ;;  %9269 = vmatpush.msra.mxu2 %v13584_v30 }
0x1aa7   :  { %v8837_v50 = vsub.f32 %v8835_v33, %v8836_v35  ;;  %8969 = vmatmul.f32.vlgmr.msra.gmra.mxu3 %v8836_v35 }
0x1aa8   :  { %9240 = vmatpush.msra.mxu1 %v11752_v34  ;;  %9312 = vmatpush.msra.mxu3 %v11745_v11 }
0x1aa9   :  { %v8838_v16 = vand.u32 4294901760, %v8837_v50  ;;  %9273 = vmatpush.msra.mxu2 %v13585_v36 }
0x1aaa   :  { %9242 = vmatpush.msra.mxu1 %v13443_v62  ;;  %9314 = vmatpush.msra.mxu3 %v11747_v56 }
0x1aab   :  { %8839 = vmatmul.f32.vlgmr.msra.gmra.mxu0 %v8838_v16  ;;  %9043 = vmatmul.f32.vlgmr.msrb.gmra.mxu1 %v8834_v27 }
0x1aac   :  { %9199 = vmatpush.msra.mxu0 %v13586_v63  ;;  %9244 = vmatpush.msra.mxu1 %v13446_v31 }
0x1aad   :  { %9316 = vmatpush.msra.mxu3 %v11752_v34  ;;  %9277 = vmatpush.msra.mxu2 %v13587_v59 }
0x1aae   :  { %9202 = vmatpush.msra.mxu0 %v13588_v57  ;;  %9246 = vmatpush.msra.mxu1 %v13537_v9 }
0x1aaf   :  { %9318 = vmatpush.msra.mxu3 %v13443_v62  ;;  %9281 = vmatpush.msra.mxu2 %v13589_v23 }
0x1ab0   :  { %9205 = vmatpush.msra.mxu0 %v13590_v2  ;;  %9248 = vmatpush.msra.mxu1 %v13538_v55 }
0x1ab1   :  { %9320 = vmatpush.msra.mxu3 %v13446_v31  ;;  %9285 = vmatpush.msra.mxu2 %v13592_v29 }
0x1ab2   :  { %9208 = vmatpush.msra.mxu0 %v13608_v54  ;;  %9250 = vmatpush.msra.mxu1 %v13581_v38 }
0x1ab3   :  { %9014 = vmatmul.f32.vlgmr.msrb.gmra.mxu0 %v8834_v27  ;;  %9322 = vmatpush.msra.mxu3 %v13537_v9 }
0x1ab4   :  { %9211 = vmatpush.msra.mxu0 %v13609_v13  ;;  %9289 = vmatpush.msra.mxu2 %v13596_v20 }
0x1ab5   :  { %9324 = vmatpush.msra.mxu3 %v13538_v55  ;;  %9427 = vmatpush.msrb.mxu1 %v13407_v60  ;;  %v9085_v60 = vpop.permute.xlu0 %9084 }
0x1ab6   :  { %9214 = vmatpush.msra.mxu0 %v13610_v12  ;;  %9293 = vmatpush.msra.mxu2 %v13599_v14 }
0x1ab7   :  { %9326 = vmatpush.msra.mxu3 %v13581_v38  ;;  %9433 = vmatpush.msrb.mxu1 %v13409_v17 }
0x1ab8   :  { %9217 = vmatpush.msra.mxu0 %v13597_v32  ;;  %9297 = vmatpush.msra.mxu2 %v13602_v28 }
0x1ab9   :  { %9439 = vmatpush.msrb.mxu1 %v13411_v26 }
0x1aba   :  { %9220 = vmatpush.msra.mxu0 %v13600_v39 }
0x1abb   :  { %9445 = vmatpush.msrb.mxu1 %v13413_v1 }
0x1abc   :  { %9390 = vmatpush.msrb.mxu0 %v11745_v11 }
0x1abd   :  { %9451 = vmatpush.msrb.mxu1 %v11855_v40 }
0x1abe   :  { %9392 = vmatpush.msrb.mxu0 %v11747_v56 }
0x1abf   :  { %9457 = vmatpush.msrb.mxu1 %v11864_v6 }
0x1ac0   :  { %9394 = vmatpush.msrb.mxu0 %v11752_v34 }
0x1ac1   :  { %9463 = vmatpush.msrb.mxu1 %v13444_v8 }
0x1ac2   :  { %9396 = vmatpush.msrb.mxu0 %v13443_v62  ;;  %v9089_v17 = vpop.permute.xlu1 %9088 }
0x1ac3   :  { %v9091_v26 = vsel %vm428_vm3, %v9085_v60, %v9089_v17  ;;  %9469 = vmatpush.msrb.mxu1 %v13447_v4 }
0x1ac4   :  { %9398 = vmatpush.msrb.mxu0 %v13446_v31  ;;  %v9093_v40 = vsel %vm3685_vm4, %v9091_v26, 0 }
0x1ac5   :  { %v9119_v1 = vand.u32 4294901760, %v9093_v40 }
0x1ac6   :  { %9400 = vmatpush.msrb.mxu0 %v13537_v9 }
0x1ac7   :  { %v9120_v6 = vsub.f32 %v9093_v40, %v9119_v1  ;;  %9185 = vmatmul.f32.vlgmr.msrb.gmra.mxu3 %v9119_v1 }
0x1ac8   :  { %9402 = vmatpush.msrb.mxu0 %v13538_v55  ;;  %9522 = vmatpush.msrb.mxu3 %v11745_v11 }
0x1ac9   :  { %v9121_v8 = vand.u32 4294901760, %v9120_v6  ;;  %9223 = vmatmul.f32.vlgmr.msra.gmra.mxu0 %v9120_v6 }
0x1aca   :  { %9524 = vmatpush.msrb.mxu3 %v11747_v56  ;;  %9404 = vmatpush.msrb.mxu0 %v13581_v38 }
0x1acb   :  { %v9122_v4 = vsub.f32 %v9120_v6, %v9121_v8  ;;  %9254 = vmatmul.f32.vlgmr.msra.gmra.mxu1 %v9121_v8 }
0x1acc   :  { %9555 = vmatpush.msra.mxu0 %v13584_v30  ;;  %9526 = vmatpush.msrb.mxu3 %v11752_v34 }
0x1acd   :  { %9598 = vmatpush.msra.mxu1 %v11745_v11  ;;  %v9123_v21 = vand.u32 4294901760, %v9122_v4 }
0x1ace   :  { %9559 = vmatpush.msra.mxu0 %v13585_v36  ;;  %9528 = vmatpush.msrb.mxu3 %v13443_v62 }
0x1acf   :  { %9600 = vmatpush.msra.mxu1 %v11747_v56  ;;  %9124 = vmatmul.f32.vlgmr.msrb.gmra.mxu2 %v9123_v21 }
0x1ad0   :  { %9328 = vmatmul.f32.vlgmr.msra.gmra.mxu3 %v9119_v1  ;;  %9485 = vmatpush.msrb.mxu2 %v13586_v63 }
0x1ad1   :  { %9530 = vmatpush.msrb.mxu3 %v13446_v31  ;;  %9602 = vmatpush.msra.mxu1 %v11752_v34 }
0x1ad2   :  { %9563 = vmatpush.msra.mxu0 %v13587_v59  ;;  %9488 = vmatpush.msrb.mxu2 %v13588_v57 }
0x1ad3   :  { %9532 = vmatpush.msrb.mxu3 %v13537_v9  ;;  %9604 = vmatpush.msra.mxu1 %v13443_v62 }
0x1ad4   :  { %9567 = vmatpush.msra.mxu0 %v13589_v23  ;;  %9491 = vmatpush.msrb.mxu2 %v13590_v2  ;;  %v13021_v2 = vld [vmem:[%s13083_s11 + $0x2] ss:$0 sm:$0xff] }
0x1ad5   :  { %9534 = vmatpush.msrb.mxu3 %v13538_v55  ;;  %9606 = vmatpush.msra.mxu1 %v13446_v31 }
0x1ad6   :  { %9571 = vmatpush.msra.mxu0 %v13592_v29  ;;  %9494 = vmatpush.msrb.mxu2 %v13608_v54 }
0x1ad7   :  { %9536 = vmatpush.msrb.mxu3 %v13581_v38  ;;  %9299 = vmatmul.f32.vlgmr.msra.gmra.mxu2 %v9119_v1 }
0x1ad8   :  { %9608 = vmatpush.msra.mxu1 %v13537_v9  ;;  %9497 = vmatpush.msrb.mxu2 %v13609_v13 }
0x1ad9   :  { %9575 = vmatpush.msra.mxu0 %v13596_v20 }
0x1ada   :  { %9610 = vmatpush.msra.mxu1 %v13538_v55  ;;  %9500 = vmatpush.msrb.mxu2 %v13610_v12 }
0x1adb   :  { %9579 = vmatpush.msra.mxu0 %v13599_v14 }
0x1adc   :  { %9612 = vmatpush.msra.mxu1 %v13581_v38  ;;  %9503 = vmatpush.msrb.mxu2 %v13597_v32 }
0x1add   :  { %9583 = vmatpush.msra.mxu0 %v13602_v28 }
0x1ade   :  { %9506 = vmatpush.msrb.mxu2 %v13600_v39 }
0x1b20   :  { %v8901_v11 = vpop.f32.mrf.mxu1 }
0x1b28   :  { %v8840_v56 = vpop.f32.mrf.mxu0  ;;  %v8939_v31 = vpop.f32.mrf.mxu2 }
0x1b29   :  { %v8841_v34 = vadd.f32 %v12903_v48, %v8840_v56  ;;  %v9044_v63 = vpop.f32.mrf.mxu1 }
0x1b2a   :  { %v8970_v55 = vpop.f32.mrf.mxu3 }
0x1b2b   :  { %v8902_v62 = vadd.f32 %v8901_v11, %v8841_v34 }
0x1b2d   :  { %v8940_v9 = vadd.f32 %v8939_v31, %v8902_v62 }
0x1b2f   :  { %v8971_v20 = vadd.f32 %v8970_v55, %v8940_v9 }
0x1b30   :  { %v9015_v30 = vpop.f32.mrf.mxu0 }
0x1b31   :  { %v9016_v36 = vadd.f32 %v9015_v30, %v8971_v20 }
0x1b33   :  { %v9045_v59 = vadd.f32 %v9044_v63, %v9016_v36 }
0x1b35   :  { %10038 = vtanh.f32 %v9045_v59  ;;  %v9770_v15 = vmul.f32 -1.442695, %v9045_v59 }
0x1b3b   :  { %v10039_v38 = vpop.eup %10038 }
0x1b3c   :  { %9069 = vrot.lane.b32.xlu2 %v10039_v38, %s10252_s1 }
0x1b46   :  { %v9224_v14 = vpop.f32.mrf.mxu0 }
0x1b48   :  { %v9255_v28 = vpop.f32.mrf.mxu1 }
0x1b4a   :  { %v9186_v57 = vpop.f32.mrf.mxu3 }
0x1b52   :  { %v9125_v23 = vpop.f32.mrf.mxu2 }
0x1b53   :  { %v9126_v29 = vadd.f32 %v13021_v2, %v9125_v23  ;;  %v9329_v53 = vpop.f32.mrf.mxu3 }
0x1b55   :  { %v9187_v32 = vadd.f32 %v9186_v57, %v9126_v29 }
0x1b57   :  { %v9225_v39 = vadd.f32 %v9224_v14, %v9187_v32 }
0x1b59   :  { %v9256_v48 = vadd.f32 %v9255_v28, %v9225_v39 }
0x1b5a   :  { %v9300_v19 = vpop.f32.mrf.mxu2 }
0x1b5b   :  { %v9301_v51 = vadd.f32 %v9300_v19, %v9256_v48 }
0x1b5d   :  { %v9330_v7 = vadd.f32 %v9329_v53, %v9301_v51 }
0x1b5f   :  { %10040 = vtanh.f32 %v9330_v7  ;;  %v9771_v43 = vmul.f32 -1.442695, %v9330_v7 }
0x1b60   :  { %10042 = vpow2.f32 %v9770_v15 }
0x1b65   :  { %v10041_v24 = vpop.eup %10040 }
0x1b66   :  { %9354 = vrot.lane.b32.xlu0 %v10041_v24, %s10252_s1  ;;  %v10043_v41 = vpop.eup %10042 }
0x1b67   :  { %v9050_v58 = vadd.f32 1.0, %v10043_v41 }
0x1b69   :  { %10044 = vrcp.f32 %v9050_v58  ;;  %v9062_v25 = vand.u32 2147483648, %v9050_v58  ;;  %vm9056_vm14 = vweird.f32 %v9050_v58  ;;  %v9060_v42 = vand.u32 2147483647, %v9050_v58 }
0x1b6a   :  { %10046 = vpow2.f32 %v9771_v43 }
0x1b6b   :  { %v9063_v3 = vor.u32 1.1754944e-38, %v9062_v25  ;;  %vm9061_vm8 = vcmp.eq.f32.partialorder %v9060_v42, 8.507059e+37 }
0x1b6f   :  { %v10045_v0 = vpop.eup %10044 }
0x1b70   :  { %v9052_v49 = vmul.f32 %v10045_v0, %v9050_v58  ;;  %vm9057_vm13 = vweird.f32 %v10045_v0  ;;  %v10047_v37 = vpop.eup %10046 }
0x1b71   :  { %vm9058_vm15 = vmor %vm9056_vm14, %vm9057_vm13  ;;  %v9335_v27 = vadd.f32 1.0, %v10047_v37 }
0x1b72   :  { %v9053_v47 = vsub.f32 1.0, %v9052_v49 }
0x1b73   :  { %10048 = vrcp.f32 %v9335_v27  ;;  %v9347_v13 = vand.u32 2147483648, %v9335_v27  ;;  %vm9341_vm1 = vweird.f32 %v9335_v27  ;;  %v9345_v12 = vand.u32 2147483647, %v9335_v27 }
0x1b74   :  { %v9054_v46 = vmul.f32 %v10045_v0, %v9053_v47 }
0x1b75   :  { %v9348_v17 = vor.u32 1.1754944e-38, %v9347_v13  ;;  %vm9346_vm5 = vcmp.eq.f32.partialorder %v9345_v12, 8.507059e+37 }
0x1b76   :  { %v9055_v22 = vadd.f32 %v10045_v0, %v9054_v46  ;;  %v13612_v46 = vld [vmem:[#allocation23_spill] sm:$0xff] }
0x1b78   :  { %v9059_v61 = vsel %vm9058_vm15, %v10045_v0, %v9055_v22  ;;  %v9677_v22 = vmul.f32 %v13612_v46, %v13612_v46 }
0x1b79   :  { %v9064_v52 = vsel %vm9061_vm8, %v9063_v3, %v9059_v61  ;;  %v10049_v33 = vpop.eup %10048 }
0x1b7a   :  { %v9337_v35 = vmul.f32 %v10049_v33, %v9335_v27  ;;  %vm9342_vm0 = vweird.f32 %v10049_v33  ;;  %v9067_v6 = vmul.f32 %v9064_v52, %v12915_v10  ;;  %v9661_v10 = vrot.slane %v12928_v5, 6 }
0x1b7b   :  { %vm9343_vm2 = vmor %vm9341_vm1, %vm9342_vm0 }
0x1b7c   :  { %v9338_v50 = vsub.f32 1.0, %v9337_v35 }
0x1b7e   :  { %v9339_v16 = vmul.f32 %v10049_v33, %v9338_v50 }
0x1b80   :  { %v9340_v54 = vadd.f32 %v10049_v33, %v9339_v16 }
0x1b82   :  { %v9344_v60 = vsel %vm9343_vm2, %v10049_v33, %v9340_v54 }
0x1b83   :  { %v9349_v40 = vsel %vm9346_vm5, %v9348_v17, %v9344_v60 }
0x1b84   :  { %v9352_v11 = vmul.f32 %v9349_v40, %v12921_v44  ;;  %v13611_v44 = vld [vmem:[#allocation22_spill] sm:$0xff] }
0x1b85   :  { %v9674_v36 = vsel %vm9668_vm7, %v13611_v44, %v9661_v10 }
0x1b96   :  { %v9070_v18 = vpop.permute.xlu2 %9069 }
0x1b97   :  { %v9072_v45 = vmul.f32 %v9070_v18, %v9064_v52 }
0x1b99   :  { %9074 = vrot.lane.b32.xlu1 %v9072_v45, %s10253_s4 }
0x1bd8   :  { %v9355_v26 = vpop.permute.xlu0 %9354 }
0x1bd9   :  { %v9357_v1 = vmul.f32 %v9355_v26, %v9349_v40 }
0x1bdb   :  { %9359 = vrot.lane.b32.xlu2 %v9357_v1, %s10253_s4 }
0x1c0b   :  { %v9075_v8 = vpop.permute.xlu1 %9074 }
0x1c0c   :  { %v9077_v4 = vadd.f32 %v9075_v8, %v9067_v6 }
0x1c0e   :  { %10050 = vtanh.f32 %v9077_v4 }
0x1c14   :  { %v10051_v21 = vpop.eup %10050 }
0x1c15   :  { %9080 = vrot.lane.b32.xlu0 %v10051_v21, %s10252_s1 }
0x1c35   :  { %v9360_v56 = vpop.permute.xlu2 %9359 }
0x1c36   :  { %v13030_v34 = vadd.f32 %v9360_v56, %v9352_v11 }
0x1c38   :  { %10052 = vtanh.f32 %v13030_v34 }
0x1c3e   :  { %v10053_v62 = vpop.eup %10052 }
0x1c3f   :  { %9365 = vrot.lane.b32.xlu1 %v10053_v62, %s10252_s1 }
0x1c87   :  { %v9081_v31 = vpop.permute.xlu0 %9080 }
0x1c88   :  { %v9083_v9 = vmul.f32 %v9081_v31, %v9064_v52 }
0x1c8a   :  { %9370 = vrot.lane.b32.xlu2 %v9083_v9, %s10253_s4 }
0x1cb1   :  { %v9366_v55 = vpop.permute.xlu1 %9365 }
0x1cb2   :  { %v9368_v20 = vmul.f32 %v9366_v55, %v9349_v40 }
0x1cb4   :  { %v9663_v30 = vrot.slane %v9368_v20, 4  ;;  %9374 = vrot.lane.b32.xlu0 %v9368_v20, %s10252_s1 }
0x1cb6   :  { %v13040_v63 = vsel %vm9670_vm9, %v9674_v36, %v9663_v30 }
0x1ce4   :  { %v9371_v59 = vpop.permute.xlu2 %9370 }
0x1d26   :  { %v9375_v38 = vpop.permute.xlu0 %9374 }
0x1d27   :  { %v9377_v57 = vsel %vm428_vm3, %v9371_v59, %v9375_v38 }
0x1d28   :  { %v9379_v23 = vsel %vm3685_vm4, %v9377_v57, 0 }
0x1d29   :  { %v9405_v29 = vand.u32 4294901760, %v9379_v23 }
0x1d2b   :  { %v9406_v32 = vsub.f32 %v9379_v23, %v9405_v29  ;;  %9471 = vmatmul.f32.vlgmr.msrb.gmra.mxu1 %v9405_v29 }
0x1d2d   :  { %v9407_v5 = vand.u32 4294901760, %v9406_v32  ;;  %9509 = vmatmul.f32.vlgmr.msrb.gmra.mxu2 %v9406_v32 }
0x1d2f   :  { %v9408_v14 = vsub.f32 %v9406_v32, %v9407_v5  ;;  %9540 = vmatmul.f32.vlgmr.msrb.gmra.mxu3 %v9407_v5 }
0x1d31   :  { %v9409_v39 = vand.u32 4294901760, %v9408_v14 }
0x1d33   :  { %9410 = vmatmul.f32.vlgmr.msrb.gmra.mxu0 %v9409_v39  ;;  %9614 = vmatmul.f32.vlgmr.msra.gmra.mxu1 %v9405_v29 }
0x1d3b   :  { %9585 = vmatmul.f32.vlgmr.msra.gmra.mxu0 %v9405_v29 }
0x1da8   :  { %v9472_v28 = vpop.f32.mrf.mxu1 }
0x1db0   :  { %v9411_v48 = vpop.f32.mrf.mxu0  ;;  %v9510_v53 = vpop.f32.mrf.mxu2 }
0x1db1   :  { %v9412_v19 = vadd.f32 %v13021_v2, %v9411_v48  ;;  %v9615_v0 = vpop.f32.mrf.mxu1 }
0x1db2   :  { %v9541_v24 = vpop.f32.mrf.mxu3 }
0x1db3   :  { %v9473_v51 = vadd.f32 %v9472_v28, %v9412_v19 }
0x1db5   :  { %v9511_v7 = vadd.f32 %v9510_v53, %v9473_v51  ;;  %v13614_v53 = vld [vmem:[#allocation18_spill] sm:$0xff] }
0x1db7   :  { %v9542_v15 = vadd.f32 %v9541_v24, %v9511_v7 }
0x1db8   :  { %v9586_v41 = vpop.f32.mrf.mxu0 }
0x1db9   :  { %v9587_v58 = vadd.f32 %v9586_v41, %v9542_v15 }
0x1dbb   :  { %v9616_v49 = vadd.f32 %v9615_v0, %v9587_v58 }
0x1dbd   :  { %10054 = vtanh.f32 %v9616_v49  ;;  %v9772_v25 = vmul.f32 -1.442695, %v9616_v49 }
0x1dbf   :  { %10056 = vpow2.f32 %v9772_v25 }
0x1dc3   :  { %v10055_v47 = vpop.eup %10054 }
0x1dc4   :  { %9640 = vrot.lane.b32.xlu1 %v10055_v47, %s10252_s1 }
0x1dc5   :  { %v10057_v2 = vpop.eup %10056 }
0x1dc6   :  { %v9621_v42 = vadd.f32 1.0, %v10057_v2 }
0x1dc8   :  { %10058 = vrcp.f32 %v9621_v42  ;;  %v9633_v43 = vand.u32 2147483648, %v9621_v42  ;;  %vm9627_vm9 = vweird.f32 %v9621_v42  ;;  %v9631_v37 = vand.u32 2147483647, %v9621_v42 }
0x1dca   :  { %v9634_v33 = vor.u32 1.1754944e-38, %v9633_v43  ;;  %vm9632_vm11 = vcmp.eq.f32.partialorder %v9631_v37, 8.507059e+37 }
0x1dcc   :  { %9681 = vrot.lane.b32.xlu1 %v9677_v22, %s10253_s4 }
0x1dce   :  { %v10059_v61 = vpop.eup %10058 }
0x1dcf   :  { %v9623_v3 = vmul.f32 %v10059_v61, %v9621_v42  ;;  %vm9628_vm7 = vweird.f32 %v10059_v61 }
0x1dd0   :  { %vm9629_vm6 = vmor %vm9627_vm9, %vm9628_vm7 }
0x1dd1   :  { %v9624_v18 = vsub.f32 1.0, %v9623_v3 }
0x1dd3   :  { %v9625_v52 = vmul.f32 %v10059_v61, %v9624_v18 }
0x1dd5   :  { %v9626_v45 = vadd.f32 %v10059_v61, %v9625_v52 }
0x1dd7   :  { %v9630_v27 = vsel %vm9629_vm6, %v10059_v61, %v9626_v45 }
0x1dd8   :  { %v9635_v50 = vsel %vm9632_vm11, %v9634_v33, %v9630_v27 }
0x1dd9   :  { %v9638_v54 = vmul.f32 %v9635_v50, %v13030_v34 }
0x1e36   :  { %v9641_v35 = vpop.permute.xlu1 %9640 }
0x1e37   :  { %v9643_v16 = vmul.f32 %v9641_v35, %v9635_v50 }
0x1e39   :  { %9645 = vrot.lane.b32.xlu2 %v9643_v16, %s10253_s4 }
0x1e3e   :  { %v9682_v17 = vpop.permute.xlu1 %9681 }
0x1e3f   :  { %v9687_v26 = vsel %vm428_vm3, %v9682_v17, 0.0 }
0x1e93   :  { %v9646_v13 = vpop.permute.xlu2 %9645 }
0x1e94   :  { %v9648_v12 = vadd.f32 %v9646_v13, %v9638_v54 }
0x1e96   :  { %10060 = vtanh.f32 %v9648_v12 }
0x1e9c   :  { %v10061_v60 = vpop.eup %10060 }
0x1e9d   :  { %9651 = vrot.lane.b32.xlu0 %v10061_v60, %s10252_s1 }
0x1ec7   :  { %9688 = vadd.xlane.f32.xlu0 %v9687_v26 }
0x1f0f   :  { %v9652_v40 = vpop.permute.xlu0 %9651 }
0x1f10   :  { %v9654_v1 = vmul.f32 %v9652_v40, %v9635_v50 }
0x1f12   :  { %v9666_v6 = vrot.slane %v9654_v1, 2 }
0x1f14   :  { %v9676_v8 = vsel %vm9672_vm10, %v13040_v63, %v9666_v6  ;;  %v13613_v63 = vld [vmem:[#allocation39_spill] sm:$0xff] }
0x1f15   :  { %v9678_v4 = vmul.f32 %v9676_v8, %v9676_v8 }
0x1f17   :  { %9683 = vrot.lane.b32.xlu2 %v9678_v4, %s10253_s4 }
0x1f3a   :  { %v9689_v21 = vpop.xlane.xlu0 %9688 }
0x1f3b   :  { %v9693_v11 = vmax.f32 %v9689_v21, 1e-24 }
0x1f3d   :  { %10062 = vrsqrt.f32 %v9693_v11  ;;  %vm9701_vm13 = vweird.f32 %v9693_v11 }
0x1f43   :  { %v10063_v56 = vpop.eup %10062 }
0x1f44   :  { %v9696_v34 = vmul.f32 %v10063_v56, %v9693_v11  ;;  %vm9702_vm12 = vweird.f32 %v10063_v56 }
0x1f45   :  { %vm9703_vm14 = vmor %vm9701_vm13, %vm9702_vm12 }
0x1f46   :  { %v9697_v62 = vmul.f32 %v10063_v56, %v9696_v34 }
0x1f48   :  { %v9698_v31 = vmul.f32 0.5, %v9697_v62 }
0x1f4a   :  { %v9699_v9 = vsub.f32 1.5, %v9698_v31 }
0x1f4c   :  { %v9700_v10 = vmul.f32 %v10063_v56, %v9699_v9 }
0x1f4e   :  { %v9704_v55 = vsel %vm9703_vm14, %v10063_v56, %v9700_v10 }
0x1f4f   :  { %v9715_v20 = vmul.f32 %v9704_v55, %v13612_v46 }
0x1f51   :  { %9719 = vrot.lane.b32.xlu2 %v9715_v20, %s10252_s1 }
0x1f71   :  { %v9684_v30 = vpop.permute.xlu2 %9683 }
0x1f72   :  { %v9690_v44 = vsel %vm428_vm3, %v9684_v30, 0.0 }
0x1f73   :  { %9691 = vadd.xlane.f32.xlu1 %v9690_v44 }
0x1fab   :  { %v9720_v36 = vpop.permute.xlu2 %9719 }
0x1fac   :  { %v9725_v59 = vsel %vm428_vm3, %v13613_v63, %v9720_v36 }
0x1fad   :  { %v9727_v38 = vsel %vm3685_vm4, %v9725_v59, 0.0 }
0x1fae   :  { %9729 = vst [vmem:[%s13084_s12] sm:$0xff] %v9727_v38 }
0x1fe6   :  { %v9692_v57 = vpop.xlane.xlu1 %9691 }
0x1fe7   :  { %v9694_v23 = vmax.f32 %v9692_v57, 1e-24 }
0x1fe9   :  { %10064 = vrsqrt.f32 %v9694_v23  ;;  %vm9711_vm15 = vweird.f32 %v9694_v23 }
0x1fef   :  { %v10065_v29 = vpop.eup %10064 }
0x1ff0   :  { %v9706_v32 = vmul.f32 %v10065_v29, %v9694_v23  ;;  %vm9712_vm10 = vweird.f32 %v10065_v29 }
0x1ff1   :  { %vm9713_vm8 = vmor %vm9711_vm15, %vm9712_vm10 }
0x1ff2   :  { %v9707_v5 = vmul.f32 %v10065_v29, %v9706_v32 }
0x1ff4   :  { %v9708_v14 = vmul.f32 0.5, %v9707_v5 }
0x1ff6   :  { %v9709_v39 = vsub.f32 1.5, %v9708_v14 }
0x1ff8   :  { %v9710_v28 = vmul.f32 %v10065_v29, %v9709_v39 }
0x1ffa   :  { %v9714_v48 = vsel %vm9713_vm8, %v10065_v29, %v9710_v28 }
0x1ffb   :  { %v9716_v19 = vmul.f32 %v9714_v48, %v9676_v8 }
0x1ffd   :  { %9721 = vrot.lane.b32.xlu2 %v9716_v19, %s10252_s1 }
0x2057   :  { %v9722_v51 = vpop.permute.xlu2 %9721 }
0x2058   :  { %v9726_v7 = vsel %vm428_vm3, %v13614_v53, %v9722_v51 }
0x2059   :  { %v9728_v24 = vsel %vm3685_vm4, %v9726_v7, 0.0 }
0x205a   :  { %9730 = vst [vmem:[%s13084_s12 + $0x8] sm:$0xff] %v9728_v24 }
0x205b   :  { %9735 = vsyncpa [#allocation3], 1 }
0x205c   :  { %9736 = vsyncpa [#allocation5], 1 }
0x205d   :  { %9737 = vsyncpa [#allocation8], 1 }
0x205e   :  { %9738 = vsyncpa [#allocation11], 1 }

</bundles_post_ra>
